<compile_context>
chip_gen: v7x
topology: tpu7x:2x2x1
jax: 0.10.0
libtpu: 0.0.40
codegen_flags: <defaults>
</compile_context>

<pallas_src>
import math
from functools import partial
from itertools import combinations

import jax
import jax.numpy as jnp
from jax.experimental import pallas as pl
from jax.experimental.pallas import tpu as pltpu

NUM_SAMPLES = 1


# ----------------------------------------------------------------------------
# Kernel 1: synthetic CNN backbone (conv-as-matmul + ReLU + global avg pool).
# Each grid step processes `imgs_per_block` images as one batched MXU matmul
# and one vectorized pool + full-block store.
# ----------------------------------------------------------------------------
def _backbone_kernel(x_ref, w_ref, b_ref, o_ref, *, imgs_per_block, positions):
    x = x_ref[...]                                                   # (B*P, K) f32
    y = jnp.dot(x.astype(jnp.bfloat16), w_ref[...],                  # w is bf16
                preferred_element_type=jnp.float32)                  # (B*P, D)
    y = jnp.maximum(y + b_ref[...], 0.0)
    d = y.shape[1]
    # per-image global average pool: one sublane reduce + one (B, D) store
    o_ref[...] = jnp.mean(y.reshape(imgs_per_block, positions, d), axis=1)


def backbone_features(images, conv_w, conv_b):
    # images: (N, C, H, W)  ->  features: (N, D)
    n, c, h, w = images.shape
    kh = kw = 3
    # TODO(synk): im2col stays HBM-side (fine at 16x16); move it in-kernel for
    # real-resolution backbones (and re-derive the block size for v7x's 64 MiB
    # VMEM) to avoid the 9x patch-tensor blowup.
    xp = jnp.pad(images, ((0, 0), (0, 0), (1, 1), (1, 1)))
    xp = jnp.transpose(xp, (0, 2, 3, 1))                   # (N, H+2, W+2, C)
    cols = [xp[:, i:i + h, j:j + w, :] for i in range(kh) for j in range(kw)]
    patches = jnp.concatenate(cols, axis=-1)               # (N, H, W, kh*kw*C)
    p_sz = h * w
    k_sz = c * kh * kw
    patches = patches.reshape(n * p_sz, k_sz)              # image-major rows
    d = conv_w.shape[1]

    blk = next(b for b in (16, 8, 4, 2, 1) if n % b == 0)  # images per grid step
    return pl.pallas_call(
        partial(_backbone_kernel, imgs_per_block=blk, positions=p_sz),
        out_shape=jax.ShapeDtypeStruct((n, d), jnp.float32),
        grid=(n // blk,),
        in_specs=[
            pl.BlockSpec((blk * p_sz, k_sz), lambda i: (i, 0)),
            pl.BlockSpec((k_sz, d), lambda i: (0, 0)),
            pl.BlockSpec((1, d), lambda i: (0, 0)),
        ],
        out_specs=pl.BlockSpec((blk, d), lambda i: (i, 0)),
        compiler_params=pltpu.CompilerParams(dimension_semantics=("parallel",)),
    )(patches, conv_w, conv_b)                             # (N, D)


# ----------------------------------------------------------------------------
# Kernel 2: fused TRX path.  One pallas_call, grid over temp_set:
#   fused k/v projection + LayerNorm(k) + per-class cross attention + softmax
#   + prototype + squared-distance logits.  All matmuls bf16 on the MXU.
# ----------------------------------------------------------------------------
def _trx_fused_kernel(x_ref, wkv_ref, bkv_ref, gk_ref, bek_ref, nmask_ref,
                      pool_ref, o_ref, *, n_s_rows, way, d_out, scale):
    x = x_ref[...]                                         # (R, F), supports first
    # single fused projection matmul: (R, F) x (F, 2*Do), bf16 MXU, f32 acc
    kv = jnp.dot(x.astype(jnp.bfloat16), wkv_ref[...],
                 preferred_element_type=jnp.float32) + bkv_ref[...]
    k = kv[:, :d_out]
    v = kv[:, d_out:]
    # LayerNorm(k) in f32 (biased variance, eps=1e-5, torch semantics)
    mu = jnp.mean(k, axis=-1, keepdims=True)
    xc = k - mu
    var = jnp.mean(xc * xc, axis=-1, keepdims=True)
    kn = (xc * jax.lax.rsqrt(var + 1e-5)) * gk_ref[...] + bek_ref[...]

    sk = kn[:n_s_rows].astype(jnp.bfloat16)                # (S, Do) support keys
    sv = v[:n_s_rows].astype(jnp.bfloat16)                 # (S, Do) support values
    qk = (kn[n_s_rows:] * scale).astype(jnp.bfloat16)      # (Q, Do), scale applied once
    qv = v[n_s_rows:]                                      # (Q, Do) f32

    # scores over ALL support tuples at once: (Q, Do) . (S, Do)^T -> (Q, S)
    s = jax.lax.dot_general(qk, sk, (((1,), (1,)), ((), ())),
                            preferred_element_type=jnp.float32)
    nmask = nmask_ref[...]                                 # (way, S): 0 valid / -1e30
    sq_cols = []
    for c in range(way):                                   # way is small & static
        sc = s + nmask[c:c + 1, :]                         # mask other classes + padding
        m = jnp.max(sc, axis=-1, keepdims=True)            # mask applied BEFORE max
        e = jnp.exp(sc - m)
        a = e * pl.reciprocal(jnp.sum(e, axis=-1, keepdims=True), approx=True)
        proto = jnp.dot(a.astype(jnp.bfloat16), sv,
                        preferred_element_type=jnp.float32)  # (Q, Do)
        diff = qv - proto
        sq_cols.append(jnp.sum(diff * diff, axis=-1, keepdims=True))  # (Q, 1)
    sq = jnp.concatenate(sq_cols, axis=-1)                 # (Q, way)
    # pool rows carry -1/t_len for real query tuples (0 for padding): one matmul,
    # one lane-dense (n_q, way) store.
    o_ref[...] = jnp.dot(pool_ref[...], sq, preferred_element_type=jnp.float32)


# ----------------------------------------------------------------------------
# Glue (plain JAX): positional encoding, tuple gather, class grouping, assembly
# ----------------------------------------------------------------------------
def positional_encoding(d_model, max_len, scale=0.1):
    position = jnp.arange(max_len, dtype=jnp.float32)[:, None]
    div_term = jnp.exp(jnp.arange(0, d_model, 2, dtype=jnp.float32)
                       * (-math.log(10000.0) / d_model))
    pe = jnp.zeros((max_len, d_model), jnp.float32)
    pe = pe.at[:, 0::2].set(jnp.sin(position * div_term) * scale)
    pe = pe.at[:, 1::2].set(jnp.cos(position * div_term) * scale)
    return pe


def temporal_cross_transformers(support_feat, support_labels, query_feat,
                                params_list, cfg):
    n_s, seq_len, d_in = support_feat.shape
    n_q = query_feat.shape[0]
    way, shot = cfg["way"], cfg["shot"]
    d_out = cfg["trans_linear_out_dim"]
    temp_set = cfg["temp_set"]
    n_sets = len(temp_set)

    pe = positional_encoding(d_in, cfg["max_len"])[:seq_len]
    support_pe = support_feat + pe[None, :, :]    # dropout(p=0.0) is identity
    query_pe = query_feat + pe[None, :, :]

    # TODO(synk): class grouping assumes labels are exactly 0..way-1 with `shot`
    # supports each (matches all_distances[:, c.long()] in the reference).
    order = jnp.argsort(support_labels)
    support_pe = support_pe[order]

    # tuple counts / feature widths padded to the max across temp_sets
    tuple_lists = [list(combinations(range(seq_len), ts)) for ts in temp_set]
    t_lens = [len(t) for t in tuple_lists]
    t_max = ((max(t_lens) + 7) // 8) * 8
    f_max = d_in * max(temp_set)
    n_s_rows = n_s * t_max
    n_q_rows = n_q * t_max
    rows = n_s_rows + n_q_rows

    xs, wkvs, bkvs, gks, beks, nmasks, pools = [], [], [], [], [], [], []
    for ts, p, tuples, t_len in zip(temp_set, params_list, tuple_lists, t_lens):
        # pad tuple list with duplicates of tuples[0] (padding masked below)
        tuples = tuples + [tuples[0]] * (t_max - t_len)
        idx = jnp.array(tuples, dtype=jnp.int32)                    # (t_max, ts)
        # TODO(synk): tuple gather is a wrapper-side XLA gather; move it into
        # the kernel via PrefetchScalarGridSpec once profiling shows it matters.
        s_t = support_pe[:, idx, :].reshape(n_s_rows, ts * d_in)
        q_t = query_pe[:, idx, :].reshape(n_q_rows, ts * d_in)
        x = jnp.concatenate([s_t, q_t], axis=0)                     # (rows, ts*d_in)
        xs.append(jnp.pad(x, ((0, 0), (0, f_max - ts * d_in))))
        wkvs.append(jnp.pad(p["wkv"], ((0, f_max - ts * d_in), (0, 0))))
        bkvs.append(p["bkv"])
        gks.append(p["gk"])
        beks.append(p["betak"])

        valid = jnp.arange(t_max) < t_len                           # (t_max,)
        # additive mask selecting (class == c) & valid support tuples
        col_cls = jnp.repeat(jnp.arange(way), shot * t_max)         # (n_s_rows,)
        col_valid = jnp.tile(valid, (n_s,))                         # (n_s_rows,)
        nmasks.append(jnp.where(
            (col_cls[None, :] == jnp.arange(way)[:, None]) & col_valid[None, :],
            0.0, -1e30).astype(jnp.float32))                        # (way, n_s_rows)
        # pooling matrix: -1/t_len for valid tuple rows of the owning query
        qrow_owner = jnp.repeat(jnp.arange(n_q), t_max)             # (n_q_rows,)
        qrow_valid = jnp.tile(valid, (n_q,))
        pools.append(jnp.where(
            (qrow_owner[None, :] == jnp.arange(n_q)[:, None]) & qrow_valid[None, :],
            -1.0 / t_len, 0.0).astype(jnp.float32))                 # (n_q, n_q_rows)

    x_all = jnp.stack(xs)             # (n_sets, rows, f_max) f32
    wkv = jnp.stack(wkvs)             # (n_sets, f_max, 2*Do) bf16
    bkv = jnp.stack(bkvs)             # (n_sets, 1, 2*Do) f32
    gk = jnp.stack(gks)               # (n_sets, 1, Do) f32
    bek = jnp.stack(beks)             # (n_sets, 1, Do) f32
    nmask = jnp.stack(nmasks)         # (n_sets, way, n_s_rows) f32
    pool = jnp.stack(pools)           # (n_sets, n_q, n_q_rows) f32

    return pl.pallas_call(
        partial(_trx_fused_kernel, n_s_rows=n_s_rows, way=way, d_out=d_out,
                scale=1.0 / math.sqrt(d_out)),
        out_shape=jax.ShapeDtypeStruct((n_sets, n_q, way), jnp.float32),
        grid=(n_sets,),
        in_specs=[
            pl.BlockSpec((None, rows, f_max), lambda i: (i, 0, 0)),
            pl.BlockSpec((None, f_max, 2 * d_out), lambda i: (i, 0, 0)),
            pl.BlockSpec((None, 1, 2 * d_out), lambda i: (i, 0, 0)),
            pl.BlockSpec((None, 1, d_out), lambda i: (i, 0, 0)),
            pl.BlockSpec((None, 1, d_out), lambda i: (i, 0, 0)),
            pl.BlockSpec((None, way, n_s_rows), lambda i: (i, 0, 0)),
            pl.BlockSpec((None, n_q, n_q_rows), lambda i: (i, 0, 0)),
        ],
        out_specs=pl.BlockSpec((None, n_q, way), lambda i: (i, 0, 0)),
        compiler_params=pltpu.CompilerParams(dimension_semantics=("parallel",)),
    )(x_all, wkv, bkv, gk, bek, nmask, pool)               # (n_sets, n_q, way)


def cnn_trx_forward(params, cfg, context_images, context_labels, target_images):
    n_ctx = context_images.shape[0]
    all_images = jnp.concatenate([context_images, target_images], axis=0)
    feats = backbone_features(all_images, params["conv_w"], params["conv_b"])
    dim = feats.shape[1]
    seq_len = cfg["seq_len"]
    context_features = feats[:n_ctx].reshape(-1, seq_len, dim)
    target_features = feats[n_ctx:].reshape(-1, seq_len, dim)

    all_logits = temporal_cross_transformers(
        context_features, context_labels, target_features,
        params["transformers"], cfg)                       # (n_sets, n_q, way)
    sample_logits = jnp.mean(all_logits, axis=0)           # (n_q, way)
    n_target = target_features.shape[0]
    # split_first_dim_linear(x, [NUM_SAMPLES, n_target])
    return sample_logits.reshape(NUM_SAMPLES, n_target, cfg["way"])


def init_params(key, cfg):
    d_in = cfg["trans_linear_in_dim"]
    d_out = cfg["trans_linear_out_dim"]
    keys = jax.random.split(key, 2 + 4 * len(cfg["temp_set"]))
    it = iter(keys)
    kc = 3 * 3 * 3
    bound = 1.0 / math.sqrt(kc)
    # weights stored bf16 (halves weight DMA, removes per-call casts)
    conv_w = jax.random.uniform(next(it), (kc, d_in), jnp.float32,
                                -bound, bound).astype(jnp.bfloat16)
    conv_b = jax.random.uniform(next(it), (1, d_in), jnp.float32, -bound, bound)
    transformers = []
    for ts in cfg["temp_set"]:
        f = d_in * ts
        b = 1.0 / math.sqrt(f)
        wk = jax.random.uniform(next(it), (f, d_out), jnp.float32, -b, b)
        bk = jax.random.uniform(next(it), (1, d_out), jnp.float32, -b, b)
        wv = jax.random.uniform(next(it), (f, d_out), jnp.float32, -b, b)
        bv = jax.random.uniform(next(it), (1, d_out), jnp.float32, -b, b)
        transformers.append(dict(
            wkv=jnp.concatenate([wk, wv], axis=1).astype(jnp.bfloat16),  # fused k/v
            bkv=jnp.concatenate([bk, bv], axis=1),
            gk=jnp.ones((1, d_out), jnp.float32),        # LayerNorm gamma
            betak=jnp.zeros((1, d_out), jnp.float32),    # LayerNorm beta
        ))
    return dict(conv_w=conv_w, conv_b=conv_b, transformers=transformers)


if __name__ == "__main__":
    cfg = dict(method="resnet18", modality=("rgb",),
               seq_len=8, temp_set=(2, 3),
               trans_linear_in_dim=32, trans_linear_out_dim=128,
               trans_dropout=0.0, way=2, shot=1)
    cfg["max_len"] = int(cfg["seq_len"] * 1.5)

    key = jax.random.PRNGKey(0)
    kp, kc_img, kt_img = jax.random.split(key, 3)
    params = init_params(kp, cfg)

    n_support_videos = cfg["way"] * cfg["shot"]   # 2 support videos
    n_query_videos = 2                            # 2 query videos
    context_images = jax.random.normal(
        kc_img, (n_support_videos * cfg["seq_len"], 3, 16, 16), jnp.float32)
    target_images = jax.random.normal(
        kt_img, (n_query_videos * cfg["seq_len"], 3, 16, 16), jnp.float32)
    context_labels = jnp.repeat(jnp.arange(cfg["way"], dtype=jnp.float32), cfg["shot"])

    fwd = jax.jit(partial(cnn_trx_forward, params, cfg))
    logits = fwd(context_images, context_labels, target_images)
    jax.block_until_ready(logits)
    assert logits.shape == (NUM_SAMPLES, n_query_videos, cfg["way"])
    print("KERNEL_OK")
</pallas_src>

<mosaic_0001>
module attributes {stable_mosaic.version = 11 : i64} {
  func.func @_backbone_kernel(%arg0: i32, %arg1: memref<4096x27xf32, #tpu.memory_space<vmem>>, %arg2: memref<27x32xbf16, #tpu.memory_space<vmem>>, %arg3: memref<1x32xf32, #tpu.memory_space<vmem>>, %arg4: memref<16x32xf32, #tpu.memory_space<vmem>>) attributes {dimension_semantics = [#tpu.dimension_semantics<parallel>], iteration_bounds = array<i64: 2>, scalar_prefetch = 0 : i64, scratch_operands = 0 : i64, tpu.core_type = #tpu.core_type<tc>, window_params = [{transform_indices = @transform_0, window_bounds = array<i64: 4096, 27>}, {pipeline_mode = #tpu.pipeline_mode<synchronous>, transform_indices = @transform_1, window_bounds = array<i64: 27, 32>}, {pipeline_mode = #tpu.pipeline_mode<synchronous>, transform_indices = @transform_2, window_bounds = array<i64: 1, 32>}, {transform_indices = @transform_3, window_bounds = array<i64: 16, 32>}]} {
    %c0 = arith.constant 0 : index
    %c0_0 = arith.constant 0 : index
    %0 = vector.load %arg1[%c0, %c0_0] : memref<4096x27xf32, #tpu.memory_space<vmem>>, vector<4096x27xf32>
    %1 = arith.truncf %0 : vector<4096x27xf32> to vector<4096x27xbf16>
    %c0_1 = arith.constant 0 : index
    %c0_2 = arith.constant 0 : index
    %2 = vector.load %arg2[%c0_1, %c0_2] : memref<27x32xbf16, #tpu.memory_space<vmem>>, vector<27x32xbf16>
    %cst = arith.constant dense<0.000000e+00> : vector<4096x32xf32>
    %3 = tpu.matmul %1, %2, %cst {dimension_numbers = #tpu.dot_dimension_numbers<[1], [0], [0], [1], [0, 0, 1, 1], [], []>} : vector<4096x27xbf16>, vector<27x32xbf16>, vector<4096x32xf32> -> vector<4096x32xf32>
    %c0_3 = arith.constant 0 : index
    %c0_4 = arith.constant 0 : index
    %4 = vector.load %arg3[%c0_3, %c0_4] : memref<1x32xf32, #tpu.memory_space<vmem>>, vector<1x32xf32>
    %5 = vector.broadcast %4 : vector<1x32xf32> to vector<4096x32xf32>
    %6 = arith.addf %3, %5 : vector<4096x32xf32>
    %cst_5 = arith.constant 0.000000e+00 : f32
    %7 = vector.broadcast %cst_5 : f32 to vector<4096x32xf32>
    %8 = arith.maximumf %6, %7 : vector<4096x32xf32>
    %9 = vector.shape_cast %8 : vector<4096x32xf32> to vector<16x256x32xf32>
    %cst_6 = arith.constant dense<0.000000e+00> : vector<16x32xf32>
    %10 = vector.multi_reduction <add>, %9, %cst_6 [1] : vector<16x256x32xf32> to vector<16x32xf32>
    %cst_7 = arith.constant 2.560000e+02 : f32
    %11 = vector.broadcast %cst_7 : f32 to vector<16x32xf32>
    %12 = arith.divf %10, %11 : vector<16x32xf32>
    %c0_8 = arith.constant 0 : index
    %c0_9 = arith.constant 0 : index
    %13 = vector.load %arg4[%c0_8, %c0_9] : memref<16x32xf32, #tpu.memory_space<vmem>>, vector<16x32xf32>
    tpu.vector_store %arg4[%c0_8, %c0_9], %12 {strides = array<i32>} : memref<16x32xf32, #tpu.memory_space<vmem>>, vector<16x32xf32>,
    return
  }
  func.func @transform_0(%arg0: i32) -> (i32, i32) {
    %c0_i32 = arith.constant 0 : i32
    %c0_i32_0 = arith.constant 0 : i32
    return %arg0, %c0_i32 : i32, i32
  }
  func.func @transform_1(%arg0: i32) -> (i32, i32) {
    %c0_i32 = arith.constant 0 : i32
    %c0_i32_0 = arith.constant 0 : i32
    %c0_i32_1 = arith.constant 0 : i32
    return %c0_i32, %c0_i32_0 : i32, i32
  }
  func.func @transform_2(%arg0: i32) -> (i32, i32) {
    %c0_i32 = arith.constant 0 : i32
    %c0_i32_0 = arith.constant 0 : i32
    %c0_i32_1 = arith.constant 0 : i32
    return %c0_i32, %c0_i32_0 : i32, i32
  }
  func.func @transform_3(%arg0: i32) -> (i32, i32) {
    %c0_i32 = arith.constant 0 : i32
    %c0_i32_0 = arith.constant 0 : i32
    return %arg0, %c0_i32 : i32, i32
  }
}

module attributes {stable_mosaic.version = 11 : i64} {
  func.func @_trx_fused_kernel(%arg0: i32, %arg1: memref<1x224x96xf32, #tpu.memory_space<vmem>>, %arg2: memref<1x96x256xbf16, #tpu.memory_space<vmem>>, %arg3: memref<1x1x256xf32, #tpu.memory_space<vmem>>, %arg4: memref<1x1x128xf32, #tpu.memory_space<vmem>>, %arg5: memref<1x1x128xf32, #tpu.memory_space<vmem>>, %arg6: memref<1x2x112xf32, #tpu.memory_space<vmem>>, %arg7: memref<1x2x112xf32, #tpu.memory_space<vmem>>, %arg8: memref<1x2x2xf32, #tpu.memory_space<vmem>>) attributes {dimension_semantics = [#tpu.dimension_semantics<parallel>], iteration_bounds = array<i64: 2>, scalar_prefetch = 0 : i64, scratch_operands = 0 : i64, tpu.core_type = #tpu.core_type<tc>, window_params = [{transform_indices = @transform_0, window_bounds = array<i64: 1, 224, 96>}, {transform_indices = @transform_1, window_bounds = array<i64: 1, 96, 256>}, {transform_indices = @transform_2, window_bounds = array<i64: 1, 1, 256>}, {transform_indices = @transform_3, window_bounds = array<i64: 1, 1, 128>}, {transform_indices = @transform_4, window_bounds = array<i64: 1, 1, 128>}, {transform_indices = @transform_5, window_bounds = array<i64: 1, 2, 112>}, {transform_indices = @transform_6, window_bounds = array<i64: 1, 2, 112>}, {transform_indices = @transform_7, window_bounds = array<i64: 1, 2, 2>}]} {
    %c0 = arith.constant 0 : index
    %c0_0 = arith.constant 0 : index
    %c0_1 = arith.constant 0 : index
    %0 = vector.load %arg1[%c0, %c0_0, %c0_1] : memref<1x224x96xf32, #tpu.memory_space<vmem>>, vector<1x224x96xf32>
    %1 = vector.shape_cast %0 : vector<1x224x96xf32> to vector<224x96xf32>
    %2 = arith.truncf %1 : vector<224x96xf32> to vector<224x96xbf16>
    %c0_2 = arith.constant 0 : index
    %c0_3 = arith.constant 0 : index
    %c0_4 = arith.constant 0 : index
    %3 = vector.load %arg2[%c0_2, %c0_3, %c0_4] : memref<1x96x256xbf16, #tpu.memory_space<vmem>>, vector<1x96x256xbf16>
    %4 = vector.shape_cast %3 : vector<1x96x256xbf16> to vector<96x256xbf16>
    %cst = arith.constant dense<0.000000e+00> : vector<224x256xf32>
    %5 = tpu.matmul %2, %4, %cst {dimension_numbers = #tpu.dot_dimension_numbers<[1], [0], [0], [1], [0, 0, 1, 1], [], []>} : vector<224x96xbf16>, vector<96x256xbf16>, vector<224x256xf32> -> vector<224x256xf32>
    %c0_5 = arith.constant 0 : index
    %c0_6 = arith.constant 0 : index
    %c0_7 = arith.constant 0 : index
    %6 = vector.load %arg3[%c0_5, %c0_6, %c0_7] : memref<1x1x256xf32, #tpu.memory_space<vmem>>, vector<1x1x256xf32>
    %7 = vector.shape_cast %6 : vector<1x1x256xf32> to vector<1x256xf32>
    %8 = vector.broadcast %7 : vector<1x256xf32> to vector<224x256xf32>
    %9 = arith.addf %5, %8 : vector<224x256xf32>
    %10 = vector.extract_strided_slice %9 {offsets = [0, 0], sizes = [224, 128], strides = [1, 1]} : vector<224x256xf32> to vector<224x128xf32>
    %11 = vector.extract_strided_slice %9 {offsets = [0, 128], sizes = [224, 128], strides = [1, 1]} : vector<224x256xf32> to vector<224x128xf32>
    %cst_8 = arith.constant dense<0.000000e+00> : vector<224xf32>
    %12 = vector.multi_reduction <add>, %10, %cst_8 [1] : vector<224x128xf32> to vector<224xf32>
    %13 = vector.shape_cast %12 : vector<224xf32> to vector<224x1xf32>
    %cst_9 = arith.constant 1.280000e+02 : f32
    %14 = vector.broadcast %cst_9 : f32 to vector<224x1xf32>
    %15 = arith.divf %13, %14 : vector<224x1xf32>
    %16 = vector.broadcast %15 : vector<224x1xf32> to vector<224x128xf32>
    %17 = arith.subf %10, %16 : vector<224x128xf32>
    %18 = arith.mulf %17, %17 : vector<224x128xf32>
    %cst_10 = arith.constant dense<0.000000e+00> : vector<224xf32>
    %19 = vector.multi_reduction <add>, %18, %cst_10 [1] : vector<224x128xf32> to vector<224xf32>
    %20 = vector.shape_cast %19 : vector<224xf32> to vector<224x1xf32>
    %cst_11 = arith.constant 1.280000e+02 : f32
    %21 = vector.broadcast %cst_11 : f32 to vector<224x1xf32>
    %22 = arith.divf %20, %21 : vector<224x1xf32>
    %cst_12 = arith.constant 9.99999974E-6 : f32
    %23 = vector.broadcast %cst_12 : f32 to vector<224x1xf32>
    %24 = arith.addf %22, %23 : vector<224x1xf32>
    %25 = math.rsqrt %24 : vector<224x1xf32>
    %26 = vector.broadcast %25 : vector<224x1xf32> to vector<224x128xf32>
    %27 = arith.mulf %17, %26 : vector<224x128xf32>
    %c0_13 = arith.constant 0 : index
    %c0_14 = arith.constant 0 : index
    %c0_15 = arith.constant 0 : index
    %28 = vector.load %arg4[%c0_13, %c0_14, %c0_15] : memref<1x1x128xf32, #tpu.memory_space<vmem>>, vector<1x1x128xf32>
    %29 = vector.shape_cast %28 : vector<1x1x128xf32> to vector<1x128xf32>
    %30 = vector.broadcast %29 : vector<1x128xf32> to vector<224x128xf32>
    %31 = arith.mulf %27, %30 : vector<224x128xf32>
    %c0_16 = arith.constant 0 : index
    %c0_17 = arith.constant 0 : index
    %c0_18 = arith.constant 0 : index
    %32 = vector.load %arg5[%c0_16, %c0_17, %c0_18] : memref<1x1x128xf32, #tpu.memory_space<vmem>>, vector<1x1x128xf32>
    %33 = vector.shape_cast %32 : vector<1x1x128xf32> to vector<1x128xf32>
    %34 = vector.broadcast %33 : vector<1x128xf32> to vector<224x128xf32>
    %35 = arith.addf %31, %34 : vector<224x128xf32>
    %36 = vector.extract_strided_slice %35 {offsets = [0, 0], sizes = [112, 128], strides = [1, 1]} : vector<224x128xf32> to vector<112x128xf32>
    %37 = arith.truncf %36 : vector<112x128xf32> to vector<112x128xbf16>
    %38 = vector.extract_strided_slice %11 {offsets = [0, 0], sizes = [112, 128], strides = [1, 1]} : vector<224x128xf32> to vector<112x128xf32>
    %39 = arith.truncf %38 : vector<112x128xf32> to vector<112x128xbf16>
    %40 = vector.extract_strided_slice %35 {offsets = [112, 0], sizes = [112, 128], strides = [1, 1]} : vector<224x128xf32> to vector<112x128xf32>
    %cst_19 = arith.constant 0.0883883461 : f32
    %41 = vector.broadcast %cst_19 : f32 to vector<112x128xf32>
    %42 = arith.mulf %40, %41 : vector<112x128xf32>
    %43 = arith.truncf %42 : vector<112x128xf32> to vector<112x128xbf16>
    %44 = vector.extract_strided_slice %11 {offsets = [112, 0], sizes = [112, 128], strides = [1, 1]} : vector<224x128xf32> to vector<112x128xf32>
    %cst_20 = arith.constant dense<0.000000e+00> : vector<112x112xf32>
    %45 = tpu.matmul %43, %37, %cst_20 {dimension_numbers = #tpu.dot_dimension_numbers<[1], [1], [0], [0], [0, 0, 1, 0], [], []>} : vector<112x128xbf16>, vector<112x128xbf16>, vector<112x112xf32> -> vector<112x112xf32>
    %c0_21 = arith.constant 0 : index
    %c0_22 = arith.constant 0 : index
    %c0_23 = arith.constant 0 : index
    %46 = vector.load %arg6[%c0_21, %c0_22, %c0_23] : memref<1x2x112xf32, #tpu.memory_space<vmem>>, vector<1x2x112xf32>
    %47 = vector.shape_cast %46 : vector<1x2x112xf32> to vector<2x112xf32>
    %48 = vector.extract_strided_slice %47 {offsets = [0, 0], sizes = [1, 112], strides = [1, 1]} : vector<2x112xf32> to vector<1x112xf32>
    %49 = vector.broadcast %48 : vector<1x112xf32> to vector<112x112xf32>
    %50 = arith.addf %45, %49 : vector<112x112xf32>
    %cst_24 = arith.constant dense<0xFF800000> : vector<112xf32>
    %51 = vector.multi_reduction <maximumf>, %50, %cst_24 [1] : vector<112x112xf32> to vector<112xf32>
    %52 = vector.shape_cast %51 : vector<112xf32> to vector<112x1xf32>
    %53 = vector.broadcast %52 : vector<112x1xf32> to vector<112x112xf32>
    %54 = arith.subf %50, %53 : vector<112x112xf32>
    %55 = math.exp %54 : vector<112x112xf32>
    %cst_25 = arith.constant dense<0.000000e+00> : vector<112xf32>
    %56 = vector.multi_reduction <add>, %55, %cst_25 [1] : vector<112x112xf32> to vector<112xf32>
    %57 = vector.shape_cast %56 : vector<112xf32> to vector<112x1xf32>
    %58 = tpu.reciprocal %57 {approx = true} : vector<112x1xf32> -> vector<112x1xf32>
    %59 = vector.broadcast %58 : vector<112x1xf32> to vector<112x112xf32>
    %60 = arith.mulf %55, %59 : vector<112x112xf32>
    %61 = arith.truncf %60 : vector<112x112xf32> to vector<112x112xbf16>
    %cst_26 = arith.constant dense<0.000000e+00> : vector<112x128xf32>
    %62 = tpu.matmul %61, %39, %cst_26 {dimension_numbers = #tpu.dot_dimension_numbers<[1], [0], [0], [1], [0, 0, 1, 1], [], []>} : vector<112x112xbf16>, vector<112x128xbf16>, vector<112x128xf32> -> vector<112x128xf32>
    %63 = arith.subf %44, %62 : vector<112x128xf32>
    %64 = arith.mulf %63, %63 : vector<112x128xf32>
    %cst_27 = arith.constant dense<0.000000e+00> : vector<112xf32>
    %65 = vector.multi_reduction <add>, %64, %cst_27 [1] : vector<112x128xf32> to vector<112xf32>
    %66 = vector.shape_cast %65 : vector<112xf32> to vector<112x1xf32>
    %67 = vector.extract_strided_slice %47 {offsets = [1, 0], sizes = [1, 112], strides = [1, 1]} : vector<2x112xf32> to vector<1x112xf32>
    %68 = vector.broadcast %67 : vector<1x112xf32> to vector<112x112xf32>
    %69 = arith.addf %45, %68 : vector<112x112xf32>
    %cst_28 = arith.constant dense<0xFF800000> : vector<112xf32>
    %70 = vector.multi_reduction <maximumf>, %69, %cst_28 [1] : vector<112x112xf32> to vector<112xf32>
    %71 = vector.shape_cast %70 : vector<112xf32> to vector<112x1xf32>
    %72 = vector.broadcast %71 : vector<112x1xf32> to vector<112x112xf32>
    %73 = arith.subf %69, %72 : vector<112x112xf32>
    %74 = math.exp %73 : vector<112x112xf32>
    %cst_29 = arith.constant dense<0.000000e+00> : vector<112xf32>
    %75 = vector.multi_reduction <add>, %74, %cst_29 [1] : vector<112x112xf32> to vector<112xf32>
    %76 = vector.shape_cast %75 : vector<112xf32> to vector<112x1xf32>
    %77 = tpu.reciprocal %76 {approx = true} : vector<112x1xf32> -> vector<112x1xf32>
    %78 = vector.broadcast %77 : vector<112x1xf32> to vector<112x112xf32>
    %79 = arith.mulf %74, %78 : vector<112x112xf32>
    %80 = arith.truncf %79 : vector<112x112xf32> to vector<112x112xbf16>
    %cst_30 = arith.constant dense<0.000000e+00> : vector<112x128xf32>
    %81 = tpu.matmul %80, %39, %cst_30 {dimension_numbers = #tpu.dot_dimension_numbers<[1], [0], [0], [1], [0, 0, 1, 1], [], []>} : vector<112x112xbf16>, vector<112x128xbf16>, vector<112x128xf32> -> vector<112x128xf32>
    %82 = arith.subf %44, %81 : vector<112x128xf32>
    %83 = arith.mulf %82, %82 : vector<112x128xf32>
    %cst_31 = arith.constant dense<0.000000e+00> : vector<112xf32>
    %84 = vector.multi_reduction <add>, %83, %cst_31 [1] : vector<112x128xf32> to vector<112xf32>
    %85 = vector.shape_cast %84 : vector<112xf32> to vector<112x1xf32>
    %86 = tpu.concatenate %66, %85 in 1 : vector<112x1xf32>, vector<112x1xf32> -> vector<112x2xf32>
    %c0_32 = arith.constant 0 : index
    %c0_33 = arith.constant 0 : index
    %c0_34 = arith.constant 0 : index
    %87 = vector.load %arg7[%c0_32, %c0_33, %c0_34] : memref<1x2x112xf32, #tpu.memory_space<vmem>>, vector<1x2x112xf32>
    %88 = vector.shape_cast %87 : vector<1x2x112xf32> to vector<2x112xf32>
    %cst_35 = arith.constant dense<0.000000e+00> : vector<2x2xf32>
    %89 = tpu.matmul %88, %86, %cst_35 {dimension_numbers = #tpu.dot_dimension_numbers<[1], [0], [0], [1], [0, 0, 1, 1], [], []>} : vector<2x112xf32>, vector<112x2xf32>, vector<2x2xf32> -> vector<2x2xf32>
    %c0_36 = arith.constant 0 : index
    %c0_37 = arith.constant 0 : index
    %c0_38 = arith.constant 0 : index
    %90 = vector.load %arg8[%c0_36, %c0_37, %c0_38] : memref<1x2x2xf32, #tpu.memory_space<vmem>>, vector<1x2x2xf32>
    %91 = vector.shape_cast %90 : vector<1x2x2xf32> to vector<2x2xf32>
    %92 = vector.shape_cast %89 : vector<2x2xf32> to vector<1x2x2xf32>
    tpu.vector_store %arg8[%c0_36, %c0_37, %c0_38], %92 {strides = array<i32>} : memref<1x2x2xf32, #tpu.memory_space<vmem>>, vector<1x2x2xf32>,
    return
  }
  func.func @transform_0(%arg0: i32) -> (i32, i32, i32) {
    %c0_i32 = arith.constant 0 : i32
    %c0_i32_0 = arith.constant 0 : i32
    %c0_i32_1 = arith.constant 0 : i32
    return %arg0, %c0_i32, %c0_i32_0 : i32, i32, i32
  }
  func.func @transform_1(%arg0: i32) -> (i32, i32, i32) {
    %c0_i32 = arith.constant 0 : i32
    %c0_i32_0 = arith.constant 0 : i32
    %c0_i32_1 = arith.constant 0 : i32
    return %arg0, %c0_i32, %c0_i32_0 : i32, i32, i32
  }
  func.func @transform_2(%arg0: i32) -> (i32, i32, i32) {
    %c0_i32 = arith.constant 0 : i32
    %c0_i32_0 = arith.constant 0 : i32
    %c0_i32_1 = arith.constant 0 : i32
    return %arg0, %c0_i32, %c0_i32_0 : i32, i32, i32
  }
  func.func @transform_3(%arg0: i32) -> (i32, i32, i32) {
    %c0_i32 = arith.constant 0 : i32
    %c0_i32_0 = arith.constant 0 : i32
    %c0_i32_1 = arith.constant 0 : i32
    return %arg0, %c0_i32, %c0_i32_0 : i32, i32, i32
  }
  func.func @transform_4(%arg0: i32) -> (i32, i32, i32) {
    %c0_i32 = arith.constant 0 : i32
    %c0_i32_0 = arith.constant 0 : i32
    %c0_i32_1 = arith.constant 0 : i32
    return %arg0, %c0_i32, %c0_i32_0 : i32, i32, i32
  }
  func.func @transform_5(%arg0: i32) -> (i32, i32, i32) {
    %c0_i32 = arith.constant 0 : i32
    %c0_i32_0 = arith.constant 0 : i32
    %c0_i32_1 = arith.constant 0 : i32
    return %arg0, %c0_i32, %c0_i32_0 : i32, i32, i32
  }
  func.func @transform_6(%arg0: i32) -> (i32, i32, i32) {
    %c0_i32 = arith.constant 0 : i32
    %c0_i32_0 = arith.constant 0 : i32
    %c0_i32_1 = arith.constant 0 : i32
    return %arg0, %c0_i32, %c0_i32_0 : i32, i32, i32
  }
  func.func @transform_7(%arg0: i32) -> (i32, i32, i32) {
    %c0_i32 = arith.constant 0 : i32
    %c0_i32_0 = arith.constant 0 : i32
    %c0_i32_1 = arith.constant 0 : i32
    return %arg0, %c0_i32, %c0_i32_0 : i32, i32, i32
  }
}

</mosaic_0001>

<bundles_post_ra>
// kernel: cnn_trx_forward.2
= control target key start
LH: loop header
LB: loop body
LE: loop exit
PB: predicated region body
PF: predicated region fallthrough
CT: control target
= control target key end

     0   :  { %s6647_s12 = smov 0   ;;  %s10272_s0 = inlined_call_operand.vmem [shape: f32[8192,27], index: 0, kind: input, shape index: {}]   ;;  %s10273_s1 = inlined_call_operand.vmem [shape: bf16[27,32], index: 1, kind: input, shape index: {}]   ;;  %s10274_s2 = inlined_call_operand.vmem [shape: f32[1,32], index: 2, kind: input, shape index: {}]   ;;  %s10275_s3 = inlined_call_operand.vmem [shape: f32[32,32], index: 3, kind: output, shape index: {}]  }
   0x1 LB: > { %s5553_s13 = sadd.s32 4294967295, %s6624_s12   ;;  %p5557_p0 = scmp.ge.s32.totalorder %s6624_s12, 1  ;;  %s6624_s12 = sphi %s6647_s12, %s13_s12  }
   0x2   : > { %p138_p1 = scmp.lt.s32.totalorder %s6624_s12, 3 }
   0x4   : > { %p139_p2 = pnand %p5557_p0, %p138_p1 }
   0x6   : > { %142 = sbr.rel (%p139_p2) target bundleno = 831 (0x33f), region = 32 }
   0xd   : > { %v6610_v0 = vld [vmem:[%s10273_s1] sm:$0xff]   ;;  %vm1734_vm0 = vcmask 1044480   ;;  %v6611_v1 = vld [vmem:[%s10273_s1 + $0x8] sm:$0x3f]   ;;  %vm1735_vm1 = vcmask 1045504   ;;  %s5558_s18 = sshll.u32 %s5553_s13, 9 }
   0xe   : > { %6081 = vmatprep.subr.bf16.mxu0 %v6610_v0  ;;  %6597 = vmatprep.subr.bf16.mxu1 %v6610_v0  ;;  %v6626_v2 = vmov 65535   ;;  %p163_p3 = scmp.lt.s32.totalorder %s5558_s18, 1023  ;;  %vm965_vm2 = vcmask 220160   ;;  %vm4334_vm3 = vcmask 261120   ;;  %vm5472_vm4 = vcmask 1041409   ;;  %s5560_s10 = sshll.u32 %s5553_s13, 1 }
   0xf   : > { %6082 = vmatpush3.bf16.msra.mxu0 %v6610_v0  ;;  %6599 = vmatpush3.bf16.msra.mxu1 %v6610_v0  ;;  %v1736_v3 = vsel %vm1734_vm0, 4294967295, %v6626_v2  ;;  %vm5474_vm5 = vcmask 1042434   ;;  %vm5476_vm6 = vcmask 1043459   ;;  %vm5478_vm7 = vcmask 1044484   ;;  %p169_p4 = scmp.lt.s32.totalorder %s5560_s10, 3 }
  0x10   : > { %v1737_v4 = vsel %vm1735_vm1, %v1736_v3, 0  ;;  %s10627_s18 = smov (!%p163_p3, %s5558_s18), 1023  ;;  %vm5480_vm8 = vcmask 1045509   ;;  %vm5482_vm9 = vcmask 1046534   ;;  %vm5484_vm10 = vcmask 1047559  }
  0x11   : > { %v1739_v5 = vand.u32 %v6611_v1, %v1737_v4  ;;  %s5559_s19 = sshll.u32 %s10627_s18, 3  ;;  %s10629_s10 = smov (!%p169_p4, %s5560_s10), 3 }
  0x12   : > { %s6666_s22 = scalar_lea.vmem %s10272_s0, %s5559_s19  ;;  %s5561_s11 = sshll.u32 %s10629_s10, 3 }
  0x13   : > { %6083 = vmatprep.subr.bf16.mxu0 %v1739_v5  ;;  %6598 = vmatprep.subr.bf16.mxu1 %v1739_v5  ;;  %v175_v6 = vld [vmem:[%s6666_s22] sm:$0xff]  ;;  %v176_v7 = vld [vmem:[%s6666_s22 + $0x8] sm:$0xff]  ;;  %v177_v11 = vld [vmem:[%s6666_s22 + $0x10] sm:$0xff]  ;;  %s172_s15 = scalar_lea.vmem %s10275_s3, %s5561_s11 }
  0x14   : > { %6084 = vmatpush3.bf16.msra.mxu0 %v1739_v5  ;;  %6600 = vmatpush3.bf16.msra.mxu1 %v1739_v5  ;;  %v431_v8 = vld [vmem:[%s6666_s22 + $0x800] sm:$0xff]  ;;  %v687_v9 = vpack.c.bf16 %v176_v7, %v175_v6  ;;  %v432_v10 = vld [vmem:[%s6666_s22 + $0x808] sm:$0xff]  ;;  %v178_v12 = vld [vmem:[%s6666_s22 + $0x18] sm:$0xff] }
  0x15   : > { %v815_v13 = vpack.c.bf16 %v432_v10, %v431_v8  ;;  %v688_v14 = vpack.c.bf16 %v178_v12, %v177_v11  ;;  %v433_v15 = vld [vmem:[%s6666_s22 + $0x810] sm:$0xff]  ;;  %v434_v16 = vld [vmem:[%s6666_s22 + $0x818] sm:$0xff]  ;;  %v179_v17 = vld [vmem:[%s6666_s22 + $0x20] sm:$0xff] }
  0x16   : > { %6085 = vmatprep.mubr.msk.bf16.mxu0 %vm965_vm2, %v687_v9  ;;  %v816_v18 = vpack.c.bf16 %v434_v16, %v433_v15  ;;  %v180_v19 = vld [vmem:[%s6666_s22 + $0x28] sm:$0xff]  ;;  %v435_v20 = vld [vmem:[%s6666_s22 + $0x820] sm:$0xff]  ;;  %v181_v24 = vld [vmem:[%s6666_s22 + $0x30] sm:$0xff] }
  0x17   : > { %v436_v21 = vld [vmem:[%s6666_s22 + $0x828] sm:$0xff]  ;;  %6341 = vmatprep.mubr.msk.bf16.mxu1 %vm965_vm2, %v815_v13  ;;  %6086 = vmatmul.mubr.msk.bf16.vlgmr.msra.gmra.mrb[0].mxu0 %vm965_vm2, %v688_v14  ;;  %v689_v22 = vpack.c.bf16 %v180_v19, %v179_v17  ;;  %v182_v25 = vld [vmem:[%s6666_s22 + $0x38] sm:$0xff]  ;;  %v437_v26 = vld [vmem:[%s6666_s22 + $0x830] sm:$0xff] }
  0x18   : > { %v817_v23 = vpack.c.bf16 %v436_v21, %v435_v20  ;;  %6342 = vmatmul.mubr.msk.bf16.vlgmr.msra.gmra.mrb[0].mxu1 %vm965_vm2, %v816_v18  ;;  %v438_v27 = vld [vmem:[%s6666_s22 + $0x838] sm:$0xff]  ;;  %v183_v28 = vld [vmem:[%s6666_s22 + $0x40] sm:$0xff]  ;;  %v184_v29 = vld [vmem:[%s6666_s22 + $0x48] sm:$0xff]  ;;  %v690_v32 = vpack.c.bf16 %v182_v25, %v181_v24 }
  0x19   : > { %6089 = vmatprep.mubr.msk.bf16.mxu0 %vm965_vm2, %v689_v22  ;;  %v439_v30 = vld [vmem:[%s6666_s22 + $0x840] sm:$0xff]  ;;  %v440_v31 = vld [vmem:[%s6666_s22 + $0x848] sm:$0xff]  ;;  %v818_v33 = vpack.c.bf16 %v438_v27, %v437_v26  ;;  %v691_v34 = vpack.c.bf16 %v184_v29, %v183_v28  ;;  %v185_v36 = vld [vmem:[%s6666_s22 + $0x50] sm:$0xff] }
  0x1a   : > { %6345 = vmatprep.mubr.msk.bf16.mxu1 %vm965_vm2, %v817_v23  ;;  %v819_v35 = vpack.c.bf16 %v440_v31, %v439_v30  ;;  %v186_v37 = vld [vmem:[%s6666_s22 + $0x58] sm:$0xff]  ;;  %v441_v38 = vld [vmem:[%s6666_s22 + $0x850] sm:$0xff]  ;;  %v187_v40 = vld [vmem:[%s6666_s22 + $0x60] sm:$0xff] }
  0x1b   : > { %v442_v39 = vld [vmem:[%s6666_s22 + $0x858] sm:$0xff]  ;;  %v188_v41 = vld [vmem:[%s6666_s22 + $0x68] sm:$0xff]  ;;  %v443_v42 = vld [vmem:[%s6666_s22 + $0x860] sm:$0xff]  ;;  %v692_v44 = vpack.c.bf16 %v186_v37, %v185_v36 }
  0x1c   : > { %v444_v43 = vld [vmem:[%s6666_s22 + $0x868] sm:$0xff]  ;;  %v820_v45 = vpack.c.bf16 %v442_v39, %v441_v38  ;;  %v693_v46 = vpack.c.bf16 %v188_v41, %v187_v40  ;;  %v189_v48 = vld [vmem:[%s6666_s22 + $0x70] sm:$0xff]  ;;  %v190_v49 = vld [vmem:[%s6666_s22 + $0x78] sm:$0xff] }
  0x1d   : > { %v821_v47 = vpack.c.bf16 %v444_v43, %v443_v42  ;;  %v445_v50 = vld [vmem:[%s6666_s22 + $0x870] sm:$0xff]  ;;  %v446_v51 = vld [vmem:[%s6666_s22 + $0x878] sm:$0xff]  ;;  %v191_v52 = vld [vmem:[%s6666_s22 + $0x80] sm:$0xff]  ;;  %v694_v56 = vpack.c.bf16 %v190_v49, %v189_v48 }
  0x1e   : > { %v192_v53 = vld [vmem:[%s6666_s22 + $0x88] sm:$0xff]  ;;  %v447_v54 = vld [vmem:[%s6666_s22 + $0x880] sm:$0xff]  ;;  %v822_v57 = vpack.c.bf16 %v446_v51, %v445_v50  ;;  %v193_v60 = vld [vmem:[%s6666_s22 + $0x90] sm:$0xff] }
  0x1f   : > { %6090 = vmatmul.mubr.msk.bf16.gmra.mrb[4].mxu0 %vm965_vm2, %v690_v32  ;;  %v448_v55 = vld [vmem:[%s6666_s22 + $0x888] sm:$0xff]  ;;  %v695_v58 = vpack.c.bf16 %v192_v53, %v191_v52  ;;  %v194_v61 = vld [vmem:[%s6666_s22 + $0x98] sm:$0xff]  ;;  %v449_v62 = vld [vmem:[%s6666_s22 + $0x890] sm:$0xff] }
  0x20   : > { %6346 = vmatmul.mubr.msk.bf16.gmra.mrb[4].mxu1 %vm965_vm2, %v818_v33  ;;  %6093 = vmatprep.mubr.msk.bf16.mxu0 %vm965_vm2, %v691_v34  ;;  %v823_v59 = vpack.c.bf16 %v448_v55, %v447_v54  ;;  %v450_v63 = vld [vmem:[%s6666_s22 + $0x898] sm:$0xff]  ;;  %v195_v0 = vld [vmem:[%s6666_s22 + $0xa0] sm:$0xff]  ;;  %v196_v1 = vld [vmem:[%s6666_s22 + $0xa8] sm:$0xff]  ;;  %v696_v4 = vpack.c.bf16 %v194_v61, %v193_v60 }
  0x21   : > { %6349 = vmatprep.mubr.msk.bf16.mxu1 %vm965_vm2, %v819_v35  ;;  %v451_v2 = vld [vmem:[%s6666_s22 + $0x8a0] sm:$0xff]  ;;  %v452_v3 = vld [vmem:[%s6666_s22 + $0x8a8] sm:$0xff]  ;;  %v824_v5 = vpack.c.bf16 %v450_v63, %v449_v62  ;;  %v697_v6 = vpack.c.bf16 %v196_v1, %v195_v0  ;;  %v197_v8 = vld [vmem:[%s6666_s22 + $0xb0] sm:$0xff] }
  0x22   : > { %v825_v7 = vpack.c.bf16 %v452_v3, %v451_v2  ;;  %v198_v9 = vld [vmem:[%s6666_s22 + $0xb8] sm:$0xff]  ;;  %v453_v10 = vld [vmem:[%s6666_s22 + $0x8b0] sm:$0xff]  ;;  %v199_v12 = vld [vmem:[%s6666_s22 + $0xc0] sm:$0xff] }
  0x23   : > { %v454_v11 = vld [vmem:[%s6666_s22 + $0x8b8] sm:$0xff]  ;;  %v200_v13 = vld [vmem:[%s6666_s22 + $0xc8] sm:$0xff]  ;;  %v455_v14 = vld [vmem:[%s6666_s22 + $0x8c0] sm:$0xff]  ;;  %v698_v16 = vpack.c.bf16 %v198_v9, %v197_v8 }
  0x24   : > { %v456_v15 = vld [vmem:[%s6666_s22 + $0x8c8] sm:$0xff]  ;;  %v826_v17 = vpack.c.bf16 %v454_v11, %v453_v10  ;;  %v699_v18 = vpack.c.bf16 %v200_v13, %v199_v12  ;;  %v201_v20 = vld [vmem:[%s6666_s22 + $0xd0] sm:$0xff]  ;;  %v202_v21 = vld [vmem:[%s6666_s22 + $0xd8] sm:$0xff] }
  0x25   : > { %v827_v19 = vpack.c.bf16 %v456_v15, %v455_v14  ;;  %v457_v22 = vld [vmem:[%s6666_s22 + $0x8d0] sm:$0xff]  ;;  %v458_v23 = vld [vmem:[%s6666_s22 + $0x8d8] sm:$0xff]  ;;  %v203_v24 = vld [vmem:[%s6666_s22 + $0xe0] sm:$0xff]  ;;  %v700_v28 = vpack.c.bf16 %v202_v21, %v201_v20 }
  0x26   : > { %v204_v25 = vld [vmem:[%s6666_s22 + $0xe8] sm:$0xff]  ;;  %v459_v26 = vld [vmem:[%s6666_s22 + $0x8e0] sm:$0xff]  ;;  %v828_v29 = vpack.c.bf16 %v458_v23, %v457_v22  ;;  %v205_v32 = vld [vmem:[%s6666_s22 + $0xf0] sm:$0xff] }
  0x27   : > { %6094 = vmatmul.mubr.msk.bf16.gmra.mrb[8].mxu0 %vm965_vm2, %v692_v44  ;;  %v460_v27 = vld [vmem:[%s6666_s22 + $0x8e8] sm:$0xff]  ;;  %v701_v30 = vpack.c.bf16 %v204_v25, %v203_v24  ;;  %v206_v33 = vld [vmem:[%s6666_s22 + $0xf8] sm:$0xff]  ;;  %v461_v34 = vld [vmem:[%s6666_s22 + $0x8f0] sm:$0xff] }
  0x28   : > { %6350 = vmatmul.mubr.msk.bf16.gmra.mrb[8].mxu1 %vm965_vm2, %v820_v45  ;;  %6097 = vmatprep.mubr.msk.bf16.mxu0 %vm965_vm2, %v693_v46  ;;  %v829_v31 = vpack.c.bf16 %v460_v27, %v459_v26  ;;  %v462_v35 = vld [vmem:[%s6666_s22 + $0x8f8] sm:$0xff]  ;;  %v207_v36 = vld [vmem:[%s6666_s22 + $0x100] sm:$0xff]  ;;  %v208_v37 = vld [vmem:[%s6666_s22 + $0x108] sm:$0xff]  ;;  %v702_v40 = vpack.c.bf16 %v206_v33, %v205_v32 }
  0x29   : > { %6353 = vmatprep.mubr.msk.bf16.mxu1 %vm965_vm2, %v821_v47  ;;  %v463_v38 = vld [vmem:[%s6666_s22 + $0x900] sm:$0xff]  ;;  %v464_v39 = vld [vmem:[%s6666_s22 + $0x908] sm:$0xff]  ;;  %v830_v41 = vpack.c.bf16 %v462_v35, %v461_v34  ;;  %v703_v42 = vpack.c.bf16 %v208_v37, %v207_v36  ;;  %v209_v44 = vld [vmem:[%s6666_s22 + $0x110] sm:$0xff] }
  0x2a   : > { %v831_v43 = vpack.c.bf16 %v464_v39, %v463_v38  ;;  %v210_v45 = vld [vmem:[%s6666_s22 + $0x118] sm:$0xff]  ;;  %v465_v46 = vld [vmem:[%s6666_s22 + $0x910] sm:$0xff]  ;;  %v211_v48 = vld [vmem:[%s6666_s22 + $0x120] sm:$0xff] }
  0x2b   : > { %v466_v47 = vld [vmem:[%s6666_s22 + $0x918] sm:$0xff]  ;;  %v212_v49 = vld [vmem:[%s6666_s22 + $0x128] sm:$0xff]  ;;  %v467_v50 = vld [vmem:[%s6666_s22 + $0x920] sm:$0xff]  ;;  %v704_v52 = vpack.c.bf16 %v210_v45, %v209_v44 }
  0x2c   : > { %v468_v51 = vld [vmem:[%s6666_s22 + $0x928] sm:$0xff]  ;;  %v832_v53 = vpack.c.bf16 %v466_v47, %v465_v46  ;;  %v705_v54 = vpack.c.bf16 %v212_v49, %v211_v48  ;;  %v215_v60 = vld [vmem:[%s6666_s22 + $0x140] sm:$0xff] }
  0x2d   : > { %v833_v55 = vpack.c.bf16 %v468_v51, %v467_v50  ;;  %v216_v61 = vld [vmem:[%s6666_s22 + $0x148] sm:$0xff]  ;;  %v471_v62 = vld [vmem:[%s6666_s22 + $0x940] sm:$0xff] }
  0x2e   : > { %v472_v63 = vld [vmem:[%s6666_s22 + $0x948] sm:$0xff]  ;;  %v707_v2 = vpack.c.bf16 %v216_v61, %v215_v60  ;;  %v219_v8 = vld [vmem:[%s6666_s22 + $0x160] sm:$0xff] }
  0x2f   : > { %6098 = vmatmul.mubr.msk.bf16.gmra.mrb[12].mxu0 %vm965_vm2, %v694_v56  ;;  %v213_v56 = vld [vmem:[%s6666_s22 + $0x130] sm:$0xff]  ;;  %v835_v3 = vpack.c.bf16 %v472_v63, %v471_v62  ;;  %v220_v9 = vld [vmem:[%s6666_s22 + $0x168] sm:$0xff]  ;;  %v475_v10 = vld [vmem:[%s6666_s22 + $0x960] sm:$0xff] }
  0x30   : > { %6354 = vmatmul.mubr.msk.bf16.gmra.mrb[12].mxu1 %vm965_vm2, %v822_v57  ;;  %6101 = vmatprep.mubr.msk.bf16.mxu0 %vm965_vm2, %v695_v58  ;;  %v214_v57 = vld [vmem:[%s6666_s22 + $0x138] sm:$0xff]  ;;  %v469_v58 = vld [vmem:[%s6666_s22 + $0x930] sm:$0xff]  ;;  %v476_v11 = vld [vmem:[%s6666_s22 + $0x968] sm:$0xff]  ;;  %v709_v14 = vpack.c.bf16 %v220_v9, %v219_v8 }
  0x31   : > { %6357 = vmatprep.mubr.msk.bf16.mxu1 %vm965_vm2, %v823_v59  ;;  %v470_v59 = vld [vmem:[%s6666_s22 + $0x938] sm:$0xff]  ;;  %v706_v0 = vpack.c.bf16 %v214_v57, %v213_v56  ;;  %v837_v15 = vpack.c.bf16 %v476_v11, %v475_v10  ;;  %v223_v20 = vld [vmem:[%s6666_s22 + $0x180] sm:$0xff]  ;;  %v224_v21 = vld [vmem:[%s6666_s22 + $0x188] sm:$0xff] }
  0x32   : > { %v834_v1 = vpack.c.bf16 %v470_v59, %v469_v58  ;;  %v479_v22 = vld [vmem:[%s6666_s22 + $0x980] sm:$0xff]  ;;  %v480_v23 = vld [vmem:[%s6666_s22 + $0x988] sm:$0xff]  ;;  %v711_v26 = vpack.c.bf16 %v224_v21, %v223_v20 }
  0x33   : > { %v839_v27 = vpack.c.bf16 %v480_v23, %v479_v22  ;;  %v227_v32 = vld [vmem:[%s6666_s22 + $0x1a0] sm:$0xff]  ;;  %v228_v33 = vld [vmem:[%s6666_s22 + $0x1a8] sm:$0xff] }
  0x34   : > { %v483_v34 = vld [vmem:[%s6666_s22 + $0x9a0] sm:$0xff]  ;;  %v484_v35 = vld [vmem:[%s6666_s22 + $0x9a8] sm:$0xff]  ;;  %v713_v38 = vpack.c.bf16 %v228_v33, %v227_v32 }
  0x35   : > { %v841_v39 = vpack.c.bf16 %v484_v35, %v483_v34  ;;  %v231_v44 = vld [vmem:[%s6666_s22 + $0x1c0] sm:$0xff]  ;;  %v232_v45 = vld [vmem:[%s6666_s22 + $0x1c8] sm:$0xff] }
  0x36   : > { %v487_v46 = vld [vmem:[%s6666_s22 + $0x9c0] sm:$0xff]  ;;  %v488_v47 = vld [vmem:[%s6666_s22 + $0x9c8] sm:$0xff]  ;;  %v715_v50 = vpack.c.bf16 %v232_v45, %v231_v44 }
  0x37   : > { %6102 = vmatmul.mubr.msk.bf16.gmra.mrb[16].mxu0 %vm965_vm2, %v696_v4  ;;  %v217_v4 = vld [vmem:[%s6666_s22 + $0x150] sm:$0xff]  ;;  %v843_v51 = vpack.c.bf16 %v488_v47, %v487_v46  ;;  %v235_v56 = vld [vmem:[%s6666_s22 + $0x1e0] sm:$0xff]  ;;  %v236_v57 = vld [vmem:[%s6666_s22 + $0x1e8] sm:$0xff] }
  0x38   : > { %6358 = vmatmul.mubr.msk.bf16.gmra.mrb[16].mxu1 %vm965_vm2, %v824_v5  ;;  %6105 = vmatprep.mubr.msk.bf16.mxu0 %vm965_vm2, %v697_v6  ;;  %v218_v5 = vld [vmem:[%s6666_s22 + $0x158] sm:$0xff]  ;;  %v473_v6 = vld [vmem:[%s6666_s22 + $0x950] sm:$0xff]  ;;  %v491_v58 = vld [vmem:[%s6666_s22 + $0x9e0] sm:$0xff]  ;;  %v717_v62 = vpack.c.bf16 %v236_v57, %v235_v56 }
  0x39   : > { %6361 = vmatprep.mubr.msk.bf16.mxu1 %vm965_vm2, %v825_v7  ;;  %v474_v7 = vld [vmem:[%s6666_s22 + $0x958] sm:$0xff]  ;;  %v708_v12 = vpack.c.bf16 %v218_v5, %v217_v4  ;;  %v492_v59 = vld [vmem:[%s6666_s22 + $0x9e8] sm:$0xff]  ;;  %v239_v4 = vld [vmem:[%s6666_s22 + $0x200] sm:$0xff] }
  0x3a   : > { %v836_v13 = vpack.c.bf16 %v474_v7, %v473_v6  ;;  %v845_v63 = vpack.c.bf16 %v492_v59, %v491_v58  ;;  %v240_v5 = vld [vmem:[%s6666_s22 + $0x208] sm:$0xff]  ;;  %v495_v6 = vld [vmem:[%s6666_s22 + $0xa00] sm:$0xff] }
  0x3b   : > { %v496_v7 = vld [vmem:[%s6666_s22 + $0xa08] sm:$0xff]  ;;  %v719_v10 = vpack.c.bf16 %v240_v5, %v239_v4 }
  0x3c   : > { %v847_v11 = vpack.c.bf16 %v496_v7, %v495_v6 }
  0x3f   : > { %6106 = vmatmul.mubr.msk.bf16.gmra.mrb[20].mxu0 %vm965_vm2, %v698_v16  ;;  %v221_v16 = vld [vmem:[%s6666_s22 + $0x170] sm:$0xff] }
  0x40   : > { %6362 = vmatmul.mubr.msk.bf16.gmra.mrb[20].mxu1 %vm965_vm2, %v826_v17  ;;  %6109 = vmatprep.mubr.msk.bf16.mxu0 %vm965_vm2, %v699_v18  ;;  %v222_v17 = vld [vmem:[%s6666_s22 + $0x178] sm:$0xff]  ;;  %v477_v18 = vld [vmem:[%s6666_s22 + $0x970] sm:$0xff] }
  0x41   : > { %6365 = vmatprep.mubr.msk.bf16.mxu1 %vm965_vm2, %v827_v19  ;;  %v478_v19 = vld [vmem:[%s6666_s22 + $0x978] sm:$0xff]  ;;  %v710_v24 = vpack.c.bf16 %v222_v17, %v221_v16  ;;  %v243_v16 = vld [vmem:[%s6666_s22 + $0x220] sm:$0xff]  ;;  %v244_v17 = vld [vmem:[%s6666_s22 + $0x228] sm:$0xff] }
  0x42   : > { %v838_v25 = vpack.c.bf16 %v478_v19, %v477_v18  ;;  %v499_v18 = vld [vmem:[%s6666_s22 + $0xa20] sm:$0xff]  ;;  %v500_v19 = vld [vmem:[%s6666_s22 + $0xa28] sm:$0xff]  ;;  %v721_v22 = vpack.c.bf16 %v244_v17, %v243_v16 }
  0x43   : > { %v849_v23 = vpack.c.bf16 %v500_v19, %v499_v18 }
  0x47   : > { %6110 = vmatmul.mubr.msk.bf16.gmra.mrb[24].mxu0 %vm965_vm2, %v700_v28  ;;  %v225_v28 = vld [vmem:[%s6666_s22 + $0x190] sm:$0xff] }
  0x48   : > { %6366 = vmatmul.mubr.msk.bf16.gmra.mrb[24].mxu1 %vm965_vm2, %v828_v29  ;;  %6113 = vmatprep.mubr.msk.bf16.mxu0 %vm965_vm2, %v701_v30  ;;  %v226_v29 = vld [vmem:[%s6666_s22 + $0x198] sm:$0xff]  ;;  %v481_v30 = vld [vmem:[%s6666_s22 + $0x990] sm:$0xff] }
  0x49   : > { %6369 = vmatprep.mubr.msk.bf16.mxu1 %vm965_vm2, %v829_v31  ;;  %v482_v31 = vld [vmem:[%s6666_s22 + $0x998] sm:$0xff]  ;;  %v712_v36 = vpack.c.bf16 %v226_v29, %v225_v28  ;;  %v247_v28 = vld [vmem:[%s6666_s22 + $0x240] sm:$0xff]  ;;  %v248_v29 = vld [vmem:[%s6666_s22 + $0x248] sm:$0xff] }
  0x4a   : > { %v840_v37 = vpack.c.bf16 %v482_v31, %v481_v30  ;;  %v503_v30 = vld [vmem:[%s6666_s22 + $0xa40] sm:$0xff]  ;;  %v504_v31 = vld [vmem:[%s6666_s22 + $0xa48] sm:$0xff]  ;;  %v723_v34 = vpack.c.bf16 %v248_v29, %v247_v28 }
  0x4b   : > { %v851_v35 = vpack.c.bf16 %v504_v31, %v503_v30 }
  0x4f   : > { %6114 = vmatmul.mubr.msk.bf16.gmra.mrb[28].mxu0 %vm965_vm2, %v702_v40  ;;  %v229_v40 = vld [vmem:[%s6666_s22 + $0x1b0] sm:$0xff] }
  0x50   : > { %6370 = vmatmul.mubr.msk.bf16.gmra.mrb[28].mxu1 %vm965_vm2, %v830_v41  ;;  %6117 = vmatprep.mubr.msk.bf16.mxu0 %vm965_vm2, %v703_v42  ;;  %v230_v41 = vld [vmem:[%s6666_s22 + $0x1b8] sm:$0xff]  ;;  %v485_v42 = vld [vmem:[%s6666_s22 + $0x9b0] sm:$0xff] }
  0x51   : > { %6373 = vmatprep.mubr.msk.bf16.mxu1 %vm965_vm2, %v831_v43  ;;  %v486_v43 = vld [vmem:[%s6666_s22 + $0x9b8] sm:$0xff]  ;;  %v714_v48 = vpack.c.bf16 %v230_v41, %v229_v40  ;;  %v251_v40 = vld [vmem:[%s6666_s22 + $0x260] sm:$0xff]  ;;  %v252_v41 = vld [vmem:[%s6666_s22 + $0x268] sm:$0xff] }
  0x52   : > { %v842_v49 = vpack.c.bf16 %v486_v43, %v485_v42  ;;  %v507_v42 = vld [vmem:[%s6666_s22 + $0xa60] sm:$0xff]  ;;  %v508_v43 = vld [vmem:[%s6666_s22 + $0xa68] sm:$0xff]  ;;  %v725_v46 = vpack.c.bf16 %v252_v41, %v251_v40 }
  0x53   : > { %v853_v47 = vpack.c.bf16 %v508_v43, %v507_v42 }
  0x57   : > { %6118 = vmatmul.mubr.msk.bf16.gmra.mrb[32].mxu0 %vm965_vm2, %v704_v52  ;;  %v233_v52 = vld [vmem:[%s6666_s22 + $0x1d0] sm:$0xff] }
  0x58   : > { %6374 = vmatmul.mubr.msk.bf16.gmra.mrb[32].mxu1 %vm965_vm2, %v832_v53  ;;  %6121 = vmatprep.mubr.msk.bf16.mxu0 %vm965_vm2, %v705_v54  ;;  %v234_v53 = vld [vmem:[%s6666_s22 + $0x1d8] sm:$0xff]  ;;  %v489_v54 = vld [vmem:[%s6666_s22 + $0x9d0] sm:$0xff] }
  0x59   : > { %6377 = vmatprep.mubr.msk.bf16.mxu1 %vm965_vm2, %v833_v55  ;;  %v490_v55 = vld [vmem:[%s6666_s22 + $0x9d8] sm:$0xff]  ;;  %v716_v60 = vpack.c.bf16 %v234_v53, %v233_v52  ;;  %v255_v52 = vld [vmem:[%s6666_s22 + $0x280] sm:$0xff]  ;;  %v256_v53 = vld [vmem:[%s6666_s22 + $0x288] sm:$0xff] }
  0x5a   : > { %v844_v61 = vpack.c.bf16 %v490_v55, %v489_v54  ;;  %v511_v54 = vld [vmem:[%s6666_s22 + $0xa80] sm:$0xff]  ;;  %v512_v55 = vld [vmem:[%s6666_s22 + $0xa88] sm:$0xff]  ;;  %v727_v58 = vpack.c.bf16 %v256_v53, %v255_v52 }
  0x5b   : > { %v855_v59 = vpack.c.bf16 %v512_v55, %v511_v54 }
  0x5f   : > { %6122 = vmatmul.mubr.msk.bf16.gmra.mrb[36].mxu0 %vm965_vm2, %v706_v0  ;;  %v237_v0 = vld [vmem:[%s6666_s22 + $0x1f0] sm:$0xff] }
  0x60   : > { %6378 = vmatmul.mubr.msk.bf16.gmra.mrb[36].mxu1 %vm965_vm2, %v834_v1  ;;  %6125 = vmatprep.mubr.msk.bf16.mxu0 %vm965_vm2, %v707_v2  ;;  %v238_v1 = vld [vmem:[%s6666_s22 + $0x1f8] sm:$0xff]  ;;  %v493_v2 = vld [vmem:[%s6666_s22 + $0x9f0] sm:$0xff] }
  0x61   : > { %6381 = vmatprep.mubr.msk.bf16.mxu1 %vm965_vm2, %v835_v3  ;;  %v494_v3 = vld [vmem:[%s6666_s22 + $0x9f8] sm:$0xff]  ;;  %v718_v8 = vpack.c.bf16 %v238_v1, %v237_v0  ;;  %v259_v0 = vld [vmem:[%s6666_s22 + $0x2a0] sm:$0xff]  ;;  %v260_v1 = vld [vmem:[%s6666_s22 + $0x2a8] sm:$0xff] }
  0x62   : > { %v846_v9 = vpack.c.bf16 %v494_v3, %v493_v2  ;;  %v515_v2 = vld [vmem:[%s6666_s22 + $0xaa0] sm:$0xff]  ;;  %v516_v3 = vld [vmem:[%s6666_s22 + $0xaa8] sm:$0xff]  ;;  %v729_v6 = vpack.c.bf16 %v260_v1, %v259_v0  ;;  %v6999_v0 = vld [vmem:[%s6666_s22 + $0x350] sm:$0xff] }
  0x63   : > { %v857_v7 = vpack.c.bf16 %v516_v3, %v515_v2  ;;  %v7002_v1 = vld [vmem:[%s6666_s22 + $0x358] sm:$0xff]  ;;  %v7005_v2 = vld [vmem:[%s6666_s22 + $0xb50] sm:$0xff] }
  0x64   : > { %v7008_v3 = vld [vmem:[%s6666_s22 + $0xb58] sm:$0xff] }
  0x67   : > { %6126 = vmatmul.mubr.msk.bf16.gmra.mrb[40].mxu0 %vm965_vm2, %v708_v12  ;;  %v241_v12 = vld [vmem:[%s6666_s22 + $0x210] sm:$0xff] }
  0x68   : > { %6382 = vmatmul.mubr.msk.bf16.gmra.mrb[40].mxu1 %vm965_vm2, %v836_v13  ;;  %6129 = vmatprep.mubr.msk.bf16.mxu0 %vm965_vm2, %v709_v14  ;;  %v242_v13 = vld [vmem:[%s6666_s22 + $0x218] sm:$0xff]  ;;  %v497_v14 = vld [vmem:[%s6666_s22 + $0xa10] sm:$0xff] }
  0x69   : > { %6385 = vmatprep.mubr.msk.bf16.mxu1 %vm965_vm2, %v837_v15  ;;  %v498_v15 = vld [vmem:[%s6666_s22 + $0xa18] sm:$0xff]  ;;  %v720_v20 = vpack.c.bf16 %v242_v13, %v241_v12  ;;  %v263_v12 = vld [vmem:[%s6666_s22 + $0x2c0] sm:$0xff]  ;;  %v264_v13 = vld [vmem:[%s6666_s22 + $0x2c8] sm:$0xff] }
  0x6a   : > { %v848_v21 = vpack.c.bf16 %v498_v15, %v497_v14  ;;  %v519_v14 = vld [vmem:[%s6666_s22 + $0xac0] sm:$0xff]  ;;  %v520_v15 = vld [vmem:[%s6666_s22 + $0xac8] sm:$0xff]  ;;  %v731_v18 = vpack.c.bf16 %v264_v13, %v263_v12 }
  0x6b   : > { %v859_v19 = vpack.c.bf16 %v520_v15, %v519_v14  ;;  %v7035_v12 = vld [vmem:[%s6666_s22 + $0x380] sm:$0xff]  ;;  %v7038_v13 = vld [vmem:[%s6666_s22 + $0x388] sm:$0xff] }
  0x6c   : > { %v7041_v14 = vld [vmem:[%s6666_s22 + $0xb80] sm:$0xff]  ;;  %v7044_v15 = vld [vmem:[%s6666_s22 + $0xb88] sm:$0xff] }
  0x6f   : > { %6130 = vmatmul.mubr.msk.bf16.gmra.mrb[44].mxu0 %vm965_vm2, %v710_v24  ;;  %v245_v24 = vld [vmem:[%s6666_s22 + $0x230] sm:$0xff] }
  0x70   : > { %6386 = vmatmul.mubr.msk.bf16.gmra.mrb[44].mxu1 %vm965_vm2, %v838_v25  ;;  %6133 = vmatprep.mubr.msk.bf16.mxu0 %vm965_vm2, %v711_v26  ;;  %v246_v25 = vld [vmem:[%s6666_s22 + $0x238] sm:$0xff]  ;;  %v501_v26 = vld [vmem:[%s6666_s22 + $0xa30] sm:$0xff] }
  0x71   : > { %6389 = vmatprep.mubr.msk.bf16.mxu1 %vm965_vm2, %v839_v27  ;;  %v502_v27 = vld [vmem:[%s6666_s22 + $0xa38] sm:$0xff]  ;;  %v722_v32 = vpack.c.bf16 %v246_v25, %v245_v24  ;;  %v267_v24 = vld [vmem:[%s6666_s22 + $0x2e0] sm:$0xff]  ;;  %v268_v25 = vld [vmem:[%s6666_s22 + $0x2e8] sm:$0xff] }
  0x72   : > { %v850_v33 = vpack.c.bf16 %v502_v27, %v501_v26  ;;  %v523_v26 = vld [vmem:[%s6666_s22 + $0xae0] sm:$0xff]  ;;  %v524_v27 = vld [vmem:[%s6666_s22 + $0xae8] sm:$0xff]  ;;  %v733_v30 = vpack.c.bf16 %v268_v25, %v267_v24 }
  0x73   : > { %v861_v31 = vpack.c.bf16 %v524_v27, %v523_v26  ;;  %v7071_v25 = vld [vmem:[%s6666_s22 + $0xba0] sm:$0xff]  ;;  %v7074_v26 = vld [vmem:[%s6666_s22 + $0xba8] sm:$0xff]  ;;  %v7077_v27 = vld [vmem:[%s6666_s22 + $0x3b0] sm:$0xff] }
  0x74   : > { %10368 = vst [vmem:[#allocation6_spill] sm:$0xff] %v7071_v25  ;;  %10369 = vst [vmem:[#allocation7_spill] sm:$0xff] %v7074_v26  ;;  %v7236_v25 = vld [vmem:[%s6666_s22 + $0x458] sm:$0xff]  ;;  %v7262_v26 = vld [vmem:[%s6666_s22 + $0xc68] sm:$0xff] }
  0x75   : > { %10370 = vst [vmem:[#allocation8_spill] sm:$0xff] %v7077_v27  ;;  %v7297_v27 = vld [vmem:[%s6666_s22 + $0x490] sm:$0xff] }
  0x77   : > { %6134 = vmatmul.mubr.msk.bf16.gmra.mrb[48].mxu0 %vm965_vm2, %v712_v36  ;;  %v249_v36 = vld [vmem:[%s6666_s22 + $0x250] sm:$0xff] }
  0x78   : > { %6390 = vmatmul.mubr.msk.bf16.gmra.mrb[48].mxu1 %vm965_vm2, %v840_v37  ;;  %6137 = vmatprep.mubr.msk.bf16.mxu0 %vm965_vm2, %v713_v38  ;;  %v250_v37 = vld [vmem:[%s6666_s22 + $0x258] sm:$0xff]  ;;  %v505_v38 = vld [vmem:[%s6666_s22 + $0xa50] sm:$0xff] }
  0x79   : > { %6393 = vmatprep.mubr.msk.bf16.mxu1 %vm965_vm2, %v841_v39  ;;  %v506_v39 = vld [vmem:[%s6666_s22 + $0xa58] sm:$0xff]  ;;  %v724_v44 = vpack.c.bf16 %v250_v37, %v249_v36  ;;  %v271_v36 = vld [vmem:[%s6666_s22 + $0x300] sm:$0xff]  ;;  %v272_v37 = vld [vmem:[%s6666_s22 + $0x308] sm:$0xff] }
  0x7a   : > { %v852_v45 = vpack.c.bf16 %v506_v39, %v505_v38  ;;  %v527_v38 = vld [vmem:[%s6666_s22 + $0xb00] sm:$0xff]  ;;  %v528_v39 = vld [vmem:[%s6666_s22 + $0xb08] sm:$0xff]  ;;  %v735_v42 = vpack.c.bf16 %v272_v37, %v271_v36  ;;  %v7103_v36 = vld [vmem:[%s6666_s22 + $0x3d0] sm:$0xff] }
  0x7b   : > { %v863_v43 = vpack.c.bf16 %v528_v39, %v527_v38  ;;  %10378 = vst [vmem:[#allocation16_spill] sm:$0xff] %v7103_v36  ;;  %v7106_v37 = vld [vmem:[%s6666_s22 + $0x3d8] sm:$0xff]  ;;  %v7109_v38 = vld [vmem:[%s6666_s22 + $0xbd0] sm:$0xff] }
  0x7c   : > { %10379 = vst [vmem:[#allocation17_spill] sm:$0xff] %v7106_v37  ;;  %10380 = vst [vmem:[#allocation18_spill] sm:$0xff] %v7109_v38  ;;  %v7112_v39 = vld [vmem:[%s6666_s22 + $0xbd8] sm:$0xff]  ;;  %v7280_v38 = vld [vmem:[%s6666_s22 + $0x488] sm:$0xff] }
  0x7d   : > { %10381 = vst [vmem:[#allocation19_spill] sm:$0xff] %v7112_v39  ;;  %v7274_v36 = vld [vmem:[%s6666_s22 + $0xc78] sm:$0xff]  ;;  %v7291_v37 = vld [vmem:[%s6666_s22 + $0xc80] sm:$0xff]  ;;  %v7329_v39 = vld [vmem:[%s6666_s22 + $0x4b0] sm:$0xff] }
  0x7e   : > { %10412 = vst [vmem:[#allocation50_spill] sm:$0xff] %v7329_v39 }
  0x7f   : > { %6138 = vmatmul.mubr.msk.bf16.gmra.mrb[52].mxu0 %vm965_vm2, %v714_v48  ;;  %v253_v48 = vld [vmem:[%s6666_s22 + $0x270] sm:$0xff] }
  0x80   : > { %6394 = vmatmul.mubr.msk.bf16.gmra.mrb[52].mxu1 %vm965_vm2, %v842_v49  ;;  %6141 = vmatprep.mubr.msk.bf16.mxu0 %vm965_vm2, %v715_v50  ;;  %v254_v49 = vld [vmem:[%s6666_s22 + $0x278] sm:$0xff]  ;;  %v509_v50 = vld [vmem:[%s6666_s22 + $0xa70] sm:$0xff] }
  0x81   : > { %6397 = vmatprep.mubr.msk.bf16.mxu1 %vm965_vm2, %v843_v51  ;;  %v510_v51 = vld [vmem:[%s6666_s22 + $0xa78] sm:$0xff]  ;;  %v726_v56 = vpack.c.bf16 %v254_v49, %v253_v48  ;;  %v275_v48 = vld [vmem:[%s6666_s22 + $0x320] sm:$0xff]  ;;  %v276_v49 = vld [vmem:[%s6666_s22 + $0x328] sm:$0xff] }
  0x82   : > { %v854_v57 = vpack.c.bf16 %v510_v51, %v509_v50  ;;  %v531_v50 = vld [vmem:[%s6666_s22 + $0xb20] sm:$0xff]  ;;  %v532_v51 = vld [vmem:[%s6666_s22 + $0xb28] sm:$0xff]  ;;  %v737_v54 = vpack.c.bf16 %v276_v49, %v275_v48  ;;  %v7135_v48 = vld [vmem:[%s6666_s22 + $0x3f0] sm:$0xff] }
  0x83   : > { %v865_v55 = vpack.c.bf16 %v532_v51, %v531_v50  ;;  %10386 = vst [vmem:[#allocation24_spill] sm:$0xff] %v7135_v48  ;;  %v7138_v49 = vld [vmem:[%s6666_s22 + $0x3f8] sm:$0xff]  ;;  %v7141_v50 = vld [vmem:[%s6666_s22 + $0xbf0] sm:$0xff] }
  0x84   : > { %10387 = vst [vmem:[#allocation25_spill] sm:$0xff] %v7138_v49  ;;  %10388 = vst [vmem:[#allocation26_spill] sm:$0xff] %v7141_v50  ;;  %v7144_v51 = vld [vmem:[%s6666_s22 + $0xbf8] sm:$0xff]  ;;  %v7317_v50 = vld [vmem:[%s6666_s22 + $0x4a0] sm:$0xff] }
  0x85   : > { %10389 = vst [vmem:[#allocation27_spill] sm:$0xff] %v7144_v51  ;;  %v7306_v48 = vld [vmem:[%s6666_s22 + $0xc98] sm:$0xff]  ;;  %v7320_v51 = vld [vmem:[%s6666_s22 + $0x4a8] sm:$0xff]  ;;  %v7355_v49 = vld [vmem:[%s6666_s22 + $0xcc0] sm:$0xff] }
  0x86   : > { %10416 = vst [vmem:[#allocation54_spill] sm:$0xff] %v7355_v49  ;;  %v7530_v49 = vld [vmem:[%s6666_s22 + $0x548] sm:$0xff] }
  0x87   : > { %6142 = vmatmul.mubr.msk.bf16.gmra.mrb[56].mxu0 %vm965_vm2, %v716_v60  ;;  %v257_v60 = vld [vmem:[%s6666_s22 + $0x290] sm:$0xff]  ;;  %10446 = vst [vmem:[#allocation80_spill] sm:$0xff] %v7530_v49  ;;  %v7651_v49 = vld [vmem:[%s6666_s22 + $0xd78] sm:$0xff] }
  0x88   : > { %6398 = vmatmul.mubr.msk.bf16.gmra.mrb[56].mxu1 %vm965_vm2, %v844_v61  ;;  %6145 = vmatprep.mubr.msk.bf16.mxu0 %vm965_vm2, %v717_v62  ;;  %v258_v61 = vld [vmem:[%s6666_s22 + $0x298] sm:$0xff]  ;;  %v513_v62 = vld [vmem:[%s6666_s22 + $0xa90] sm:$0xff] }
  0x89   : > { %6401 = vmatprep.mubr.msk.bf16.mxu1 %vm965_vm2, %v845_v63  ;;  %v514_v63 = vld [vmem:[%s6666_s22 + $0xa98] sm:$0xff]  ;;  %v728_v4 = vpack.c.bf16 %v258_v61, %v257_v60  ;;  %v6984_v60 = vld [vmem:[%s6666_s22 + $0x340] sm:$0xff]  ;;  %v6989_v61 = vld [vmem:[%s6666_s22 + $0x348] sm:$0xff] }
  0x8a   : > { %v856_v5 = vpack.c.bf16 %v514_v63, %v513_v62  ;;  %v6992_v62 = vld [vmem:[%s6666_s22 + $0xb40] sm:$0xff]  ;;  %v6995_v63 = vld [vmem:[%s6666_s22 + $0xb48] sm:$0xff]  ;;  %v739_v24 = vpack.c.bf16 %v6989_v61, %v6984_v60  ;;  %v7168_v60 = vld [vmem:[%s6666_s22 + $0x410] sm:$0xff] }
  0x8b   : > { %10394 = vst [vmem:[#allocation32_spill] sm:$0xff] %v7168_v60  ;;  %v7171_v61 = vld [vmem:[%s6666_s22 + $0x418] sm:$0xff]  ;;  %v10425_v60 = vpack.c.bf16 %v7002_v1, %v6999_v0  ;;  %v7410_v1 = vld [vmem:[%s6666_s22 + $0x4f0] sm:$0xff]  ;;  %v7454_v0 = vld [vmem:[%s6666_s22 + $0xd00] sm:$0xff] }
  0x8c   : > { %10395 = vst [vmem:[#allocation33_spill] sm:$0xff] %v7171_v61  ;;  %v7349_v61 = vld [vmem:[%s6666_s22 + $0x4c0] sm:$0xff]  ;;  %10426 = vst [vmem:[#allocation63_spill] sm:$0xff] %v7410_v1  ;;  %v7509_v1 = vld [vmem:[%s6666_s22 + $0x538] sm:$0xff] }
  0x8d   : > { %10435 = vst [vmem:[#allocation69_spill] sm:$0xff] %v7454_v0  ;;  %10442 = vst [vmem:[#allocation76_spill] sm:$0xff] %v7509_v1  ;;  %v7518_v0 = vld [vmem:[%s6666_s22 + $0xd30] sm:$0xff] }
  0x8e   : > { %10443 = vst [vmem:[#allocation77_spill] sm:$0xff] %v7518_v0 }
  0x8f   : > { %6146 = vmatmul.mubr.msk.bf16.gmra.mrb[60].mxu0 %vm965_vm2, %v718_v8  ;;  %v261_v8 = vld [vmem:[%s6666_s22 + $0x2b0] sm:$0xff] }
  0x90   : > { %6402 = vmatmul.mubr.msk.bf16.gmra.mrb[60].mxu1 %vm965_vm2, %v846_v9  ;;  %6149 = vmatprep.mubr.msk.bf16.mxu0 %vm965_vm2, %v719_v10  ;;  %v262_v9 = vld [vmem:[%s6666_s22 + $0x2b8] sm:$0xff]  ;;  %v517_v10 = vld [vmem:[%s6666_s22 + $0xab0] sm:$0xff] }
  0x91   : > { %6405 = vmatprep.mubr.msk.bf16.mxu1 %vm965_vm2, %v847_v11  ;;  %v518_v11 = vld [vmem:[%s6666_s22 + $0xab8] sm:$0xff]  ;;  %v730_v16 = vpack.c.bf16 %v262_v9, %v261_v8  ;;  %v7023_v8 = vld [vmem:[%s6666_s22 + $0x370] sm:$0xff] }
  0x92   : > { %v858_v17 = vpack.c.bf16 %v518_v11, %v517_v10  ;;  %v7026_v9 = vld [vmem:[%s6666_s22 + $0x378] sm:$0xff]  ;;  %v7029_v10 = vld [vmem:[%s6666_s22 + $0xb70] sm:$0xff] }
  0x93   : > { %v7032_v11 = vld [vmem:[%s6666_s22 + $0xb78] sm:$0xff] }
  0x97   : > { %6150 = vmatmul.mubr.msk.bf16.gmra.mrb[64].mxu0 %vm965_vm2, %v720_v20  ;;  %v265_v20 = vld [vmem:[%s6666_s22 + $0x2d0] sm:$0xff] }
  0x98   : > { %6406 = vmatmul.mubr.msk.bf16.gmra.mrb[64].mxu1 %vm965_vm2, %v848_v21  ;;  %6153 = vmatprep.mubr.msk.bf16.mxu0 %vm965_vm2, %v721_v22  ;;  %v266_v21 = vld [vmem:[%s6666_s22 + $0x2d8] sm:$0xff]  ;;  %v521_v22 = vld [vmem:[%s6666_s22 + $0xad0] sm:$0xff] }
  0x99   : > { %6409 = vmatprep.mubr.msk.bf16.mxu1 %vm965_vm2, %v849_v23  ;;  %v522_v23 = vld [vmem:[%s6666_s22 + $0xad8] sm:$0xff]  ;;  %v732_v28 = vpack.c.bf16 %v266_v21, %v265_v20  ;;  %v7061_v21 = vld [vmem:[%s6666_s22 + $0x3a0] sm:$0xff] }
  0x9a   : > { %v860_v29 = vpack.c.bf16 %v522_v23, %v521_v22  ;;  %v7058_v20 = vld [vmem:[%s6666_s22 + $0xb98] sm:$0xff]  ;;  %10366 = vst [vmem:[#allocation4_spill] sm:$0xff] %v7061_v21  ;;  %v7064_v22 = vld [vmem:[%s6666_s22 + $0x3a8] sm:$0xff]  ;;  %v7239_v21 = vld [vmem:[%s6666_s22 + $0xc50] sm:$0xff] }
  0x9b   : > { %10365 = vst [vmem:[#allocation3_spill] sm:$0xff] %v7058_v20  ;;  %10367 = vst [vmem:[#allocation5_spill] sm:$0xff] %v7064_v22  ;;  %v7227_v20 = vld [vmem:[%s6666_s22 + $0xc40] sm:$0xff]  ;;  %v7242_v22 = vld [vmem:[%s6666_s22 + $0xc58] sm:$0xff] }
  0x9c   : > { %10408 = vst [vmem:[#allocation46_spill] sm:$0xff] %v7239_v21  ;;  %v10429_v21 = vpack.c.bf16 %v7008_v3, %v7005_v2  ;;  %v7433_v2 = vld [vmem:[%s6666_s22 + $0xcf8] sm:$0xff]  ;;  %v7436_v3 = vld [vmem:[%s6666_s22 + $0x500] sm:$0xff] }
  0x9d   : > { %10431 = vst [vmem:[#allocation66_spill] sm:$0xff] %v7433_v2  ;;  %10432 = vst [vmem:[#allocation67_spill] sm:$0xff] %v7436_v3  ;;  %v7506_v2 = vld [vmem:[%s6666_s22 + $0x530] sm:$0xff]  ;;  %v7524_v3 = vld [vmem:[%s6666_s22 + $0x540] sm:$0xff] }
  0x9e   : > { %10441 = vst [vmem:[#allocation75_spill] sm:$0xff] %v7506_v2  ;;  %10445 = vst [vmem:[#allocation79_spill] sm:$0xff] %v7524_v3  ;;  %v7648_v3 = vld [vmem:[%s6666_s22 + $0xd70] sm:$0xff] }
  0x9f   : > { %6154 = vmatmul.mubr.msk.bf16.gmra.mrb[68].mxu0 %vm965_vm2, %v722_v32  ;;  %v269_v32 = vld [vmem:[%s6666_s22 + $0x2f0] sm:$0xff] }
  0xa0   : > { %6410 = vmatmul.mubr.msk.bf16.gmra.mrb[68].mxu1 %vm965_vm2, %v850_v33  ;;  %6157 = vmatprep.mubr.msk.bf16.mxu0 %vm965_vm2, %v723_v34  ;;  %v270_v33 = vld [vmem:[%s6666_s22 + $0x2f8] sm:$0xff]  ;;  %v525_v34 = vld [vmem:[%s6666_s22 + $0xaf0] sm:$0xff] }
  0xa1   : > { %6413 = vmatprep.mubr.msk.bf16.mxu1 %vm965_vm2, %v851_v35  ;;  %v526_v35 = vld [vmem:[%s6666_s22 + $0xaf8] sm:$0xff]  ;;  %v734_v40 = vpack.c.bf16 %v270_v33, %v269_v32  ;;  %v7092_v32 = vld [vmem:[%s6666_s22 + $0x3c8] sm:$0xff]  ;;  %v867_v33 = vpack.c.bf16 %v6995_v63, %v6992_v62  ;;  %v7174_v62 = vld [vmem:[%s6666_s22 + $0xc10] sm:$0xff] }
  0xa2   : > { %v862_v41 = vpack.c.bf16 %v526_v35, %v525_v34  ;;  %10375 = vst [vmem:[#allocation13_spill] sm:$0xff] %v7092_v32  ;;  %v7097_v34 = vld [vmem:[%s6666_s22 + $0xbc0] sm:$0xff]  ;;  %v7100_v35 = vld [vmem:[%s6666_s22 + $0xbc8] sm:$0xff]  ;;  %10396 = vst [vmem:[#allocation34_spill] sm:$0xff] %v7174_v62 }
  0xa3   : > { %10376 = vst [vmem:[#allocation14_spill] sm:$0xff] %v7097_v34  ;;  %10377 = vst [vmem:[#allocation15_spill] sm:$0xff] %v7100_v35  ;;  %v7177_v63 = vld [vmem:[%s6666_s22 + $0xc18] sm:$0xff]  ;;  %v7271_v32 = vld [vmem:[%s6666_s22 + $0xc70] sm:$0xff] }
  0xa4   : > { %10397 = vst [vmem:[#allocation35_spill] sm:$0xff] %v7177_v63  ;;  %v7268_v34 = vld [vmem:[%s6666_s22 + $0x478] sm:$0xff]  ;;  %v7294_v35 = vld [vmem:[%s6666_s22 + $0xc88] sm:$0xff]  ;;  %v7335_v62 = vld [vmem:[%s6666_s22 + $0xcb0] sm:$0xff] }
  0xa5   : > { %10414 = vst [vmem:[#allocation52_spill] sm:$0xff] %v7335_v62  ;;  %v7370_v63 = vld [vmem:[%s6666_s22 + $0xcd8] sm:$0xff]  ;;  %v7474_v62 = vld [vmem:[%s6666_s22 + $0xd10] sm:$0xff] }
  0xa6   : > { %10420 = vst [vmem:[#allocation58_spill] sm:$0xff] %v7370_v63  ;;  %10439 = vst [vmem:[#allocation73_spill] sm:$0xff] %v7474_v62  ;;  %v7491_v63 = vld [vmem:[%s6666_s22 + $0x528] sm:$0xff] }
  0xa7   : > { %6158 = vmatmul.mubr.msk.bf16.gmra.mrb[72].mxu0 %vm965_vm2, %v724_v44  ;;  %v273_v44 = vld [vmem:[%s6666_s22 + $0x310] sm:$0xff] }
  0xa8   : > { %6414 = vmatmul.mubr.msk.bf16.gmra.mrb[72].mxu1 %vm965_vm2, %v852_v45  ;;  %6161 = vmatprep.mubr.msk.bf16.mxu0 %vm965_vm2, %v725_v46  ;;  %v274_v45 = vld [vmem:[%s6666_s22 + $0x318] sm:$0xff]  ;;  %v529_v46 = vld [vmem:[%s6666_s22 + $0xb10] sm:$0xff] }
  0xa9   : > { %6417 = vmatprep.mubr.msk.bf16.mxu1 %vm965_vm2, %v853_v47  ;;  %v530_v47 = vld [vmem:[%s6666_s22 + $0xb18] sm:$0xff]  ;;  %v736_v52 = vpack.c.bf16 %v274_v45, %v273_v44  ;;  %v7194_v45 = vld [vmem:[%s6666_s22 + $0xc20] sm:$0xff]  ;;  %v7197_v44 = vld [vmem:[%s6666_s22 + $0xc28] sm:$0xff] }
  0xaa   : > { %v864_v53 = vpack.c.bf16 %v530_v47, %v529_v46  ;;  %v7129_v46 = vld [vmem:[%s6666_s22 + $0xbe0] sm:$0xff]  ;;  %v7132_v47 = vld [vmem:[%s6666_s22 + $0xbe8] sm:$0xff]  ;;  %10400 = vst [vmem:[#allocation38_spill] sm:$0xff] %v7194_v45  ;;  %10401 = vst [vmem:[#allocation39_spill] sm:$0xff] %v7197_v44 }
  0xab   : > { %10384 = vst [vmem:[#allocation22_spill] sm:$0xff] %v7129_v46  ;;  %10385 = vst [vmem:[#allocation23_spill] sm:$0xff] %v7132_v47  ;;  %v7300_v46 = vld [vmem:[%s6666_s22 + $0x498] sm:$0xff]  ;;  %v7361_v45 = vld [vmem:[%s6666_s22 + $0x4d0] sm:$0xff] }
  0xac   : > { %10417 = vst [vmem:[#allocation55_spill] sm:$0xff] %v7361_v45  ;;  %v7387_v44 = vld [vmem:[%s6666_s22 + $0xce0] sm:$0xff]  ;;  %v7390_v47 = vld [vmem:[%s6666_s22 + $0xce8] sm:$0xff] }
  0xad   : > { %10423 = vst [vmem:[#allocation61_spill] sm:$0xff] %v7387_v44  ;;  %10424 = vst [vmem:[#allocation62_spill] sm:$0xff] %v7390_v47  ;;  %v7494_v45 = vld [vmem:[%s6666_s22 + $0xd20] sm:$0xff] }
  0xaf   : > { %6162 = vmatmul.mubr.msk.bf16.gmra.mrb[76].mxu0 %vm965_vm2, %v726_v56  ;;  %v6971_v56 = vld [vmem:[%s6666_s22 + $0x330] sm:$0xff] }
  0xb0   : > { %6418 = vmatmul.mubr.msk.bf16.gmra.mrb[76].mxu1 %vm965_vm2, %v854_v57  ;;  %6165 = vmatprep.mubr.msk.bf16.mxu0 %vm965_vm2, %v727_v58  ;;  %v6974_v57 = vld [vmem:[%s6666_s22 + $0x338] sm:$0xff]  ;;  %v6978_v58 = vld [vmem:[%s6666_s22 + $0xb30] sm:$0xff] }
  0xb1   : > { %6421 = vmatprep.mubr.msk.bf16.mxu1 %vm965_vm2, %v855_v59  ;;  %v6981_v59 = vld [vmem:[%s6666_s22 + $0xb38] sm:$0xff] }
  0xb2   : > { %v866_v23 = vpack.c.bf16 %v6981_v59, %v6978_v58  ;;  %v7162_v58 = vld [vmem:[%s6666_s22 + $0xc00] sm:$0xff]  ;;  %v7165_v59 = vld [vmem:[%s6666_s22 + $0xc08] sm:$0xff] }
  0xb3   : > { %10392 = vst [vmem:[#allocation30_spill] sm:$0xff] %v7162_v58  ;;  %10393 = vst [vmem:[#allocation31_spill] sm:$0xff] %v7165_v59  ;;  %v7326_v58 = vld [vmem:[%s6666_s22 + $0xca8] sm:$0xff] }
  0xb4   : > { %v7352_v59 = vld [vmem:[%s6666_s22 + $0x4c8] sm:$0xff] }
  0xb7   : > { %6166 = vmatmul.mubr.msk.bf16.gmra.mrb[80].mxu0 %vm965_vm2, %v728_v4  ;;  %v7011_v4 = vld [vmem:[%s6666_s22 + $0x360] sm:$0xff] }
  0xb8   : > { %6422 = vmatmul.mubr.msk.bf16.gmra.mrb[80].mxu1 %vm965_vm2, %v856_v5  ;;  %6169 = vmatprep.mubr.msk.bf16.mxu0 %vm965_vm2, %v729_v6  ;;  %v7014_v5 = vld [vmem:[%s6666_s22 + $0x368] sm:$0xff]  ;;  %v7017_v6 = vld [vmem:[%s6666_s22 + $0xb60] sm:$0xff] }
  0xb9   : > { %6425 = vmatprep.mubr.msk.bf16.mxu1 %vm965_vm2, %v857_v7  ;;  %v7020_v7 = vld [vmem:[%s6666_s22 + $0xb68] sm:$0xff] }
  0xbf   : > { %6170 = vmatmul.mubr.msk.bf16.gmra.mrb[84].mxu0 %vm965_vm2, %v730_v16  ;;  %v738_v16 = vpack.c.bf16 %v6974_v57, %v6971_v56  ;;  %v7183_v57 = vld [vmem:[%s6666_s22 + $0x428] sm:$0xff]  ;;  %v7206_v56 = vld [vmem:[%s6666_s22 + $0xc30] sm:$0xff] }
  0xc0   : > { %6426 = vmatmul.mubr.msk.bf16.gmra.mrb[84].mxu1 %vm965_vm2, %v858_v17  ;;  %6173 = vmatprep.mubr.msk.bf16.mxu0 %vm965_vm2, %v731_v18  ;;  %v7049_v17 = vld [vmem:[%s6666_s22 + $0x390] sm:$0xff]  ;;  %v7052_v18 = vld [vmem:[%s6666_s22 + $0x398] sm:$0xff]  ;;  %10399 = vst [vmem:[#allocation37_spill] sm:$0xff] %v7183_v57  ;;  %10404 = vst [vmem:[#allocation42_spill] sm:$0xff] %v7206_v56 }
  0xc1   : > { %6429 = vmatprep.mubr.msk.bf16.mxu1 %vm965_vm2, %v859_v19  ;;  %v7055_v19 = vld [vmem:[%s6666_s22 + $0xb90] sm:$0xff]  ;;  %v7364_v57 = vld [vmem:[%s6666_s22 + $0x4d8] sm:$0xff] }
  0xc2   : > { %10364 = vst [vmem:[#allocation2_spill] sm:$0xff] %v7055_v19  ;;  %v7248_v19 = vld [vmem:[%s6666_s22 + $0x468] sm:$0xff]  ;;  %10418 = vst [vmem:[#allocation56_spill] sm:$0xff] %v7364_v57 }
  0xc3   : > { %10410 = vst [vmem:[#allocation48_spill] sm:$0xff] %v7248_v19  ;;  %v7416_v19 = vld [vmem:[%s6666_s22 + $0xcf0] sm:$0xff] }
  0xc4   : > { %10428 = vst [vmem:[#allocation65_spill] sm:$0xff] %v7416_v19  ;;  %v7503_v19 = vld [vmem:[%s6666_s22 + $0xd28] sm:$0xff] }
  0xc7   : > { %6174 = vmatmul.mubr.msk.bf16.gmra.mrb[88].mxu0 %vm965_vm2, %v732_v28  ;;  %v7080_v28 = vld [vmem:[%s6666_s22 + $0x3b8] sm:$0xff] }
  0xc8   : > { %6430 = vmatmul.mubr.msk.bf16.gmra.mrb[88].mxu1 %vm965_vm2, %v860_v29  ;;  %6177 = vmatprep.mubr.msk.bf16.mxu0 %vm965_vm2, %v733_v30  ;;  %10371 = vst [vmem:[#allocation9_spill] sm:$0xff] %v7080_v28  ;;  %v7083_v29 = vld [vmem:[%s6666_s22 + $0xbb0] sm:$0xff]  ;;  %v7086_v30 = vld [vmem:[%s6666_s22 + $0xbb8] sm:$0xff]  ;;  %v7259_v28 = vld [vmem:[%s6666_s22 + $0xc60] sm:$0xff] }
  0xc9   : > { %6433 = vmatprep.mubr.msk.bf16.mxu1 %vm965_vm2, %v861_v31  ;;  %10372 = vst [vmem:[#allocation10_spill] sm:$0xff] %v7083_v29  ;;  %10373 = vst [vmem:[#allocation11_spill] sm:$0xff] %v7086_v30  ;;  %v7089_v31 = vld [vmem:[%s6666_s22 + $0x3c0] sm:$0xff] }
  0xca   : > { %10374 = vst [vmem:[#allocation12_spill] sm:$0xff] %v7089_v31  ;;  %v7245_v29 = vld [vmem:[%s6666_s22 + $0x460] sm:$0xff]  ;;  %v7265_v31 = vld [vmem:[%s6666_s22 + $0x470] sm:$0xff] }
  0xcb   : > { %10409 = vst [vmem:[#allocation47_spill] sm:$0xff] %v7245_v29  ;;  %v7277_v30 = vld [vmem:[%s6666_s22 + $0x480] sm:$0xff]  ;;  %v10430_v29 = vpack.c.bf16 %v7014_v5, %v7011_v4  ;;  %v10434_v4 = vpack.c.bf16 %v7020_v7, %v7017_v6  ;;  %v7460_v6 = vld [vmem:[%s6666_s22 + $0x510] sm:$0xff]  ;;  %v7471_v5 = vld [vmem:[%s6666_s22 + $0x518] sm:$0xff] }
  0xcc   : > { %10437 = vst [vmem:[#allocation71_spill] sm:$0xff] %v7460_v6  ;;  %10438 = vst [vmem:[#allocation72_spill] sm:$0xff] %v7471_v5  ;;  %v7536_v6 = vld [vmem:[%s6666_s22 + $0xd48] sm:$0xff]  ;;  %v10450_v5 = vpack.c.bf16 %v7032_v11, %v7029_v10 }
  0xcd   : > { %10448 = vst [vmem:[#allocation82_spill] sm:$0xff] %v7536_v6 }
  0xcf   : > { %6178 = vmatmul.mubr.msk.bf16.gmra.mrb[92].mxu0 %vm965_vm2, %v734_v40  ;;  %v7115_v40 = vld [vmem:[%s6666_s22 + $0x3e0] sm:$0xff]  ;;  %v10470_v0 = vld [vmem:[#allocation9_spill] sm:$0xff] }
  0xd0   : > { %6434 = vmatmul.mubr.msk.bf16.gmra.mrb[92].mxu1 %vm965_vm2, %v862_v41  ;;  %6181 = vmatprep.mubr.msk.bf16.mxu0 %vm965_vm2, %v735_v42  ;;  %10382 = vst [vmem:[#allocation20_spill] sm:$0xff] %v7115_v40  ;;  %v7118_v41 = vld [vmem:[%s6666_s22 + $0x3e8] sm:$0xff]  ;;  %v7233_v42 = vld [vmem:[%s6666_s22 + $0x450] sm:$0xff]  ;;  %v10474_v2 = vld [vmem:[#allocation10_spill] sm:$0xff] }
  0xd1   : > { %6437 = vmatprep.mubr.msk.bf16.mxu1 %vm965_vm2, %v863_v43  ;;  %10383 = vst [vmem:[#allocation21_spill] sm:$0xff] %v7118_v41  ;;  %v7212_v43 = vld [vmem:[%s6666_s22 + $0x440] sm:$0xff]  ;;  %v7303_v40 = vld [vmem:[%s6666_s22 + $0xc90] sm:$0xff] }
  0xd2   : > { %10406 = vst [vmem:[#allocation44_spill] sm:$0xff] %v7212_v43  ;;  %10411 = vst [vmem:[#allocation49_spill] sm:$0xff] %v7303_v40  ;;  %v7323_v41 = vld [vmem:[%s6666_s22 + $0xca0] sm:$0xff]  ;;  %v7457_v40 = vld [vmem:[%s6666_s22 + $0xd08] sm:$0xff] }
  0xd3   : > { %10436 = vst [vmem:[#allocation70_spill] sm:$0xff] %v7457_v40  ;;  %v7521_v40 = vld [vmem:[%s6666_s22 + $0xd38] sm:$0xff]  ;;  %v7533_v43 = vld [vmem:[%s6666_s22 + $0xd40] sm:$0xff] }
  0xd4   : > { %10444 = vst [vmem:[#allocation78_spill] sm:$0xff] %v7521_v40  ;;  %10447 = vst [vmem:[#allocation81_spill] sm:$0xff] %v7533_v43 }
  0xd7   : > { %6182 = vmatmul.mubr.msk.bf16.gmra.mrb[96].mxu0 %vm965_vm2, %v736_v52  ;;  %v7147_v52 = vld [vmem:[%s6666_s22 + $0x400] sm:$0xff] }
  0xd8   : > { %6438 = vmatmul.mubr.msk.bf16.gmra.mrb[96].mxu1 %vm965_vm2, %v864_v53  ;;  %6185 = vmatprep.mubr.msk.bf16.mxu0 %vm965_vm2, %v737_v54  ;;  %10390 = vst [vmem:[#allocation28_spill] sm:$0xff] %v7147_v52  ;;  %v7150_v53 = vld [vmem:[%s6666_s22 + $0x408] sm:$0xff]  ;;  %v7332_v52 = vld [vmem:[%s6666_s22 + $0x4b8] sm:$0xff] }
  0xd9   : > { %6441 = vmatprep.mubr.msk.bf16.mxu1 %vm965_vm2, %v865_v55  ;;  %10391 = vst [vmem:[#allocation29_spill] sm:$0xff] %v7150_v53  ;;  %v7209_v55 = vld [vmem:[%s6666_s22 + $0xc38] sm:$0xff]  ;;  %v7215_v54 = vld [vmem:[%s6666_s22 + $0x448] sm:$0xff]  ;;  %10413 = vst [vmem:[#allocation51_spill] sm:$0xff] %v7332_v52 }
  0xda   : > { %10405 = vst [vmem:[#allocation43_spill] sm:$0xff] %v7209_v55  ;;  %10407 = vst [vmem:[#allocation45_spill] sm:$0xff] %v7215_v54  ;;  %v7338_v53 = vld [vmem:[%s6666_s22 + $0xcb8] sm:$0xff]  ;;  %v7381_v55 = vld [vmem:[%s6666_s22 + $0x4e0] sm:$0xff] }
  0xdb   : > { %10415 = vst [vmem:[#allocation53_spill] sm:$0xff] %v7338_v53  ;;  %10421 = vst [vmem:[#allocation59_spill] sm:$0xff] %v7381_v55  ;;  %v7399_v54 = vld [vmem:[%s10274_s2] ss:$0 sm:$0xff]  ;;  %v7477_v53 = vld [vmem:[%s6666_s22 + $0xd18] sm:$0xff] }
  0xdc   : > { %10440 = vst [vmem:[#allocation74_spill] sm:$0xff] %v7477_v53  ;;  %v10449_v53 = vpack.c.bf16 %v7026_v9, %v7023_v8 }
  0xdf   : > { %6186 = vmatmul.mubr.msk.bf16.gmra.mrb[100].mxu0 %vm965_vm2, %v738_v16  ;;  %v7180_v16 = vld [vmem:[%s6666_s22 + $0x420] sm:$0xff] }
  0xe0   : > { %10398 = vst [vmem:[#allocation36_spill] sm:$0xff] %v7180_v16  ;;  %6442 = vmatmul.mubr.msk.bf16.gmra.mrb[100].mxu1 %vm965_vm2, %v866_v23  ;;  %6189 = vmatprep.mubr.msk.bf16.mxu0 %vm965_vm2, %v739_v24  ;;  %v7200_v23 = vld [vmem:[%s6666_s22 + $0x430] sm:$0xff]  ;;  %v7203_v24 = vld [vmem:[%s6666_s22 + $0x438] sm:$0xff]  ;;  %v7358_v16 = vld [vmem:[%s6666_s22 + $0xcc8] sm:$0xff] }
  0xe1   : > { %10402 = vst [vmem:[#allocation40_spill] sm:$0xff] %v7200_v23  ;;  %10403 = vst [vmem:[#allocation41_spill] sm:$0xff] %v7203_v24  ;;  %6445 = vmatprep.mubr.msk.bf16.mxu1 %vm965_vm2, %v867_v33  ;;  %v7230_v33 = vld [vmem:[%s6666_s22 + $0xc48] sm:$0xff]  ;;  %v7367_v23 = vld [vmem:[%s6666_s22 + $0xcd0] sm:$0xff] }
  0xe2   : > { %10419 = vst [vmem:[#allocation57_spill] sm:$0xff] %v7367_v23  ;;  %v7384_v24 = vld [vmem:[%s6666_s22 + $0x4e8] sm:$0xff]  ;;  %v7488_v23 = vld [vmem:[%s6666_s22 + $0x520] sm:$0xff] }
  0xe3   : > { %10422 = vst [vmem:[#allocation60_spill] sm:$0xff] %v7384_v24 }
  0xe7   : > { %6190 = vmatmul.mubr.msk.bf16.gmra.mrb[104].mxu0 %vm965_vm2, %v10425_v60  ;;  %v7413_v60 = vld [vmem:[%s6666_s22 + $0x4f8] sm:$0xff] }
  0xe8   : > { %10427 = vst [vmem:[#allocation64_spill] sm:$0xff] %v7413_v60  ;;  %6446 = vmatmul.mubr.msk.bf16.gmra.mrb[104].mxu1 %vm965_vm2, %v10429_v21  ;;  %6193 = vmatprep.mubr.msk.bf16.mxu0 %vm965_vm2, %v10430_v29  ;;  %v7439_v21 = vld [vmem:[%s6666_s22 + $0x508] sm:$0xff] }
  0xe9   : > { %10433 = vst [vmem:[#allocation68_spill] sm:$0xff] %v7439_v21  ;;  %6449 = vmatprep.mubr.msk.bf16.mxu1 %vm965_vm2, %v10434_v4 }
  0xea   : > { %v6087_v7 = vpop.f32.mrb[0].mxu0 }
  0xeb   : > { %v6343_v39 = vpop.f32.mrb[0].mxu1  ;;  %v1775_v52 = vpop.f32.mrb[1].mxu0  ;;  %v1784_v57 = vadd.f32 %v6087_v7, %v7399_v54 }
  0xec   : > { %v1776_v29 = vadd.f32 %v7399_v54, %v1775_v52  ;;  %v2799_v56 = vpop.f32.mrb[1].mxu1  ;;  %v6088_v44 = vpop.f32.mrb[2].mxu0  ;;  %v2808_v7 = vadd.f32 %v6343_v39, %v7399_v54 }
  0xed   : > { %v2800_v52 = vadd.f32 %v7399_v54, %v2799_v56  ;;  %v6344_v60 = vpop.f32.mrb[2].mxu1  ;;  %v1778_v47 = vpop.f32.mrb[3].mxu0  ;;  %v1787_v39 = vadd.f32 %v6088_v44, %v7399_v54 }
  0xee   : > { %v3822_v21 = vmax.f32 %v1776_v29, 0.0  ;;  %v2811_v55 = vadd.f32 %v6344_v60, %v7399_v54  ;;  %v1779_v56 = vadd.f32 %v7399_v54, %v1778_v47  ;;  %v2802_v24 = vpop.f32.mrb[3].mxu1  ;;  %v3824_v60 = vmax.f32 %v1784_v57, 0.0  ;;  %v7581_v47 = vld [vmem:[%s6666_s22 + $0x550] sm:$0xff] }
  0xef   : > { %v4078_v4 = vmax.f32 %v2800_v52, 0.0  ;;  %v2803_v62 = vadd.f32 %v7399_v54, %v2802_v24  ;;  %6194 = vmatmul.mubr.msk.bf16.gmra.mrb[108].mxu0 %vm965_vm2, %v10449_v53  ;;  %v10451_v24 = vpack.c.bf16 %v7038_v13, %v7035_v12  ;;  %v4080_v53 = vmax.f32 %v2808_v7, 0.0  ;;  %10453 = vst [vmem:[#allocation83_spill] sm:$0xff] %v7581_v47 }
  0xf0   : > { %v3823_v29 = vmax.f32 %v1779_v56, 0.0  ;;  %6450 = vmatmul.mubr.msk.bf16.gmra.mrb[108].mxu1 %vm965_vm2, %v10450_v5  ;;  %v10452_v57 = vpack.c.bf16 %v7044_v15, %v7041_v14  ;;  %v4335_v12 = vsel %vm4334_vm3, %v3822_v21, 0.0  ;;  %v3825_v13 = vmax.f32 %v1787_v39, 0.0 }
  0xf1   : > { %6197 = vmatprep.mubr.msk.bf16.mxu0 %vm965_vm2, %v10451_v24  ;;  %v4079_v52 = vmax.f32 %v2803_v62, 0.0  ;;  %v4081_v5 = vmax.f32 %v2811_v55, 0.0  ;;  %v4887_v62 = vsel %vm4334_vm3, %v4078_v4, 0.0  ;;  %v4338_v10 = vsel %vm4334_vm3, %v3824_v60, 0.0 }
  0xf2   : > { %6453 = vmatprep.mubr.msk.bf16.mxu1 %vm965_vm2, %v10452_v57  ;;  %v4336_v56 = vsel %vm4334_vm3, %v3823_v29, 0.0  ;;  %v6091_v24 = vpop.f32.mrb[4].mxu0  ;;  %v4890_v11 = vsel %vm4334_vm3, %v4080_v53, 0.0 }
  0xf3   : > { %v4337_v7 = vadd.f32 %v4336_v56, %v4335_v12  ;;  %v4888_v14 = vsel %vm4334_vm3, %v4079_v52, 0.0  ;;  %v1800_v15 = vadd.f32 %v6091_v24, %v7399_v54  ;;  %v6347_v57 = vpop.f32.mrb[4].mxu1  ;;  %v1791_v9 = vpop.f32.mrb[5].mxu0  ;;  %v4340_v24 = vsel %vm4334_vm3, %v3825_v13, 0.0  ;;  %v7589_v13 = vld [vmem:[%s6666_s22 + $0x558] sm:$0xff] }
  0xf4   : > { %v4889_v8 = vadd.f32 %v4888_v14, %v4887_v62  ;;  %v2824_v21 = vadd.f32 %v6347_v57, %v7399_v54  ;;  %v1792_v55 = vadd.f32 %v7399_v54, %v1791_v9  ;;  %v2815_v39 = vpop.f32.mrb[5].mxu1  ;;  %v6092_v29 = vpop.f32.mrb[6].mxu0  ;;  %v4892_v53 = vsel %vm4334_vm3, %v4081_v5, 0.0  ;;  %10455 = vst [vmem:[#allocation84_spill] sm:$0xff] %v7589_v13  ;;  %v10458_v5 = vld [vmem:[#allocation3_spill] sm:$0xff] }
  0xf5   : > { %v4339_v4 = vadd.f32 %v4338_v10, %v4337_v7  ;;  %v2816_v52 = vadd.f32 %v7399_v54, %v2815_v39  ;;  %v1803_v12 = vadd.f32 %v6092_v29, %v7399_v54  ;;  %v6348_v56 = vpop.f32.mrb[6].mxu1  ;;  %v1794_v60 = vpop.f32.mrb[7].mxu0  ;;  %v3828_v10 = vmax.f32 %v1800_v15, 0.0  ;;  %v10459_v15 = vld [vmem:[#allocation2_spill] sm:$0xff] }
  0xf6   : > { %v4891_v62 = vadd.f32 %v4890_v11, %v4889_v8  ;;  %v3826_v14 = vmax.f32 %v1792_v55, 0.0  ;;  %v2827_v9 = vadd.f32 %v6348_v56, %v7399_v54  ;;  %v2818_v57 = vpop.f32.mrb[7].mxu1  ;;  %v10454_v29 = vpack.c.bf16 %v7052_v18, %v7049_v17  ;;  %v7592_v8 = vld [vmem:[%s6666_s22 + $0xd50] sm:$0xff]  ;;  %v7595_v11 = vld [vmem:[%s6666_s22 + $0xd58] sm:$0xff] }
  0xf7   : > { %v4341_v7 = vadd.f32 %v4340_v24, %v4339_v4  ;;  %v4082_v39 = vmax.f32 %v2816_v52, 0.0  ;;  %10456 = vst [vmem:[#allocation85_spill] sm:$0xff] %v7592_v8  ;;  %10457 = vst [vmem:[#allocation86_spill] sm:$0xff] %v7595_v11  ;;  %v4084_v55 = vmax.f32 %v2824_v21, 0.0  ;;  %v3829_v43 = vmax.f32 %v1803_v12, 0.0  ;;  %v10461_v52 = vld [vmem:[#allocation5_spill] sm:$0xff] }
  0xf8   : > { %6198 = vmatmul.mubr.msk.bf16.gmra.mrb[112].mxu0 %vm965_vm2, %v10454_v29  ;;  %v4342_v56 = vsel %vm4334_vm3, %v3826_v14, 0.0  ;;  %v4893_v44 = vadd.f32 %v4892_v53, %v4891_v62  ;;  %v10460_v4 = vpack.c.bf16 %v10458_v5, %v10459_v15  ;;  %v10462_v17 = vld [vmem:[#allocation4_spill] sm:$0xff]  ;;  %v7607_v24 = vld [vmem:[%s6666_s22 + $0x560] sm:$0xff]  ;;  %v7610_v29 = vld [vmem:[%s6666_s22 + $0x568] sm:$0xff]  ;;  %v4085_v62 = vmax.f32 %v2827_v9, 0.0  ;;  %10469 = vst [vmem:[#allocation5_spill] sm:$0xff] %v7648_v3 }
  0xf9   : > { %v10463_v18 = vpack.c.bf16 %v10461_v52, %v10462_v17  ;;  %10464 = vst [vmem:[#allocation3_spill] sm:$0xff] %v7607_v24  ;;  %10465 = vst [vmem:[#allocation2_spill] sm:$0xff] %v7610_v29  ;;  %v4343_v6 = vadd.f32 %v4342_v56, %v4341_v7  ;;  %v4894_v21 = vsel %vm4334_vm3, %v4082_v39, 0.0  ;;  %v1795_v12 = vadd.f32 %v7399_v54, %v1794_v60  ;;  %v10466_v14 = vld [vmem:[#allocation7_spill] sm:$0xff]  ;;  %v10467_v53 = vld [vmem:[#allocation6_spill] sm:$0xff] }
  0xfa   : > { %6454 = vmatmul.mubr.msk.bf16.gmra.mrb[112].mxu1 %vm965_vm2, %v10460_v4  ;;  %v10468_v5 = vpack.c.bf16 %v10466_v14, %v10467_v53  ;;  %v4895_v15 = vadd.f32 %v4894_v21, %v4893_v44  ;;  %v2819_v4 = vadd.f32 %v7399_v54, %v2818_v57  ;;  %v6095_v52 = vpop.f32.mrb[8].mxu0  ;;  %v4346_v9 = vsel %vm4334_vm3, %v3828_v10, 0.0  ;;  %v7628_v57 = vld [vmem:[%s6666_s22 + $0xd60] sm:$0xff]  ;;  %v7644_v29 = vld [vmem:[%s6666_s22 + $0x578] sm:$0xff] }
  0xfb   : > { %6201 = vmatprep.mubr.msk.bf16.mxu0 %vm965_vm2, %v10463_v18  ;;  %v3827_v60 = vmax.f32 %v1795_v12, 0.0  ;;  %v1816_v39 = vadd.f32 %v6095_v52, %v7399_v54  ;;  %v6351_v56 = vpop.f32.mrb[8].mxu1  ;;  %v1807_v18 = vpop.f32.mrb[9].mxu0  ;;  %v4898_v21 = vsel %vm4334_vm3, %v4084_v55, 0.0  ;;  %v7634_v12 = vld [vmem:[%s6666_s22 + $0xd68] sm:$0xff]  ;;  %v7637_v52 = vld [vmem:[%s6666_s22 + $0x570] sm:$0xff] }
  0xfc   : > { %6457 = vmatprep.mubr.msk.bf16.mxu1 %vm965_vm2, %v10468_v5  ;;  %v4083_v14 = vmax.f32 %v2819_v4, 0.0  ;;  %v2840_v53 = vadd.f32 %v6351_v56, %v7399_v54  ;;  %v1808_v5 = vadd.f32 %v7399_v54, %v1807_v18  ;;  %v2831_v7 = vpop.f32.mrb[9].mxu1  ;;  %v6096_v10 = vpop.f32.mrb[10].mxu0  ;;  %v4348_v44 = vsel %vm4334_vm3, %v3829_v43, 0.0 }
  0xfd   : > { %v4900_v17 = vsel %vm4334_vm3, %v4085_v62, 0.0  ;;  %v4344_v24 = vsel %vm4334_vm3, %v3827_v60, 0.0  ;;  %v2832_v55 = vadd.f32 %v7399_v54, %v2831_v7  ;;  %v6352_v4 = vpop.f32.mrb[10].mxu1  ;;  %v1810_v56 = vpop.f32.mrb[11].mxu0  ;;  %v3832_v11 = vmax.f32 %v1816_v39, 0.0  ;;  %v10471_v7 = vld [vmem:[#allocation8_spill] sm:$0xff] }
  0xfe   : > { %v4345_v18 = vadd.f32 %v4344_v24, %v4343_v6  ;;  %v4896_v8 = vsel %vm4334_vm3, %v4083_v14, 0.0  ;;  %v3830_v47 = vmax.f32 %v1808_v5, 0.0  ;;  %v2834_v13 = vpop.f32.mrb[11].mxu1  ;;  %v1819_v60 = vadd.f32 %v6096_v10, %v7399_v54  ;;  %v10473_v5 = vld [vmem:[#allocation11_spill] sm:$0xff] }
  0xff   : > { %v4897_v43 = vadd.f32 %v4896_v8, %v4895_v15  ;;  %v4086_v62 = vmax.f32 %v2832_v55, 0.0  ;;  %v10472_v40 = vpack.c.bf16 %v10470_v0, %v10471_v7  ;;  %v4088_v39 = vmax.f32 %v2840_v53, 0.0  ;;  %v10476_v8 = vld [vmem:[#allocation13_spill] sm:$0xff]  ;;  %v10477_v15 = vld [vmem:[#allocation12_spill] sm:$0xff]  ;;  %v10479_v53 = vld [vmem:[#allocation15_spill] sm:$0xff] }
 0x100   : > { %v4347_v24 = vadd.f32 %v4346_v9, %v4345_v18  ;;  %v2843_v14 = vadd.f32 %v6352_v4, %v7399_v54  ;;  %v10475_v1 = vpack.c.bf16 %v10473_v5, %v10474_v2  ;;  %v10478_v10 = vpack.c.bf16 %v10476_v8, %v10477_v15  ;;  %v10480_v4 = vld [vmem:[#allocation14_spill] sm:$0xff] }
 0x101   : > { %6202 = vmatmul.mubr.msk.bf16.gmra.mrb[116].mxu0 %vm965_vm2, %v10472_v40  ;;  %v4899_v0 = vadd.f32 %v4898_v21, %v4897_v43  ;;  %v4350_v55 = vsel %vm4334_vm3, %v3830_v47, 0.0  ;;  %v1811_v9 = vadd.f32 %v7399_v54, %v1810_v56  ;;  %v10481_v18 = vpack.c.bf16 %v10479_v53, %v10480_v4 }
 0x102   : > { %6458 = vmatmul.mubr.msk.bf16.gmra.mrb[116].mxu1 %vm965_vm2, %v10475_v1  ;;  %6205 = vmatprep.mubr.msk.bf16.mxu0 %vm965_vm2, %v10478_v10  ;;  %v4354_v2 = vsel %vm4334_vm3, %v3832_v11, 0.0  ;;  %v4349_v7 = vadd.f32 %v4348_v44, %v4347_v24  ;;  %v4902_v5 = vsel %vm4334_vm3, %v4086_v62, 0.0  ;;  %v2835_v8 = vadd.f32 %v7399_v54, %v2834_v13  ;;  %v6099_v21 = vpop.f32.mrb[12].mxu0 }
 0x103   : > { %6461 = vmatprep.mubr.msk.bf16.mxu1 %vm965_vm2, %v10481_v18  ;;  %v4901_v43 = vadd.f32 %v4900_v17, %v4899_v0  ;;  %v3833_v47 = vmax.f32 %v1819_v60, 0.0  ;;  %v3831_v15 = vmax.f32 %v1811_v9, 0.0  ;;  %v1832_v56 = vadd.f32 %v6099_v21, %v7399_v54  ;;  %v6355_v10 = vpop.f32.mrb[12].mxu1  ;;  %v1823_v53 = vpop.f32.mrb[13].mxu0 }
 0x104   : > { %v4906_v4 = vsel %vm4334_vm3, %v4088_v39, 0.0  ;;  %v4351_v18 = vadd.f32 %v4350_v55, %v4349_v7  ;;  %v4089_v40 = vmax.f32 %v2843_v14, 0.0  ;;  %v4087_v1 = vmax.f32 %v2835_v8, 0.0  ;;  %v2847_v6 = vpop.f32.mrb[13].mxu1  ;;  %v6100_v11 = vpop.f32.mrb[14].mxu0 }
 0x105   : > { %v4903_v44 = vadd.f32 %v4902_v5, %v4901_v43  ;;  %v4352_v62 = vsel %vm4334_vm3, %v3831_v15, 0.0  ;;  %v2856_v13 = vadd.f32 %v6355_v10, %v7399_v54  ;;  %v1824_v17 = vadd.f32 %v7399_v54, %v1823_v53  ;;  %v6356_v60 = vpop.f32.mrb[14].mxu1  ;;  %v1826_v24 = vpop.f32.mrb[15].mxu0  ;;  %v10482_v43 = vld [vmem:[#allocation17_spill] sm:$0xff]  ;;  %v10483_v15 = vld [vmem:[#allocation16_spill] sm:$0xff] }
 0x106   : > { %v4353_v0 = vadd.f32 %v4352_v62, %v4351_v18  ;;  %v4904_v9 = vsel %vm4334_vm3, %v4087_v1, 0.0  ;;  %v3836_v21 = vmax.f32 %v1832_v56, 0.0  ;;  %v2848_v39 = vadd.f32 %v7399_v54, %v2847_v6  ;;  %v2850_v55 = vpop.f32.mrb[15].mxu1  ;;  %v10485_v56 = vld [vmem:[#allocation19_spill] sm:$0xff]  ;;  %v10486_v6 = vld [vmem:[#allocation18_spill] sm:$0xff] }
 0x107   : > { %v4356_v14 = vsel %vm4334_vm3, %v3833_v47, 0.0  ;;  %v4905_v7 = vadd.f32 %v4904_v9, %v4903_v44  ;;  %v3834_v8 = vmax.f32 %v1824_v17, 0.0  ;;  %v1835_v5 = vadd.f32 %v6100_v11, %v7399_v54  ;;  %v10488_v47 = vld [vmem:[#allocation21_spill] sm:$0xff]  ;;  %v10489_v44 = vld [vmem:[#allocation20_spill] sm:$0xff] }
 0x108   : > { %v10484_v10 = vpack.c.bf16 %v10482_v43, %v10483_v15  ;;  %v4908_v53 = vsel %vm4334_vm3, %v4089_v40, 0.0  ;;  %v4355_v18 = vadd.f32 %v4354_v2, %v4353_v0  ;;  %v4090_v62 = vmax.f32 %v2848_v39, 0.0  ;;  %v10491_v2 = vld [vmem:[#allocation23_spill] sm:$0xff]  ;;  %v10492_v0 = vld [vmem:[#allocation22_spill] sm:$0xff] }
 0x109   : > { %v2859_v1 = vadd.f32 %v6356_v60, %v7399_v54  ;;  %v10487_v3 = vpack.c.bf16 %v10485_v56, %v10486_v6  ;;  %v10490_v17 = vpack.c.bf16 %v10488_v47, %v10489_v44  ;;  %v4907_v11 = vadd.f32 %v4906_v4, %v4905_v7 }
 0x10a   : > { %6206 = vmatmul.mubr.msk.bf16.gmra.mrb[120].mxu0 %vm965_vm2, %v10484_v10  ;;  %v4092_v9 = vmax.f32 %v2856_v13, 0.0  ;;  %v4358_v43 = vsel %vm4334_vm3, %v3834_v8, 0.0  ;;  %v1827_v40 = vadd.f32 %v7399_v54, %v1826_v24  ;;  %v10493_v39 = vpack.c.bf16 %v10491_v2, %v10492_v0  ;;  %v6103_v56 = vpop.f32.mrb[16].mxu0 }
 0x10b   : > { %6462 = vmatmul.mubr.msk.bf16.gmra.mrb[120].mxu1 %vm965_vm2, %v10487_v3  ;;  %6209 = vmatprep.mubr.msk.bf16.mxu0 %vm965_vm2, %v10490_v17  ;;  %v4362_v60 = vsel %vm4334_vm3, %v3836_v21, 0.0  ;;  %v4357_v15 = vadd.f32 %v4356_v14, %v4355_v18  ;;  %v4910_v3 = vsel %vm4334_vm3, %v4090_v62, 0.0  ;;  %v2851_v10 = vadd.f32 %v7399_v54, %v2850_v55  ;;  %v6359_v8 = vpop.f32.mrb[16].mxu1  ;;  %v1839_v24 = vpop.f32.mrb[17].mxu0 }
 0x10c   : > { %6465 = vmatprep.mubr.msk.bf16.mxu1 %vm965_vm2, %v10493_v39  ;;  %v4909_v6 = vadd.f32 %v4908_v53, %v4907_v11  ;;  %v3837_v4 = vmax.f32 %v1835_v5, 0.0  ;;  %v3835_v13 = vmax.f32 %v1827_v40, 0.0  ;;  %v1848_v7 = vadd.f32 %v6103_v56, %v7399_v54  ;;  %v2863_v0 = vpop.f32.mrb[17].mxu1  ;;  %v6104_v21 = vpop.f32.mrb[18].mxu0 }
 0x10d   : > { %v4359_v47 = vadd.f32 %v4358_v43, %v4357_v15  ;;  %v4093_v44 = vmax.f32 %v2859_v1, 0.0  ;;  %v4091_v17 = vmax.f32 %v2851_v10, 0.0  ;;  %v2872_v2 = vadd.f32 %v6359_v8, %v7399_v54  ;;  %v6360_v5 = vpop.f32.mrb[18].mxu1  ;;  %v1842_v62 = vpop.f32.mrb[19].mxu0 }
 0x10e   : > { %v4914_v14 = vsel %vm4334_vm3, %v4092_v9, 0.0  ;;  %v4911_v18 = vadd.f32 %v4910_v3, %v4909_v6  ;;  %v4360_v55 = vsel %vm4334_vm3, %v3835_v13, 0.0  ;;  %v1840_v53 = vadd.f32 %v7399_v54, %v1839_v24  ;;  %v2866_v43 = vpop.f32.mrb[19].mxu1  ;;  %v10494_v3 = vld [vmem:[#allocation25_spill] sm:$0xff]  ;;  %v10495_v6 = vld [vmem:[#allocation24_spill] sm:$0xff] }
 0x10f   : > { %v4361_v11 = vadd.f32 %v4360_v55, %v4359_v47  ;;  %v4912_v40 = vsel %vm4334_vm3, %v4091_v17, 0.0  ;;  %v3840_v39 = vmax.f32 %v1848_v7, 0.0  ;;  %v2864_v1 = vadd.f32 %v7399_v54, %v2863_v0  ;;  %v10497_v7 = vld [vmem:[#allocation27_spill] sm:$0xff]  ;;  %v10498_v55 = vld [vmem:[#allocation26_spill] sm:$0xff] }
 0x110   : > { %v4364_v15 = vsel %vm4334_vm3, %v3837_v4, 0.0  ;;  %v4913_v10 = vadd.f32 %v4912_v40, %v4911_v18  ;;  %v3838_v56 = vmax.f32 %v1840_v53, 0.0  ;;  %v1851_v9 = vadd.f32 %v6104_v21, %v7399_v54  ;;  %v10500_v4 = vld [vmem:[#allocation29_spill] sm:$0xff]  ;;  %v10501_v18 = vld [vmem:[#allocation28_spill] sm:$0xff] }
 0x111   : > { %v10496_v13 = vpack.c.bf16 %v10494_v3, %v10495_v6  ;;  %v4916_v8 = vsel %vm4334_vm3, %v4093_v44, 0.0  ;;  %v4363_v24 = vadd.f32 %v4362_v60, %v4361_v11  ;;  %v4096_v47 = vmax.f32 %v2872_v2, 0.0  ;;  %v10503_v60 = vld [vmem:[#allocation31_spill] sm:$0xff]  ;;  %v10504_v2 = vld [vmem:[#allocation30_spill] sm:$0xff] }
 0x112   : > { %v4094_v17 = vmax.f32 %v2864_v1, 0.0  ;;  %v10499_v0 = vpack.c.bf16 %v10497_v7, %v10498_v55  ;;  %v10502_v53 = vpack.c.bf16 %v10500_v4, %v10501_v18  ;;  %v4915_v21 = vadd.f32 %v4914_v14, %v4913_v10  ;;  %v6107_v55 = vpop.f32.mrb[20].mxu0 }
 0x113   : > { %6210 = vmatmul.mubr.msk.bf16.gmra.mrb[124].mxu0 %vm965_vm2, %v10496_v13  ;;  %v4366_v40 = vsel %vm4334_vm3, %v3838_v56, 0.0  ;;  %v2875_v3 = vadd.f32 %v6360_v5, %v7399_v54  ;;  %v1843_v44 = vadd.f32 %v7399_v54, %v1842_v62  ;;  %v10505_v11 = vpack.c.bf16 %v10503_v60, %v10504_v2  ;;  %v1855_v62 = vpop.f32.mrb[21].mxu0 }
 0x114   : > { %6466 = vmatmul.mubr.msk.bf16.gmra.mrb[124].mxu1 %vm965_vm2, %v10499_v0  ;;  %6213 = vmatprep.mubr.msk.bf16.mxu0 %vm965_vm2, %v10502_v53  ;;  %v4370_v1 = vsel %vm4334_vm3, %v3840_v39, 0.0  ;;  %v4365_v6 = vadd.f32 %v4364_v15, %v4363_v24  ;;  %v4918_v13 = vsel %vm4334_vm3, %v4094_v17, 0.0  ;;  %v2867_v7 = vadd.f32 %v7399_v54, %v2866_v43  ;;  %v6363_v0 = vpop.f32.mrb[20].mxu1  ;;  %v6108_v15 = vpop.f32.mrb[22].mxu0 }
 0x115   : > { %6469 = vmatprep.mubr.msk.bf16.mxu1 %vm965_vm2, %v10505_v11  ;;  %v4917_v14 = vadd.f32 %v4916_v8, %v4915_v21  ;;  %v3841_v10 = vmax.f32 %v1851_v9, 0.0  ;;  %v3839_v56 = vmax.f32 %v1843_v44, 0.0  ;;  %v1864_v5 = vadd.f32 %v6107_v55, %v7399_v54  ;;  %v2879_v39 = vpop.f32.mrb[21].mxu1  ;;  %v1858_v21 = vpop.f32.mrb[23].mxu0 }
 0x116   : > { %v4922_v4 = vsel %vm4334_vm3, %v4096_v47, 0.0  ;;  %v4367_v18 = vadd.f32 %v4366_v40, %v4365_v6  ;;  %v4095_v53 = vmax.f32 %v2867_v7, 0.0  ;;  %v2888_v60 = vadd.f32 %v6363_v0, %v7399_v54  ;;  %v6364_v9 = vpop.f32.mrb[22].mxu1 }
 0x117   : > { %v4919_v24 = vadd.f32 %v4918_v13, %v4917_v14  ;;  %v4097_v17 = vmax.f32 %v2875_v3, 0.0  ;;  %v4368_v43 = vsel %vm4334_vm3, %v3839_v56, 0.0  ;;  %v1856_v8 = vadd.f32 %v7399_v54, %v1855_v62  ;;  %v2882_v40 = vpop.f32.mrb[23].mxu1  ;;  %v10506_v3 = vld [vmem:[#allocation33_spill] sm:$0xff]  ;;  %v10507_v14 = vld [vmem:[#allocation32_spill] sm:$0xff] }
 0x118   : > { %v4369_v44 = vadd.f32 %v4368_v43, %v4367_v18  ;;  %v4920_v2 = vsel %vm4334_vm3, %v4095_v53, 0.0  ;;  %v3844_v11 = vmax.f32 %v1864_v5, 0.0  ;;  %v2880_v47 = vadd.f32 %v7399_v54, %v2879_v39  ;;  %v10509_v5 = vld [vmem:[#allocation35_spill] sm:$0xff]  ;;  %v10510_v43 = vld [vmem:[#allocation34_spill] sm:$0xff] }
 0x119   : > { %v4372_v6 = vsel %vm4334_vm3, %v3841_v10, 0.0  ;;  %v4921_v7 = vadd.f32 %v4920_v2, %v4919_v24  ;;  %v3842_v55 = vmax.f32 %v1856_v8, 0.0  ;;  %v1867_v13 = vadd.f32 %v6108_v15, %v7399_v54  ;;  %v10512_v10 = vld [vmem:[#allocation37_spill] sm:$0xff]  ;;  %v10513_v24 = vld [vmem:[#allocation36_spill] sm:$0xff] }
 0x11a   : > { %v10508_v56 = vpack.c.bf16 %v10506_v3, %v10507_v14  ;;  %v4371_v0 = vadd.f32 %v4370_v1, %v4369_v44  ;;  %v4100_v62 = vmax.f32 %v2888_v60, 0.0  ;;  %v4098_v18 = vmax.f32 %v2880_v47, 0.0  ;;  %v10515_v60 = vld [vmem:[#allocation39_spill] sm:$0xff]  ;;  %v10516_v44 = vld [vmem:[#allocation38_spill] sm:$0xff] }
 0x11b   : > { %v2891_v53 = vadd.f32 %v6364_v9, %v7399_v54  ;;  %v10511_v39 = vpack.c.bf16 %v10509_v5, %v10510_v43  ;;  %v10514_v8 = vpack.c.bf16 %v10512_v10, %v10513_v24  ;;  %v4924_v15 = vsel %vm4334_vm3, %v4097_v17, 0.0  ;;  %v6111_v43 = vpop.f32.mrb[24].mxu0 }
 0x11c   : > { %6214 = vmatmul.mubr.msk.bf16.gmra.mrb[128].mxu0 %vm965_vm2, %v10508_v56  ;;  %v4923_v2 = vadd.f32 %v4922_v4, %v4921_v7  ;;  %v4374_v3 = vsel %vm4334_vm3, %v3842_v55, 0.0  ;;  %v1859_v1 = vadd.f32 %v7399_v54, %v1858_v21  ;;  %v10517_v9 = vpack.c.bf16 %v10515_v60, %v10516_v44  ;;  %v6367_v55 = vpop.f32.mrb[24].mxu1  ;;  %v1871_v21 = vpop.f32.mrb[25].mxu0 }
 0x11d   : > { %6470 = vmatmul.mubr.msk.bf16.gmra.mrb[128].mxu1 %vm965_vm2, %v10511_v39  ;;  %6217 = vmatprep.mubr.msk.bf16.mxu0 %vm965_vm2, %v10514_v8  ;;  %v4378_v47 = vsel %vm4334_vm3, %v3844_v11, 0.0  ;;  %v4373_v14 = vadd.f32 %v4372_v6, %v4371_v0  ;;  %v4926_v56 = vsel %vm4334_vm3, %v4098_v18, 0.0  ;;  %v2883_v5 = vadd.f32 %v7399_v54, %v2882_v40  ;;  %v2895_v44 = vpop.f32.mrb[25].mxu1  ;;  %v6112_v11 = vpop.f32.mrb[26].mxu0 }
 0x11e   : > { %6473 = vmatprep.mubr.msk.bf16.mxu1 %vm965_vm2, %v10517_v9  ;;  %v4925_v39 = vadd.f32 %v4924_v15, %v4923_v2  ;;  %v3845_v17 = vmax.f32 %v1867_v13, 0.0  ;;  %v3843_v4 = vmax.f32 %v1859_v1, 0.0  ;;  %v1880_v7 = vadd.f32 %v6111_v43, %v7399_v54  ;;  %v6368_v13 = vpop.f32.mrb[26].mxu1  ;;  %v1874_v15 = vpop.f32.mrb[27].mxu0  ;;  %v10518_v43 = vld [vmem:[#allocation41_spill] sm:$0xff] }
 0x11f   : > { %v4930_v10 = vsel %vm4334_vm3, %v4100_v62, 0.0  ;;  %v4375_v24 = vadd.f32 %v4374_v3, %v4373_v14  ;;  %v4101_v8 = vmax.f32 %v2891_v53, 0.0  ;;  %v4099_v60 = vmax.f32 %v2883_v5, 0.0  ;;  %v2898_v3 = vpop.f32.mrb[27].mxu1 }
 0x120   : > { %v4927_v6 = vadd.f32 %v4926_v56, %v4925_v39  ;;  %v4376_v0 = vsel %vm4334_vm3, %v3843_v4, 0.0  ;;  %v2904_v40 = vadd.f32 %v6367_v55, %v7399_v54  ;;  %v1872_v18 = vadd.f32 %v7399_v54, %v1871_v21  ;;  %v10519_v39 = vld [vmem:[#allocation40_spill] sm:$0xff] }
 0x121   : > { %v4377_v2 = vadd.f32 %v4376_v0, %v4375_v24  ;;  %v4928_v1 = vsel %vm4334_vm3, %v4099_v60, 0.0  ;;  %v3848_v9 = vmax.f32 %v1880_v7, 0.0  ;;  %v2896_v62 = vadd.f32 %v7399_v54, %v2895_v44  ;;  %v10521_v60 = vld [vmem:[#allocation43_spill] sm:$0xff]  ;;  %v10522_v44 = vld [vmem:[#allocation42_spill] sm:$0xff] }
 0x122   : > { %v4380_v53 = vsel %vm4334_vm3, %v3845_v17, 0.0  ;;  %v4929_v14 = vadd.f32 %v4928_v1, %v4927_v6  ;;  %v3846_v5 = vmax.f32 %v1872_v18, 0.0  ;;  %v1883_v56 = vadd.f32 %v6112_v11, %v7399_v54  ;;  %v10524_v17 = vld [vmem:[#allocation45_spill] sm:$0xff]  ;;  %v10525_v6 = vld [vmem:[#allocation44_spill] sm:$0xff] }
 0x123   : > { %v10520_v4 = vpack.c.bf16 %v10518_v43, %v10519_v39  ;;  %v4932_v55 = vsel %vm4334_vm3, %v4101_v8, 0.0  ;;  %v4379_v21 = vadd.f32 %v4378_v47, %v4377_v2  ;;  %v4102_v24 = vmax.f32 %v2896_v62, 0.0 }
 0x124   : > { %v2907_v7 = vadd.f32 %v6368_v13, %v7399_v54  ;;  %v10523_v0 = vpack.c.bf16 %v10521_v60, %v10522_v44  ;;  %v10526_v18 = vpack.c.bf16 %v10524_v17, %v10525_v6  ;;  %v4931_v11 = vadd.f32 %v4930_v10, %v4929_v14 }
 0x125   : > { %6218 = vmatmul.mubr.msk.bf16.gmra.mrb[132].mxu0 %vm965_vm2, %v10520_v4  ;;  %v4104_v1 = vmax.f32 %v2904_v40, 0.0  ;;  %v4382_v43 = vsel %vm4334_vm3, %v3846_v5, 0.0  ;;  %v1875_v8 = vadd.f32 %v7399_v54, %v1874_v15  ;;  %v10527_v47 = vpack.c.bf16 %v7230_v33, %v7227_v20  ;;  %v6115_v4 = vpop.f32.mrb[28].mxu0  ;;  %v6371_v5 = vpop.f32.mrb[28].mxu1 }
 0x126   : > { %6474 = vmatmul.mubr.msk.bf16.gmra.mrb[132].mxu1 %vm965_vm2, %v10523_v0  ;;  %6221 = vmatprep.mubr.msk.bf16.mxu0 %vm965_vm2, %v10526_v18  ;;  %v4386_v13 = vsel %vm4334_vm3, %v3848_v9, 0.0  ;;  %v4381_v2 = vadd.f32 %v4380_v53, %v4379_v21  ;;  %v4934_v62 = vsel %vm4334_vm3, %v4102_v24, 0.0  ;;  %v2899_v39 = vadd.f32 %v7399_v54, %v2898_v3  ;;  %v1887_v15 = vpop.f32.mrb[29].mxu0  ;;  %v2911_v17 = vpop.f32.mrb[29].mxu1 }
 0x127   : > { %6477 = vmatprep.mubr.msk.bf16.mxu1 %vm965_vm2, %v10527_v47  ;;  %v4933_v60 = vadd.f32 %v4932_v55, %v4931_v11  ;;  %v3849_v10 = vmax.f32 %v1883_v56, 0.0  ;;  %v3847_v40 = vmax.f32 %v1875_v8, 0.0  ;;  %v1896_v14 = vadd.f32 %v6115_v4, %v7399_v54  ;;  %v6116_v9 = vpop.f32.mrb[30].mxu0  ;;  %v6372_v56 = vpop.f32.mrb[30].mxu1 }
 0x128   : > { %v4383_v44 = vadd.f32 %v4382_v43, %v4381_v2  ;;  %v4105_v0 = vmax.f32 %v2907_v7, 0.0  ;;  %v4103_v20 = vmax.f32 %v2899_v39, 0.0  ;;  %v2920_v33 = vadd.f32 %v6371_v5, %v7399_v54  ;;  %v1890_v24 = vpop.f32.mrb[31].mxu0  ;;  %v2914_v43 = vpop.f32.mrb[31].mxu1 }
 0x129   : > { %v4938_v53 = vsel %vm4334_vm3, %v4104_v1, 0.0  ;;  %v4935_v21 = vadd.f32 %v4934_v62, %v4933_v60  ;;  %v4384_v3 = vsel %vm4334_vm3, %v3847_v40, 0.0  ;;  %v1888_v55 = vadd.f32 %v7399_v54, %v1887_v15  ;;  %v10532_v15 = vld [vmem:[#allocation47_spill] sm:$0xff] }
 0x12a   : > { %v4385_v6 = vadd.f32 %v4384_v3, %v4383_v44  ;;  %v4936_v18 = vsel %vm4334_vm3, %v4103_v20, 0.0  ;;  %v3852_v11 = vmax.f32 %v1896_v14, 0.0  ;;  %v2912_v7 = vadd.f32 %v7399_v54, %v2911_v17  ;;  %v10529_v14 = vld [vmem:[#allocation46_spill] sm:$0xff] }
 0x12b   : > { %v4388_v8 = vsel %vm4334_vm3, %v3849_v10, 0.0  ;;  %v4937_v47 = vadd.f32 %v4936_v18, %v4935_v21  ;;  %v4108_v2 = vmax.f32 %v2920_v33, 0.0  ;;  %v3850_v39 = vmax.f32 %v1888_v55, 0.0  ;;  %v10531_v10 = vld [vmem:[#allocation48_spill] sm:$0xff]  ;;  %v6119_v21 = vpop.f32.mrb[32].mxu0 }
 0x12c   : > { %v10528_v1 = vpack.c.bf16 %v7236_v25, %v7233_v42  ;;  %v4940_v62 = vsel %vm4334_vm3, %v4105_v0, 0.0  ;;  %v4387_v4 = vadd.f32 %v4386_v13, %v4385_v6  ;;  %v4106_v60 = vmax.f32 %v2912_v7, 0.0  ;;  %v1903_v6 = vpop.f32.mrb[33].mxu0 }
 0x12d   : > { %v1899_v40 = vadd.f32 %v6116_v9, %v7399_v54  ;;  %v10530_v5 = vpack.c.bf16 %v7242_v22, %v10529_v14  ;;  %v10533_v44 = vpack.c.bf16 %v10531_v10, %v10532_v15  ;;  %v4939_v20 = vadd.f32 %v4938_v53, %v4937_v47 }
 0x12e   : > { %6222 = vmatmul.mubr.msk.bf16.gmra.mrb[136].mxu0 %vm965_vm2, %v10528_v1  ;;  %v4390_v25 = vsel %vm4334_vm3, %v3850_v39, 0.0  ;;  %v2923_v42 = vadd.f32 %v6372_v56, %v7399_v54  ;;  %v1891_v13 = vadd.f32 %v7399_v54, %v1890_v24  ;;  %v10534_v0 = vpack.c.bf16 %v7262_v26, %v7259_v28  ;;  %v6375_v24 = vpop.f32.mrb[32].mxu1 }
 0x12f   : > { %6478 = vmatmul.mubr.msk.bf16.gmra.mrb[136].mxu1 %vm965_vm2, %v10530_v5  ;;  %6225 = vmatprep.mubr.msk.bf16.mxu0 %vm965_vm2, %v10533_v44  ;;  %v4394_v22 = vsel %vm4334_vm3, %v3852_v11, 0.0  ;;  %v4389_v33 = vadd.f32 %v4388_v8, %v4387_v4  ;;  %v4942_v17 = vsel %vm4334_vm3, %v4106_v60, 0.0  ;;  %v2915_v9 = vadd.f32 %v7399_v54, %v2914_v43  ;;  %v2927_v11 = vpop.f32.mrb[33].mxu1  ;;  %v6120_v8 = vpop.f32.mrb[34].mxu0 }
 0x130   : > { %6481 = vmatprep.mubr.msk.bf16.mxu1 %vm965_vm2, %v10534_v0  ;;  %v4946_v53 = vsel %vm4334_vm3, %v4108_v2, 0.0  ;;  %v4941_v3 = vadd.f32 %v4940_v62, %v4939_v20  ;;  %v3851_v55 = vmax.f32 %v1891_v13, 0.0  ;;  %v1912_v56 = vadd.f32 %v6119_v21, %v7399_v54  ;;  %v6376_v2 = vpop.f32.mrb[34].mxu1  ;;  %v1906_v62 = vpop.f32.mrb[35].mxu0 }
 0x131   : > { %v4391_v18 = vadd.f32 %v4390_v25, %v4389_v33  ;;  %v3853_v26 = vmax.f32 %v1899_v40, 0.0  ;;  %v4107_v28 = vmax.f32 %v2915_v9, 0.0  ;;  %v2936_v7 = vadd.f32 %v6375_v24, %v7399_v54  ;;  %v2930_v40 = vpop.f32.mrb[35].mxu1 }
 0x132   : > { %v4943_v47 = vadd.f32 %v4942_v17, %v4941_v3  ;;  %v4109_v39 = vmax.f32 %v2923_v42, 0.0  ;;  %v4392_v43 = vsel %vm4334_vm3, %v3851_v55, 0.0  ;;  %v1904_v1 = vadd.f32 %v7399_v54, %v1903_v6 }
 0x133   : > { %v4393_v4 = vadd.f32 %v4392_v43, %v4391_v18  ;;  %v4944_v60 = vsel %vm4334_vm3, %v4107_v28, 0.0  ;;  %v3856_v14 = vmax.f32 %v1912_v56, 0.0  ;;  %v2928_v5 = vadd.f32 %v7399_v54, %v2927_v11  ;;  %v6379_v18 = vpop.f32.mrb[36].mxu1 }
 0x134   : > { %v4945_v10 = vadd.f32 %v4944_v60, %v4943_v47  ;;  %v4112_v15 = vmax.f32 %v2936_v7, 0.0  ;;  %v3854_v44 = vmax.f32 %v1904_v1, 0.0  ;;  %v1915_v20 = vadd.f32 %v6120_v8, %v7399_v54  ;;  %v2943_v11 = vpop.f32.mrb[37].mxu1 }
 0x135   : > { %v10535_v25 = vpack.c.bf16 %v7268_v34, %v7265_v31  ;;  %v4396_v42 = vsel %vm4334_vm3, %v3853_v26, 0.0  ;;  %v4395_v13 = vadd.f32 %v4394_v22, %v4393_v4  ;;  %v4110_v0 = vmax.f32 %v2928_v5, 0.0 }
 0x136   : > { %v2939_v33 = vadd.f32 %v6376_v2, %v7399_v54  ;;  %v10536_v17 = vpack.c.bf16 %v7274_v36, %v7271_v32  ;;  %v10537_v9 = vpack.c.bf16 %v7280_v38, %v7277_v30  ;;  %v4948_v31 = vsel %vm4334_vm3, %v4109_v39, 0.0  ;;  %v6123_v30 = vpop.f32.mrb[36].mxu0  ;;  %v6380_v2 = vpop.f32.mrb[38].mxu1 }
 0x137   : > { %6226 = vmatmul.mubr.msk.bf16.gmra.mrb[140].mxu0 %vm965_vm2, %v10535_v25  ;;  %v4947_v34 = vadd.f32 %v4946_v53, %v4945_v10  ;;  %v3857_v21 = vmax.f32 %v1915_v20, 0.0  ;;  %v1907_v3 = vadd.f32 %v7399_v54, %v1906_v62  ;;  %v10538_v22 = vpack.c.bf16 %v7294_v35, %v7291_v37  ;;  %v1919_v26 = vpop.f32.mrb[37].mxu0 }
 0x138   : > { %6482 = vmatmul.mubr.msk.bf16.gmra.mrb[140].mxu1 %vm965_vm2, %v10536_v17  ;;  %6229 = vmatprep.mubr.msk.bf16.mxu0 %vm965_vm2, %v10537_v9  ;;  %v4397_v55 = vadd.f32 %v4396_v42, %v4395_v13  ;;  %v4407_v32 = vsel %vm4334_vm3, %v3856_v14, 0.0  ;;  %v4113_v36 = vmax.f32 %v2939_v33, 0.0  ;;  %v2931_v56 = vadd.f32 %v7399_v54, %v2930_v40  ;;  %v6124_v8 = vpop.f32.mrb[38].mxu0  ;;  %v2946_v40 = vpop.f32.mrb[39].mxu1  ;;  %v10540_v17 = vld [vmem:[#allocation49_spill] sm:$0xff] }
 0x139   : > { %6485 = vmatprep.mubr.msk.bf16.mxu1 %vm965_vm2, %v10538_v22  ;;  %v4949_v38 = vadd.f32 %v4948_v31, %v4947_v34  ;;  %v4959_v24 = vsel %vm4334_vm3, %v4112_v15, 0.0  ;;  %v4404_v53 = vsel %vm4334_vm3, %v3854_v44, 0.0  ;;  %v3855_v6 = vmax.f32 %v1907_v3, 0.0  ;;  %v1922_v62 = vpop.f32.mrb[39].mxu0 }
 0x13a   : > { %v4398_v28 = vrot.slane %v4397_v55, 4  ;;  %v4956_v35 = vsel %vm4334_vm3, %v4110_v0, 0.0  ;;  %v4111_v37 = vmax.f32 %v2931_v56, 0.0  ;;  %v1928_v7 = vadd.f32 %v6123_v30, %v7399_v54 }
 0x13b   : > { %v4950_v47 = vrot.slane %v4949_v38, 4  ;;  %v4409_v39 = vsel %vm4334_vm3, %v3857_v21, 0.0  ;;  %v4405_v43 = vsel %vm4334_vm3, %v3855_v6, 0.0  ;;  %v1920_v1 = vadd.f32 %v7399_v54, %v1919_v26  ;;  %v7907_v6 = vld [vmem:[%s6666_s22 + $0x588] sm:$0xff] }
 0x13c   : > { %v4399_v4 = vadd.f32 %v4398_v28, %v4397_v55  ;;  %v4961_v60 = vsel %vm4334_vm3, %v4113_v36, 0.0  ;;  %v4406_v14 = vadd.f32 %v4405_v43, %v4404_v53  ;;  %v4957_v5 = vsel %vm4334_vm3, %v4111_v37, 0.0  ;;  %v7904_v53 = vld [vmem:[%s6666_s22 + $0x580] sm:$0xff] }
 0x13d   : > { %v4951_v10 = vadd.f32 %v4950_v47, %v4949_v38  ;;  %v4958_v15 = vadd.f32 %v4957_v5, %v4956_v35  ;;  %v2952_v44 = vadd.f32 %v6379_v18, %v7399_v54  ;;  %v3858_v20 = vmax.f32 %v1920_v1, 0.0  ;;  %v6383_v38 = vpop.f32.mrb[40].mxu1  ;;  %v7913_v43 = vld [vmem:[%s10274_s2] ss:$0 sm:$0xff] }
 0x13e   : > { %v10539_v25 = vpack.c.bf16 %v7300_v46, %v7297_v27  ;;  %v4400_v42 = vrot.slane %v4399_v4, 2  ;;  %v4408_v13 = vadd.f32 %v4407_v32, %v4406_v14  ;;  %v3860_v0 = vmax.f32 %v1928_v7, 0.0  ;;  %v2959_v28 = vpop.f32.mrb[41].mxu1 }
 0x13f   : > { %v2944_v33 = vadd.f32 %v7399_v54, %v2943_v11  ;;  %v10541_v9 = vpack.c.bf16 %v7306_v48, %v10540_v17  ;;  %v10542_v31 = vpack.c.bf16 %v7320_v51, %v7317_v50  ;;  %v4952_v34 = vrot.slane %v4951_v10, 2  ;;  %v6127_v51 = vpop.f32.mrb[40].mxu0  ;;  %v6384_v47 = vpop.f32.mrb[42].mxu1  ;;  %v10548_v17 = vld [vmem:[#allocation52_spill] sm:$0xff] }
 0x140   : > { %6230 = vmatmul.mubr.msk.bf16.gmra.mrb[144].mxu0 %vm965_vm2, %v10539_v25  ;;  %v4960_v27 = vadd.f32 %v4959_v24, %v4958_v15  ;;  %v4411_v46 = vsel %vm4334_vm3, %v3858_v20, 0.0  ;;  %v1931_v21 = vadd.f32 %v6124_v8, %v7399_v54  ;;  %v10543_v3 = vpack.c.bf16 %v7326_v58, %v7323_v41  ;;  %v1935_v24 = vpop.f32.mrb[41].mxu0  ;;  %v10544_v15 = vld [vmem:[#allocation51_spill] sm:$0xff] }
 0x141   : > { %6486 = vmatmul.mubr.msk.bf16.gmra.mrb[144].mxu1 %vm965_vm2, %v10541_v9  ;;  %6233 = vmatprep.mubr.msk.bf16.mxu0 %vm965_vm2, %v10542_v31  ;;  %v4401_v48 = vadd.f32 %v4400_v42, %v4399_v4  ;;  %v4410_v22 = vadd.f32 %v4409_v39, %v4408_v13  ;;  %v4114_v55 = vmax.f32 %v2944_v33, 0.0  ;;  %v2955_v50 = vadd.f32 %v6380_v2, %v7399_v54  ;;  %v6128_v35 = vpop.f32.mrb[42].mxu0  ;;  %v10547_v33 = vld [vmem:[#allocation53_spill] sm:$0xff] }
 0x142   : > { %6489 = vmatprep.mubr.msk.bf16.mxu1 %vm965_vm2, %v10543_v3  ;;  %v4953_v32 = vadd.f32 %v4952_v34, %v4951_v10  ;;  %v4116_v36 = vmax.f32 %v2952_v44, 0.0  ;;  %v4962_v56 = vadd.f32 %v4961_v60, %v4960_v27  ;;  %v1923_v30 = vadd.f32 %v7399_v54, %v1922_v62  ;;  %v1938_v39 = vpop.f32.mrb[43].mxu0  ;;  %v2962_v62 = vpop.f32.mrb[43].mxu1  ;;  %v10545_v44 = vld [vmem:[#allocation50_spill] sm:$0xff] }
 0x143   : > { %v4402_v41 = vrot.slane %v4401_v48, 1  ;;  %v4412_v58 = vadd.f32 %v4411_v46, %v4410_v22  ;;  %v4963_v18 = vsel %vm4334_vm3, %v4114_v55, 0.0  ;;  %v3861_v26 = vmax.f32 %v1931_v21, 0.0  ;;  %v10551_v21 = vld [vmem:[#allocation54_spill] sm:$0xff] }
 0x144   : > { %v4954_v37 = vrot.slane %v4953_v32, 1  ;;  %v4964_v7 = vadd.f32 %v4963_v18, %v4962_v56  ;;  %v4117_v11 = vmax.f32 %v2955_v50, 0.0  ;;  %v3859_v8 = vmax.f32 %v1923_v30, 0.0  ;;  %v6387_v56 = vpop.f32.mrb[44].mxu1 }
 0x145   : > { %v4403_v54 = vadd.f32 %v4402_v41, %v4401_v48  ;;  %v2947_v1 = vadd.f32 %v7913_v43, %v2946_v40  ;;  %v1944_v2 = vadd.f32 %v7913_v43, %v6127_v51  ;;  %v775_v4 = vpack.c.bf16 %v7907_v6, %v7904_v53 }
 0x146   : > { %v4415_v60 = vsel %vm4334_vm3, %v3860_v0, 0.0  ;;  %v4967_v14 = vsel %vm4334_vm3, %v4116_v36, 0.0  ;;  %v4413_v5 = vsel %vm4334_vm3, %v3859_v8, 0.0  ;;  %v1936_v10 = vadd.f32 %v7913_v43, %v1935_v24 }
 0x147   : > { %v10546_v20 = vpack.c.bf16 %v10544_v15, %v10545_v44  ;;  %v4955_v40 = vadd.f32 %v4954_v37, %v4953_v32  ;;  %v4417_v25 = vsel %vm4334_vm3, %v3861_v26, 0.0  ;;  %v4414_v42 = vadd.f32 %v4413_v5, %v4412_v58  ;;  %v2975_v58 = vpop.f32.mrb[45].mxu1  ;;  %v10553_v15 = vld [vmem:[#allocation56_spill] sm:$0xff] }
 0x148   : > { %v4115_v13 = vmax.f32 %v2947_v1, 0.0  ;;  %v10549_v9 = vpack.c.bf16 %v10547_v33, %v10548_v17  ;;  %v10550_v0 = vpack.c.bf16 %v7352_v59, %v7349_v61  ;;  %v4969_v31 = vsel %vm4334_vm3, %v4117_v11, 0.0  ;;  %v6131_v61 = vpop.f32.mrb[44].mxu0  ;;  %v6388_v11 = vpop.f32.mrb[46].mxu1  ;;  %v10559_v17 = vld [vmem:[#allocation60_spill] sm:$0xff] }
 0x149   : > { %6234 = vmatmul.mubr.msk.bf16.gmra.mrb[148].mxu0 %vm965_vm2, %v10546_v20  ;;  %v2968_v34 = vadd.f32 %v7913_v43, %v6383_v38  ;;  %v3862_v27 = vmax.f32 %v1936_v10, 0.0  ;;  %v2960_v46 = vadd.f32 %v7913_v43, %v2959_v28  ;;  %v10552_v3 = vpack.c.bf16 %v7358_v16, %v10551_v21  ;;  %v1951_v30 = vpop.f32.mrb[45].mxu0  ;;  %v10562_v21 = vld [vmem:[#allocation62_spill] sm:$0xff] }
 0x14a   : > { %6490 = vmatmul.mubr.msk.bf16.gmra.mrb[148].mxu1 %vm965_vm2, %v10549_v9  ;;  %6237 = vmatprep.mubr.msk.bf16.mxu0 %vm965_vm2, %v10550_v0  ;;  %v7943_v48 = vmul.f32 0.00390625, %v4403_v54  ;;  %v4416_v22 = vadd.f32 %v4415_v60, %v4414_v42  ;;  %v4965_v55 = vsel %vm4334_vm3, %v4115_v13, 0.0  ;;  %v3864_v59 = vmax.f32 %v1944_v2, 0.0  ;;  %v6132_v18 = vpop.f32.mrb[46].mxu0  ;;  %v2978_v60 = vpop.f32.mrb[47].mxu1  ;;  %v10556_v42 = vld [vmem:[#allocation58_spill] sm:$0xff] }
 0x14b   : > { %6493 = vmatprep.mubr.msk.bf16.mxu1 %vm965_vm2, %v10552_v3  ;;  %v4966_v50 = vadd.f32 %v4965_v55, %v4964_v7  ;;  %v4419_v51 = vsel %vm4334_vm3, %v3862_v27, 0.0  ;;  %v4118_v32 = vmax.f32 %v2960_v46, 0.0  ;;  %v1947_v36 = vadd.f32 %v7913_v43, %v6128_v35  ;;  %v1954_v8 = vpop.f32.mrb[47].mxu0  ;;  %v10557_v13 = vld [vmem:[#allocation57_spill] sm:$0xff]  ;;  %v10560_v9 = vld [vmem:[#allocation59_spill] sm:$0xff] }
 0x14c   : > { %v7948_v38 = vmul.f32 0.00390625, %v4955_v40  ;;  %v4418_v16 = vadd.f32 %v4417_v25, %v4416_v22  ;;  %v2971_v24 = vadd.f32 %v7913_v43, %v6384_v47  ;;  %v1939_v41 = vadd.f32 %v7913_v43, %v1938_v39  ;;  %v10563_v3 = vld [vmem:[#allocation61_spill] sm:$0xff] }
 0x14d   : > { %v4968_v26 = vadd.f32 %v4967_v14, %v4966_v50  ;;  %v4120_v28 = vmax.f32 %v2968_v34, 0.0  ;;  %v2963_v37 = vadd.f32 %v7913_v43, %v2962_v62  ;;  %v1960_v7 = vadd.f32 %v7913_v43, %v6131_v61  ;;  %v10554_v14 = vld [vmem:[#allocation55_spill] sm:$0xff] }
 0x14e   : > { %v4423_v35 = vsel %vm4334_vm3, %v3864_v59, 0.0  ;;  %v4420_v54 = vadd.f32 %v4419_v51, %v4418_v16  ;;  %v4971_v1 = vsel %vm4334_vm3, %v4118_v32, 0.0  ;;  %v3863_v2 = vmax.f32 %v1939_v41, 0.0  ;;  %v6135_v51 = vpop.f32.mrb[48].mxu0  ;;  %v6391_v16 = vpop.f32.mrb[48].mxu1 }
 0x14f   : > { %v4970_v47 = vadd.f32 %v4969_v31, %v4968_v26  ;;  %v3865_v5 = vmax.f32 %v1947_v36, 0.0  ;;  %v4121_v39 = vmax.f32 %v2971_v24, 0.0  ;;  %v4119_v10 = vmax.f32 %v2963_v37, 0.0  ;;  %v1967_v24 = vpop.f32.mrb[49].mxu0  ;;  %v2991_v37 = vpop.f32.mrb[49].mxu1 }
 0x150   : > { %v10555_v44 = vpack.c.bf16 %v10553_v15, %v10554_v14  ;;  %v4421_v62 = vsel %vm4334_vm3, %v3863_v2, 0.0  ;;  %v2984_v20 = vadd.f32 %v7913_v43, %v6387_v56  ;;  %v1952_v40 = vadd.f32 %v7913_v43, %v1951_v30  ;;  %v6392_v2 = vpop.f32.mrb[50].mxu1 }
 0x151   : > { %v2976_v25 = vadd.f32 %v7913_v43, %v2975_v58  ;;  %v10558_v33 = vpack.c.bf16 %v10556_v42, %v10557_v13  ;;  %v10561_v0 = vpack.c.bf16 %v10559_v17, %v10560_v9  ;;  %v4972_v31 = vadd.f32 %v4971_v1, %v4970_v47  ;;  %v2994_v15 = vpop.f32.mrb[51].mxu1  ;;  %v10569_v9 = vld [vmem:[#allocation65_spill] sm:$0xff] }
 0x152   : > { %6238 = vmatmul.mubr.msk.bf16.gmra.mrb[152].mxu0 %vm965_vm2, %v10555_v44  ;;  %v4422_v34 = vadd.f32 %v4421_v62, %v4420_v54  ;;  %v4973_v27 = vsel %vm4334_vm3, %v4119_v10, 0.0  ;;  %v3868_v46 = vmax.f32 %v1960_v7, 0.0  ;;  %v10564_v22 = vpack.c.bf16 %v10562_v21, %v10563_v3  ;;  %v6136_v7 = vpop.f32.mrb[50].mxu0 }
 0x153   : > { %6494 = vmatmul.mubr.msk.bf16.gmra.mrb[152].mxu1 %vm965_vm2, %v10558_v33  ;;  %6241 = vmatprep.mubr.msk.bf16.mxu0 %vm965_vm2, %v10561_v0  ;;  %v4975_v55 = vsel %vm4334_vm3, %v4120_v28, 0.0  ;;  %v3866_v59 = vmax.f32 %v1952_v40, 0.0  ;;  %v4122_v61 = vmax.f32 %v2976_v25, 0.0  ;;  %v1963_v50 = vadd.f32 %v7913_v43, %v6132_v18  ;;  %v10566_v40 = vld [vmem:[#allocation63_spill] sm:$0xff] }
 0x154   : > { %6497 = vmatprep.mubr.msk.bf16.mxu1 %vm965_vm2, %v10564_v22  ;;  %v4424_v32 = vadd.f32 %v4423_v35, %v4422_v34  ;;  %v4974_v36 = vadd.f32 %v4973_v27, %v4972_v31  ;;  %v2987_v56 = vadd.f32 %v7913_v43, %v6388_v11  ;;  %v1955_v30 = vadd.f32 %v7913_v43, %v1954_v8  ;;  %v1970_v11 = vpop.f32.mrb[51].mxu0  ;;  %v10571_v31 = vld [vmem:[#allocation68_spill] sm:$0xff]  ;;  %v10572_v34 = vld [vmem:[#allocation67_spill] sm:$0xff] }
 0x155   : > { %v4425_v41 = vsel %vm4334_vm3, %v3865_v5, 0.0  ;;  %v4977_v58 = vsel %vm4334_vm3, %v4121_v39, 0.0  ;;  %v4124_v26 = vmax.f32 %v2984_v20, 0.0  ;;  %v4427_v28 = vsel %vm4334_vm3, %v3866_v59, 0.0  ;;  %v10565_v20 = vld [vmem:[#allocation64_spill] sm:$0xff]  ;;  %v10575_v59 = vld [vmem:[#allocation69_spill] sm:$0xff] }
 0x156   : > { %v4976_v54 = vadd.f32 %v4975_v55, %v4974_v36  ;;  %v4431_v18 = vsel %vm4334_vm3, %v3868_v46, 0.0  ;;  %v4426_v35 = vadd.f32 %v4425_v41, %v4424_v32  ;;  %v3867_v1 = vmax.f32 %v1955_v30, 0.0  ;;  %v10574_v55 = vld [vmem:[#allocation70_spill] sm:$0xff] }
 0x157   : > { %v4979_v8 = vsel %vm4334_vm3, %v4122_v61, 0.0  ;;  %v3869_v47 = vmax.f32 %v1963_v50, 0.0  ;;  %v4125_v10 = vmax.f32 %v2987_v56, 0.0  ;;  %v2979_v5 = vadd.f32 %v7913_v43, %v2978_v60  ;;  %v10568_v60 = vld [vmem:[#allocation66_spill] sm:$0xff]  ;;  %v6139_v56 = vpop.f32.mrb[52].mxu0 }
 0x158   : > { %v4428_v39 = vadd.f32 %v4427_v28, %v4426_v35  ;;  %v4978_v14 = vadd.f32 %v4977_v58, %v4976_v54  ;;  %v4429_v44 = vsel %vm4334_vm3, %v3867_v1, 0.0  ;;  %v1976_v62 = vadd.f32 %v7913_v43, %v6135_v51  ;;  %v6395_v58 = vpop.f32.mrb[52].mxu1 }
 0x159   : > { %v10567_v25 = vpack.c.bf16 %v10565_v20, %v10566_v40  ;;  %v4983_v42 = vsel %vm4334_vm3, %v4124_v26, 0.0  ;;  %v4123_v13 = vmax.f32 %v2979_v5, 0.0  ;;  %v3000_v33 = vadd.f32 %v7913_v43, %v6391_v16  ;;  %v1983_v26 = vpop.f32.mrb[53].mxu0  ;;  %v3007_v35 = vpop.f32.mrb[53].mxu1 }
 0x15a   : > { %v1968_v17 = vadd.f32 %v7913_v43, %v1967_v24  ;;  %v10570_v0 = vpack.c.bf16 %v10568_v60, %v10569_v9  ;;  %v10573_v27 = vpack.c.bf16 %v10571_v31, %v10572_v34  ;;  %v4980_v46 = vadd.f32 %v4979_v8, %v4978_v14  ;;  %v6140_v1 = vpop.f32.mrb[54].mxu0  ;;  %v10580_v31 = vld [vmem:[#allocation74_spill] sm:$0xff]  ;;  %v10581_v34 = vld [vmem:[#allocation73_spill] sm:$0xff] }
 0x15b   : > { %6242 = vmatmul.mubr.msk.bf16.gmra.mrb[156].mxu0 %vm965_vm2, %v10567_v25  ;;  %v4430_v21 = vadd.f32 %v4429_v44, %v4428_v39  ;;  %v2992_v3 = vadd.f32 %v7913_v43, %v2991_v37  ;;  %v1979_v22 = vadd.f32 %v7913_v43, %v6136_v7  ;;  %v10576_v61 = vpack.c.bf16 %v10574_v55, %v10575_v59  ;;  %v1986_v39 = vpop.f32.mrb[55].mxu0 }
 0x15c   : > { %6498 = vmatmul.mubr.msk.bf16.gmra.mrb[156].mxu1 %vm965_vm2, %v10570_v0  ;;  %6245 = vmatprep.mubr.msk.bf16.mxu0 %vm965_vm2, %v10573_v27  ;;  %v4433_v50 = vsel %vm4334_vm3, %v3869_v47, 0.0  ;;  %v4985_v51 = vsel %vm4334_vm3, %v4125_v10, 0.0  ;;  %v4981_v32 = vsel %vm4334_vm3, %v4123_v13, 0.0  ;;  %v3870_v36 = vmax.f32 %v1968_v17, 0.0  ;;  %v10577_v13 = vld [vmem:[#allocation72_spill] sm:$0xff]  ;;  %v10578_v17 = vld [vmem:[#allocation71_spill] sm:$0xff] }
 0x15d   : > { %6501 = vmatprep.mubr.msk.bf16.mxu1 %vm965_vm2, %v10576_v61  ;;  %v4432_v30 = vadd.f32 %v4431_v18, %v4430_v21  ;;  %v4982_v16 = vadd.f32 %v4981_v32, %v4980_v46  ;;  %v3872_v24 = vmax.f32 %v1976_v62, 0.0  ;;  %v4126_v41 = vmax.f32 %v2992_v3, 0.0  ;;  %v6396_v18 = vpop.f32.mrb[54].mxu1 }
 0x15e   : > { %v4435_v28 = vsel %vm4334_vm3, %v3870_v36, 0.0  ;;  %v3003_v37 = vadd.f32 %v7913_v43, %v6392_v2  ;;  %v1971_v7 = vadd.f32 %v7913_v43, %v1970_v11  ;;  %v2995_v54 = vadd.f32 %v7913_v43, %v2994_v15  ;;  %v3010_v40 = vpop.f32.mrb[55].mxu1 }
 0x15f   : > { %v4984_v8 = vadd.f32 %v4983_v42, %v4982_v16  ;;  %v4128_v47 = vmax.f32 %v3000_v33, 0.0  ;;  %v4434_v10 = vadd.f32 %v4433_v50, %v4432_v30  ;;  %v3873_v5 = vmax.f32 %v1979_v22, 0.0  ;;  %v6399_v16 = vpop.f32.mrb[56].mxu1 }
 0x160   : > { %v4987_v14 = vsel %vm4334_vm3, %v4126_v41, 0.0  ;;  %v3871_v44 = vmax.f32 %v1971_v7, 0.0  ;;  %v4127_v62 = vmax.f32 %v2995_v54, 0.0  ;;  %v1992_v20 = vadd.f32 %v7913_v43, %v6139_v56 }
 0x161   : > { %v4436_v2 = vadd.f32 %v4435_v28, %v4434_v10  ;;  %v4986_v25 = vadd.f32 %v4985_v51, %v4984_v8  ;;  %v4129_v11 = vmax.f32 %v3003_v37, 0.0  ;;  %v1984_v15 = vadd.f32 %v7913_v43, %v1983_v26  ;;  %v3023_v26 = vpop.f32.mrb[57].mxu1 }
 0x162   : > { %v10579_v42 = vpack.c.bf16 %v10577_v13, %v10578_v17  ;;  %v4439_v33 = vsel %vm4334_vm3, %v3872_v24, 0.0  ;;  %v4437_v60 = vsel %vm4334_vm3, %v3871_v44, 0.0  ;;  %v4989_v9 = vsel %vm4334_vm3, %v4127_v62, 0.0 }
 0x163   : > { %v3016_v0 = vadd.f32 %v7913_v43, %v6395_v58  ;;  %v10582_v27 = vpack.c.bf16 %v10580_v31, %v10581_v34  ;;  %v10583_v46 = vpack.c.bf16 %v7491_v63, %v7488_v23  ;;  %v4991_v21 = vsel %vm4334_vm3, %v4128_v47, 0.0  ;;  %v6143_v63 = vpop.f32.mrb[56].mxu0 }
 0x164   : > { %6246 = vmatmul.mubr.msk.bf16.gmra.mrb[160].mxu0 %vm965_vm2, %v10579_v42  ;;  %v4988_v3 = vadd.f32 %v4987_v14, %v4986_v25  ;;  %v4438_v22 = vadd.f32 %v4437_v60, %v4436_v2  ;;  %v3874_v55 = vmax.f32 %v1984_v15, 0.0  ;;  %v10584_v59 = vpack.c.bf16 %v7503_v19, %v7494_v45  ;;  %v1999_v24 = vpop.f32.mrb[57].mxu0  ;;  %v10585_v2 = vld [vmem:[#allocation76_spill] sm:$0xff]  ;;  %v10586_v25 = vld [vmem:[#allocation75_spill] sm:$0xff]  ;;  %v10588_v42 = vld [vmem:[#allocation78_spill] sm:$0xff] }
 0x165   : > { %6502 = vmatmul.mubr.msk.bf16.gmra.mrb[160].mxu1 %vm965_vm2, %v10582_v27  ;;  %6249 = vmatprep.mubr.msk.bf16.mxu0 %vm965_vm2, %v10583_v46  ;;  %v4441_v61 = vsel %vm4334_vm3, %v3873_v5, 0.0  ;;  %v3876_v50 = vmax.f32 %v1992_v20, 0.0  ;;  %v3008_v51 = vadd.f32 %v7913_v43, %v3007_v35  ;;  %v1995_v32 = vadd.f32 %v7913_v43, %v6140_v1  ;;  %v6144_v28 = vpop.f32.mrb[58].mxu0  ;;  %v6400_v1 = vpop.f32.mrb[58].mxu1 }
 0x166   : > { %6505 = vmatprep.mubr.msk.bf16.mxu1 %vm965_vm2, %v10584_v59  ;;  %v4993_v23 = vsel %vm4334_vm3, %v4129_v11, 0.0  ;;  %v4440_v36 = vadd.f32 %v4439_v33, %v4438_v22  ;;  %v4990_v56 = vadd.f32 %v4989_v9, %v4988_v3  ;;  %v3019_v30 = vadd.f32 %v7913_v43, %v6396_v18  ;;  %v2002_v8 = vpop.f32.mrb[59].mxu0  ;;  %v3026_v14 = vpop.f32.mrb[59].mxu1  ;;  %v10589_v33 = vld [vmem:[#allocation77_spill] sm:$0xff]  ;;  %v10591_v9 = vld [vmem:[#allocation80_spill] sm:$0xff]  ;;  %v10594_v3 = vld [vmem:[#allocation82_spill] sm:$0xff] }
 0x167   : > { %v4132_v41 = vmax.f32 %v3016_v0, 0.0  ;;  %v4443_v19 = vsel %vm4334_vm3, %v3874_v55, 0.0  ;;  %v4130_v45 = vmax.f32 %v3008_v51, 0.0  ;;  %v1987_v58 = vadd.f32 %v7913_v43, %v1986_v39  ;;  %v10592_v0 = vld [vmem:[#allocation79_spill] sm:$0xff]  ;;  %v10595_v22 = vld [vmem:[#allocation81_spill] sm:$0xff] }
 0x168   : > { %v4992_v37 = vadd.f32 %v4991_v21, %v4990_v56  ;;  %v4442_v7 = vadd.f32 %v4441_v61, %v4440_v36  ;;  %v3011_v54 = vadd.f32 %v7913_v43, %v3010_v40  ;;  %v2008_v35 = vadd.f32 %v7913_v43, %v6143_v63 }
 0x169   : > { %v4447_v47 = vsel %vm4334_vm3, %v3876_v50, 0.0  ;;  %v4995_v10 = vsel %vm4334_vm3, %v4130_v45, 0.0  ;;  %v3877_v5 = vmax.f32 %v1995_v32, 0.0  ;;  %v3875_v18 = vmax.f32 %v1987_v58, 0.0  ;;  %v6147_v32 = vpop.f32.mrb[60].mxu0 }
 0x16a   : > { %v4444_v44 = vadd.f32 %v4443_v19, %v4442_v7  ;;  %v4994_v62 = vadd.f32 %v4993_v23, %v4992_v37  ;;  %v4133_v39 = vmax.f32 %v3019_v30, 0.0  ;;  %v4131_v20 = vmax.f32 %v3011_v54, 0.0  ;;  %v6403_v30 = vpop.f32.mrb[60].mxu1 }
 0x16b   : > { %v10587_v11 = vpack.c.bf16 %v10585_v2, %v10586_v25  ;;  %v4445_v40 = vsel %vm4334_vm3, %v3875_v18, 0.0  ;;  %v3032_v15 = vadd.f32 %v7913_v43, %v6399_v16  ;;  %v2000_v13 = vadd.f32 %v7913_v43, %v1999_v24  ;;  %v2015_v16 = vpop.f32.mrb[61].mxu0  ;;  %v3039_v58 = vpop.f32.mrb[61].mxu1  ;;  %v10597_v2 = vld [vmem:[#allocation84_spill] sm:$0xff]  ;;  %v10598_v25 = vld [vmem:[#allocation83_spill] sm:$0xff] }
 0x16c   : > { %v3024_v17 = vadd.f32 %v7913_v43, %v3023_v26  ;;  %v10590_v60 = vpack.c.bf16 %v10588_v42, %v10589_v33  ;;  %v10593_v31 = vpack.c.bf16 %v10591_v9, %v10592_v0  ;;  %v4996_v34 = vadd.f32 %v4995_v10, %v4994_v62  ;;  %v6148_v26 = vpop.f32.mrb[62].mxu0  ;;  %v10601_v42 = vld [vmem:[#allocation85_spill] sm:$0xff]  ;;  %v10604_v9 = vld [vmem:[#allocation3_spill] sm:$0xff] }
 0x16d   : > { %6250 = vmatmul.mubr.msk.bf16.gmra.mrb[164].mxu0 %vm965_vm2, %v10587_v11  ;;  %v4446_v27 = vadd.f32 %v4445_v40, %v4444_v44  ;;  %v4997_v46 = vsel %vm4334_vm3, %v4131_v20, 0.0  ;;  %v3880_v21 = vmax.f32 %v2008_v35, 0.0  ;;  %v10596_v55 = vpack.c.bf16 %v10594_v3, %v10595_v22  ;;  %v6404_v35 = vpop.f32.mrb[62].mxu1 }
 0x16e   : > { %6506 = vmatmul.mubr.msk.bf16.gmra.mrb[164].mxu1 %vm965_vm2, %v10590_v60  ;;  %6253 = vmatprep.mubr.msk.bf16.mxu0 %vm965_vm2, %v10593_v31  ;;  %v4999_v59 = vsel %vm4334_vm3, %v4132_v41, 0.0  ;;  %v3878_v61 = vmax.f32 %v2000_v13, 0.0  ;;  %v4134_v50 = vmax.f32 %v3024_v17, 0.0  ;;  %v2011_v51 = vadd.f32 %v7913_v43, %v6144_v28  ;;  %v3042_v18 = vpop.f32.mrb[63].mxu1  ;;  %v10603_v60 = vld [vmem:[#allocation2_spill] sm:$0xff] }
 0x16f   : > { %6509 = vmatprep.mubr.msk.bf16.mxu1 %vm965_vm2, %v10596_v55  ;;  %v4448_v63 = vadd.f32 %v4447_v47, %v4446_v27  ;;  %v4998_v23 = vadd.f32 %v4997_v46, %v4996_v34  ;;  %v3035_v36 = vadd.f32 %v7913_v43, %v6400_v1  ;;  %v2003_v56 = vadd.f32 %v7913_v43, %v2002_v8  ;;  %v2018_v1 = vpop.f32.mrb[63].mxu0 }
 0x170   : > { %v4449_v24 = vsel %vm4334_vm3, %v3877_v5, 0.0  ;;  %v5001_v19 = vsel %vm4334_vm3, %v4133_v39, 0.0  ;;  %v4136_v45 = vmax.f32 %v3032_v15, 0.0  ;;  %v4451_v41 = vsel %vm4334_vm3, %v3878_v61, 0.0  ;;  %v6151_v61 = vpop.f32.mrb[64].mxu0 }
 0x171   : > { %v5000_v37 = vadd.f32 %v4999_v59, %v4998_v23  ;;  %v4455_v28 = vsel %vm4334_vm3, %v3880_v21, 0.0  ;;  %v4450_v7 = vadd.f32 %v4449_v24, %v4448_v63  ;;  %v3879_v54 = vmax.f32 %v2003_v56, 0.0  ;;  %v6407_v23 = vpop.f32.mrb[64].mxu1 }
 0x172   : > { %v5003_v8 = vsel %vm4334_vm3, %v4134_v50, 0.0  ;;  %v3881_v47 = vmax.f32 %v2011_v51, 0.0  ;;  %v4137_v10 = vmax.f32 %v3035_v36, 0.0  ;;  %v3027_v5 = vadd.f32 %v7913_v43, %v3026_v14  ;;  %v10600_v14 = vld [vmem:[#allocation86_spill] sm:$0xff]  ;;  %v2031_v36 = vpop.f32.mrb[65].mxu0 }
 0x173   : > { %v4452_v44 = vadd.f32 %v4451_v41, %v4450_v7  ;;  %v5002_v62 = vadd.f32 %v5001_v19, %v5000_v37  ;;  %v4453_v39 = vsel %vm4334_vm3, %v3879_v54, 0.0  ;;  %v2024_v20 = vadd.f32 %v7913_v43, %v6147_v32  ;;  %v6152_v24 = vpop.f32.mrb[66].mxu0 }
 0x174   : > { %v10599_v11 = vpack.c.bf16 %v10597_v2, %v10598_v25  ;;  %v5007_v40 = vsel %vm4334_vm3, %v4136_v45, 0.0  ;;  %v4135_v15 = vmax.f32 %v3027_v5, 0.0  ;;  %v3048_v13 = vadd.f32 %v7913_v43, %v6403_v30  ;;  %v2034_v37 = vpop.f32.mrb[67].mxu0  ;;  %v10608_v2 = vld [vmem:[#allocation5_spill] sm:$0xff] }
 0x175   : > { %v2016_v17 = vadd.f32 %v7913_v43, %v2015_v16  ;;  %v10602_v33 = vpack.c.bf16 %v10600_v14, %v10601_v42  ;;  %v10605_v0 = vpack.c.bf16 %v10603_v60, %v10604_v9  ;;  %v5004_v31 = vadd.f32 %v5003_v8, %v5002_v62  ;;  %v3055_v16 = vpop.f32.mrb[65].mxu1 }
 0x176   : > { %6254 = vmatmul.mubr.msk.bf16.gmra.mrb[168].mxu0 %vm965_vm2, %v10599_v11  ;;  %v4454_v34 = vadd.f32 %v4453_v39, %v4452_v44  ;;  %v3040_v27 = vadd.f32 %v7913_v43, %v3039_v58  ;;  %v2027_v46 = vadd.f32 %v7913_v43, %v6148_v26  ;;  %v10606_v21 = vpack.c.bf16 %v7634_v12, %v7628_v57  ;;  %v6408_v26 = vpop.f32.mrb[66].mxu1 }
 0x177   : > { %6510 = vmatmul.mubr.msk.bf16.gmra.mrb[168].mxu1 %vm965_vm2, %v10602_v33  ;;  %6257 = vmatprep.mubr.msk.bf16.mxu0 %vm965_vm2, %v10605_v0  ;;  %v4457_v3 = vsel %vm4334_vm3, %v3881_v47, 0.0  ;;  %v5009_v22 = vsel %vm4334_vm3, %v4137_v10, 0.0  ;;  %v5005_v55 = vsel %vm4334_vm3, %v4135_v15, 0.0  ;;  %v3882_v59 = vmax.f32 %v2016_v17, 0.0  ;;  %v3058_v47 = vpop.f32.mrb[67].mxu1 }
 0x178   : > { %6513 = vmatprep.mubr.msk.bf16.mxu1 %vm965_vm2, %v10606_v21  ;;  %v4456_v50 = vadd.f32 %v4455_v28, %v4454_v34  ;;  %v5006_v51 = vadd.f32 %v5005_v55, %v5004_v31  ;;  %v3884_v32 = vmax.f32 %v2024_v20, 0.0  ;;  %v4138_v63 = vmax.f32 %v3040_v27, 0.0 }
 0x179   : > { %v4459_v56 = vsel %vm4334_vm3, %v3882_v59, 0.0  ;;  %v3051_v57 = vadd.f32 %v7913_v43, %v6404_v35  ;;  %v2019_v12 = vadd.f32 %v7913_v43, %v2018_v1  ;;  %v3043_v30 = vadd.f32 %v7913_v43, %v3042_v18 }
 0x17a   : > { %v5008_v19 = vadd.f32 %v5007_v40, %v5006_v51  ;;  %v4140_v45 = vmax.f32 %v3048_v13, 0.0  ;;  %v4458_v41 = vadd.f32 %v4457_v3, %v4456_v50  ;;  %v3885_v58 = vmax.f32 %v2027_v46, 0.0 }
 0x17b   : > { %v5011_v28 = vsel %vm4334_vm3, %v4138_v63, 0.0  ;;  %v3883_v7 = vmax.f32 %v2019_v12, 0.0  ;;  %v4139_v54 = vmax.f32 %v3043_v30, 0.0  ;;  %v2040_v8 = vadd.f32 %v7913_v43, %v6151_v61 }
 0x17c   : > { %v4460_v35 = vadd.f32 %v4459_v56, %v4458_v41  ;;  %v5010_v10 = vadd.f32 %v5009_v22, %v5008_v19  ;;  %v3064_v1 = vadd.f32 %v7913_v43, %v6407_v23  ;;  %v2032_v5 = vadd.f32 %v7913_v43, %v2031_v36 }
 0x17d   : > { %v10607_v18 = vpack.c.bf16 %v7644_v29, %v7637_v52  ;;  %v4141_v44 = vmax.f32 %v3051_v57, 0.0  ;;  %v4461_v62 = vsel %vm4334_vm3, %v3883_v7, 0.0  ;;  %v5013_v39 = vsel %vm4334_vm3, %v4139_v54, 0.0 }
 0x17e   : > { %v3888_v20 = vmax.f32 %v2040_v8, 0.0  ;;  %v10609_v25 = vpack.c.bf16 %v7651_v49, %v10608_v2  ;;  %v4463_v29 = vsel %vm4334_vm3, %v3884_v32, 0.0  ;;  %v5012_v52 = vadd.f32 %v5011_v28, %v5010_v10  ;;  %v6155_v49 = vpop.f32.mrb[68].mxu0 }
 0x17f   : > { %6258 = vmatmul.mubr.msk.bf16.gmra.mrb[172].mxu0 %vm965_vm2, %v10607_v18  ;;  %v4462_v11 = vadd.f32 %v4461_v62, %v4460_v35  ;;  %v4144_v40 = vmax.f32 %v3064_v1, 0.0  ;;  %v3886_v15 = vmax.f32 %v2032_v5, 0.0  ;;  %v3056_v13 = vadd.f32 %v7913_v43, %v3055_v16  ;;  %v2047_v60 = vpop.f32.mrb[69].mxu0 }
 0x180   : > { %6514 = vmatmul.mubr.msk.bf16.gmra.mrb[172].mxu1 %vm965_vm2, %v10609_v25  ;;  %6261 = vmatprep.mubr.msk.bf16.mxu0 %vm965_vm2, %v775_v4  ;;  %v2043_v17 = vadd.f32 %v7913_v43, %v6152_v24  ;;  %v3067_v14 = vadd.f32 %v7913_v43, %v6408_v26  ;;  %v5015_v42 = vsel %vm4334_vm3, %v4140_v45, 0.0  ;;  %v4465_v33 = vsel %vm4334_vm3, %v3885_v58, 0.0  ;;  %v6411_v4 = vpop.f32.mrb[68].mxu1  ;;  %v6156_v46 = vpop.f32.mrb[70].mxu0 }
 0x181   : > { %v4464_v53 = vadd.f32 %v4463_v29, %v4462_v11  ;;  %v5014_v6 = vadd.f32 %v5013_v39, %v5012_v52  ;;  %v5017_v9 = vsel %vm4334_vm3, %v4141_v44, 0.0  ;;  %v4476_v0 = vsel %vm4334_vm3, %v3888_v20, 0.0  ;;  %v3071_v27 = vpop.f32.mrb[69].mxu1  ;;  %v2050_v61 = vpop.f32.mrb[71].mxu0 }
 0x182   : > { %v4142_v31 = vmax.f32 %v3056_v13, 0.0  ;;  %v2035_v34 = vadd.f32 %v7913_v43, %v2034_v37  ;;  %v5028_v22 = vsel %vm4334_vm3, %v4144_v40, 0.0  ;;  %v3059_v55 = vadd.f32 %v7913_v43, %v3058_v47  ;;  %v6412_v59 = vpop.f32.mrb[70].mxu1  ;;  %v8153_v8 = vpop.f32.mrb[72].mxu0 }
 0x183   : > { %v4466_v21 = vadd.f32 %v4465_v33, %v4464_v53  ;;  %v5016_v3 = vadd.f32 %v5015_v42, %v5014_v6  ;;  %v4473_v50 = vsel %vm4334_vm3, %v3886_v15, 0.0  ;;  %v3889_v51 = vmax.f32 %v2043_v17, 0.0  ;;  %v3074_v23 = vpop.f32.mrb[71].mxu1  ;;  %v2063_v18 = vpop.f32.mrb[73].mxu0  ;;  %v607_v33 = vld [vmem:[%s6666_s22 + $0xd80] sm:$0xff]  ;;  %v608_v53 = vld [vmem:[%s6666_s22 + $0xd88] sm:$0xff] }
 0x184   : > { %v4145_v32 = vmax.f32 %v3067_v14, 0.0  ;;  %v3887_v63 = vmax.f32 %v2035_v34, 0.0  ;;  %v4143_v57 = vmax.f32 %v3059_v55, 0.0  ;;  %v8144_v12 = vadd.f32 %v7913_v43, %v6155_v49  ;;  %v8155_v5 = vpop.f32.mrb[72].mxu1  ;;  %v8160_v25 = vpop.f32.mrb[74].mxu0  ;;  %v353_v6 = vld [vmem:[%s6666_s22 + $0x590] sm:$0xff] }
 0x185   : > { %v4467_v36 = vrot.slane %v4466_v21, 4  ;;  %v5018_v56 = vadd.f32 %v5017_v9, %v5016_v3  ;;  %v5025_v30 = vsel %vm4334_vm3, %v4142_v31, 0.0  ;;  %v2048_v24 = vadd.f32 %v7913_v43, %v2047_v60  ;;  %v3087_v2 = vpop.f32.mrb[73].mxu1  ;;  %v8165_v13 = vpop.f32.mrb[75].mxu0  ;;  %v354_v34 = vld [vmem:[%s6666_s22 + $0x598] sm:$0xff] }
 0x186   : > { %v4474_v16 = vsel %vm4334_vm3, %v3887_v63, 0.0  ;;  %v3072_v19 = vadd.f32 %v7913_v43, %v3071_v27  ;;  %v5026_v26 = vsel %vm4334_vm3, %v4143_v57, 0.0  ;;  %v4478_v37 = vsel %vm4334_vm3, %v3889_v51, 0.0  ;;  %v8163_v15 = vpop.f32.mrb[74].mxu1  ;;  %v609_v27 = vld [vmem:[%s6666_s22 + $0xd90] sm:$0xff]  ;;  %v8180_v57 = vpop.f32.mrb[76].mxu0 }
 0x187   : > { %v4468_v45 = vadd.f32 %v4467_v36, %v4466_v21  ;;  %v5019_v41 = vrot.slane %v5018_v56, 4  ;;  %v4475_v58 = vadd.f32 %v4474_v16, %v4473_v50  ;;  %v5030_v28 = vsel %vm4334_vm3, %v4145_v32, 0.0 }
 0x188   : > { %v5027_v7 = vadd.f32 %v5026_v26, %v5025_v30  ;;  %v3890_v54 = vmax.f32 %v2048_v24, 0.0  ;;  %v4146_v1 = vmax.f32 %v3072_v19, 0.0  ;;  %v3080_v62 = vadd.f32 %v7913_v43, %v6411_v4  ;;  %v8173_v4 = vpop.f32.mrb[75].mxu1  ;;  %v8186_v19 = vpop.f32.mrb[77].mxu0 }
 0x189   : > { %v4469_v47 = vrot.slane %v4468_v45, 2  ;;  %v5020_v35 = vadd.f32 %v5019_v41, %v5018_v56  ;;  %v4477_v10 = vadd.f32 %v4476_v0, %v4475_v58  ;;  %v2059_v20 = vadd.f32 %v7913_v43, %v6156_v46  ;;  %v610_v46 = vld [vmem:[%s6666_s22 + $0xd98] sm:$0xff]  ;;  %v8184_v24 = vpop.f32.mrb[76].mxu1 }
 0x18a   : > { %v5029_v44 = vadd.f32 %v5028_v22, %v5027_v7  ;;  %v4480_v39 = vsel %vm4334_vm3, %v3890_v54, 0.0  ;;  %v5032_v40 = vsel %vm4334_vm3, %v4146_v1, 0.0  ;;  %v3892_v17 = vmax.f32 %v8144_v12, 0.0 }
 0x18b   : > { %v4470_v29 = vadd.f32 %v4469_v47, %v4468_v45  ;;  %v5021_v52 = vrot.slane %v5020_v35, 2  ;;  %v4479_v11 = vadd.f32 %v4478_v37, %v4477_v10  ;;  %v3083_v49 = vadd.f32 %v7913_v43, %v6412_v59  ;;  %v3103_v37 = vpop.f32.mrb[77].mxu1 }
 0x18c   : > { %v5031_v14 = vadd.f32 %v5030_v28, %v5029_v44  ;;  %v2051_v42 = vadd.f32 %v7913_v43, %v2050_v61  ;;  %v3075_v31 = vadd.f32 %v7913_v43, %v3074_v23  ;;  %v4148_v21 = vmax.f32 %v3080_v62, 0.0  ;;  %v8193_v28 = vpop.f32.mrb[78].mxu0  ;;  %v8200_v10 = vpop.f32.mrb[78].mxu1 }
 0x18d   : > { %v4471_v60 = vrot.slane %v4470_v29, 1  ;;  %v5022_v9 = vadd.f32 %v5021_v52, %v5020_v35  ;;  %v4481_v0 = vadd.f32 %v4480_v39, %v4479_v11  ;;  %v3893_v22 = vmax.f32 %v2059_v20, 0.0  ;;  %v8202_v1 = vpop.f32.mrb[79].mxu0  ;;  %v8208_v20 = vpop.f32.mrb[79].mxu1 }
 0x18e   : > { %v5033_v3 = vadd.f32 %v5032_v40, %v5031_v14  ;;  %v3891_v55 = vmax.f32 %v2051_v42, 0.0  ;;  %v4147_v61 = vmax.f32 %v3075_v31, 0.0  ;;  %v903_v51 = vpack.c.bf16 %v608_v53, %v607_v33  ;;  %v355_v40 = vld [vmem:[%s6666_s22 + $0x5a0] sm:$0xff]  ;;  %v357_v42 = vld [vmem:[%s6666_s22 + $0x5b0] sm:$0xff] }
 0x18f   : > { %v4472_v59 = vadd.f32 %v4471_v60, %v4470_v29  ;;  %v5023_v50 = vrot.slane %v5022_v9, 1  ;;  %v4149_v32 = vmax.f32 %v3083_v49, 0.0  ;;  %v776_v36 = vpack.c.bf16 %v354_v34, %v353_v6  ;;  %v611_v49 = vld [vmem:[%s6666_s22 + $0xda0] sm:$0xff]  ;;  %v358_v6 = vld [vmem:[%s6666_s22 + $0x5b8] sm:$0xff]  ;;  %v613_v60 = vld [vmem:[%s6666_s22 + $0xdb0] sm:$0xff] }
 0x190   : > { %v4482_v63 = vsel %vm4334_vm3, %v3891_v55, 0.0  ;;  %v904_v56 = vpack.c.bf16 %v610_v46, %v609_v27  ;;  %v5034_v16 = vsel %vm4334_vm3, %v4147_v61, 0.0  ;;  %6517 = vmatprep.mubr.msk.bf16.mxu1 %vm965_vm2, %v903_v51  ;;  %v4484_v45 = vsel %vm4334_vm3, %v3892_v17, 0.0  ;;  %v356_v17 = vld [vmem:[%s6666_s22 + $0x5a8] sm:$0xff]  ;;  %v8234_v46 = vpop.f32.mrb[80].mxu0 }
 0x191   : > { %v5441_v12 = vmul.f32 0.00390625, %v4472_v59  ;;  %v5024_v23 = vadd.f32 %v5023_v50, %v5022_v9  ;;  %v4483_v30 = vadd.f32 %v4482_v63, %v4481_v0  ;;  %v5036_v41 = vsel %vm4334_vm3, %v4148_v21, 0.0  ;;  %6262 = vmatmul.mubr.msk.bf16.gmra.mrb[176].mxu0 %vm965_vm2, %v776_v36  ;;  %v614_v9 = vld [vmem:[%s6666_s22 + $0xdb8] sm:$0xff]  ;;  %v8238_v55 = vpop.f32.mrb[81].mxu0 }
 0x192   : > { %v4486_v58 = vsel %vm4334_vm3, %v3893_v22, 0.0  ;;  %v5035_v26 = vadd.f32 %v5034_v16, %v5033_v3  ;;  %6518 = vmatmul.mubr.msk.bf16.gmra.mrb[176].mxu1 %vm965_vm2, %v904_v56  ;;  %v2064_v35 = vadd.f32 %v7913_v43, %v2063_v18  ;;  %v5038_v44 = vsel %vm4334_vm3, %v4149_v32, 0.0 }
 0x193   : > { %v8197_v7 = vsel %vm5472_vm4, %v5441_v12, %v7943_v48  ;;  %v5449_v54 = vmul.f32 0.00390625, %v5024_v23  ;;  %v4485_v47 = vadd.f32 %v4484_v45, %v4483_v30  ;;  %v2072_v39 = vadd.f32 %v7913_v43, %v8153_v8 }
 0x194   : > { %v5037_v62 = vadd.f32 %v5036_v41, %v5035_v26  ;;  %v3088_v48 = vadd.f32 %v7913_v43, %v3087_v2  ;;  %v3096_v29 = vadd.f32 %v7913_v43, %v8155_v5  ;;  %v3894_v52 = vmax.f32 %v2064_v35, 0.0  ;;  %v612_v2 = vld [vmem:[%s6666_s22 + $0xda8] sm:$0xff] }
 0x195   : > { %v8212_v18 = vsel %vm5472_vm4, %v5449_v54, %v7948_v38  ;;  %v4487_v11 = vadd.f32 %v4486_v58, %v4485_v47  ;;  %v2075_v38 = vadd.f32 %v7913_v43, %v8160_v25  ;;  %v3099_v53 = vadd.f32 %v7913_v43, %v8163_v15  ;;  %v8236_v15 = vpop.f32.mrb[80].mxu1 }
 0x196   : > { %v4150_v14 = vmax.f32 %v3088_v48, 0.0  ;;  %v5039_v8 = vadd.f32 %v5038_v44, %v5037_v62  ;;  %v4488_v33 = vsel %vm4334_vm3, %v3894_v52, 0.0  ;;  %v2067_v5 = vadd.f32 %v7913_v43, %v8165_v13  ;;  %v8241_v51 = vpop.f32.mrb[81].mxu1  ;;  %v359_v62 = vld [vmem:[%s6666_s22 + $0x5c0] sm:$0xff] }
 0x197   : > { %v4489_v0 = vadd.f32 %v4488_v33, %v4487_v11  ;;  %v3091_v34 = vadd.f32 %v7913_v43, %v8173_v4  ;;  %v777_v27 = vpack.c.bf16 %v356_v17, %v355_v40  ;;  %v3896_v21 = vmax.f32 %v2072_v39, 0.0  ;;  %v8243_v4 = vpop.f32.mrb[82].mxu0  ;;  %v8246_v56 = vpop.f32.mrb[82].mxu1  ;;  %v615_v11 = vld [vmem:[%s6666_s22 + $0xdc0] sm:$0xff]  ;;  %v616_v40 = vld [vmem:[%s6666_s22 + $0xdc8] sm:$0xff] }
 0x198   : > { %v5040_v31 = vsel %vm4334_vm3, %v4150_v14, 0.0  ;;  %v4152_v25 = vmax.f32 %v3096_v29, 0.0  ;;  %v3895_v22 = vmax.f32 %v2067_v5, 0.0  ;;  %v905_v59 = vpack.c.bf16 %v612_v2, %v611_v49  ;;  %v8248_v12 = vpop.f32.mrb[83].mxu0  ;;  %v8256_v41 = vpop.f32.mrb[83].mxu1  ;;  %v361_v49 = vld [vmem:[%s6666_s22 + $0x5d0] sm:$0xff] }
 0x199   : > { %v5041_v3 = vadd.f32 %v5040_v31, %v5039_v8  ;;  %v4151_v13 = vmax.f32 %v3091_v34, 0.0  ;;  %6265 = vmatprep.mubr.msk.bf16.mxu0 %vm965_vm2, %v777_v27  ;;  %v778_v50 = vpack.c.bf16 %v358_v6, %v357_v42  ;;  %v906_v61 = vpack.c.bf16 %v614_v9, %v613_v60  ;;  %v362_v2 = vld [vmem:[%s6666_s22 + $0x5d8] sm:$0xff]  ;;  %v8279_v42 = vpop.f32.mrb[84].mxu0  ;;  %v617_v5 = vld [vmem:[%s6666_s22 + $0xdd0] sm:$0xff]  ;;  %v8287_v60 = vpop.f32.mrb[84].mxu1 }
 0x19a   : > { %v3897_v32 = vmax.f32 %v2075_v38, 0.0  ;;  %v4153_v63 = vmax.f32 %v3099_v53, 0.0  ;;  %v4490_v36 = vsel %vm4334_vm3, %v3895_v22, 0.0  ;;  %6521 = vmatprep.mubr.msk.bf16.mxu1 %vm965_vm2, %v905_v59  ;;  %v2080_v16 = vadd.f32 %v7913_v43, %v8186_v19  ;;  %v618_v6 = vld [vmem:[%s6666_s22 + $0xdd8] sm:$0xff]  ;;  %v8289_v9 = vpop.f32.mrb[85].mxu0  ;;  %v8291_v27 = vpop.f32.mrb[85].mxu1 }
 0x19b   : > { %v4491_v23 = vadd.f32 %v4490_v36, %v4489_v0  ;;  %v5042_v30 = vsel %vm4334_vm3, %v4151_v13, 0.0  ;;  %6266 = vmatmul.mubr.msk.bf16.gmra.mrb[180].mxu0 %vm965_vm2, %v778_v50  ;;  %v3104_v45 = vadd.f32 %v7913_v43, %v3103_v37  ;;  %v4492_v58 = vsel %vm4334_vm3, %v3896_v21, 0.0  ;;  %6522 = vmatmul.mubr.msk.bf16.gmra.mrb[180].mxu1 %vm965_vm2, %v906_v61  ;;  %v8293_v21 = vpop.f32.mrb[86].mxu0  ;;  %v8295_v13 = vpop.f32.mrb[86].mxu1 }
 0x19c   : > { %v5044_v26 = vsel %vm4334_vm3, %v4152_v25, 0.0  ;;  %v5043_v54 = vadd.f32 %v5042_v30, %v5041_v3  ;;  %v2088_v47 = vadd.f32 %v7913_v43, %v8180_v57  ;;  %v3112_v19 = vadd.f32 %v7913_v43, %v8184_v24  ;;  %v360_v57 = vld [vmem:[%s6666_s22 + $0x5c8] sm:$0xff] }
 0x19d   : > { %v4493_v35 = vadd.f32 %v4492_v58, %v4491_v23  ;;  %v3898_v37 = vmax.f32 %v2080_v16, 0.0  ;;  %v4154_v44 = vmax.f32 %v3104_v45, 0.0  ;;  %v4494_v39 = vsel %vm4334_vm3, %v3897_v32, 0.0 }
 0x19e   : > { %v5046_v48 = vsel %vm4334_vm3, %v4153_v63, 0.0  ;;  %v5045_v29 = vadd.f32 %v5044_v26, %v5043_v54  ;;  %v2091_v52 = vadd.f32 %v7913_v43, %v8193_v28  ;;  %v3115_v8 = vadd.f32 %v7913_v43, %v8200_v10  ;;  %v8305_v63 = vpop.f32.mrb[87].mxu1 }
 0x19f   : > { %v4495_v17 = vadd.f32 %v4494_v39, %v4493_v35  ;;  %v4496_v24 = vsel %vm4334_vm3, %v3898_v37, 0.0  ;;  %v5048_v14 = vsel %vm4334_vm3, %v4154_v44, 0.0  ;;  %v3900_v33 = vmax.f32 %v2088_v47, 0.0 }
 0x1a0   : > { %v5047_v38 = vadd.f32 %v5046_v48, %v5045_v29  ;;  %v2083_v28 = vadd.f32 %v7913_v43, %v8202_v1  ;;  %v3107_v53 = vadd.f32 %v7913_v43, %v8208_v20  ;;  %v4156_v0 = vmax.f32 %v3112_v19, 0.0  ;;  %v8297_v20 = vpop.f32.mrb[87].mxu0  ;;  %v363_v19 = vld [vmem:[%s6666_s22 + $0x5e0] sm:$0xff]  ;;  %v620_v48 = vld [vmem:[%s6666_s22 + $0xde8] sm:$0xff] }
 0x1a1   : > { %v4497_v10 = vadd.f32 %v4496_v24, %v4495_v17  ;;  %v779_v31 = vpack.c.bf16 %v360_v57, %v359_v62  ;;  %v907_v34 = vpack.c.bf16 %v616_v40, %v615_v11  ;;  %v780_v22 = vpack.c.bf16 %v362_v2, %v361_v49  ;;  %v8332_v29 = vpop.f32.mrb[88].mxu0  ;;  %v365_v40 = vld [vmem:[%s6666_s22 + $0x5f0] sm:$0xff]  ;;  %v8340_v17 = vpop.f32.mrb[88].mxu1 }
 0x1a2   : > { %v5049_v25 = vadd.f32 %v5048_v14, %v5047_v38  ;;  %v3899_v3 = vmax.f32 %v2083_v28, 0.0  ;;  %v4155_v1 = vmax.f32 %v3107_v53, 0.0  ;;  %v3901_v59 = vmax.f32 %v2091_v52, 0.0  ;;  %v8342_v24 = vpop.f32.mrb[89].mxu0  ;;  %v621_v38 = vld [vmem:[%s6666_s22 + $0xdf0] sm:$0xff]  ;;  %v622_v28 = vld [vmem:[%s6666_s22 + $0xdf8] sm:$0xff] }
 0x1a3   : > { %v4157_v50 = vmax.f32 %v3115_v8, 0.0  ;;  %6269 = vmatprep.mubr.msk.bf16.mxu0 %vm965_vm2, %v779_v31  ;;  %6525 = vmatprep.mubr.msk.bf16.mxu1 %vm965_vm2, %v907_v34  ;;  %v908_v61 = vpack.c.bf16 %v618_v6, %v617_v5  ;;  %v8303_v32 = vadd.f32 %v7913_v43, %v8234_v46  ;;  %v2096_v30 = vadd.f32 %v7913_v43, %v8238_v55  ;;  %v8322_v55 = vld [vmem:[%s10274_s2] ss:$0 sm:$0xff]  ;;  %v8351_v53 = vpop.f32.mrb[89].mxu1  ;;  %v8353_v5 = vpop.f32.mrb[90].mxu0 }
 0x1a4   : > { %v4498_v36 = vsel %vm4334_vm3, %v3899_v3, 0.0  ;;  %v5050_v23 = vsel %vm4334_vm3, %v4155_v1, 0.0  ;;  %6270 = vmatmul.mubr.msk.bf16.gmra.mrb[184].mxu0 %vm965_vm2, %v780_v22  ;;  %v3120_v16 = vadd.f32 %v7913_v43, %v8241_v51  ;;  %v4500_v45 = vsel %vm4334_vm3, %v3900_v33, 0.0  ;;  %v366_v33 = vld [vmem:[%s6666_s22 + $0x5f8] sm:$0xff]  ;;  %v8355_v31 = vpop.f32.mrb[90].mxu1  ;;  %v8357_v34 = vpop.f32.mrb[91].mxu0 }
 0x1a5   : > { %v5052_v46 = vsel %vm4334_vm3, %v4156_v0, 0.0  ;;  %v4499_v58 = vadd.f32 %v4498_v36, %v4497_v10  ;;  %v5051_v26 = vadd.f32 %v5050_v23, %v5049_v25  ;;  %6526 = vmatmul.mubr.msk.bf16.gmra.mrb[184].mxu1 %vm965_vm2, %v908_v61  ;;  %v3128_v54 = vadd.f32 %v7913_v43, %v8236_v15  ;;  %v364_v43 = vld [vmem:[%s6666_s22 + $0x5e8] sm:$0xff]  ;;  %v619_v15 = vld [vmem:[%s6666_s22 + $0xde0] sm:$0xff] }
 0x1a6   : > { %v3902_v47 = vmax.f32 %v2096_v30, 0.0  ;;  %v4158_v35 = vmax.f32 %v3120_v16, 0.0  ;;  %v2107_v51 = vadd.f32 %v8322_v55, %v8243_v4  ;;  %v4502_v37 = vsel %vm4334_vm3, %v3901_v59, 0.0 }
 0x1a7   : > { %v5054_v44 = vsel %vm4334_vm3, %v4157_v50, 0.0  ;;  %v4501_v62 = vadd.f32 %v4500_v45, %v4499_v58  ;;  %v5053_v39 = vadd.f32 %v5052_v46, %v5051_v26  ;;  %v3904_v52 = vmax.f32 %v8303_v32, 0.0 }
 0x1a8   : > { %v4504_v57 = vsel %vm4334_vm3, %v3902_v47, 0.0  ;;  %v5056_v4 = vsel %vm4334_vm3, %v4158_v35, 0.0  ;;  %v3131_v11 = vadd.f32 %v8322_v55, %v8246_v56  ;;  %v2099_v49 = vadd.f32 %v8322_v55, %v8248_v12  ;;  %v368_v47 = vld [vmem:[%s6666_s22 + $0x608] sm:$0xff]  ;;  %v623_v35 = vld [vmem:[%s6666_s22 + $0xe00] sm:$0xff] }
 0x1a9   : > { %v4503_v14 = vadd.f32 %v4502_v37, %v4501_v62  ;;  %v5055_v8 = vadd.f32 %v5054_v44, %v5053_v39  ;;  %v3123_v2 = vadd.f32 %v8322_v55, %v8256_v41  ;;  %v4160_v56 = vmax.f32 %v3128_v54, 0.0  ;;  %v8359_v41 = vpop.f32.mrb[91].mxu1  ;;  %v367_v54 = vld [vmem:[%s6666_s22 + $0x600] sm:$0xff]  ;;  %v624_v62 = vld [vmem:[%s6666_s22 + $0xe08] sm:$0xff] }
 0x1aa   : > { %v3905_v6 = vmax.f32 %v2107_v51, 0.0  ;;  %v781_v0 = vpack.c.bf16 %v364_v43, %v363_v19  ;;  %v909_v10 = vpack.c.bf16 %v620_v48, %v619_v15  ;;  %v3903_v3 = vmax.f32 %v2099_v49, 0.0  ;;  %v8390_v51 = vpop.f32.mrb[92].mxu0  ;;  %v8395_v39 = vpop.f32.mrb[92].mxu1  ;;  %v370_v49 = vld [vmem:[%s6666_s22 + $0x618] sm:$0xff] }
 0x1ab   : > { %v4505_v25 = vadd.f32 %v4504_v57, %v4503_v14  ;;  %v5057_v12 = vadd.f32 %v5056_v4, %v5055_v8  ;;  %v4159_v1 = vmax.f32 %v3123_v2, 0.0  ;;  %v4161_v22 = vmax.f32 %v3131_v11, 0.0  ;;  %v8397_v43 = vpop.f32.mrb[93].mxu0  ;;  %v8402_v57 = vpop.f32.mrb[93].mxu1  ;;  %v625_v2 = vld [vmem:[%s6666_s22 + $0xe10] sm:$0xff] }
 0x1ac   : > { %6273 = vmatprep.mubr.msk.bf16.mxu0 %vm965_vm2, %v781_v0  ;;  %6529 = vmatprep.mubr.msk.bf16.mxu1 %vm965_vm2, %v909_v10  ;;  %v782_v59 = vpack.c.bf16 %v366_v33, %v365_v40  ;;  %v910_v50 = vpack.c.bf16 %v622_v28, %v621_v38  ;;  %v2120_v61 = vadd.f32 %v8322_v55, %v8279_v42  ;;  %v4506_v32 = vsel %vm4334_vm3, %v3903_v3, 0.0  ;;  %v8404_v4 = vpop.f32.mrb[94].mxu0  ;;  %v626_v33 = vld [vmem:[%s6666_s22 + $0xe18] sm:$0xff]  ;;  %v8412_v38 = vpop.f32.mrb[94].mxu1 }
 0x1ad   : > { %v5058_v36 = vsel %vm4334_vm3, %v4159_v1, 0.0  ;;  %v8369_v23 = vadd.f32 %v8322_v55, %v8287_v60  ;;  %v2112_v30 = vadd.f32 %v8322_v55, %v8289_v9  ;;  %v4508_v16 = vsel %vm4334_vm3, %v3904_v52, 0.0  ;;  %v8414_v28 = vpop.f32.mrb[95].mxu0 }
 0x1ae   : > { %v4507_v45 = vadd.f32 %v4506_v32, %v4505_v25  ;;  %v5059_v46 = vadd.f32 %v5058_v36, %v5057_v12  ;;  %6274 = vmatmul.mubr.msk.bf16.gmra.mrb[188].mxu0 %vm965_vm2, %v782_v59  ;;  %6530 = vmatmul.mubr.msk.bf16.gmra.mrb[188].mxu1 %vm965_vm2, %v910_v50  ;;  %v3136_v42 = vadd.f32 %v8322_v55, %v8291_v27  ;;  %v5060_v58 = vsel %vm4334_vm3, %v4160_v56, 0.0  ;;  %v8420_v25 = vpop.f32.mrb[95].mxu1 }
 0x1af   : > { %v3906_v60 = vmax.f32 %v2112_v30, 0.0  ;;  %v8381_v26 = vadd.f32 %v8322_v55, %v8293_v21  ;;  %v8385_v9 = vadd.f32 %v8322_v55, %v8295_v13  ;;  %v4510_v19 = vsel %vm4334_vm3, %v3905_v6, 0.0  ;;  %v369_v21 = vld [vmem:[%s6666_s22 + $0x610] sm:$0xff] }
 0x1b0   : > { %v4509_v37 = vadd.f32 %v4508_v16, %v4507_v45  ;;  %v5061_v27 = vadd.f32 %v5060_v58, %v5059_v46  ;;  %v4162_v44 = vmax.f32 %v3136_v42, 0.0  ;;  %v5062_v13 = vsel %vm4334_vm3, %v4161_v22, 0.0  ;;  %v371_v45 = vld [vmem:[%s6666_s22 + $0x620] sm:$0xff]  ;;  %v8447_v46 = vpop.f32.mrb[96].mxu0 }
 0x1b1   : > { %v3908_v15 = vmax.f32 %v2120_v61, 0.0  ;;  %v4164_v48 = vmax.f32 %v8369_v23, 0.0  ;;  %v4512_v52 = vsel %vm4334_vm3, %v3906_v60, 0.0  ;;  %v2115_v8 = vadd.f32 %v8322_v55, %v8297_v20 }
 0x1b2   : > { %v4511_v11 = vadd.f32 %v4510_v19, %v4509_v37  ;;  %v5063_v40 = vadd.f32 %v5062_v13, %v5061_v27  ;;  %v5064_v14 = vsel %vm4334_vm3, %v4162_v44, 0.0  ;;  %v3909_v56 = vmax.f32 %v8381_v26, 0.0  ;;  %v627_v26 = vld [vmem:[%s6666_s22 + $0xe20] sm:$0xff]  ;;  %v628_v37 = vld [vmem:[%s6666_s22 + $0xe28] sm:$0xff]  ;;  %v373_v27 = vld [vmem:[%s6666_s22 + $0x630] sm:$0xff] }
 0x1b3   : > { %v4165_v6 = vmax.f32 %v8385_v9, 0.0  ;;  %v3139_v0 = vadd.f32 %v8322_v55, %v8305_v63  ;;  %v783_v10 = vpack.c.bf16 %v368_v47, %v367_v54  ;;  %v3907_v20 = vmax.f32 %v2115_v8, 0.0  ;;  %v8451_v9 = vpop.f32.mrb[96].mxu1  ;;  %v8453_v54 = vpop.f32.mrb[97].mxu0 }
 0x1b4   : > { %v4513_v12 = vadd.f32 %v4512_v52, %v4511_v11  ;;  %v5065_v3 = vadd.f32 %v5064_v14, %v5063_v40  ;;  %v911_v1 = vpack.c.bf16 %v624_v62, %v623_v35  ;;  %v784_v59 = vpack.c.bf16 %v370_v49, %v369_v21  ;;  %v8461_v44 = vpop.f32.mrb[97].mxu1  ;;  %v8463_v62 = vpop.f32.mrb[98].mxu0  ;;  %v374_v52 = vld [vmem:[%s6666_s22 + $0x638] sm:$0xff] }
 0x1b5   : > { %v4163_v22 = vmax.f32 %v3139_v0, 0.0  ;;  %6277 = vmatprep.mubr.msk.bf16.mxu0 %vm965_vm2, %v783_v10  ;;  %v912_v50 = vpack.c.bf16 %v626_v33, %v625_v2  ;;  %v8425_v61 = vadd.f32 %v8322_v55, %v8332_v29  ;;  %v4514_v63 = vsel %vm4334_vm3, %v3907_v20, 0.0  ;;  %v8469_v11 = vpop.f32.mrb[98].mxu1  ;;  %v8471_v40 = vpop.f32.mrb[99].mxu0  ;;  %v629_v2 = vld [vmem:[%s6666_s22 + $0xe30] sm:$0xff]  ;;  %v630_v33 = vld [vmem:[%s6666_s22 + $0xe38] sm:$0xff] }
 0x1b6   : > { %6533 = vmatprep.mubr.msk.bf16.mxu1 %vm965_vm2, %v911_v1  ;;  %v8431_v32 = vadd.f32 %v8322_v55, %v8340_v17  ;;  %v2128_v36 = vadd.f32 %v8322_v55, %v8342_v24  ;;  %v3152_v23 = vadd.f32 %v8322_v55, %v8351_v53  ;;  %v4516_v30 = vsel %vm4334_vm3, %v3908_v15, 0.0  ;;  %6278 = vmatmul.mubr.msk.bf16.gmra.mrb[192].mxu0 %vm965_vm2, %v784_v59  ;;  %v372_v24 = vld [vmem:[%s6666_s22 + $0x628] sm:$0xff] }
 0x1b7   : > { %v4515_v16 = vadd.f32 %v4514_v63, %v4513_v12  ;;  %v5066_v29 = vsel %vm4334_vm3, %v4163_v22, 0.0  ;;  %6534 = vmatmul.mubr.msk.bf16.gmra.mrb[192].mxu1 %vm965_vm2, %v912_v50  ;;  %v8443_v17 = vadd.f32 %v8322_v55, %v8353_v5  ;;  %v5068_v53 = vsel %vm4334_vm3, %v4164_v48, 0.0 }
 0x1b8   : > { %v5067_v42 = vadd.f32 %v5066_v29, %v5065_v3  ;;  %v3910_v58 = vmax.f32 %v2128_v36, 0.0  ;;  %v4166_v60 = vmax.f32 %v3152_v23, 0.0  ;;  %v4518_v47 = vsel %vm4334_vm3, %v3909_v56, 0.0  ;;  %v8479_v56 = vpop.f32.mrb[99].mxu1  ;;  %v8499_v23 = vpop.f32.mrb[100].mxu0  ;;  %v375_v29 = vld [vmem:[%s6666_s22 + $0x640] sm:$0xff] }
 0x1b9   : > { %v5070_v5 = vsel %vm4334_vm3, %v4165_v6, 0.0  ;;  %v4517_v35 = vadd.f32 %v4516_v30, %v4515_v16  ;;  %v3163_v19 = vadd.f32 %v8322_v55, %v8355_v31  ;;  %v3912_v13 = vmax.f32 %v8425_v61, 0.0 }
 0x1ba   : > { %v5069_v21 = vadd.f32 %v5068_v53, %v5067_v42  ;;  %v4168_v15 = vmax.f32 %v8431_v32, 0.0  ;;  %v4520_v48 = vsel %vm4334_vm3, %v3910_v58, 0.0  ;;  %v5072_v14 = vsel %vm4334_vm3, %v4166_v60, 0.0  ;;  %v376_v42 = vld [vmem:[%s6666_s22 + $0x648] sm:$0xff] }
 0x1bb   : > { %v4519_v31 = vadd.f32 %v4518_v47, %v4517_v35  ;;  %v3913_v8 = vmax.f32 %v8443_v17, 0.0  ;;  %v2131_v49 = vadd.f32 %v8322_v55, %v8357_v34  ;;  %v3155_v0 = vadd.f32 %v8322_v55, %v8359_v41  ;;  %v8511_v17 = vpop.f32.mrb[101].mxu0  ;;  %v631_v35 = vld [vmem:[%s6666_s22 + $0xe40] sm:$0xff] }
 0x1bc   : > { %v5071_v6 = vadd.f32 %v5070_v5, %v5069_v21  ;;  %v785_v10 = vpack.c.bf16 %v372_v24, %v371_v45  ;;  %v913_v12 = vpack.c.bf16 %v628_v37, %v627_v26  ;;  %v4169_v20 = vmax.f32 %v3163_v19, 0.0  ;;  %v8517_v60 = vpop.f32.mrb[102].mxu0  ;;  %v632_v19 = vld [vmem:[%s6666_s22 + $0xe48] sm:$0xff] }
 0x1bd   : > { %v4521_v3 = vadd.f32 %v4520_v48, %v4519_v31  ;;  %v3911_v1 = vmax.f32 %v2131_v49, 0.0  ;;  %v786_v22 = vpack.c.bf16 %v374_v52, %v373_v27  ;;  %v4167_v50 = vmax.f32 %v3155_v0, 0.0  ;;  %v8527_v27 = vpop.f32.mrb[103].mxu0  ;;  %v377_v52 = vld [vmem:[%s6666_s22 + $0x650] sm:$0xff]  ;;  %v378_v31 = vld [vmem:[%s6666_s22 + $0x658] sm:$0xff] }
 0x1be   : > { %v5073_v59 = vadd.f32 %v5072_v14, %v5071_v6  ;;  %6281 = vmatprep.mubr.msk.bf16.mxu0 %vm965_vm2, %v785_v10  ;;  %6537 = vmatprep.mubr.msk.bf16.mxu1 %vm965_vm2, %v913_v12  ;;  %v914_v34 = vpack.c.bf16 %v630_v33, %v629_v2  ;;  %v8487_v61 = vadd.f32 %v8322_v55, %v8390_v51  ;;  %v4524_v51 = vsel %vm4334_vm3, %v3912_v13, 0.0  ;;  %v633_v33 = vld [vmem:[%s6666_s22 + $0xe50] sm:$0xff]  ;;  %v634_v6 = vld [vmem:[%s6666_s22 + $0xe58] sm:$0xff] }
 0x1bf   : > { %v4522_v41 = vsel %vm4334_vm3, %v3911_v1, 0.0  ;;  %6282 = vmatmul.mubr.msk.bf16.gmra.mrb[196].mxu0 %vm965_vm2, %v786_v22  ;;  %v8493_v63 = vadd.f32 %v8322_v55, %v8395_v39  ;;  %v2144_v32 = vadd.f32 %v8322_v55, %v8397_v43  ;;  %v3168_v36 = vadd.f32 %v8322_v55, %v8402_v57  ;;  %v8509_v43 = vpop.f32.mrb[100].mxu1 }
 0x1c0   : > { %v4523_v30 = vadd.f32 %v4522_v41, %v4521_v3  ;;  %v5074_v16 = vsel %vm4334_vm3, %v4167_v50, 0.0  ;;  %6538 = vmatmul.mubr.msk.bf16.gmra.mrb[196].mxu1 %vm965_vm2, %v914_v34  ;;  %v8506_v39 = vadd.f32 %v8322_v55, %v8404_v4  ;;  %v5076_v57 = vsel %vm4334_vm3, %v4168_v15, 0.0  ;;  %v8515_v58 = vpop.f32.mrb[101].mxu1  ;;  %v8548_v41 = vpop.f32.mrb[104].mxu0 }
 0x1c1   : > { %v5075_v45 = vadd.f32 %v5074_v16, %v5073_v59  ;;  %v3914_v24 = vmax.f32 %v2144_v32, 0.0  ;;  %v4170_v53 = vmax.f32 %v3168_v36, 0.0  ;;  %v4526_v4 = vsel %vm4334_vm3, %v3913_v8, 0.0  ;;  %v8525_v37 = vpop.f32.mrb[102].mxu1 }
 0x1c2   : > { %v5078_v26 = vsel %vm4334_vm3, %v4169_v20, 0.0  ;;  %v4525_v47 = vadd.f32 %v4524_v51, %v4523_v30  ;;  %v3179_v5 = vadd.f32 %v8322_v55, %v8412_v38  ;;  %v3916_v13 = vmax.f32 %v8487_v61, 0.0  ;;  %v8534_v14 = vpop.f32.mrb[103].mxu1  ;;  %v8560_v30 = vpop.f32.mrb[105].mxu0 }
 0x1c3   : > { %v5077_v21 = vadd.f32 %v5076_v57, %v5075_v45  ;;  %v4172_v15 = vmax.f32 %v8493_v63, 0.0  ;;  %v4528_v48 = vsel %vm4334_vm3, %v3914_v24, 0.0  ;;  %v5080_v8 = vsel %vm4334_vm3, %v4170_v53, 0.0  ;;  %v8558_v51 = vpop.f32.mrb[104].mxu1 }
 0x1c4   : > { %v4527_v38 = vadd.f32 %v4526_v4, %v4525_v47  ;;  %v3917_v49 = vmax.f32 %v8506_v39, 0.0  ;;  %v2147_v2 = vadd.f32 %v8322_v55, %v8414_v28  ;;  %v3171_v10 = vadd.f32 %v8322_v55, %v8420_v25 }
 0x1c5   : > { %v5079_v0 = vadd.f32 %v5078_v26, %v5077_v21  ;;  %v787_v12 = vpack.c.bf16 %v376_v42, %v375_v29  ;;  %v915_v3 = vpack.c.bf16 %v632_v19, %v631_v35  ;;  %v4173_v1 = vmax.f32 %v3179_v5, 0.0  ;;  %v8569_v29 = vpop.f32.mrb[105].mxu1  ;;  %v380_v42 = vld [vmem:[%s6666_s22 + $0x668] sm:$0xff]  ;;  %v635_v19 = vld [vmem:[%s6666_s22 + $0xe60] sm:$0xff] }
 0x1c6   : > { %v4529_v20 = vadd.f32 %v4528_v48, %v4527_v38  ;;  %v3915_v22 = vmax.f32 %v2147_v2, 0.0  ;;  %v788_v59 = vpack.c.bf16 %v378_v31, %v377_v52  ;;  %v4171_v34 = vmax.f32 %v3171_v10, 0.0  ;;  %v8576_v4 = vpop.f32.mrb[106].mxu1  ;;  %v636_v21 = vld [vmem:[%s6666_s22 + $0xe68] sm:$0xff]  ;;  %v381_v38 = vld [vmem:[%s6666_s22 + $0x670] sm:$0xff]  ;;  %v638_v10 = vld [vmem:[%s6666_s22 + $0xe78] sm:$0xff] }
 0x1c7   : > { %v5081_v50 = vadd.f32 %v5080_v8, %v5079_v0  ;;  %6285 = vmatprep.mubr.msk.bf16.mxu0 %vm965_vm2, %v787_v12  ;;  %6541 = vmatprep.mubr.msk.bf16.mxu1 %vm965_vm2, %v915_v3  ;;  %v916_v28 = vpack.c.bf16 %v634_v6, %v633_v33  ;;  %v2168_v61 = vadd.f32 %v8322_v55, %v8447_v46  ;;  %v4532_v57 = vsel %vm4334_vm3, %v3916_v13, 0.0  ;;  %v8584_v13 = vpop.f32.mrb[107].mxu1  ;;  %v382_v8 = vld [vmem:[%s6666_s22 + $0x678] sm:$0xff]  ;;  %v637_v0 = vld [vmem:[%s6666_s22 + $0xe70] sm:$0xff] }
 0x1c8   : > { %v4530_v25 = vsel %vm4334_vm3, %v3915_v22, 0.0  ;;  %6286 = vmatmul.mubr.msk.bf16.gmra.mrb[200].mxu0 %vm965_vm2, %v788_v59  ;;  %v3192_v63 = vadd.f32 %v8322_v55, %v8451_v9  ;;  %v2160_v32 = vadd.f32 %v8322_v55, %v8453_v54  ;;  %v3184_v36 = vadd.f32 %v8322_v55, %v8461_v44  ;;  %v379_v54 = vld [vmem:[%s6666_s22 + $0x660] sm:$0xff]  ;;  %v8571_v44 = vpop.f32.mrb[106].mxu0 }
 0x1c9   : > { %v4531_v46 = vadd.f32 %v4530_v25, %v4529_v20  ;;  %v5082_v16 = vsel %vm4334_vm3, %v4171_v34, 0.0  ;;  %6542 = vmatmul.mubr.msk.bf16.gmra.mrb[200].mxu1 %vm965_vm2, %v916_v28  ;;  %v3920_v39 = vmax.f32 %v2168_v61, 0.0  ;;  %v8566_v9 = vadd.f32 %v8322_v55, %v8463_v62  ;;  %v8578_v26 = vpop.f32.mrb[107].mxu0 }
 0x1ca   : > { %v5084_v45 = vsel %vm4334_vm3, %v4172_v15, 0.0  ;;  %v5083_v24 = vadd.f32 %v5082_v16, %v5081_v50  ;;  %v4176_v53 = vmax.f32 %v3192_v63, 0.0  ;;  %v4534_v62 = vsel %vm4334_vm3, %v3917_v49, 0.0  ;;  %v8600_v28 = vpop.f32.mrb[108].mxu0  ;;  %v8605_v63 = vpop.f32.mrb[108].mxu1 }
 0x1cb   : > { %v5086_v47 = vsel %vm4334_vm3, %v4173_v1, 0.0  ;;  %v4533_v5 = vadd.f32 %v4532_v57, %v4531_v46  ;;  %v3918_v35 = vmax.f32 %v2160_v32, 0.0  ;;  %v4545_v48 = vsel %vm4334_vm3, %v3920_v39, 0.0  ;;  %v8613_v39 = vpop.f32.mrb[109].mxu1 }
 0x1cc   : > { %v5085_v15 = vadd.f32 %v5084_v45, %v5083_v24  ;;  %v4174_v52 = vmax.f32 %v3184_v36, 0.0  ;;  %v3921_v31 = vmax.f32 %v8566_v9, 0.0  ;;  %v5097_v49 = vsel %vm4334_vm3, %v4176_v53, 0.0  ;;  %v8621_v53 = vpop.f32.mrb[110].mxu1 }
 0x1cd   : > { %v4535_v2 = vadd.f32 %v4534_v62, %v4533_v5  ;;  %v3195_v33 = vadd.f32 %v8322_v55, %v8469_v11  ;;  %v2163_v6 = vadd.f32 %v8322_v55, %v8471_v40  ;;  %v3187_v3 = vadd.f32 %v8322_v55, %v8479_v56  ;;  %v8607_v56 = vpop.f32.mrb[109].mxu0 }
 0x1ce   : > { %v5087_v12 = vadd.f32 %v5086_v47, %v5085_v15  ;;  %v789_v20 = vpack.c.bf16 %v380_v42, %v379_v54  ;;  %v917_v1 = vpack.c.bf16 %v636_v21, %v635_v19  ;;  %v4542_v59 = vsel %vm4334_vm3, %v3918_v35, 0.0  ;;  %v8615_v9 = vpop.f32.mrb[110].mxu0  ;;  %v8626_v35 = vpop.f32.mrb[111].mxu1 }
 0x1cf   : > { %v4536_v22 = vrot.slane %v4535_v2, 4  ;;  %v3919_v50 = vmax.f32 %v2163_v6, 0.0  ;;  %v790_v34 = vpack.c.bf16 %v382_v8, %v381_v38  ;;  %v5094_v11 = vsel %vm4334_vm3, %v4174_v52, 0.0  ;;  %v8623_v42 = vpop.f32.mrb[111].mxu0 }
 0x1d0   : > { %v5088_v61 = vrot.slane %v5087_v12, 4  ;;  %v4175_v25 = vmax.f32 %v3187_v3, 0.0  ;;  %6289 = vmatprep.mubr.msk.bf16.mxu0 %vm965_vm2, %v789_v20  ;;  %6545 = vmatprep.mubr.msk.bf16.mxu1 %vm965_vm2, %v917_v1  ;;  %v918_v40 = vpack.c.bf16 %v638_v10, %v637_v0  ;;  %v4177_v36 = vmax.f32 %v3195_v33, 0.0  ;;  %v384_v3 = vld [vmem:[%s6666_s22 + $0x688] sm:$0xff]  ;;  %v8641_v20 = vpop.f32.mrb[112].mxu0 }
 0x1d1   : > { %v4537_v32 = vadd.f32 %v4536_v22, %v4535_v2  ;;  %v4543_v46 = vsel %vm4334_vm3, %v3919_v50, 0.0  ;;  %6290 = vmatmul.mubr.msk.bf16.gmra.mrb[204].mxu0 %vm965_vm2, %v790_v34  ;;  %v2176_v16 = vadd.f32 %v8322_v55, %v8511_v17  ;;  %v2184_v24 = vadd.f32 %v8322_v55, %v8499_v23  ;;  %v640_v34 = vld [vmem:[%s6666_s22 + $0xe88] sm:$0xff] }
 0x1d2   : > { %v5089_v54 = vadd.f32 %v5088_v61, %v5087_v12  ;;  %v4544_v57 = vadd.f32 %v4543_v46, %v4542_v59  ;;  %v5095_v45 = vsel %vm4334_vm3, %v4175_v25, 0.0  ;;  %6546 = vmatmul.mubr.msk.bf16.gmra.mrb[204].mxu1 %vm965_vm2, %v918_v40  ;;  %v4547_v17 = vsel %vm4334_vm3, %v3921_v31, 0.0  ;;  %v8645_v61 = vpop.f32.mrb[112].mxu1 }
 0x1d3   : > { %v4538_v62 = vrot.slane %v4537_v32, 2  ;;  %v5096_v47 = vadd.f32 %v5095_v45, %v5094_v11  ;;  %v3922_v5 = vmax.f32 %v2176_v16, 0.0  ;;  %v3208_v15 = vadd.f32 %v8322_v55, %v8509_v43  ;;  %v8653_v46 = vpop.f32.mrb[113].mxu1 }
 0x1d4   : > { %v5090_v19 = vrot.slane %v5089_v54, 2  ;;  %v4546_v21 = vadd.f32 %v4545_v48, %v4544_v57  ;;  %v3200_v23 = vadd.f32 %v8322_v55, %v8515_v58  ;;  %v5099_v38 = vsel %vm4334_vm3, %v4177_v36, 0.0  ;;  %v383_v58 = vld [vmem:[%s6666_s22 + $0x680] sm:$0xff]  ;;  %v386_v36 = vld [vmem:[%s6666_s22 + $0x698] sm:$0xff] }
 0x1d5   : > { %v4539_v52 = vadd.f32 %v4538_v62, %v4537_v32  ;;  %v5098_v8 = vadd.f32 %v5097_v49, %v5096_v47  ;;  %v4549_v31 = vsel %vm4334_vm3, %v3922_v5, 0.0  ;;  %v3924_v33 = vmax.f32 %v2184_v24, 0.0  ;;  %v639_v49 = vld [vmem:[%s6666_s22 + $0xe80] sm:$0xff]  ;;  %v385_v32 = vld [vmem:[%s6666_s22 + $0x690] sm:$0xff]  ;;  %v8662_v47 = vpop.f32.mrb[114].mxu1 }
 0x1d6   : > { %v5091_v2 = vadd.f32 %v5090_v19, %v5089_v54  ;;  %v4548_v6 = vadd.f32 %v4547_v17, %v4546_v21  ;;  %v4178_v0 = vmax.f32 %v3200_v23, 0.0  ;;  %v2187_v43 = vadd.f32 %v8322_v55, %v8517_v60  ;;  %v8647_v60 = vpop.f32.mrb[113].mxu0  ;;  %v641_v62 = vld [vmem:[%s6666_s22 + $0xe90] sm:$0xff]  ;;  %v642_v17 = vld [vmem:[%s6666_s22 + $0xe98] sm:$0xff]  ;;  %v8667_v23 = vpop.f32.mrb[115].mxu1 }
 0x1d7   : > { %v4540_v48 = vrot.slane %v4539_v52, 1  ;;  %v5100_v10 = vadd.f32 %v5099_v38, %v5098_v8  ;;  %v2179_v12 = vadd.f32 %v8322_v55, %v8527_v27  ;;  %v4180_v22 = vmax.f32 %v3208_v15, 0.0  ;;  %v8655_v16 = vpop.f32.mrb[114].mxu0 }
 0x1d8   : > { %v5092_v1 = vrot.slane %v5091_v2, 1  ;;  %v4550_v59 = vadd.f32 %v4549_v31, %v4548_v6  ;;  %v5101_v50 = vsel %vm4334_vm3, %v4178_v0, 0.0  ;;  %v3211_v25 = vadd.f32 %v8322_v55, %v8525_v37  ;;  %v8664_v5 = vpop.f32.mrb[115].mxu0 }
 0x1d9   : > { %v4541_v27 = vadd.f32 %v4540_v48, %v4539_v52  ;;  %v5102_v11 = vadd.f32 %v5101_v50, %v5100_v10  ;;  %v3923_v40 = vmax.f32 %v2179_v12, 0.0  ;;  %v4553_v57 = vsel %vm4334_vm3, %v3924_v33, 0.0  ;;  %v8702_v50 = vpop.f32.mrb[116].mxu1 }
 0x1da   : > { %v5093_v54 = vadd.f32 %v5092_v1, %v5091_v2  ;;  %v3203_v45 = vadd.f32 %v8322_v55, %v8534_v14  ;;  %v791_v24 = vpack.c.bf16 %v384_v3, %v383_v58  ;;  %v3925_v19 = vmax.f32 %v2187_v43, 0.0  ;;  %v8692_v58 = vpop.f32.mrb[116].mxu0 }
 0x1db   : > { %v5442_v37 = vmul.f32 0.00390625, %v4541_v27  ;;  %v4551_v21 = vsel %vm4334_vm3, %v3923_v40, 0.0  ;;  %v919_v15 = vpack.c.bf16 %v640_v34, %v639_v49  ;;  %v792_v14 = vpack.c.bf16 %v386_v36, %v385_v32  ;;  %v8704_v34 = vpop.f32.mrb[117].mxu0  ;;  %v8709_v40 = vpop.f32.mrb[117].mxu1 }
 0x1dc   : > { %v5450_v52 = vmul.f32 0.00390625, %v5093_v54  ;;  %v4552_v38 = vadd.f32 %v4551_v21, %v4550_v59  ;;  %v4179_v8 = vmax.f32 %v3203_v45, 0.0  ;;  %6293 = vmatprep.mubr.msk.bf16.mxu0 %vm965_vm2, %v791_v24  ;;  %v4181_v2 = vmax.f32 %v3211_v25, 0.0  ;;  %v388_v59 = vld [vmem:[%s6666_s22 + $0x6a8] sm:$0xff]  ;;  %v643_v25 = vld [vmem:[%s6666_s22 + $0xea0] sm:$0xff]  ;;  %v389_v45 = vld [vmem:[%s6666_s22 + $0x6b0] sm:$0xff] }
 0x1dd   : > { %v8672_v31 = vsel %vm5474_vm5, %v5442_v37, %v8197_v7  ;;  %6549 = vmatprep.mubr.msk.bf16.mxu1 %vm965_vm2, %v919_v15  ;;  %v920_v33 = vpack.c.bf16 %v642_v17, %v641_v62  ;;  %v8677_v6 = vadd.f32 %v8322_v55, %v8548_v41  ;;  %6294 = vmatmul.mubr.msk.bf16.gmra.mrb[208].mxu0 %vm965_vm2, %v792_v14  ;;  %v5105_v43 = vsel %vm4334_vm3, %v4180_v22, 0.0  ;;  %v387_v22 = vld [vmem:[%s6666_s22 + $0x6a0] sm:$0xff]  ;;  %v390_v24 = vld [vmem:[%s6666_s22 + $0x6b8] sm:$0xff]  ;;  %v8721_v62 = vpop.f32.mrb[118].mxu1 }
 0x1de   : > { %v8681_v0 = vsel %vm5474_vm5, %v5450_v52, %v8212_v18  ;;  %v4554_v48 = vadd.f32 %v4553_v57, %v4552_v38  ;;  %v5103_v10 = vsel %vm4334_vm3, %v4179_v8, 0.0  ;;  %v2192_v7 = vadd.f32 %v8322_v55, %v8560_v30  ;;  %v645_v52 = vld [vmem:[%s6666_s22 + $0xeb0] sm:$0xff]  ;;  %v646_v38 = vld [vmem:[%s6666_s22 + $0xeb8] sm:$0xff]  ;;  %v8730_v8 = vpop.f32.mrb[119].mxu1 }
 0x1df   : > { %v4555_v12 = vsel %vm4334_vm3, %v3925_v19, 0.0  ;;  %v5104_v41 = vadd.f32 %v5103_v10, %v5102_v11  ;;  %6550 = vmatmul.mubr.msk.bf16.gmra.mrb[208].mxu1 %vm965_vm2, %v920_v33  ;;  %v3216_v18 = vadd.f32 %v8322_v55, %v8569_v29  ;;  %v3224_v3 = vadd.f32 %v8322_v55, %v8558_v51  ;;  %v644_v51 = vld [vmem:[%s6666_s22 + $0xea8] sm:$0xff] }
 0x1e0   : > { %v3926_v49 = vmax.f32 %v2192_v7, 0.0  ;;  %v4556_v1 = vadd.f32 %v4555_v12, %v4554_v48  ;;  %v8698_v30 = vadd.f32 %v8322_v55, %v8571_v44  ;;  %v5107_v29 = vsel %vm4334_vm3, %v4181_v2, 0.0  ;;  %v8711_v44 = vpop.f32.mrb[118].mxu0 }
 0x1e1   : > { %v5106_v27 = vadd.f32 %v5105_v43, %v5104_v41  ;;  %v4182_v11 = vmax.f32 %v3216_v18, 0.0  ;;  %v3928_v32 = vmax.f32 %v8677_v6, 0.0  ;;  %v3227_v54 = vadd.f32 %v8322_v55, %v8576_v4  ;;  %v8723_v17 = vpop.f32.mrb[119].mxu0 }
 0x1e2   : > { %v4557_v36 = vsel %vm4334_vm3, %v3926_v49, 0.0  ;;  %v2195_v57 = vadd.f32 %v8322_v55, %v8578_v26  ;;  %v3219_v15 = vadd.f32 %v8322_v55, %v8584_v13  ;;  %v4184_v4 = vmax.f32 %v3224_v3, 0.0 }
 0x1e3   : > { %v4558_v37 = vadd.f32 %v4557_v36, %v4556_v1  ;;  %v5108_v19 = vadd.f32 %v5107_v29, %v5106_v27  ;;  %v5109_v21 = vsel %vm4334_vm3, %v4182_v11, 0.0  ;;  %v3929_v26 = vmax.f32 %v8698_v30, 0.0  ;;  %v8746_v1 = vpop.f32.mrb[120].mxu0  ;;  %v391_v29 = vld [vmem:[%s6666_s22 + $0x6c0] sm:$0xff]  ;;  %v8754_v27 = vpop.f32.mrb[120].mxu1 }
 0x1e4   : > { %v3927_v14 = vmax.f32 %v2195_v57, 0.0  ;;  %v793_v2 = vpack.c.bf16 %v388_v59, %v387_v22  ;;  %v4183_v6 = vmax.f32 %v3219_v15, 0.0  ;;  %v921_v48 = vpack.c.bf16 %v644_v51, %v643_v25  ;;  %v647_v36 = vld [vmem:[%s6666_s22 + $0xec0] sm:$0xff] }
 0x1e5   : > { %v5110_v33 = vadd.f32 %v5109_v21, %v5108_v19  ;;  %v794_v10 = vpack.c.bf16 %v390_v24, %v389_v45  ;;  %v4185_v7 = vmax.f32 %v3227_v54, 0.0  ;;  %v922_v13 = vpack.c.bf16 %v646_v38, %v645_v52  ;;  %v8762_v54 = vpop.f32.mrb[121].mxu1  ;;  %v648_v19 = vld [vmem:[%s6666_s22 + $0xec8] sm:$0xff] }
 0x1e6   : > { %v4559_v43 = vsel %vm4334_vm3, %v3927_v14, 0.0  ;;  %6297 = vmatprep.mubr.msk.bf16.mxu0 %vm965_vm2, %v793_v2  ;;  %v8737_v12 = vadd.f32 %v8322_v55, %v8600_v28  ;;  %v5111_v18 = vsel %vm4334_vm3, %v4183_v6, 0.0  ;;  %6553 = vmatprep.mubr.msk.bf16.mxu1 %vm965_vm2, %v921_v48  ;;  %v2208_v3 = vadd.f32 %v8322_v55, %v8607_v56  ;;  %v8756_v56 = vpop.f32.mrb[121].mxu0  ;;  %v8770_v21 = vpop.f32.mrb[122].mxu1  ;;  %v394_v14 = vld [vmem:[%s6666_s22 + $0x6d8] sm:$0xff] }
 0x1e7   : > { %v4560_v41 = vadd.f32 %v4559_v43, %v4558_v37  ;;  %6298 = vmatmul.mubr.msk.bf16.gmra.mrb[212].mxu0 %vm965_vm2, %v794_v10  ;;  %v3232_v49 = vadd.f32 %v8322_v55, %v8613_v39  ;;  %v4561_v28 = vsel %vm4334_vm3, %v3928_v32, 0.0  ;;  %v5113_v30 = vsel %vm4334_vm3, %v4184_v4, 0.0  ;;  %6554 = vmatmul.mubr.msk.bf16.gmra.mrb[212].mxu1 %vm965_vm2, %v922_v13  ;;  %v392_v32 = vld [vmem:[%s6666_s22 + $0x6c8] sm:$0xff]  ;;  %v8764_v57 = vpop.f32.mrb[122].mxu0  ;;  %v8780_v2 = vpop.f32.mrb[123].mxu1  ;;  %v650_v43 = vld [vmem:[%s6666_s22 + $0xed8] sm:$0xff] }
 0x1e8   : > { %v5112_v22 = vadd.f32 %v5111_v18, %v5110_v33  ;;  %v3240_v59 = vadd.f32 %v8322_v55, %v8605_v63  ;;  %v3930_v39 = vmax.f32 %v2208_v3, 0.0  ;;  %v2219_v51 = vadd.f32 %v8322_v55, %v8615_v9  ;;  %v8772_v9 = vpop.f32.mrb[123].mxu0 }
 0x1e9   : > { %v4562_v11 = vadd.f32 %v4561_v28, %v4560_v41  ;;  %v4186_v25 = vmax.f32 %v3232_v49, 0.0  ;;  %v4563_v63 = vsel %vm4334_vm3, %v3929_v26, 0.0  ;;  %v5115_v45 = vsel %vm4334_vm3, %v4185_v7, 0.0  ;;  %v393_v26 = vld [vmem:[%s6666_s22 + $0x6d0] sm:$0xff] }
 0x1ea   : > { %v5114_v24 = vadd.f32 %v5113_v30, %v5112_v22  ;;  %v3932_v37 = vmax.f32 %v8737_v12, 0.0  ;;  %v4565_v52 = vsel %vm4334_vm3, %v3930_v39, 0.0  ;;  %v3243_v4 = vadd.f32 %v8322_v55, %v8621_v53  ;;  %v649_v7 = vld [vmem:[%s6666_s22 + $0xed0] sm:$0xff] }
 0x1eb   : > { %v4564_v15 = vadd.f32 %v4563_v63, %v4562_v11  ;;  %v5117_v38 = vsel %vm4334_vm3, %v4186_v25, 0.0  ;;  %v4188_v33 = vmax.f32 %v3240_v59, 0.0  ;;  %v2211_v48 = vadd.f32 %v8322_v55, %v8623_v42  ;;  %v8796_v59 = vpop.f32.mrb[124].mxu0 }
 0x1ec   : > { %v5116_v6 = vadd.f32 %v5115_v45, %v5114_v24  ;;  %v3235_v10 = vadd.f32 %v8322_v55, %v8626_v35  ;;  %v3933_v12 = vmax.f32 %v2219_v51, 0.0  ;;  %v795_v41 = vpack.c.bf16 %v392_v32, %v391_v29  ;;  %v8807_v51 = vpop.f32.mrb[125].mxu0 }
 0x1ed   : > { %v4566_v13 = vadd.f32 %v4565_v52, %v4564_v15  ;;  %v923_v18 = vpack.c.bf16 %v648_v19, %v647_v36  ;;  %v3931_v53 = vmax.f32 %v2211_v48, 0.0  ;;  %v796_v28 = vpack.c.bf16 %v394_v14, %v393_v26  ;;  %v651_v48 = vld [vmem:[%s6666_s22 + $0xee0] sm:$0xff] }
 0x1ee   : > { %v5118_v3 = vadd.f32 %v5117_v38, %v5116_v6  ;;  %v4187_v49 = vmax.f32 %v3235_v10, 0.0  ;;  %v4189_v30 = vmax.f32 %v3243_v4, 0.0  ;;  %6301 = vmatprep.mubr.msk.bf16.mxu0 %vm965_vm2, %v795_v41  ;;  %v924_v22 = vpack.c.bf16 %v650_v43, %v649_v7  ;;  %v396_v6 = vld [vmem:[%s6666_s22 + $0x6e8] sm:$0xff]  ;;  %v397_v41 = vld [vmem:[%s6666_s22 + $0x6f0] sm:$0xff] }
 0x1ef   : > { %6557 = vmatprep.mubr.msk.bf16.mxu1 %vm965_vm2, %v923_v18  ;;  %v2232_v42 = vadd.f32 %v8322_v55, %v8641_v20  ;;  %v8794_v35 = vadd.f32 %v8322_v55, %v8645_v61  ;;  %v4567_v29 = vsel %vm4334_vm3, %v3931_v53, 0.0  ;;  %6302 = vmatmul.mubr.msk.bf16.gmra.mrb[216].mxu0 %vm965_vm2, %v796_v28  ;;  %v2224_v39 = vadd.f32 %v8322_v55, %v8647_v60  ;;  %v8805_v20 = vpop.f32.mrb[124].mxu1  ;;  %v8814_v60 = vpop.f32.mrb[126].mxu0  ;;  %v652_v10 = vld [vmem:[%s6666_s22 + $0xee8] sm:$0xff]  ;;  %v398_v28 = vld [vmem:[%s6666_s22 + $0x6f8] sm:$0xff] }
 0x1f0   : > { %v5119_v11 = vsel %vm4334_vm3, %v4187_v49, 0.0  ;;  %v3248_v25 = vadd.f32 %v8322_v55, %v8653_v46  ;;  %v4569_v61 = vsel %vm4334_vm3, %v3932_v37, 0.0  ;;  %v5121_v32 = vsel %vm4334_vm3, %v4188_v33, 0.0  ;;  %6558 = vmatmul.mubr.msk.bf16.gmra.mrb[216].mxu1 %vm965_vm2, %v924_v22  ;;  %v8812_v45 = vpop.f32.mrb[125].mxu1  ;;  %v395_v37 = vld [vmem:[%s6666_s22 + $0x6e0] sm:$0xff]  ;;  %v8821_v38 = vpop.f32.mrb[127].mxu0 }
 0x1f1   : > { %v4568_v36 = vadd.f32 %v4567_v29, %v4566_v13  ;;  %v5120_v63 = vadd.f32 %v5119_v11, %v5118_v3  ;;  %v3936_v46 = vmax.f32 %v2232_v42, 0.0  ;;  %v3934_v24 = vmax.f32 %v2224_v39, 0.0  ;;  %v8819_v52 = vpop.f32.mrb[126].mxu1  ;;  %v654_v22 = vld [vmem:[%s6666_s22 + $0xef8] sm:$0xff] }
 0x1f2   : > { %v4190_v19 = vmax.f32 %v3248_v25, 0.0  ;;  %v2235_v15 = vadd.f32 %v8322_v55, %v8655_v16  ;;  %v4571_v4 = vsel %vm4334_vm3, %v3933_v12, 0.0  ;;  %v5123_v26 = vsel %vm4334_vm3, %v4189_v30, 0.0  ;;  %v8828_v7 = vpop.f32.mrb[127].mxu1  ;;  %v653_v30 = vld [vmem:[%s6666_s22 + $0xef0] sm:$0xff] }
 0x1f3   : > { %v4570_v14 = vadd.f32 %v4569_v61, %v4568_v36  ;;  %v5122_v33 = vadd.f32 %v5121_v32, %v5120_v63  ;;  %v4192_v16 = vmax.f32 %v8794_v35, 0.0  ;;  %v4573_v43 = vsel %vm4334_vm3, %v3934_v24, 0.0  ;;  %v8844_v32 = vpop.f32.mrb[128].mxu0 }
 0x1f4   : > { %v5125_v13 = vsel %vm4334_vm3, %v4190_v19, 0.0  ;;  %v3259_v12 = vadd.f32 %v8322_v55, %v8662_v47  ;;  %v2227_v53 = vadd.f32 %v8322_v55, %v8664_v5  ;;  %v3251_v49 = vadd.f32 %v8322_v55, %v8667_v23  ;;  %v8851_v23 = vld [vmem:[%s10274_s2] ss:$0 sm:$0xff]  ;;  %v8857_v24 = vpop.f32.mrb[129].mxu0 }
 0x1f5   : > { %v4572_v18 = vadd.f32 %v4571_v4, %v4570_v14  ;;  %v5124_v3 = vadd.f32 %v5123_v26, %v5122_v33  ;;  %v4577_v42 = vsel %vm4334_vm3, %v3936_v46, 0.0  ;;  %v3937_v35 = vmax.f32 %v2235_v15, 0.0  ;;  %v8855_v46 = vpop.f32.mrb[128].mxu1  ;;  %v8869_v14 = vpop.f32.mrb[130].mxu0 }
 0x1f6   : > { %v797_v29 = vpack.c.bf16 %v396_v6, %v395_v37  ;;  %v925_v11 = vpack.c.bf16 %v652_v10, %v651_v48  ;;  %v3935_v47 = vmax.f32 %v2227_v53, 0.0  ;;  %v4191_v61 = vmax.f32 %v3251_v49, 0.0  ;;  %v8867_v26 = vpop.f32.mrb[129].mxu1  ;;  %v400_v49 = vld [vmem:[%s6666_s22 + $0x708] sm:$0xff] }
 0x1f7   : > { %v4574_v39 = vadd.f32 %v4573_v43, %v4572_v18  ;;  %v5126_v25 = vadd.f32 %v5125_v13, %v5124_v3  ;;  %v4193_v36 = vmax.f32 %v3259_v12, 0.0  ;;  %v798_v55 = vpack.c.bf16 %v398_v28, %v397_v41  ;;  %v8875_v48 = vpop.f32.mrb[130].mxu1  ;;  %v655_v28 = vld [vmem:[%s6666_s22 + $0xf00] sm:$0xff] }
 0x1f8   : > { %6305 = vmatprep.mubr.msk.bf16.mxu0 %vm965_vm2, %v797_v29  ;;  %6561 = vmatprep.mubr.msk.bf16.mxu1 %vm965_vm2, %v925_v11  ;;  %v926_v5 = vpack.c.bf16 %v654_v22, %v653_v30  ;;  %v2248_v63 = vadd.f32 %v8851_v23, %v8692_v58  ;;  %v4575_v19 = vsel %vm4334_vm3, %v3935_v47, 0.0  ;;  %v5127_v15 = vsel %vm4334_vm3, %v4191_v61, 0.0  ;;  %v8884_v41 = vpop.f32.mrb[131].mxu1  ;;  %v656_v29 = vld [vmem:[%s6666_s22 + $0xf08] sm:$0xff]  ;;  %v401_v11 = vld [vmem:[%s6666_s22 + $0x710] sm:$0xff]  ;;  %v402_v47 = vld [vmem:[%s6666_s22 + $0x718] sm:$0xff] }
 0x1f9   : > { %v8863_v37 = vadd.f32 %v8851_v23, %v8702_v50  ;;  %v2240_v4 = vadd.f32 %v8851_v23, %v8704_v34  ;;  %v4576_v58 = vadd.f32 %v4575_v19, %v4574_v39  ;;  %v5128_v33 = vadd.f32 %v5127_v15, %v5126_v25  ;;  %6306 = vmatmul.mubr.msk.bf16.gmra.mrb[220].mxu0 %vm965_vm2, %v798_v55  ;;  %v8877_v34 = vpop.f32.mrb[131].mxu0  ;;  %v657_v61 = vld [vmem:[%s6666_s22 + $0xf10] sm:$0xff]  ;;  %v658_v55 = vld [vmem:[%s6666_s22 + $0xf18] sm:$0xff] }
 0x1fa   : > { %6562 = vmatmul.mubr.msk.bf16.gmra.mrb[220].mxu1 %vm965_vm2, %v926_v5  ;;  %v3940_v6 = vmax.f32 %v2248_v63, 0.0  ;;  %v3264_v50 = vadd.f32 %v8851_v23, %v8709_v40  ;;  %v5129_v10 = vsel %vm4334_vm3, %v4192_v16, 0.0  ;;  %v2251_v13 = vadd.f32 %v8851_v23, %v8711_v44  ;;  %v399_v16 = vld [vmem:[%s6666_s22 + $0x700] sm:$0xff]  ;;  %v8904_v15 = vpop.f32.mrb[132].mxu0 }
 0x1fb   : > { %v3938_v43 = vmax.f32 %v2240_v4, 0.0  ;;  %v3275_v12 = vadd.f32 %v8851_v23, %v8721_v62  ;;  %v4579_v18 = vsel %vm4334_vm3, %v3937_v35, 0.0  ;;  %v4578_v40 = vadd.f32 %v4577_v42, %v4576_v58 }
 0x1fc   : > { %v5130_v3 = vadd.f32 %v5129_v10, %v5128_v33  ;;  %v4194_v53 = vmax.f32 %v3264_v50, 0.0  ;;  %v5131_v30 = vsel %vm4334_vm3, %v4193_v36, 0.0  ;;  %v4585_v44 = vsel %vm4334_vm3, %v3940_v6, 0.0  ;;  %v8906_v6 = vpop.f32.mrb[132].mxu1  ;;  %v8908_v50 = vpop.f32.mrb[133].mxu0 }
 0x1fd   : > { %v4196_v22 = vmax.f32 %v8863_v37, 0.0  ;;  %v4581_v62 = vsel %vm4334_vm3, %v3938_v43, 0.0  ;;  %v4580_v35 = vadd.f32 %v4579_v18, %v4578_v40  ;;  %v2243_v25 = vadd.f32 %v8851_v23, %v8723_v17 }
 0x1fe   : > { %v5132_v42 = vadd.f32 %v5131_v30, %v5130_v3  ;;  %v5133_v39 = vsel %vm4334_vm3, %v4194_v53, 0.0  ;;  %v3941_v5 = vmax.f32 %v2251_v13, 0.0  ;;  %v4197_v36 = vmax.f32 %v3275_v12, 0.0  ;;  %v8915_v12 = vpop.f32.mrb[134].mxu0 }
 0x1ff   : > { %v3267_v63 = vadd.f32 %v8851_v23, %v8730_v8  ;;  %v799_v19 = vpack.c.bf16 %v400_v49, %v399_v16  ;;  %v4582_v37 = vadd.f32 %v4581_v62, %v4580_v35  ;;  %v3939_v58 = vmax.f32 %v2243_v25, 0.0  ;;  %v8913_v8 = vpop.f32.mrb[133].mxu1  ;;  %v8929_v16 = vpop.f32.mrb[135].mxu0  ;;  %v403_v35 = vld [vmem:[%s6666_s22 + $0x720] sm:$0xff] }
 0x200   : > { %v5134_v4 = vadd.f32 %v5133_v39, %v5132_v42  ;;  %v927_v33 = vpack.c.bf16 %v656_v29, %v655_v28  ;;  %v800_v10 = vpack.c.bf16 %v402_v47, %v401_v11  ;;  %v928_v43 = vpack.c.bf16 %v658_v55, %v657_v61  ;;  %v404_v47 = vld [vmem:[%s6666_s22 + $0x728] sm:$0xff]  ;;  %v659_v61 = vld [vmem:[%s6666_s22 + $0xf20] sm:$0xff] }
 0x201   : > { %v4195_v17 = vmax.f32 %v3267_v63, 0.0  ;;  %6309 = vmatprep.mubr.msk.bf16.mxu0 %vm965_vm2, %v799_v19  ;;  %v2264_v13 = vadd.f32 %v8851_v23, %v8746_v1  ;;  %v4583_v18 = vsel %vm4334_vm3, %v3939_v58, 0.0  ;;  %v8921_v40 = vadd.f32 %v8851_v23, %v8754_v27  ;;  %v8927_v1 = vpop.f32.mrb[134].mxu1  ;;  %v660_v55 = vld [vmem:[%s6666_s22 + $0xf28] sm:$0xff] }
 0x202   : > { %6565 = vmatprep.mubr.msk.bf16.mxu1 %vm965_vm2, %v927_v33  ;;  %v2256_v3 = vadd.f32 %v8851_v23, %v8756_v56  ;;  %v3280_v53 = vadd.f32 %v8851_v23, %v8762_v54  ;;  %v4584_v49 = vadd.f32 %v4583_v18, %v4582_v37  ;;  %6310 = vmatmul.mubr.msk.bf16.gmra.mrb[224].mxu0 %vm965_vm2, %v800_v10  ;;  %v8938_v54 = vpop.f32.mrb[135].mxu1  ;;  %v5137_v30 = vsel %vm4334_vm3, %v4196_v22, 0.0  ;;  %v661_v33 = vld [vmem:[%s6666_s22 + $0xf30] sm:$0xff]  ;;  %v8960_v10 = vpop.f32.mrb[136].mxu0 }
 0x203   : > { %v5135_v28 = vsel %vm4334_vm3, %v4195_v17, 0.0  ;;  %6566 = vmatmul.mubr.msk.bf16.gmra.mrb[224].mxu1 %vm965_vm2, %v928_v43  ;;  %v3944_v27 = vmax.f32 %v2264_v13, 0.0  ;;  %v8936_v56 = vadd.f32 %v8851_v23, %v8764_v57  ;;  %v4587_v42 = vsel %vm4334_vm3, %v3941_v5, 0.0  ;;  %v406_v5 = vld [vmem:[%s6666_s22 + $0x738] sm:$0xff] }
 0x204   : > { %v5136_v62 = vadd.f32 %v5135_v28, %v5134_v4  ;;  %v3942_v29 = vmax.f32 %v2256_v3, 0.0  ;;  %v4198_v11 = vmax.f32 %v3280_v53, 0.0  ;;  %v5139_v39 = vsel %vm4334_vm3, %v4197_v36, 0.0  ;;  %v405_v4 = vld [vmem:[%s6666_s22 + $0x730] sm:$0xff]  ;;  %v662_v17 = vld [vmem:[%s6666_s22 + $0xf38] sm:$0xff]  ;;  %v8964_v3 = vpop.f32.mrb[136].mxu1 }
 0x205   : > { %v4586_v25 = vadd.f32 %v4585_v44, %v4584_v49  ;;  %v3291_v57 = vadd.f32 %v8851_v23, %v8770_v21  ;;  %v4593_v63 = vsel %vm4334_vm3, %v3944_v27, 0.0  ;;  %v4200_v19 = vmax.f32 %v8921_v40, 0.0  ;;  %v8966_v53 = vpop.f32.mrb[137].mxu0 }
 0x206   : > { %v5138_v22 = vadd.f32 %v5137_v30, %v5136_v62  ;;  %v4589_v37 = vsel %vm4334_vm3, %v3942_v29, 0.0  ;;  %v5141_v36 = vsel %vm4334_vm3, %v4198_v11, 0.0  ;;  %v3945_v44 = vmax.f32 %v8936_v56, 0.0  ;;  %v8968_v30 = vpop.f32.mrb[137].mxu1 }
 0x207   : > { %v4588_v58 = vadd.f32 %v4587_v42, %v4586_v25  ;;  %v2259_v21 = vadd.f32 %v8851_v23, %v8772_v9  ;;  %v3283_v13 = vadd.f32 %v8851_v23, %v8780_v2  ;;  %v801_v18 = vpack.c.bf16 %v404_v47, %v403_v35  ;;  %v8970_v9 = vpop.f32.mrb[138].mxu0  ;;  %v8976_v35 = vpop.f32.mrb[138].mxu1 }
 0x208   : > { %v5140_v43 = vadd.f32 %v5139_v39, %v5138_v22  ;;  %v929_v40 = vpack.c.bf16 %v660_v55, %v659_v61  ;;  %v4201_v28 = vmax.f32 %v3291_v57, 0.0  ;;  %v802_v56 = vpack.c.bf16 %v406_v5, %v405_v4  ;;  %v8978_v42 = vpop.f32.mrb[139].mxu0  ;;  %v407_v5 = vld [vmem:[%s6666_s22 + $0x740] sm:$0xff] }
 0x209   : > { %v4590_v49 = vadd.f32 %v4589_v37, %v4588_v58  ;;  %v3943_v27 = vmax.f32 %v2259_v21, 0.0  ;;  %v4199_v29 = vmax.f32 %v3283_v13, 0.0  ;;  %6313 = vmatprep.mubr.msk.bf16.mxu0 %vm965_vm2, %v801_v18  ;;  %v930_v2 = vpack.c.bf16 %v662_v17, %v661_v33  ;;  %v663_v17 = vld [vmem:[%s6666_s22 + $0xf40] sm:$0xff] }
 0x20a   : > { %v5142_v62 = vadd.f32 %v5141_v36, %v5140_v43  ;;  %6569 = vmatprep.mubr.msk.bf16.mxu1 %vm965_vm2, %v929_v40  ;;  %v2280_v11 = vadd.f32 %v8851_v23, %v8796_v59  ;;  %6314 = vmatmul.mubr.msk.bf16.gmra.mrb[228].mxu0 %vm965_vm2, %v802_v56  ;;  %v8984_v25 = vadd.f32 %v8851_v23, %v8805_v20  ;;  %v8990_v59 = vpop.f32.mrb[139].mxu1  ;;  %v4595_v58 = vsel %vm4334_vm3, %v3945_v44, 0.0  ;;  %v664_v43 = vld [vmem:[%s6666_s22 + $0xf48] sm:$0xff]  ;;  %v410_v44 = vld [vmem:[%s6666_s22 + $0x758] sm:$0xff] }
 0x20b   : > { %v4591_v39 = vsel %vm4334_vm3, %v3943_v27, 0.0  ;;  %v2272_v57 = vadd.f32 %v8851_v23, %v8807_v51  ;;  %v3296_v47 = vadd.f32 %v8851_v23, %v8812_v45  ;;  %v5143_v55 = vsel %vm4334_vm3, %v4199_v29, 0.0  ;;  %6570 = vmatmul.mubr.msk.bf16.gmra.mrb[228].mxu1 %vm965_vm2, %v930_v2  ;;  %v9012_v27 = vpop.f32.mrb[140].mxu0  ;;  %v666_v29 = vld [vmem:[%s6666_s22 + $0xf58] sm:$0xff]  ;;  %v9020_v2 = vpop.f32.mrb[140].mxu1 }
 0x20c   : > { %v4592_v61 = vadd.f32 %v4591_v39, %v4590_v49  ;;  %v3948_v22 = vmax.f32 %v2280_v11, 0.0  ;;  %v8996_v20 = vadd.f32 %v8851_v23, %v8814_v60  ;;  %v5145_v51 = vsel %vm4334_vm3, %v4200_v19, 0.0  ;;  %v408_v60 = vld [vmem:[%s6666_s22 + $0x748] sm:$0xff]  ;;  %v409_v49 = vld [vmem:[%s6666_s22 + $0x750] sm:$0xff]  ;;  %v9022_v11 = vpop.f32.mrb[141].mxu0 }
 0x20d   : > { %v5144_v37 = vadd.f32 %v5143_v55, %v5142_v62  ;;  %v3946_v45 = vmax.f32 %v2272_v57, 0.0  ;;  %v4202_v4 = vmax.f32 %v3296_v47, 0.0  ;;  %v5147_v36 = vsel %vm4334_vm3, %v4201_v28, 0.0  ;;  %v665_v62 = vld [vmem:[%s6666_s22 + $0xf50] sm:$0xff]  ;;  %v9028_v55 = vpop.f32.mrb[142].mxu0 }
 0x20e   : > { %v4594_v21 = vadd.f32 %v4593_v63, %v4592_v61  ;;  %v3307_v33 = vadd.f32 %v8851_v23, %v8819_v52  ;;  %v4601_v13 = vsel %vm4334_vm3, %v3948_v22, 0.0  ;;  %v4204_v18 = vmax.f32 %v8984_v25, 0.0  ;;  %v9026_v61 = vpop.f32.mrb[141].mxu1 }
 0x20f   : > { %v5146_v19 = vadd.f32 %v5145_v51, %v5144_v37  ;;  %v4597_v40 = vsel %vm4334_vm3, %v3946_v45, 0.0  ;;  %v5149_v28 = vsel %vm4334_vm3, %v4202_v4, 0.0  ;;  %v3949_v52 = vmax.f32 %v8996_v20, 0.0  ;;  %v9030_v37 = vpop.f32.mrb[142].mxu1  ;;  %v9032_v45 = vpop.f32.mrb[143].mxu0 }
 0x210   : > { %v4596_v63 = vadd.f32 %v4595_v58, %v4594_v21  ;;  %v2275_v56 = vadd.f32 %v8851_v23, %v8821_v38  ;;  %v3299_v25 = vadd.f32 %v8851_v23, %v8828_v7  ;;  %v803_v57 = vpack.c.bf16 %v408_v60, %v407_v5 }
 0x211   : > { %v5148_v39 = vadd.f32 %v5147_v36, %v5146_v19  ;;  %v931_v47 = vpack.c.bf16 %v664_v43, %v663_v17  ;;  %v4205_v20 = vmax.f32 %v3307_v33, 0.0  ;;  %v804_v38 = vpack.c.bf16 %v410_v44, %v409_v49  ;;  %v9038_v36 = vpop.f32.mrb[143].mxu1 }
 0x212   : > { %v4598_v22 = vadd.f32 %v4597_v40, %v4596_v63  ;;  %v3947_v51 = vmax.f32 %v2275_v56, 0.0  ;;  %v4203_v58 = vmax.f32 %v3299_v25, 0.0  ;;  %6317 = vmatprep.mubr.msk.bf16.mxu0 %vm965_vm2, %v803_v57  ;;  %v932_v7 = vpack.c.bf16 %v666_v29, %v665_v62  ;;  %v411_v63 = vld [vmem:[%s6666_s22 + $0x760] sm:$0xff]  ;;  %v413_v25 = vld [vmem:[%s6666_s22 + $0x770] sm:$0xff] }
 0x213   : > { %v5150_v4 = vadd.f32 %v5149_v28, %v5148_v39  ;;  %6573 = vmatprep.mubr.msk.bf16.mxu1 %vm965_vm2, %v931_v47  ;;  %v2296_v5 = vadd.f32 %v8851_v23, %v8844_v32  ;;  %6318 = vmatmul.mubr.msk.bf16.gmra.mrb[232].mxu0 %vm965_vm2, %v804_v38  ;;  %v3320_v33 = vadd.f32 %v8851_v23, %v8855_v46  ;;  %v5153_v46 = vsel %vm4334_vm3, %v4204_v18, 0.0  ;;  %v667_v39 = vld [vmem:[%s6666_s22 + $0xf60] sm:$0xff]  ;;  %v9062_v18 = vpop.f32.mrb[144].mxu0  ;;  %v414_v38 = vld [vmem:[%s6666_s22 + $0x778] sm:$0xff] }
 0x214   : > { %v4599_v21 = vsel %vm4334_vm3, %v3947_v51, 0.0  ;;  %v2288_v60 = vadd.f32 %v8851_v23, %v8857_v24  ;;  %v3312_v17 = vadd.f32 %v8851_v23, %v8867_v26  ;;  %v5151_v32 = vsel %vm4334_vm3, %v4203_v58, 0.0  ;;  %6574 = vmatmul.mubr.msk.bf16.gmra.mrb[232].mxu1 %vm965_vm2, %v932_v7  ;;  %v412_v26 = vld [vmem:[%s6666_s22 + $0x768] sm:$0xff]  ;;  %v669_v7 = vld [vmem:[%s6666_s22 + $0xf70] sm:$0xff] }
 0x215   : > { %v4600_v43 = vadd.f32 %v4599_v21, %v4598_v22  ;;  %v3952_v19 = vmax.f32 %v2296_v5, 0.0  ;;  %v2299_v40 = vadd.f32 %v8851_v23, %v8869_v14  ;;  %v5152_v49 = vadd.f32 %v5151_v32, %v5150_v4  ;;  %v668_v14 = vld [vmem:[%s6666_s22 + $0xf68] sm:$0xff]  ;;  %v670_v5 = vld [vmem:[%s6666_s22 + $0xf78] sm:$0xff] }
 0x216   : > { %v4208_v44 = vmax.f32 %v3320_v33, 0.0  ;;  %v3950_v24 = vmax.f32 %v2288_v60, 0.0  ;;  %v4603_v28 = vsel %vm4334_vm3, %v3949_v52, 0.0  ;;  %v5155_v56 = vsel %vm4334_vm3, %v4205_v20, 0.0  ;;  %v9066_v52 = vpop.f32.mrb[144].mxu1  ;;  %v9068_v20 = vpop.f32.mrb[145].mxu0 }
 0x217   : > { %v4602_v62 = vadd.f32 %v4601_v13, %v4600_v43  ;;  %v3323_v29 = vadd.f32 %v8851_v23, %v8875_v48  ;;  %v5154_v57 = vadd.f32 %v5153_v46, %v5152_v49  ;;  %v4614_v47 = vsel %vm4334_vm3, %v3952_v19, 0.0  ;;  %v9076_v21 = vpop.f32.mrb[145].mxu1  ;;  %v9078_v33 = vpop.f32.mrb[146].mxu0 }
 0x218   : > { %v4206_v22 = vmax.f32 %v3312_v17, 0.0  ;;  %v3953_v51 = vmax.f32 %v2299_v40, 0.0  ;;  %v5166_v48 = vsel %vm4334_vm3, %v4208_v44, 0.0  ;;  %v4611_v4 = vsel %vm4334_vm3, %v3950_v24, 0.0  ;;  %10610 = vst [vmem:[#allocation4_spill] sm:$0xff] %v9078_v33  ;;  %v9082_v19 = vpop.f32.mrb[146].mxu1 }
 0x219   : > { %v4604_v13 = vadd.f32 %v4603_v28, %v4602_v62  ;;  %v2291_v58 = vadd.f32 %v8851_v23, %v8877_v34  ;;  %v5156_v60 = vadd.f32 %v5155_v56, %v5154_v57  ;;  %v3315_v17 = vadd.f32 %v8851_v23, %v8884_v41  ;;  %v9084_v40 = vpop.f32.mrb[147].mxu0  ;;  %v9086_v24 = vpop.f32.mrb[147].mxu1 }
 0x21a   : > { %v805_v43 = vpack.c.bf16 %v412_v26, %v411_v63  ;;  %v933_v32 = vpack.c.bf16 %v668_v14, %v667_v39  ;;  %v4209_v49 = vmax.f32 %v3323_v29, 0.0  ;;  %v806_v34 = vpack.c.bf16 %v414_v38, %v413_v25 }
 0x21b   : > { %v4605_v46 = vrot.slane %v4604_v13, 4  ;;  %v3951_v44 = vmax.f32 %v2291_v58, 0.0  ;;  %v5157_v28 = vrot.slane %v5156_v60, 4  ;;  %v5163_v62 = vsel %vm4334_vm3, %v4206_v22, 0.0 }
 0x21c   : > { %v4207_v33 = vmax.f32 %v3315_v17, 0.0  ;;  %6321 = vmatprep.mubr.msk.bf16.mxu0 %vm965_vm2, %v805_v43  ;;  %6577 = vmatprep.mubr.msk.bf16.mxu1 %vm965_vm2, %v933_v32  ;;  %v934_v41 = vpack.c.bf16 %v670_v5, %v669_v7  ;;  %v2312_v56 = vadd.f32 %v8851_v23, %v8904_v15  ;;  %v2304_v29 = vadd.f32 %v8851_v23, %v8908_v50  ;;  %v9101_v7 = vpop.f32.mrb[148].mxu0 }
 0x21d   : > { %v4606_v63 = vadd.f32 %v4605_v46, %v4604_v13  ;;  %v4612_v26 = vsel %vm4334_vm3, %v3951_v44, 0.0  ;;  %6322 = vmatmul.mubr.msk.bf16.gmra.mrb[236].mxu0 %vm965_vm2, %v806_v34  ;;  %v5158_v39 = vadd.f32 %v5157_v28, %v5156_v60  ;;  %v4616_v14 = vsel %vm4334_vm3, %v3953_v51, 0.0 }
 0x21e   : > { %v4613_v25 = vadd.f32 %v4612_v26, %v4611_v4  ;;  %v5164_v57 = vsel %vm4334_vm3, %v4207_v33, 0.0  ;;  %6578 = vmatmul.mubr.msk.bf16.gmra.mrb[236].mxu1 %vm965_vm2, %v934_v41  ;;  %v5168_v38 = vsel %vm4334_vm3, %v4209_v49, 0.0  ;;  %v3954_v58 = vmax.f32 %v2304_v29, 0.0  ;;  %v9109_v4 = vpop.f32.mrb[148].mxu1  ;;  %v9111_v33 = vpop.f32.mrb[149].mxu0  ;;  %v415_v26 = vld [vmem:[%s6666_s22 + $0x780] sm:$0xff] }
 0x21f   : > { %v4607_v22 = vrot.slane %v4606_v63, 2  ;;  %v5165_v13 = vadd.f32 %v5164_v57, %v5163_v62  ;;  %v5159_v15 = vrot.slane %v5158_v39, 2  ;;  %v9105_v50 = vadd.f32 %v8851_v23, %v8906_v6  ;;  %v9114_v46 = vpop.f32.mrb[149].mxu1  ;;  %v671_v57 = vld [vmem:[%s6666_s22 + $0xf80] sm:$0xff] }
 0x220   : > { %v4615_v5 = vadd.f32 %v4614_v47, %v4613_v25  ;;  %v3328_v51 = vadd.f32 %v8851_v23, %v8913_v8  ;;  %v3956_v43 = vmax.f32 %v2312_v56, 0.0  ;;  %v4618_v32 = vsel %vm4334_vm3, %v3954_v58, 0.0  ;;  %v9116_v47 = vpop.f32.mrb[150].mxu0  ;;  %v9120_v34 = vpop.f32.mrb[150].mxu1  ;;  %v416_v56 = vld [vmem:[%s6666_s22 + $0x788] sm:$0xff] }
 0x221   : > { %v4608_v60 = vadd.f32 %v4607_v22, %v4606_v63  ;;  %v5167_v17 = vadd.f32 %v5166_v48, %v5165_v13  ;;  %v5160_v6 = vadd.f32 %v5159_v15, %v5158_v39  ;;  %v2315_v8 = vadd.f32 %v8851_v23, %v8915_v12  ;;  %10611 = vst [vmem:[#allocation7_spill] sm:$0xff] %v9120_v34  ;;  %v9122_v28 = vpop.f32.mrb[151].mxu0  ;;  %v9130_v29 = vpop.f32.mrb[151].mxu1  ;;  %v672_v22 = vld [vmem:[%s6666_s22 + $0xf88] sm:$0xff]  ;;  %v418_v15 = vld [vmem:[%s6666_s22 + $0x798] sm:$0xff] }
 0x222   : > { %v4617_v49 = vadd.f32 %v4616_v14, %v4615_v5  ;;  %v4210_v44 = vmax.f32 %v3328_v51, 0.0  ;;  %10612 = vst [vmem:[#allocation6_spill] sm:$0xff] %v9122_v28  ;;  %v3339_v41 = vadd.f32 %v8851_v23, %v8927_v1  ;;  %v2307_v63 = vadd.f32 %v8851_v23, %v8929_v16  ;;  %10613 = vst [vmem:[#allocation9_spill] sm:$0xff] %v9130_v29  ;;  %v417_v16 = vld [vmem:[%s6666_s22 + $0x790] sm:$0xff]  ;;  %v674_v28 = vld [vmem:[%s6666_s22 + $0xf98] sm:$0xff] }
 0x223   : > { %v4609_v48 = vrot.slane %v4608_v60, 1  ;;  %v5169_v62 = vadd.f32 %v5168_v38, %v5167_v17  ;;  %v5161_v39 = vrot.slane %v5160_v6, 1  ;;  %v4212_v12 = vmax.f32 %v9105_v50, 0.0  ;;  %v673_v50 = vld [vmem:[%s6666_s22 + $0xf90] sm:$0xff] }
 0x224   : > { %v4619_v14 = vadd.f32 %v4618_v32, %v4617_v49  ;;  %v5170_v25 = vsel %vm4334_vm3, %v4210_v44, 0.0  ;;  %v4622_v1 = vsel %vm4334_vm3, %v3956_v43, 0.0  ;;  %v3955_v58 = vmax.f32 %v2307_v63, 0.0 }
 0x225   : > { %v4610_v38 = vadd.f32 %v4609_v48, %v4608_v60  ;;  %v5171_v13 = vadd.f32 %v5170_v25, %v5169_v62  ;;  %v5162_v5 = vadd.f32 %v5161_v39, %v5160_v6  ;;  %v3957_v51 = vmax.f32 %v2315_v8, 0.0  ;;  %v9144_v60 = vpop.f32.mrb[152].mxu0 }
 0x226   : > { %v3331_v17 = vadd.f32 %v8851_v23, %v8938_v54  ;;  %v807_v29 = vpack.c.bf16 %v416_v56, %v415_v26  ;;  %v4213_v49 = vmax.f32 %v3339_v41, 0.0  ;;  %v4620_v44 = vsel %vm4334_vm3, %v3955_v58, 0.0  ;;  %v9147_v8 = vpop.f32.mrb[152].mxu1  ;;  %v9149_v63 = vpop.f32.mrb[153].mxu0 }
 0x227   : > { %v5443_v32 = vmul.f32 0.00390625, %v4610_v38  ;;  %v935_v34 = vpack.c.bf16 %v672_v22, %v671_v57  ;;  %v5451_v43 = vmul.f32 0.00390625, %v5162_v5  ;;  %v4621_v48 = vadd.f32 %v4620_v44, %v4619_v14  ;;  %v9166_v39 = vpop.f32.mrb[154].mxu0  ;;  %v420_v5 = vld [vmem:[%s6666_s22 + $0x7a8] sm:$0xff] }
 0x228   : > { %v4211_v62 = vmax.f32 %v3331_v17, 0.0  ;;  %6325 = vmatprep.mubr.msk.bf16.mxu0 %vm965_vm2, %v807_v29  ;;  %v808_v6 = vpack.c.bf16 %v418_v15, %v417_v16  ;;  %v936_v41 = vpack.c.bf16 %v674_v28, %v673_v50  ;;  %v9158_v26 = vadd.f32 %v8851_v23, %v8960_v10  ;;  %v9164_v29 = vpop.f32.mrb[153].mxu1  ;;  %v676_v44 = vld [vmem:[%s6666_s22 + $0xfa8] sm:$0xff] }
 0x229   : > { %v9153_v54 = vsel %vm5476_vm6, %v5443_v32, %v8672_v31  ;;  %6581 = vmatprep.mubr.msk.bf16.mxu1 %vm965_vm2, %v935_v34  ;;  %v9162_v56 = vadd.f32 %v8851_v23, %v8964_v3  ;;  %v9170_v14 = vsel %vm5476_vm6, %v5451_v43, %v8681_v0  ;;  %v4623_v31 = vadd.f32 %v4622_v1, %v4621_v48  ;;  %v9176_v28 = vpop.f32.mrb[154].mxu1  ;;  %v9178_v3 = vpop.f32.mrb[155].mxu0  ;;  %v422_v43 = vld [vmem:[%s6666_s22 + $0x7b8] sm:$0xff] }
 0x22a   : > { %10614 = vst [vmem:[#allocation8_spill] sm:$0xff] %v9153_v54  ;;  %10615 = vst [vmem:[#allocation11_spill] sm:$0xff] %v9170_v14  ;;  %v5172_v34 = vsel %vm4334_vm3, %v4211_v62, 0.0  ;;  %6326 = vmatmul.mubr.msk.bf16.gmra.mrb[240].mxu0 %vm965_vm2, %v808_v6  ;;  %v2320_v10 = vadd.f32 %v8851_v23, %v8966_v53  ;;  %v5174_v25 = vsel %vm4334_vm3, %v4212_v12, 0.0  ;;  %v4624_v0 = vsel %vm4334_vm3, %v3957_v51, 0.0  ;;  %6582 = vmatmul.mubr.msk.bf16.gmra.mrb[240].mxu1 %vm965_vm2, %v936_v41  ;;  %v9185_v38 = vpop.f32.mrb[155].mxu1 }
 0x22b   : > { %v5173_v57 = vadd.f32 %v5172_v34, %v5171_v13  ;;  %v3344_v22 = vadd.f32 %v8851_v23, %v8968_v30  ;;  %v4625_v1 = vadd.f32 %v4624_v0, %v4623_v31  ;;  %v2331_v58 = vadd.f32 %v8851_v23, %v8970_v9  ;;  %v419_v30 = vld [vmem:[%s6666_s22 + $0x7a0] sm:$0xff]  ;;  %v677_v41 = vld [vmem:[%s6666_s22 + $0xfb0] sm:$0xff]  ;;  %v678_v31 = vld [vmem:[%s6666_s22 + $0xfb8] sm:$0xff] }
 0x22c   : > { %v3958_v53 = vmax.f32 %v2320_v10, 0.0  ;;  %v3355_v12 = vadd.f32 %v8851_v23, %v8976_v35  ;;  %v5176_v13 = vsel %vm4334_vm3, %v4213_v49, 0.0  ;;  %v675_v51 = vld [vmem:[%s6666_s22 + $0xfa0] sm:$0xff]  ;;  %v3960_v17 = vmax.f32 %v9158_v26, 0.0  ;;  %v421_v35 = vld [vmem:[%s6666_s22 + $0x7b0] sm:$0xff] }
 0x22d   : > { %v5175_v16 = vadd.f32 %v5174_v25, %v5173_v57  ;;  %v4214_v15 = vmax.f32 %v3344_v22, 0.0  ;;  %v4216_v50 = vmax.f32 %v9162_v56, 0.0  ;;  %v2323_v9 = vadd.f32 %v8851_v23, %v8978_v42 }
 0x22e   : > { %v4626_v32 = vsel %vm4334_vm3, %v3958_v53, 0.0  ;;  %v3347_v6 = vadd.f32 %v8851_v23, %v8990_v59  ;;  %v9208_v26 = vpop.f32.mrb[156].mxu0  ;;  %v3961_v56 = vmax.f32 %v2331_v58, 0.0  ;;  %v4217_v34 = vmax.f32 %v3355_v12, 0.0 }
 0x22f   : > { %v4627_v49 = vadd.f32 %v4626_v32, %v4625_v1  ;;  %v5177_v48 = vadd.f32 %v5176_v13, %v5175_v16  ;;  %v5178_v62 = vsel %vm4334_vm3, %v4214_v15, 0.0  ;;  %v3959_v10 = vmax.f32 %v2323_v9, 0.0  ;;  %v9210_v0 = vpop.f32.mrb[156].mxu1  ;;  %v9212_v42 = vpop.f32.mrb[157].mxu0 }
 0x230   : > { %v809_v25 = vpack.c.bf16 %v420_v5, %v419_v30  ;;  %v4215_v22 = vmax.f32 %v3347_v6, 0.0  ;;  %v937_v53 = vpack.c.bf16 %v676_v44, %v675_v51  ;;  %v810_v1 = vpack.c.bf16 %v422_v43, %v421_v35  ;;  %v9214_v13 = vpop.f32.mrb[157].mxu1  ;;  %v9216_v16 = vpop.f32.mrb[158].mxu0  ;;  %v423_v6 = vld [vmem:[%s6666_s22 + $0x7c0] sm:$0xff] }
 0x231   : > { %v5179_v57 = vadd.f32 %v5178_v62, %v5177_v48  ;;  %v4628_v59 = vsel %vm4334_vm3, %v3959_v10, 0.0  ;;  %v938_v58 = vpack.c.bf16 %v678_v31, %v677_v41  ;;  %v2344_v12 = vadd.f32 %v8851_v23, %v9012_v27  ;;  %v9226_v30 = vpop.f32.mrb[158].mxu1  ;;  %v9228_v5 = vpop.f32.mrb[159].mxu0  ;;  %v424_v10 = vld [vmem:[%s6666_s22 + $0x7c8] sm:$0xff] }
 0x232   : > { %6329 = vmatprep.mubr.msk.bf16.mxu0 %vm965_vm2, %v809_v25  ;;  %v9224_v15 = vadd.f32 %v8851_v23, %v9020_v2  ;;  %v4629_v51 = vadd.f32 %v4628_v59, %v4627_v49  ;;  %v5180_v32 = vsel %vm4334_vm3, %v4215_v22, 0.0  ;;  %6585 = vmatprep.mubr.msk.bf16.mxu1 %vm965_vm2, %v937_v53  ;;  %v2336_v9 = vadd.f32 %v8851_v23, %v9022_v11  ;;  %v9237_v2 = vpop.f32.mrb[159].mxu1  ;;  %v679_v25 = vld [vmem:[%s6666_s22 + $0xfc0] sm:$0xff]  ;;  %v425_v59 = vld [vmem:[%s6666_s22 + $0x7d0] sm:$0xff] }
 0x233   : > { %6330 = vmatmul.mubr.msk.bf16.gmra.mrb[244].mxu0 %vm965_vm2, %v810_v1  ;;  %v3360_v27 = vadd.f32 %v8851_v23, %v9026_v61  ;;  %v4630_v44 = vsel %vm4334_vm3, %v3960_v17, 0.0  ;;  %v5182_v35 = vsel %vm4334_vm3, %v4216_v50, 0.0  ;;  %v5181_v43 = vadd.f32 %v5180_v32, %v5179_v57  ;;  %6586 = vmatmul.mubr.msk.bf16.gmra.mrb[244].mxu1 %vm965_vm2, %v938_v58  ;;  %v680_v57 = vld [vmem:[%s6666_s22 + $0xfc8] sm:$0xff]  ;;  %v681_v32 = vld [vmem:[%s6666_s22 + $0xfd0] sm:$0xff] }
 0x234   : > { %v3964_v49 = vmax.f32 %v2344_v12, 0.0  ;;  %v4631_v48 = vadd.f32 %v4630_v44, %v4629_v51  ;;  %v3962_v62 = vmax.f32 %v2336_v9, 0.0  ;;  %v2347_v61 = vadd.f32 %v8851_v23, %v9028_v55  ;;  %v682_v9 = vld [vmem:[%s6666_s22 + $0xfd8] sm:$0xff] }
 0x235   : > { %v4218_v11 = vmax.f32 %v3360_v27, 0.0  ;;  %v4632_v41 = vsel %vm4334_vm3, %v3961_v56, 0.0  ;;  %v5184_v17 = vsel %vm4334_vm3, %v4217_v34, 0.0  ;;  %v5183_v31 = vadd.f32 %v5182_v35, %v5181_v43  ;;  %v426_v56 = vld [vmem:[%s6666_s22 + $0x7d8] sm:$0xff] }
 0x236   : > { %v4220_v50 = vmax.f32 %v9224_v15, 0.0  ;;  %v4633_v22 = vadd.f32 %v4632_v41, %v4631_v48  ;;  %v4634_v53 = vsel %vm4334_vm3, %v3962_v62, 0.0  ;;  %v3371_v55 = vadd.f32 %v8851_v23, %v9030_v37 }
 0x237   : > { %v5186_v1 = vsel %vm4334_vm3, %v4218_v11, 0.0  ;;  %v9257_v58 = vpop.f32.mrb[160].mxu0  ;;  %v4638_v34 = vsel %vm4334_vm3, %v3964_v49, 0.0  ;;  %v5185_v12 = vadd.f32 %v5184_v17, %v5183_v31  ;;  %v2339_v15 = vadd.f32 %v8851_v23, %v9032_v45 }
 0x238   : > { %v3363_v51 = vadd.f32 %v8851_v23, %v9038_v36  ;;  %v9266_v27 = vpop.f32.mrb[160].mxu1  ;;  %v9268_v44 = vpop.f32.mrb[161].mxu0  ;;  %v4635_v37 = vadd.f32 %v4634_v53, %v4633_v22  ;;  %v3965_v35 = vmax.f32 %v2347_v61, 0.0  ;;  %v811_v43 = vpack.c.bf16 %v424_v10, %v423_v6 }
 0x239   : > { %v939_v48 = vpack.c.bf16 %v680_v57, %v679_v25  ;;  %v9270_v62 = vpop.f32.mrb[161].mxu1  ;;  %v9272_v49 = vpop.f32.mrb[162].mxu0  ;;  %v5187_v11 = vadd.f32 %v5186_v1, %v5185_v12  ;;  %v3963_v41 = vmax.f32 %v2339_v15, 0.0  ;;  %v812_v17 = vpack.c.bf16 %v426_v56, %v425_v59 }
 0x23a   : > { %v4219_v45 = vmax.f32 %v3363_v51, 0.0  ;;  %v9274_v31 = vpop.f32.mrb[162].mxu1  ;;  %v9276_v36 = vpop.f32.mrb[163].mxu0  ;;  %v4221_v14 = vmax.f32 %v3371_v55, 0.0  ;;  %6333 = vmatprep.mubr.msk.bf16.mxu0 %vm965_vm2, %v811_v43  ;;  %v940_v61 = vpack.c.bf16 %v682_v9, %v681_v32  ;;  %v2360_v6 = vadd.f32 %v8851_v23, %v9062_v18  ;;  %v10616_v51 = vld [vmem:[#allocation4_spill] sm:$0xff]  ;;  %v427_v32 = vld [vmem:[%s6666_s22 + $0x7e0] sm:$0xff] }
 0x23b   : > { %6589 = vmatprep.mubr.msk.bf16.mxu1 %vm965_vm2, %v939_v48  ;;  %v3384_v10 = vadd.f32 %v8851_v23, %v9066_v52  ;;  %v9284_v25 = vpop.f32.mrb[163].mxu1  ;;  %v4636_v57 = vsel %vm4334_vm3, %v3963_v41, 0.0  ;;  %6334 = vmatmul.mubr.msk.bf16.gmra.mrb[248].mxu0 %vm965_vm2, %v812_v17  ;;  %v2352_v53 = vadd.f32 %v8851_v23, %v9068_v20  ;;  %v3376_v1 = vadd.f32 %v8851_v23, %v9076_v21  ;;  %v683_v48 = vld [vmem:[%s6666_s22 + $0xfe0] sm:$0xff] }
 0x23c   : > { %v5188_v22 = vsel %vm4334_vm3, %v4219_v45, 0.0  ;;  %v5190_v18 = vsel %vm4334_vm3, %v4220_v50, 0.0  ;;  %v4637_v52 = vadd.f32 %v4636_v57, %v4635_v37  ;;  %6590 = vmatmul.mubr.msk.bf16.gmra.mrb[248].mxu1 %vm965_vm2, %v940_v61  ;;  %v3968_v59 = vmax.f32 %v2360_v6, 0.0  ;;  %v428_v37 = vld [vmem:[%s6666_s22 + $0x7e8] sm:$0xff] }
 0x23d   : > { %v5189_v55 = vadd.f32 %v5188_v22, %v5187_v11  ;;  %v4224_v56 = vmax.f32 %v3384_v10, 0.0  ;;  %v3966_v12 = vmax.f32 %v2352_v53, 0.0  ;;  %v4222_v15 = vmax.f32 %v3376_v1, 0.0  ;;  %v684_v11 = vld [vmem:[%s6666_s22 + $0xfe8] sm:$0xff]  ;;  %v430_v1 = vld [vmem:[%s6666_s22 + $0x7f8] sm:$0xff] }
 0x23e   : > { %v2363_v20 = vadd.f32 %v8851_v23, %v10616_v51  ;;  %v4640_v9 = vsel %vm4334_vm3, %v3965_v35, 0.0  ;;  %v5192_v21 = vsel %vm4334_vm3, %v4221_v14, 0.0  ;;  %v4639_v43 = vadd.f32 %v4638_v34, %v4637_v52  ;;  %v429_v14 = vld [vmem:[%s6666_s22 + $0x7f0] sm:$0xff]  ;;  %v686_v52 = vld [vmem:[%s6666_s22 + $0xff8] sm:$0xff] }
 0x23f   : > { %v5191_v50 = vadd.f32 %v5190_v18, %v5189_v55  ;;  %v4646_v45 = vsel %vm4334_vm3, %v3968_v59, 0.0  ;;  %v4642_v17 = vsel %vm4334_vm3, %v3966_v12, 0.0  ;;  %v5194_v61 = vsel %vm4334_vm3, %v4222_v15, 0.0  ;;  %v685_v18 = vld [vmem:[%s6666_s22 + $0xff0] sm:$0xff] }
 0x240   : > { %v9303_v41 = vpop.f32.mrb[164].mxu0  ;;  %v3387_v35 = vadd.f32 %v8851_v23, %v9082_v19  ;;  %v4641_v10 = vadd.f32 %v4640_v9, %v4639_v43  ;;  %v2355_v22 = vadd.f32 %v8851_v23, %v9084_v40  ;;  %v3379_v53 = vadd.f32 %v8851_v23, %v9086_v24 }
 0x241   : > { %v9311_v34 = vpop.f32.mrb[164].mxu1  ;;  %v9313_v6 = vpop.f32.mrb[165].mxu0  ;;  %v5193_v57 = vadd.f32 %v5192_v21, %v5191_v50  ;;  %v5198_v19 = vsel %vm4334_vm3, %v4224_v56, 0.0  ;;  %v3969_v12 = vmax.f32 %v2363_v20, 0.0  ;;  %v813_v15 = vpack.c.bf16 %v428_v37, %v427_v32 }
 0x242   : > { %10617 = vst [vmem:[#allocation10_spill] sm:$0xff] %v9313_v6  ;;  %v9322_v55 = vpop.f32.mrb[165].mxu1  ;;  %v9324_v59 = vpop.f32.mrb[166].mxu0  ;;  %v941_v51 = vpack.c.bf16 %v684_v11, %v683_v48  ;;  %v4643_v40 = vadd.f32 %v4642_v17, %v4641_v10  ;;  %v3967_v50 = vmax.f32 %v2355_v22, 0.0  ;;  %v4223_v24 = vmax.f32 %v3379_v53, 0.0  ;;  %v10619_v22 = vld [vmem:[#allocation7_spill] sm:$0xff] }
 0x243   : > { %10618 = vst [vmem:[#allocation13_spill] sm:$0xff] %v9324_v59  ;;  %v9327_v9 = vpop.f32.mrb[166].mxu1  ;;  %v9329_v21 = vpop.f32.mrb[167].mxu0  ;;  %v5195_v43 = vadd.f32 %v5194_v61, %v5193_v57  ;;  %v4225_v6 = vmax.f32 %v3387_v35, 0.0  ;;  %6337 = vmatprep.mubr.msk.bf16.mxu0 %vm965_vm2, %v813_v15  ;;  %v814_v59 = vpack.c.bf16 %v430_v1, %v429_v14  ;;  %v942_v56 = vpack.c.bf16 %v686_v52, %v685_v18 }
 0x244   : > { %v9331_v54 = vpop.f32.mrb[167].mxu1  ;;  %6593 = vmatprep.mubr.msk.bf16.mxu1 %vm965_vm2, %v941_v51  ;;  %v2376_v20 = vadd.f32 %v8851_v23, %v9101_v7  ;;  %v4644_v32 = vsel %vm4334_vm3, %v3967_v50, 0.0  ;;  %v5196_v37 = vsel %vm4334_vm3, %v4223_v24, 0.0  ;;  %v3400_v48 = vadd.f32 %v8851_v23, %v9109_v4  ;;  %v10620_v24 = vld [vmem:[#allocation6_spill] sm:$0xff] }
 0x245   : > { %v2368_v11 = vadd.f32 %v8851_v23, %v9111_v33  ;;  %v4645_v17 = vadd.f32 %v4644_v32, %v4643_v40  ;;  %v5197_v61 = vadd.f32 %v5196_v37, %v5195_v43  ;;  %6338 = vmatmul.mubr.msk.bf16.gmra.mrb[252].mxu0 %vm965_vm2, %v814_v59  ;;  %6594 = vmatmul.mubr.msk.bf16.gmra.mrb[252].mxu1 %vm965_vm2, %v942_v56  ;;  %v4648_v33 = vsel %vm4334_vm3, %v3969_v12, 0.0 }
 0x246   : > { %v3972_v35 = vmax.f32 %v2376_v20, 0.0  ;;  %v3392_v7 = vadd.f32 %v8851_v23, %v9114_v46  ;;  %v4228_v14 = vmax.f32 %v3400_v48, 0.0  ;;  %v2379_v57 = vadd.f32 %v8851_v23, %v9116_v47  ;;  %v9376_v48 = vld [vmem:[%s10274_s2] ss:$0 sm:$0xff] }
 0x247   : > { %v3970_v10 = vmax.f32 %v2368_v11, 0.0  ;;  %v3403_v4 = vadd.f32 %v8851_v23, %v10619_v22  ;;  %v4647_v1 = vadd.f32 %v4646_v45, %v4645_v17  ;;  %v5199_v18 = vadd.f32 %v5198_v19, %v5197_v61  ;;  %v10621_v11 = vld [vmem:[#allocation9_spill] sm:$0xff] }
 0x248   : > { %v4226_v52 = vmax.f32 %v3392_v7, 0.0  ;;  %v5200_v46 = vsel %vm4334_vm3, %v4225_v6, 0.0  ;;  %v4654_v51 = vsel %vm4334_vm3, %v3972_v35, 0.0  ;;  %v5206_v47 = vsel %vm4334_vm3, %v4228_v14, 0.0 }
 0x249   : > { %v9351_v53 = vpop.f32.mrb[168].mxu0  ;;  %v4650_v40 = vsel %vm4334_vm3, %v3970_v10, 0.0  ;;  %v4649_v12 = vadd.f32 %v4648_v33, %v4647_v1  ;;  %v5201_v45 = vadd.f32 %v5200_v46, %v5199_v18  ;;  %v2371_v56 = vadd.f32 %v8851_v23, %v10620_v24 }
 0x24a   : > { %v9354_v59 = vpop.f32.mrb[168].mxu1  ;;  %v9356_v15 = vpop.f32.mrb[169].mxu0  ;;  %v5202_v19 = vsel %vm4334_vm3, %v4226_v52, 0.0  ;;  %v3973_v32 = vmax.f32 %v2379_v57, 0.0  ;;  %v4229_v37 = vmax.f32 %v3403_v4, 0.0  ;;  %v3395_v17 = vadd.f32 %v9376_v48, %v10621_v11 }
 0x24b   : > { %v9362_v43 = vpop.f32.mrb[169].mxu1  ;;  %v9364_v50 = vpop.f32.mrb[170].mxu0  ;;  %v2392_v61 = vadd.f32 %v9376_v48, %v9144_v60  ;;  %v4651_v23 = vadd.f32 %v4650_v40, %v4649_v12  ;;  %v5203_v7 = vadd.f32 %v5202_v19, %v5201_v45  ;;  %v3971_v14 = vmax.f32 %v2371_v56, 0.0 }
 0x24c   : > { %v9369_v20 = vpop.f32.mrb[170].mxu1  ;;  %v9371_v6 = vpop.f32.mrb[171].mxu0  ;;  %v3416_v10 = vadd.f32 %v9376_v48, %v9147_v8  ;;  %v4227_v57 = vmax.f32 %v3395_v17, 0.0  ;;  %v2384_v4 = vadd.f32 %v9376_v48, %v9149_v63  ;;  %v3408_v33 = vadd.f32 %v9376_v48, %v9164_v29 }
 0x24d   : > { %v9382_v35 = vpop.f32.mrb[171].mxu1  ;;  %v3976_v22 = vmax.f32 %v2392_v61, 0.0  ;;  %v4652_v1 = vsel %vm4334_vm3, %v3971_v14, 0.0  ;;  %v2395_v60 = vadd.f32 %v9376_v48, %v9166_v39  ;;  %v3419_v52 = vadd.f32 %v9376_v48, %v9176_v28 }
 0x24e   : > { %v4232_v18 = vmax.f32 %v3416_v10, 0.0  ;;  %v4656_v46 = vsel %vm4334_vm3, %v3973_v32, 0.0  ;;  %v4653_v8 = vadd.f32 %v4652_v1, %v4651_v23  ;;  %v5204_v40 = vsel %vm4334_vm3, %v4227_v57, 0.0 }
 0x24f   : > { %v3974_v12 = vmax.f32 %v2384_v4, 0.0  ;;  %v5208_v63 = vsel %vm4334_vm3, %v4229_v37, 0.0  ;;  %v5205_v29 = vadd.f32 %v5204_v40, %v5203_v7  ;;  %v4662_v19 = vsel %vm4334_vm3, %v3976_v22, 0.0 }
 0x250   : > { %v4230_v24 = vmax.f32 %v3408_v33, 0.0  ;;  %v4655_v11 = vadd.f32 %v4654_v51, %v4653_v8  ;;  %v5214_v28 = vsel %vm4334_vm3, %v4232_v18, 0.0  ;;  %v3977_v32 = vmax.f32 %v2395_v60, 0.0 }
 0x251   : > { %v2387_v17 = vadd.f32 %v9376_v48, %v9178_v3  ;;  %v5207_v37 = vadd.f32 %v5206_v47, %v5205_v29  ;;  %v4658_v7 = vsel %vm4334_vm3, %v3974_v12, 0.0  ;;  %v4233_v14 = vmax.f32 %v3419_v52, 0.0 }
 0x252   : > { %v9397_v45 = vpop.f32.mrb[172].mxu0  ;;  %v3411_v10 = vadd.f32 %v9376_v48, %v9185_v38  ;;  %v4657_v22 = vadd.f32 %v4656_v46, %v4655_v11  ;;  %v5210_v4 = vsel %vm4334_vm3, %v4230_v24, 0.0  ;;  %v2408_v3 = vadd.f32 %v9376_v48, %v9208_v26 }
 0x253   : > { %v9401_v56 = vpop.f32.mrb[172].mxu1  ;;  %v9403_v39 = vpop.f32.mrb[173].mxu0  ;;  %v3975_v33 = vmax.f32 %v2387_v17, 0.0  ;;  %v5209_v47 = vadd.f32 %v5208_v63, %v5207_v37  ;;  %v3432_v60 = vadd.f32 %v9376_v48, %v9210_v0  ;;  %v2400_v38 = vadd.f32 %v9376_v48, %v9212_v42 }
 0x254   : > { %v9408_v61 = vpop.f32.mrb[173].mxu1  ;;  %v9410_v23 = vpop.f32.mrb[174].mxu0  ;;  %v4231_v18 = vmax.f32 %v3411_v10, 0.0  ;;  %v4659_v52 = vadd.f32 %v4658_v7, %v4657_v22  ;;  %v3980_v46 = vmax.f32 %v2408_v3, 0.0  ;;  %v3424_v40 = vadd.f32 %v9376_v48, %v9214_v13 }
 0x255   : > { %v9415_v57 = vpop.f32.mrb[174].mxu1  ;;  %v9417_v51 = vpop.f32.mrb[175].mxu0  ;;  %v4660_v8 = vsel %vm4334_vm3, %v3975_v33, 0.0  ;;  %v5211_v12 = vadd.f32 %v5210_v4, %v5209_v47  ;;  %v4664_v26 = vsel %vm4334_vm3, %v3977_v32, 0.0  ;;  %v3978_v63 = vmax.f32 %v2400_v38, 0.0 }
 0x256   : > { %v9422_v1 = vpop.f32.mrb[175].mxu1  ;;  %v5212_v29 = vsel %vm4334_vm3, %v4231_v18, 0.0  ;;  %v5216_v24 = vsel %vm4334_vm3, %v4233_v14, 0.0  ;;  %v4661_v11 = vadd.f32 %v4660_v8, %v4659_v52  ;;  %v4234_v0 = vmax.f32 %v3424_v40, 0.0 }
 0x257   : > { %v2411_v42 = vadd.f32 %v9376_v48, %v9216_v16  ;;  %v5213_v17 = vadd.f32 %v5212_v29, %v5211_v12  ;;  %v4670_v37 = vsel %vm4334_vm3, %v3980_v46, 0.0  ;;  %v4236_v7 = vmax.f32 %v3432_v60, 0.0 }
 0x258   : > { %v3435_v13 = vadd.f32 %v9376_v48, %v9226_v30  ;;  %v4663_v10 = vadd.f32 %v4662_v19, %v4661_v11  ;;  %v4666_v32 = vsel %vm4334_vm3, %v3978_v63, 0.0  ;;  %v2403_v4 = vadd.f32 %v9376_v48, %v9228_v5 }
 0x259   : > { %v3981_v22 = vmax.f32 %v2411_v42, 0.0  ;;  %v5215_v14 = vadd.f32 %v5214_v28, %v5213_v17  ;;  %v5218_v33 = vsel %vm4334_vm3, %v4234_v0, 0.0  ;;  %v3427_v16 = vadd.f32 %v9376_v48, %v9237_v2 }
 0x25a   : > { %v2424_v3 = vadd.f32 %v9376_v48, %v9257_v58  ;;  %v4665_v47 = vadd.f32 %v4664_v26, %v4663_v10  ;;  %v4237_v18 = vmax.f32 %v3435_v13, 0.0  ;;  %v3979_v60 = vmax.f32 %v2403_v4, 0.0 }
 0x25b   : > { %v3448_v30 = vadd.f32 %v9376_v48, %v9266_v27  ;;  %v5222_v19 = vsel %vm4334_vm3, %v4236_v7, 0.0  ;;  %v5217_v38 = vadd.f32 %v5216_v24, %v5215_v14  ;;  %v4672_v5 = vsel %vm4334_vm3, %v3981_v22, 0.0 }
 0x25c   : > { %v4235_v28 = vmax.f32 %v3427_v16, 0.0  ;;  %v4667_v52 = vadd.f32 %v4666_v32, %v4665_v47  ;;  %v4668_v8 = vsel %vm4334_vm3, %v3979_v60, 0.0  ;;  %v3984_v46 = vmax.f32 %v2424_v3, 0.0 }
 0x25d   : > { %v2416_v2 = vadd.f32 %v9376_v48, %v9268_v44  ;;  %v5219_v58 = vadd.f32 %v5218_v33, %v5217_v38  ;;  %v4240_v12 = vmax.f32 %v3448_v30, 0.0  ;;  %v3440_v27 = vadd.f32 %v9376_v48, %v9270_v62 }
 0x25e   : > { %v5220_v40 = vsel %vm4334_vm3, %v4235_v28, 0.0  ;;  %v5224_v26 = vsel %vm4334_vm3, %v4237_v18, 0.0  ;;  %v4669_v29 = vadd.f32 %v4668_v8, %v4667_v52  ;;  %v2427_v24 = vadd.f32 %v9376_v48, %v9272_v49  ;;  %v10622_v8 = vld [vmem:[#allocation10_spill] sm:$0xff] }
 0x25f   : > { %v3982_v63 = vmax.f32 %v2416_v2, 0.0  ;;  %v5221_v11 = vadd.f32 %v5220_v40, %v5219_v58  ;;  %v4238_v0 = vmax.f32 %v3440_v27, 0.0  ;;  %v3451_v42 = vadd.f32 %v9376_v48, %v9274_v31 }
 0x260   : > { %v2419_v44 = vadd.f32 %v9376_v48, %v9276_v36  ;;  %v4671_v17 = vadd.f32 %v4670_v37, %v4669_v29  ;;  %v4683_v7 = vsel %vm4334_vm3, %v3984_v46, 0.0  ;;  %v3985_v13 = vmax.f32 %v2427_v24, 0.0 }
 0x261   : > { %v3443_v62 = vadd.f32 %v9376_v48, %v9284_v25  ;;  %v5223_v10 = vadd.f32 %v5222_v19, %v5221_v11  ;;  %v5235_v32 = vsel %vm4334_vm3, %v4240_v12, 0.0  ;;  %v4241_v22 = vmax.f32 %v3451_v42, 0.0 }
 0x262   : > { %v3983_v49 = vmax.f32 %v2419_v44, 0.0  ;;  %v4673_v4 = vadd.f32 %v4672_v5, %v4671_v17  ;;  %v4680_v14 = vsel %vm4334_vm3, %v3982_v63, 0.0  ;;  %v2440_v31 = vadd.f32 %v9376_v48, %v9303_v41 }
 0x263   : > { %v4239_v33 = vmax.f32 %v3443_v62, 0.0  ;;  %v5225_v36 = vadd.f32 %v5224_v26, %v5223_v10  ;;  %v5232_v37 = vsel %vm4334_vm3, %v4238_v0, 0.0  ;;  %v3464_v25 = vadd.f32 %v9376_v48, %v9311_v34 }
 0x264   : > { %v4681_v16 = vsel %vm4334_vm3, %v3983_v49, 0.0  ;;  %v9475_v3 = vpop.f32.mrb[176].mxu0  ;;  %v4674_v18 = vrot.slane %v4673_v4, 4  ;;  %v4685_v60 = vsel %vm4334_vm3, %v3985_v13, 0.0  ;;  %v5237_v28 = vsel %vm4334_vm3, %v4241_v22, 0.0  ;;  %v10623_v13 = vld [vmem:[#allocation13_spill] sm:$0xff] }
 0x265   : > { %v9477_v47 = vpop.f32.mrb[176].mxu1  ;;  %v4682_v30 = vadd.f32 %v4681_v16, %v4680_v14  ;;  %v5233_v19 = vsel %vm4334_vm3, %v4239_v33, 0.0  ;;  %v9481_v38 = vpop.f32.mrb[177].mxu0  ;;  %v5226_v5 = vrot.slane %v5225_v36, 4  ;;  %v2432_v34 = vadd.f32 %v9376_v48, %v10622_v8 }
 0x266   : > { %v9483_v41 = vpop.f32.mrb[177].mxu1  ;;  %v5234_v52 = vadd.f32 %v5233_v19, %v5232_v37  ;;  %v9488_v46 = vpop.f32.mrb[178].mxu0  ;;  %v4675_v58 = vadd.f32 %v4674_v18, %v4673_v4  ;;  %v3988_v12 = vmax.f32 %v2440_v31, 0.0  ;;  %v3456_v27 = vadd.f32 %v9376_v48, %v9322_v55 }
 0x267   : > { %v9490_v2 = vpop.f32.mrb[178].mxu1  ;;  %v4684_v40 = vadd.f32 %v4683_v7, %v4682_v30  ;;  %v9494_v26 = vpop.f32.mrb[179].mxu0  ;;  %v5227_v63 = vadd.f32 %v5226_v5, %v5225_v36  ;;  %v4244_v11 = vmax.f32 %v3464_v25, 0.0  ;;  %v3986_v0 = vmax.f32 %v2432_v34, 0.0 }
 0x268   : > { %v9496_v29 = vpop.f32.mrb[179].mxu1  ;;  %v5236_v24 = vadd.f32 %v5235_v32, %v5234_v52  ;;  %v4676_v42 = vrot.slane %v4675_v58, 2  ;;  %v4242_v17 = vmax.f32 %v3456_v27, 0.0  ;;  %v2443_v62 = vadd.f32 %v9376_v48, %v10623_v13 }
 0x269   : > { %v4686_v44 = vadd.f32 %v4685_v60, %v4684_v40  ;;  %v5228_v7 = vrot.slane %v5227_v63, 2  ;;  %v4687_v10 = vsel %vm4334_vm3, %v3986_v0, 0.0  ;;  %v3467_v55 = vadd.f32 %v9376_v48, %v9327_v9 }
 0x26a   : > { %v5238_v22 = vadd.f32 %v5237_v28, %v5236_v24  ;;  %v4677_v49 = vadd.f32 %v4676_v42, %v4675_v58  ;;  %v5239_v14 = vsel %vm4334_vm3, %v4242_v17, 0.0  ;;  %v3989_v32 = vmax.f32 %v2443_v62, 0.0 }
 0x26b   : > { %v4688_v4 = vadd.f32 %v4687_v10, %v4686_v44  ;;  %v5229_v33 = vadd.f32 %v5228_v7, %v5227_v63  ;;  %v4245_v36 = vmax.f32 %v3467_v55, 0.0  ;;  %v2435_v37 = vadd.f32 %v9376_v48, %v9329_v21 }
 0x26c   : > { %v5240_v31 = vadd.f32 %v5239_v14, %v5238_v22  ;;  %v4678_v16 = vrot.slane %v4677_v49, 1  ;;  %v4691_v25 = vsel %vm4334_vm3, %v3988_v12, 0.0  ;;  %v3459_v18 = vadd.f32 %v9376_v48, %v9331_v54  ;;  %v10625_v14 = vld [vmem:[#allocation11_spill] sm:$0xff] }
 0x26d   : > { %v2456_v9 = vadd.f32 %v9376_v48, %v9351_v53  ;;  %v5230_v60 = vrot.slane %v5229_v33, 1  ;;  %v5243_v30 = vsel %vm4334_vm3, %v4244_v11, 0.0  ;;  %v3987_v19 = vmax.f32 %v2435_v37, 0.0 }
 0x26e   : > { %v3480_v5 = vadd.f32 %v9376_v48, %v9354_v59  ;;  %v9514_v28 = vpop.f32.mrb[180].mxu0  ;;  %v4679_v52 = vadd.f32 %v4678_v16, %v4677_v49  ;;  %v4693_v21 = vsel %vm4334_vm3, %v3989_v32, 0.0  ;;  %v4243_v8 = vmax.f32 %v3459_v18, 0.0  ;;  %v9519_v54 = vpop.f32.mrb[180].mxu1 }
 0x26f   : > { %v2448_v34 = vadd.f32 %v9376_v48, %v9356_v15  ;;  %v9521_v58 = vpop.f32.mrb[181].mxu0  ;;  %v5231_v53 = vadd.f32 %v5230_v60, %v5229_v33  ;;  %v5245_v40 = vsel %vm4334_vm3, %v4245_v36, 0.0  ;;  %v4689_v12 = vsel %vm4334_vm3, %v3987_v19, 0.0  ;;  %v9527_v27 = vpop.f32.mrb[181].mxu1 }
 0x270   : > { %v3472_v59 = vadd.f32 %v9376_v48, %v9362_v43  ;;  %v9529_v63 = vpop.f32.mrb[182].mxu0  ;;  %v5444_v24 = vmul.f32 0.00390625, %v4679_v52  ;;  %v4690_v11 = vadd.f32 %v4689_v12, %v4688_v4  ;;  %v5241_v15 = vsel %vm4334_vm3, %v4243_v8, 0.0  ;;  %v9532_v42 = vpop.f32.mrb[182].mxu1  ;;  %v10624_v43 = vld [vmem:[#allocation8_spill] sm:$0xff] }
 0x271   : > { %v3992_v0 = vmax.f32 %v2456_v9, 0.0  ;;  %v9534_v44 = vpop.f32.mrb[183].mxu0  ;;  %v5452_v17 = vmul.f32 0.00390625, %v5231_v53  ;;  %v5242_v13 = vadd.f32 %v5241_v15, %v5240_v31  ;;  %v4248_v62 = vmax.f32 %v3480_v5, 0.0  ;;  %v9536_v10 = vpop.f32.mrb[183].mxu1 }
 0x272   : > { %v3990_v7 = vmax.f32 %v2448_v34, 0.0  ;;  %v9540_v22 = vsel %vm5478_vm7, %v5444_v24, %v10624_v43  ;;  %v4692_v55 = vadd.f32 %v4691_v25, %v4690_v11  ;;  %v4246_v49 = vmax.f32 %v3472_v59, 0.0 }
 0x273   : > { %v2459_v4 = vadd.f32 %v9376_v48, %v9364_v50  ;;  %v9546_v32 = vsel %vm5478_vm7, %v5452_v17, %v10625_v14  ;;  %v5244_v33 = vadd.f32 %v5243_v30, %v5242_v13  ;;  %v3483_v36 = vadd.f32 %v9376_v48, %v9369_v20 }
 0x274   : > { %v4695_v31 = vsel %vm4334_vm3, %v3990_v7, 0.0  ;;  %v4694_v37 = vadd.f32 %v4693_v21, %v4692_v55  ;;  %v5247_v16 = vsel %vm4334_vm3, %v4246_v49, 0.0  ;;  %v2451_v25 = vadd.f32 %v9376_v48, %v9371_v6 }
 0x275   : > { %v3993_v18 = vmax.f32 %v2459_v4, 0.0  ;;  %v5246_v9 = vadd.f32 %v5245_v40, %v5244_v33  ;;  %v4249_v60 = vmax.f32 %v3483_v36, 0.0  ;;  %v3475_v50 = vadd.f32 %v9376_v48, %v9382_v35 }
 0x276   : > { %v2472_v30 = vadd.f32 %v9376_v48, %v9397_v45  ;;  %v4699_v19 = vsel %vm4334_vm3, %v3992_v0, 0.0  ;;  %v4696_v5 = vadd.f32 %v4695_v31, %v4694_v37  ;;  %v3991_v52 = vmax.f32 %v2451_v25, 0.0 }
 0x277   : > { %v3496_v20 = vadd.f32 %v9376_v48, %v9401_v56  ;;  %v9561_v21 = vpop.f32.mrb[184].mxu0  ;;  %v5251_v8 = vsel %vm4334_vm3, %v4248_v62, 0.0  ;;  %v5248_v6 = vadd.f32 %v5247_v16, %v5246_v9  ;;  %v4247_v34 = vmax.f32 %v3475_v50, 0.0 }
 0x278   : > { %v3996_v53 = vmax.f32 %v2472_v30, 0.0  ;;  %v9564_v40 = vpop.f32.mrb[184].mxu1  ;;  %v9566_v35 = vpop.f32.mrb[185].mxu0  ;;  %v4701_v45 = vsel %vm4334_vm3, %v3993_v18, 0.0  ;;  %v4697_v12 = vsel %vm4334_vm3, %v3991_v52, 0.0  ;;  %v2464_v59 = vadd.f32 %v9376_v48, %v9403_v39 }
 0x279   : > { %v3488_v56 = vadd.f32 %v9376_v48, %v9408_v61  ;;  %v9574_v24 = vpop.f32.mrb[185].mxu1  ;;  %v9576_v11 = vpop.f32.mrb[186].mxu0  ;;  %v5253_v15 = vsel %vm4334_vm3, %v4249_v60, 0.0  ;;  %v4698_v0 = vadd.f32 %v4697_v12, %v4696_v5  ;;  %v5249_v17 = vsel %vm4334_vm3, %v4247_v34, 0.0 }
 0x27a   : > { %v2475_v13 = vadd.f32 %v9376_v48, %v9410_v23  ;;  %v9582_v62 = vpop.f32.mrb[186].mxu1  ;;  %v9584_v7 = vpop.f32.mrb[187].mxu0  ;;  %v5250_v39 = vadd.f32 %v5249_v17, %v5248_v6  ;;  %v4252_v43 = vmax.f32 %v3496_v20, 0.0  ;;  %v3994_v55 = vmax.f32 %v2464_v59, 0.0 }
 0x27b   : > { %v4250_v61 = vmax.f32 %v3488_v56, 0.0  ;;  %v9586_v49 = vpop.f32.mrb[187].mxu1  ;;  %v4700_v4 = vadd.f32 %v4699_v19, %v4698_v0  ;;  %v4707_v14 = vsel %vm4334_vm3, %v3996_v53, 0.0  ;;  %v3499_v33 = vadd.f32 %v9376_v48, %v9415_v57 }
 0x27c   : > { %v2467_v31 = vadd.f32 %v9376_v48, %v9417_v51  ;;  %v5252_v23 = vadd.f32 %v5251_v8, %v5250_v39  ;;  %v4703_v36 = vsel %vm4334_vm3, %v3994_v55, 0.0  ;;  %v3997_v37 = vmax.f32 %v2475_v13, 0.0 }
 0x27d   : > { %v3491_v16 = vadd.f32 %v9376_v48, %v9422_v1  ;;  %v4702_v18 = vadd.f32 %v4701_v45, %v4700_v4  ;;  %v5255_v25 = vsel %vm4334_vm3, %v4250_v61, 0.0  ;;  %v4253_v9 = vmax.f32 %v3499_v33, 0.0 }
 0x27e   : > { %v3995_v60 = vmax.f32 %v2467_v31, 0.0  ;;  %v5254_v50 = vadd.f32 %v5253_v15, %v5252_v23  ;;  %v2488_v57 = vadd.f32 %v9376_v48, %v9475_v3  ;;  %v3512_v51 = vadd.f32 %v9376_v48, %v9477_v47 }
 0x27f   : > { %v4251_v30 = vmax.f32 %v3491_v16, 0.0  ;;  %v5259_v19 = vsel %vm4334_vm3, %v4252_v43, 0.0  ;;  %v4704_v5 = vadd.f32 %v4703_v36, %v4702_v18  ;;  %v2480_v1 = vadd.f32 %v9376_v48, %v9481_v38 }
 0x280   : > { %v4705_v52 = vsel %vm4334_vm3, %v3995_v60, 0.0  ;;  %v5256_v20 = vadd.f32 %v5255_v25, %v5254_v50  ;;  %v4000_v6 = vmax.f32 %v2488_v57, 0.0  ;;  %v4256_v34 = vmax.f32 %v3512_v51, 0.0 }
 0x281   : > { %v5257_v8 = vsel %vm4334_vm3, %v4251_v30, 0.0  ;;  %v9606_v53 = vpop.f32.mrb[188].mxu0  ;;  %v9608_v45 = vpop.f32.mrb[188].mxu1  ;;  %v4706_v3 = vadd.f32 %v4705_v52, %v4704_v5  ;;  %v3998_v12 = vmax.f32 %v2480_v1, 0.0  ;;  %v3504_v47 = vadd.f32 %v9376_v48, %v9483_v41 }
 0x282   : > { %v2491_v59 = vadd.f32 %v9376_v48, %v9488_v46  ;;  %v9614_v56 = vpop.f32.mrb[189].mxu0  ;;  %v9616_v38 = vpop.f32.mrb[189].mxu1  ;;  %v4709_v15 = vsel %vm4334_vm3, %v3997_v37, 0.0  ;;  %v5261_v0 = vsel %vm4334_vm3, %v4253_v9, 0.0  ;;  %v5258_v17 = vadd.f32 %v5257_v8, %v5256_v20 }
 0x283   : > { %v3515_v13 = vadd.f32 %v9376_v48, %v9490_v2  ;;  %v9622_v39 = vpop.f32.mrb[190].mxu0  ;;  %v9624_v43 = vpop.f32.mrb[190].mxu1  ;;  %v4708_v41 = vadd.f32 %v4707_v14, %v4706_v3  ;;  %v4715_v55 = vsel %vm4334_vm3, %v4000_v6, 0.0  ;;  %v4254_v46 = vmax.f32 %v3504_v47, 0.0 }
 0x284   : > { %v4001_v61 = vmax.f32 %v2491_v59, 0.0  ;;  %v9627_v4 = vpop.f32.mrb[191].mxu0  ;;  %v9629_v33 = vpop.f32.mrb[191].mxu1  ;;  %v5260_v31 = vadd.f32 %v5259_v19, %v5258_v17  ;;  %v4711_v23 = vsel %vm4334_vm3, %v3998_v12, 0.0  ;;  %v2483_v36 = vadd.f32 %v9376_v48, %v9494_v26 }
 0x285   : > { %v3507_v2 = vadd.f32 %v9376_v48, %v9496_v29  ;;  %v5267_v37 = vsel %vm4334_vm3, %v4256_v34, 0.0  ;;  %v4710_v14 = vadd.f32 %v4709_v15, %v4708_v41  ;;  %v5263_v16 = vsel %vm4334_vm3, %v4254_v46, 0.0 }
 0x286   : > { %v2504_v18 = vadd.f32 %v9376_v48, %v9514_v28  ;;  %v5262_v25 = vadd.f32 %v5261_v0, %v5260_v31  ;;  %v4257_v9 = vmax.f32 %v3515_v13, 0.0  ;;  %v3999_v60 = vmax.f32 %v2483_v36, 0.0 }
 0x287   : > { %v4255_v50 = vmax.f32 %v3507_v2, 0.0  ;;  %v4712_v30 = vadd.f32 %v4711_v23, %v4710_v14  ;;  %v4717_v57 = vsel %vm4334_vm3, %v4001_v61, 0.0  ;;  %v3528_v26 = vadd.f32 %v9376_v48, %v9519_v54 }
 0x288   : > { %v2496_v29 = vadd.f32 %v9376_v48, %v9521_v58  ;;  %v5264_v51 = vadd.f32 %v5263_v16, %v5262_v25  ;;  %v4713_v19 = vsel %vm4334_vm3, %v3999_v60, 0.0  ;;  %v3520_v28 = vadd.f32 %v9376_v48, %v9527_v27 }
 0x289   : > { %v5265_v5 = vsel %vm4334_vm3, %v4255_v50, 0.0  ;;  %v4714_v52 = vadd.f32 %v4713_v19, %v4712_v30  ;;  %v4004_v1 = vmax.f32 %v2504_v18, 0.0  ;;  %v4260_v20 = vmax.f32 %v3528_v26, 0.0  ;;  %v9649_v6 = vpop.f32.mrb[192].mxu0 }
 0x28a   : > { %v4002_v8 = vmax.f32 %v2496_v29, 0.0  ;;  %v9651_v34 = vpop.f32.mrb[192].mxu1  ;;  %v5266_v54 = vadd.f32 %v5265_v5, %v5264_v51  ;;  %v4258_v3 = vmax.f32 %v3520_v28, 0.0  ;;  %v2507_v58 = vadd.f32 %v9376_v48, %v9529_v63  ;;  %v9657_v47 = vpop.f32.mrb[193].mxu0 }
 0x28b   : > { %v3531_v12 = vadd.f32 %v9376_v48, %v9532_v42  ;;  %v9659_v59 = vpop.f32.mrb[193].mxu1  ;;  %v5269_v27 = vsel %vm4334_vm3, %v4257_v9, 0.0  ;;  %v4716_v15 = vadd.f32 %v4715_v55, %v4714_v52  ;;  %v2499_v17 = vadd.f32 %v9376_v48, %v9534_v44  ;;  %v9665_v13 = vpop.f32.mrb[194].mxu0 }
 0x28c   : > { %v4719_v0 = vsel %vm4334_vm3, %v4002_v8, 0.0  ;;  %v9667_v41 = vpop.f32.mrb[194].mxu1  ;;  %v5268_v63 = vadd.f32 %v5267_v37, %v5266_v54  ;;  %v5271_v46 = vsel %vm4334_vm3, %v4258_v3, 0.0  ;;  %v4005_v42 = vmax.f32 %v2507_v58, 0.0  ;;  %v9670_v31 = vpop.f32.mrb[195].mxu0 }
 0x28d   : > { %v4261_v61 = vmax.f32 %v3531_v12, 0.0  ;;  %v9672_v23 = vpop.f32.mrb[195].mxu1  ;;  %v4718_v36 = vadd.f32 %v4717_v57, %v4716_v15  ;;  %v4003_v55 = vmax.f32 %v2499_v17, 0.0  ;;  %v3523_v2 = vadd.f32 %v9376_v48, %v9536_v10 }
 0x28e   : > { %v2520_v44 = vadd.f32 %v9376_v48, %v9561_v21  ;;  %v4723_v14 = vsel %vm4334_vm3, %v4004_v1, 0.0  ;;  %v5275_v37 = vsel %vm4334_vm3, %v4260_v20, 0.0  ;;  %v5270_v16 = vadd.f32 %v5269_v27, %v5268_v63 }
 0x28f   : > { %v3544_v18 = vadd.f32 %v9376_v48, %v9564_v40  ;;  %v4720_v25 = vadd.f32 %v4719_v0, %v4718_v36  ;;  %v4721_v9 = vsel %vm4334_vm3, %v4003_v55, 0.0  ;;  %v4259_v60 = vmax.f32 %v3523_v2, 0.0 }
 0x290   : > { %v4008_v50 = vmax.f32 %v2520_v44, 0.0  ;;  %v5272_v30 = vadd.f32 %v5271_v46, %v5270_v16  ;;  %v4725_v57 = vsel %vm4334_vm3, %v4005_v42, 0.0  ;;  %v2512_v10 = vadd.f32 %v9376_v48, %v9566_v35 }
 0x291   : > { %v3536_v21 = vadd.f32 %v9376_v48, %v9574_v24  ;;  %v5277_v26 = vsel %vm4334_vm3, %v4261_v61, 0.0  ;;  %v4722_v29 = vadd.f32 %v4721_v9, %v4720_v25  ;;  %v5273_v51 = vsel %vm4334_vm3, %v4259_v60, 0.0 }
 0x292   : > { %v2523_v40 = vadd.f32 %v9376_v48, %v9576_v11  ;;  %v9692_v19 = vpop.f32.mrb[196].mxu0  ;;  %v5274_v5 = vadd.f32 %v5273_v51, %v5272_v30  ;;  %v4264_v28 = vmax.f32 %v3544_v18, 0.0  ;;  %v4006_v52 = vmax.f32 %v2512_v10, 0.0 }
 0x293   : > { %v4262_v1 = vmax.f32 %v3536_v21, 0.0  ;;  %v9694_v20 = vpop.f32.mrb[196].mxu1  ;;  %v9696_v35 = vpop.f32.mrb[197].mxu0  ;;  %v4724_v8 = vadd.f32 %v4723_v14, %v4722_v29  ;;  %v4731_v24 = vsel %vm4334_vm3, %v4008_v50, 0.0  ;;  %v3547_v54 = vadd.f32 %v9376_v48, %v9582_v62 }
 0x294   : > { %v2515_v3 = vadd.f32 %v9376_v48, %v9584_v7  ;;  %v9703_v11 = vpop.f32.mrb[197].mxu1  ;;  %v9705_v58 = vpop.f32.mrb[198].mxu0  ;;  %v5276_v12 = vadd.f32 %v5275_v37, %v5274_v5  ;;  %v4727_v27 = vsel %vm4334_vm3, %v4006_v52, 0.0  ;;  %v4009_v15 = vmax.f32 %v2523_v40, 0.0 }
 0x295   : > { %v3539_v0 = vadd.f32 %v9376_v48, %v9586_v49  ;;  %v9710_v17 = vpop.f32.mrb[198].mxu1  ;;  %v9712_v63 = vpop.f32.mrb[199].mxu0  ;;  %v4726_v46 = vadd.f32 %v4725_v57, %v4724_v8  ;;  %v5279_v62 = vsel %vm4334_vm3, %v4262_v1, 0.0  ;;  %v4265_v42 = vmax.f32 %v3547_v54, 0.0 }
 0x296   : > { %v4007_v7 = vmax.f32 %v2515_v3, 0.0  ;;  %v9715_v61 = vpop.f32.mrb[199].mxu1  ;;  %v5278_v36 = vadd.f32 %v5277_v26, %v5276_v12  ;;  %v2536_v2 = vadd.f32 %v9376_v48, %v9606_v53  ;;  %v3560_v44 = vadd.f32 %v9376_v48, %v9608_v45 }
 0x297   : > { %v4263_v55 = vmax.f32 %v3539_v0, 0.0  ;;  %v5283_v49 = vsel %vm4334_vm3, %v4264_v28, 0.0  ;;  %v4728_v14 = vadd.f32 %v4727_v27, %v4726_v46  ;;  %v2528_v16 = vadd.f32 %v9376_v48, %v9614_v56 }
 0x298   : > { %v4729_v37 = vsel %vm4334_vm3, %v4007_v7, 0.0  ;;  %v5280_v18 = vadd.f32 %v5279_v62, %v5278_v36  ;;  %v4012_v9 = vmax.f32 %v2536_v2, 0.0  ;;  %v4268_v60 = vmax.f32 %v3560_v44, 0.0 }
 0x299   : > { %v5281_v25 = vsel %vm4334_vm3, %v4263_v55, 0.0  ;;  %v4730_v50 = vadd.f32 %v4729_v37, %v4728_v14  ;;  %v4010_v30 = vmax.f32 %v2528_v16, 0.0  ;;  %v3552_v53 = vadd.f32 %v9376_v48, %v9616_v38 }
 0x29a   : > { %v2539_v45 = vadd.f32 %v9376_v48, %v9622_v39  ;;  %v4733_v57 = vsel %vm4334_vm3, %v4009_v15, 0.0  ;;  %v5285_v10 = vsel %vm4334_vm3, %v4265_v42, 0.0  ;;  %v5282_v21 = vadd.f32 %v5281_v25, %v5280_v18 }
 0x29b   : > { %v3563_v56 = vadd.f32 %v9376_v48, %v9624_v43  ;;  %v9734_v26 = vpop.f32.mrb[200].mxu0  ;;  %v4732_v29 = vadd.f32 %v4731_v24, %v4730_v50  ;;  %v4739_v51 = vsel %vm4334_vm3, %v4012_v9, 0.0  ;;  %v5291_v40 = vsel %vm4334_vm3, %v4268_v60, 0.0 }
 0x29c   : > { %v4266_v5 = vmax.f32 %v3552_v53, 0.0  ;;  %v9738_v38 = vpop.f32.mrb[200].mxu1  ;;  %v9740_v28 = vpop.f32.mrb[201].mxu0  ;;  %v5284_v39 = vadd.f32 %v5283_v49, %v5282_v21  ;;  %v4735_v52 = vsel %vm4334_vm3, %v4010_v30, 0.0  ;;  %v2531_v1 = vadd.f32 %v9376_v48, %v9627_v4 }
 0x29d   : > { %v3555_v43 = vadd.f32 %v9376_v48, %v9629_v33  ;;  %v9747_v8 = vpop.f32.mrb[201].mxu1  ;;  %v9749_v24 = vpop.f32.mrb[202].mxu0  ;;  %v4734_v54 = vadd.f32 %v4733_v57, %v4732_v29  ;;  %v4013_v12 = vmax.f32 %v2539_v45, 0.0  ;;  %v2552_v27 = vadd.f32 %v9376_v48, %v9649_v6 }
 0x29e   : > { %v5287_v3 = vsel %vm4334_vm3, %v4266_v5, 0.0  ;;  %v9754_v15 = vpop.f32.mrb[202].mxu1  ;;  %v9756_v0 = vpop.f32.mrb[203].mxu0  ;;  %v5286_v46 = vadd.f32 %v5285_v10, %v5284_v39  ;;  %v4269_v4 = vmax.f32 %v3563_v56, 0.0  ;;  %v4011_v62 = vmax.f32 %v2531_v1, 0.0 }
 0x29f   : > { %v4267_v42 = vmax.f32 %v3555_v43, 0.0  ;;  %v9758_v33 = vpop.f32.mrb[203].mxu1  ;;  %v4736_v7 = vadd.f32 %v4735_v52, %v4734_v54  ;;  %v4016_v36 = vmax.f32 %v2552_v27, 0.0  ;;  %v3576_v55 = vadd.f32 %v9376_v48, %v9651_v34 }
 0x2a0   : > { %v2544_v2 = vadd.f32 %v9376_v48, %v9657_v47  ;;  %v5288_v44 = vadd.f32 %v5287_v3, %v5286_v46  ;;  %v4737_v6 = vsel %vm4334_vm3, %v4011_v62, 0.0  ;;  %v3568_v14 = vadd.f32 %v9376_v48, %v9659_v59 }
 0x2a1   : > { %v5289_v49 = vsel %vm4334_vm3, %v4267_v42, 0.0  ;;  %v4741_v37 = vsel %vm4334_vm3, %v4013_v12, 0.0  ;;  %v4738_v16 = vadd.f32 %v4737_v6, %v4736_v7  ;;  %v4272_v18 = vmax.f32 %v3576_v55, 0.0 }
 0x2a2   : > { %v4014_v25 = vmax.f32 %v2544_v2, 0.0  ;;  %v5290_v9 = vadd.f32 %v5289_v49, %v5288_v44  ;;  %v4270_v60 = vmax.f32 %v3568_v14, 0.0  ;;  %v2555_v34 = vadd.f32 %v9376_v48, %v9665_v13 }
 0x2a3   : > { %v3579_v47 = vadd.f32 %v9376_v48, %v9667_v41  ;;  %v5293_v50 = vsel %vm4334_vm3, %v4269_v4, 0.0  ;;  %v4740_v30 = vadd.f32 %v4739_v51, %v4738_v16  ;;  %v4752_v53 = vsel %vm4334_vm3, %v4016_v36, 0.0 }
 0x2a4   : > { %v2547_v59 = vadd.f32 %v9376_v48, %v9670_v31  ;;  %v9777_v45 = vpop.f32.mrb[204].mxu0  ;;  %v5292_v57 = vadd.f32 %v5291_v40, %v5290_v9  ;;  %v5304_v10 = vsel %vm4334_vm3, %v4272_v18, 0.0  ;;  %v4017_v21 = vmax.f32 %v2555_v34, 0.0 }
 0x2a5   : > { %v4273_v56 = vmax.f32 %v3579_v47, 0.0  ;;  %v9780_v29 = vpop.f32.mrb[204].mxu1  ;;  %v9782_v13 = vpop.f32.mrb[205].mxu0  ;;  %v4742_v41 = vadd.f32 %v4741_v37, %v4740_v30  ;;  %v3571_v51 = vadd.f32 %v9376_v48, %v9672_v23  ;;  %v2568_v39 = vadd.f32 %v9376_v48, %v9692_v19 }
 0x2a6   : > { %v4015_v5 = vmax.f32 %v2547_v59, 0.0  ;;  %v9788_v31 = vpop.f32.mrb[205].mxu1  ;;  %v9790_v52 = vpop.f32.mrb[206].mxu0  ;;  %v5294_v40 = vadd.f32 %v5293_v50, %v5292_v57  ;;  %v4749_v1 = vsel %vm4334_vm3, %v4014_v25, 0.0  ;;  %v5301_v43 = vsel %vm4334_vm3, %v4270_v60, 0.0 }
 0x2a7   : > { %v3592_v54 = vadd.f32 %v9376_v48, %v9694_v20  ;;  %v9796_v3 = vpop.f32.mrb[206].mxu1  ;;  %v9798_v12 = vpop.f32.mrb[207].mxu0  ;;  %v4743_v23 = vrot.slane %v4742_v41, 4  ;;  %v4754_v27 = vsel %vm4334_vm3, %v4017_v21, 0.0  ;;  %v4271_v46 = vmax.f32 %v3571_v51, 0.0 }
 0x2a8   : > { %v4750_v19 = vsel %vm4334_vm3, %v4015_v5, 0.0  ;;  %v9802_v4 = vpop.f32.mrb[207].mxu1  ;;  %v5295_v62 = vrot.slane %v5294_v40, 4  ;;  %v5306_v42 = vsel %vm4334_vm3, %v4273_v56, 0.0  ;;  %v2560_v36 = vadd.f32 %v9376_v48, %v9696_v35 }
 0x2a9   : > { %v4751_v7 = vadd.f32 %v4750_v19, %v4749_v1  ;;  %v4744_v20 = vadd.f32 %v4743_v23, %v4742_v41  ;;  %v5302_v55 = vsel %vm4334_vm3, %v4271_v46, 0.0  ;;  %v4020_v2 = vmax.f32 %v2568_v39, 0.0 }
 0x2aa   : > { %v3584_v44 = vadd.f32 %v9376_v48, %v9703_v11  ;;  %v5296_v6 = vadd.f32 %v5295_v62, %v5294_v40  ;;  %v5303_v14 = vadd.f32 %v5302_v55, %v5301_v43  ;;  %v4276_v37 = vmax.f32 %v3592_v54, 0.0 }
 0x2ab   : > { %v4753_v49 = vadd.f32 %v4752_v53, %v4751_v7  ;;  %v4745_v16 = vrot.slane %v4744_v20, 2  ;;  %v4018_v18 = vmax.f32 %v2560_v36, 0.0  ;;  %v2571_v9 = vadd.f32 %v9376_v48, %v9705_v58 }
 0x2ac   : > { %v4274_v25 = vmax.f32 %v3584_v44, 0.0  ;;  %v5297_v60 = vrot.slane %v5296_v6, 2  ;;  %v5305_v35 = vadd.f32 %v5304_v10, %v5303_v14  ;;  %v3595_v47 = vadd.f32 %v9376_v48, %v9710_v17 }
 0x2ad   : > { %v4755_v34 = vadd.f32 %v4754_v27, %v4753_v49  ;;  %v4746_v50 = vadd.f32 %v4745_v16, %v4744_v20  ;;  %v4760_v11 = vsel %vm4334_vm3, %v4020_v2, 0.0  ;;  %v4756_v30 = vsel %vm4334_vm3, %v4018_v18, 0.0 }
 0x2ae   : > { %v5308_v53 = vsel %vm4334_vm3, %v4274_v25, 0.0  ;;  %v5298_v59 = vadd.f32 %v5297_v60, %v5296_v6  ;;  %v5307_v21 = vadd.f32 %v5306_v42, %v5305_v35  ;;  %v4021_v56 = vmax.f32 %v2571_v9, 0.0  ;;  %v9861_v35 = vld [vmem:[%s10274_s2] ss:$0 sm:$0xff] }
 0x2af   : > { %v4757_v57 = vadd.f32 %v4756_v30, %v4755_v34  ;;  %v4747_v41 = vrot.slane %v4746_v50, 1  ;;  %v4277_v5 = vmax.f32 %v3595_v47, 0.0  ;;  %v2563_v58 = vadd.f32 %v9376_v48, %v9712_v63 }
 0x2b0   : > { %v3587_v10 = vadd.f32 %v9376_v48, %v9715_v61  ;;  %v5299_v17 = vrot.slane %v5298_v59, 1  ;;  %v5312_v51 = vsel %vm4334_vm3, %v4276_v37, 0.0  ;;  %v5309_v39 = vadd.f32 %v5308_v53, %v5307_v21  ;;  %v9824_v1 = vpop.f32.mrb[208].mxu0 }
 0x2b1   : > { %v2584_v40 = vadd.f32 %v9376_v48, %v9734_v26  ;;  %v4748_v43 = vadd.f32 %v4747_v41, %v4746_v50  ;;  %v4019_v54 = vmax.f32 %v2563_v58, 0.0  ;;  %v3608_v27 = vadd.f32 %v9376_v48, %v9738_v38  ;;  %v9830_v63 = vpop.f32.mrb[209].mxu0 }
 0x2b2   : > { %v4275_v23 = vmax.f32 %v3587_v10, 0.0  ;;  %v9828_v19 = vpop.f32.mrb[208].mxu1  ;;  %v5300_v61 = vadd.f32 %v5299_v17, %v5298_v59  ;;  %v4762_v46 = vsel %vm4334_vm3, %v4021_v56, 0.0  ;;  %v2576_v62 = vadd.f32 %v9376_v48, %v9740_v28  ;;  %v9839_v7 = vpop.f32.mrb[210].mxu0 }
 0x2b3   : > { %v3600_v26 = vadd.f32 %v9376_v48, %v9747_v8  ;;  %v9837_v42 = vpop.f32.mrb[209].mxu1  ;;  %v5445_v36 = vmul.f32 0.00390625, %v4748_v43  ;;  %v5314_v38 = vsel %vm4334_vm3, %v4277_v5, 0.0  ;;  %v4758_v20 = vsel %vm4334_vm3, %v4019_v54, 0.0  ;;  %v9846_v44 = vpop.f32.mrb[211].mxu0 }
 0x2b4   : > { %v5310_v55 = vsel %vm4334_vm3, %v4275_v23, 0.0  ;;  %v9844_v2 = vpop.f32.mrb[210].mxu1  ;;  %v5453_v6 = vmul.f32 0.00390625, %v5300_v61  ;;  %v4759_v28 = vadd.f32 %v4758_v20, %v4757_v57  ;;  %v4024_v14 = vmax.f32 %v2584_v40, 0.0 }
 0x2b5   : > { %v5311_v49 = vadd.f32 %v5310_v55, %v5309_v39  ;;  %v9848_v48 = vpop.f32.mrb[211].mxu1  ;;  %v9852_v8 = vsel %vm5480_vm8, %v5445_v36, %v9540_v22  ;;  %v4280_v37 = vmax.f32 %v3608_v27, 0.0  ;;  %v4022_v16 = vmax.f32 %v2576_v62, 0.0 }
 0x2b6   : > { %v4278_v18 = vmax.f32 %v3600_v26, 0.0  ;;  %v9856_v25 = vsel %vm5480_vm8, %v5453_v6, %v9546_v32  ;;  %v4761_v9 = vadd.f32 %v4760_v11, %v4759_v28  ;;  %v2587_v34 = vadd.f32 %v9861_v35, %v9749_v24 }
 0x2b7   : > { %v5313_v60 = vadd.f32 %v5312_v51, %v5311_v49  ;;  %v4764_v22 = vsel %vm4334_vm3, %v4022_v16, 0.0  ;;  %v3611_v50 = vadd.f32 %v9861_v35, %v9754_v15  ;;  %v2579_v32 = vadd.f32 %v9861_v35, %v9756_v0 }
 0x2b8   : > { %v5316_v47 = vsel %vm4334_vm3, %v4278_v18, 0.0  ;;  %v4763_v11 = vadd.f32 %v4762_v46, %v4761_v9  ;;  %v3603_v53 = vadd.f32 %v9861_v35, %v9758_v33  ;;  %v4025_v59 = vmax.f32 %v2587_v34, 0.0 }
 0x2b9   : > { %v5315_v30 = vadd.f32 %v5314_v38, %v5313_v60  ;;  %v4281_v57 = vmax.f32 %v3611_v50, 0.0  ;;  %v4023_v21 = vmax.f32 %v2579_v32, 0.0  ;;  %v2600_v24 = vadd.f32 %v9861_v35, %v9777_v45 }
 0x2ba   : > { %v9875_v56 = vpop.f32.mrb[212].mxu0  ;;  %v4768_v41 = vsel %vm4334_vm3, %v4024_v14, 0.0  ;;  %v4765_v5 = vadd.f32 %v4764_v22, %v4763_v11  ;;  %v4279_v58 = vmax.f32 %v3603_v53, 0.0  ;;  %v9878_v10 = vpop.f32.mrb[212].mxu1  ;;  %v5320_v17 = vsel %vm4334_vm3, %v4280_v37, 0.0 }
 0x2bb   : > { %v5317_v15 = vadd.f32 %v5316_v47, %v5315_v30  ;;  %v9880_v0 = vpop.f32.mrb[213].mxu0  ;;  %v4766_v33 = vsel %vm4334_vm3, %v4023_v21, 0.0  ;;  %v4028_v51 = vmax.f32 %v2600_v24, 0.0  ;;  %v3624_v39 = vadd.f32 %v9861_v35, %v9780_v29  ;;  %v9886_v45 = vpop.f32.mrb[213].mxu1 }
 0x2bc   : > { %v9888_v40 = vpop.f32.mrb[214].mxu0  ;;  %v4767_v43 = vadd.f32 %v4766_v33, %v4765_v5  ;;  %v5318_v54 = vsel %vm4334_vm3, %v4279_v58, 0.0  ;;  %v2592_v23 = vadd.f32 %v9861_v35, %v9782_v13  ;;  %v3616_v27 = vadd.f32 %v9861_v35, %v9788_v31  ;;  %v9895_v61 = vpop.f32.mrb[214].mxu1 }
 0x2bd   : > { %v9897_v46 = vpop.f32.mrb[215].mxu0  ;;  %v4770_v62 = vsel %vm4334_vm3, %v4025_v59, 0.0  ;;  %v5322_v29 = vsel %vm4334_vm3, %v4281_v57, 0.0  ;;  %v5319_v26 = vadd.f32 %v5318_v54, %v5317_v15  ;;  %v2603_v36 = vadd.f32 %v9861_v35, %v9790_v52  ;;  %v9903_v38 = vpop.f32.mrb[215].mxu1 }
 0x2be   : > { %v4769_v20 = vadd.f32 %v4768_v41, %v4767_v43  ;;  %v4026_v55 = vmax.f32 %v2592_v23, 0.0  ;;  %v4282_v13 = vmax.f32 %v3616_v27, 0.0  ;;  %v3627_v31 = vadd.f32 %v9861_v35, %v9796_v3 }
 0x2bf   : > { %v5321_v6 = vadd.f32 %v5320_v17, %v5319_v26  ;;  %v4284_v28 = vmax.f32 %v3624_v39, 0.0  ;;  %v2595_v49 = vadd.f32 %v9861_v35, %v9798_v12  ;;  %v3619_v14 = vadd.f32 %v9861_v35, %v9802_v4 }
 0x2c0   : > { %v4776_v37 = vsel %vm4334_vm3, %v4028_v51, 0.0  ;;  %v4771_v16 = vadd.f32 %v4770_v62, %v4769_v20  ;;  %v4772_v52 = vsel %vm4334_vm3, %v4026_v55, 0.0  ;;  %v5324_v18 = vsel %vm4334_vm3, %v4282_v13, 0.0 }
 0x2c1   : > { %v5323_v9 = vadd.f32 %v5322_v29, %v5321_v6  ;;  %v4029_v60 = vmax.f32 %v2603_v36, 0.0  ;;  %v4027_v34 = vmax.f32 %v2595_v49, 0.0  ;;  %v4283_v22 = vmax.f32 %v3619_v14, 0.0 }
 0x2c2   : > { %v4773_v3 = vadd.f32 %v4772_v52, %v4771_v16  ;;  %v4285_v47 = vmax.f32 %v3627_v31, 0.0  ;;  %v2616_v50 = vadd.f32 %v9861_v35, %v9824_v1  ;;  %v3640_v12 = vadd.f32 %v9861_v35, %v9828_v19  ;;  %v9918_v4 = vpop.f32.mrb[216].mxu0 }
 0x2c3   : > { %v5325_v32 = vadd.f32 %v5324_v18, %v5323_v9  ;;  %v4774_v11 = vsel %vm4334_vm3, %v4027_v34, 0.0  ;;  %v5326_v30 = vsel %vm4334_vm3, %v4283_v22, 0.0  ;;  %v2608_v53 = vadd.f32 %v9861_v35, %v9830_v63  ;;  %v9924_v59 = vpop.f32.mrb[216].mxu1  ;;  %v9926_v57 = vpop.f32.mrb[217].mxu0 }
 0x2c4   : > { %v5328_v21 = vsel %vm4334_vm3, %v4284_v28, 0.0  ;;  %v4775_v1 = vadd.f32 %v4774_v11, %v4773_v3  ;;  %v4032_v24 = vmax.f32 %v2616_v50, 0.0  ;;  %v3632_v19 = vadd.f32 %v9861_v35, %v9837_v42  ;;  %v9931_v41 = vpop.f32.mrb[217].mxu1  ;;  %v9933_v5 = vpop.f32.mrb[218].mxu0 }
 0x2c5   : > { %v5327_v15 = vadd.f32 %v5326_v30, %v5325_v32  ;;  %v4030_v58 = vmax.f32 %v2608_v53, 0.0  ;;  %v2619_v63 = vadd.f32 %v9861_v35, %v9839_v7  ;;  %v3643_v17 = vadd.f32 %v9861_v35, %v9844_v2  ;;  %v9939_v33 = vpop.f32.mrb[218].mxu1  ;;  %v9941_v51 = vpop.f32.mrb[219].mxu0 }
 0x2c6   : > { %v4778_v39 = vsel %vm4334_vm3, %v4029_v60, 0.0  ;;  %v5330_v42 = vsel %vm4334_vm3, %v4285_v47, 0.0  ;;  %v4777_v43 = vadd.f32 %v4776_v37, %v4775_v1  ;;  %v4286_v54 = vmax.f32 %v3632_v19, 0.0  ;;  %v9945_v23 = vpop.f32.mrb[219].mxu1 }
 0x2c7   : > { %v5329_v27 = vadd.f32 %v5328_v21, %v5327_v15  ;;  %v4784_v62 = vsel %vm4334_vm3, %v4032_v24, 0.0  ;;  %v4288_v29 = vmax.f32 %v3640_v12, 0.0  ;;  %v4780_v7 = vsel %vm4334_vm3, %v4030_v58, 0.0 }
 0x2c8   : > { %v4779_v26 = vadd.f32 %v4778_v39, %v4777_v43  ;;  %v5332_v2 = vsel %vm4334_vm3, %v4286_v54, 0.0  ;;  %v2611_v36 = vadd.f32 %v9861_v35, %v9846_v44  ;;  %v3635_v20 = vadd.f32 %v9861_v35, %v9848_v48 }
 0x2c9   : > { %v5331_v55 = vadd.f32 %v5330_v42, %v5329_v27  ;;  %v4033_v13 = vmax.f32 %v2619_v63, 0.0  ;;  %v4289_v31 = vmax.f32 %v3643_v17, 0.0  ;;  %v2632_v6 = vadd.f32 %v9861_v35, %v9875_v56 }
 0x2ca   : > { %v4781_v28 = vadd.f32 %v4780_v7, %v4779_v26  ;;  %v4031_v49 = vmax.f32 %v2611_v36, 0.0  ;;  %v4287_v14 = vmax.f32 %v3635_v20, 0.0  ;;  %v3656_v37 = vadd.f32 %v9861_v35, %v9878_v10 }
 0x2cb   : > { %v5333_v16 = vadd.f32 %v5332_v2, %v5331_v55  ;;  %v4036_v52 = vmax.f32 %v2632_v6, 0.0  ;;  %v2624_v44 = vadd.f32 %v9861_v35, %v9880_v0  ;;  %v3648_v48 = vadd.f32 %v9861_v35, %v9886_v45 }
 0x2cc   : > { %v5336_v18 = vsel %vm4334_vm3, %v4288_v29, 0.0  ;;  %v4782_v9 = vsel %vm4334_vm3, %v4031_v49, 0.0  ;;  %v5334_v56 = vsel %vm4334_vm3, %v4287_v14, 0.0  ;;  %v2635_v60 = vadd.f32 %v9861_v35, %v9888_v40  ;;  %v6307_v34 = vpop.f32.mrb[220].mxu0 }
 0x2cd   : > { %v9967_v22 = vpop.f32.mrb[220].mxu1  ;;  %v4786_v10 = vsel %vm4334_vm3, %v4033_v13, 0.0  ;;  %v4783_v3 = vadd.f32 %v4782_v9, %v4781_v28  ;;  %v5335_v47 = vadd.f32 %v5334_v56, %v5333_v16  ;;  %v4034_v0 = vmax.f32 %v2624_v44, 0.0  ;;  %v9970_v50 = vpop.f32.mrb[221].mxu0 }
 0x2ce   : > { %v9972_v45 = vpop.f32.mrb[221].mxu1  ;;  %v5338_v12 = vsel %vm4334_vm3, %v4289_v31, 0.0  ;;  %v4292_v32 = vmax.f32 %v3656_v37, 0.0  ;;  %v4290_v11 = vmax.f32 %v3648_v48, 0.0  ;;  %v3659_v30 = vadd.f32 %v9861_v35, %v9895_v61  ;;  %v9977_v40 = vpop.f32.mrb[222].mxu0 }
 0x2cf   : > { %v9979_v53 = vpop.f32.mrb[222].mxu1  ;;  %v4785_v21 = vadd.f32 %v4784_v62, %v4783_v3  ;;  %v5337_v1 = vadd.f32 %v5336_v18, %v5335_v47  ;;  %v4792_v24 = vsel %vm4334_vm3, %v4036_v52, 0.0  ;;  %v2627_v19 = vadd.f32 %v9861_v35, %v9897_v46  ;;  %v9984_v15 = vpop.f32.mrb[223].mxu0 }
 0x2d0   : > { %v9986_v58 = vpop.f32.mrb[223].mxu1  ;;  %v4788_v63 = vsel %vm4334_vm3, %v4034_v0, 0.0  ;;  %v5340_v17 = vsel %vm4334_vm3, %v4290_v11, 0.0  ;;  %v4037_v61 = vmax.f32 %v2635_v60, 0.0  ;;  %v3651_v39 = vadd.f32 %v9861_v35, %v9903_v38 }
 0x2d1   : > { %v4787_v42 = vadd.f32 %v4786_v10, %v4785_v21  ;;  %v5339_v43 = vadd.f32 %v5338_v12, %v5337_v1  ;;  %v4035_v54 = vmax.f32 %v2627_v19, 0.0  ;;  %v2648_v27 = vadd.f32 %v9861_v35, %v9918_v4 }
 0x2d2   : > { %v4293_v62 = vmax.f32 %v3659_v30, 0.0  ;;  %v4291_v46 = vmax.f32 %v3651_v39, 0.0  ;;  %v3672_v29 = vadd.f32 %v9861_v35, %v9924_v59  ;;  %v2640_v7 = vadd.f32 %v9861_v35, %v9926_v57 }
 0x2d3   : > { %v4789_v26 = vadd.f32 %v4788_v63, %v4787_v42  ;;  %v5341_v2 = vadd.f32 %v5340_v17, %v5339_v43  ;;  %v4790_v36 = vsel %vm4334_vm3, %v4035_v54, 0.0  ;;  %v4040_v20 = vmax.f32 %v2648_v27, 0.0 }
 0x2d4   : > { %v5344_v38 = vsel %vm4334_vm3, %v4292_v32, 0.0  ;;  %v5342_v55 = vsel %vm4334_vm3, %v4291_v46, 0.0  ;;  %v4038_v13 = vmax.f32 %v2640_v7, 0.0  ;;  %v3664_v4 = vadd.f32 %v9861_v35, %v9931_v41 }
 0x2d5   : > { %v4794_v31 = vsel %vm4334_vm3, %v4037_v61, 0.0  ;;  %v4791_v6 = vadd.f32 %v4790_v36, %v4789_v26  ;;  %v5343_v59 = vadd.f32 %v5342_v55, %v5341_v2  ;;  %v2651_v57 = vadd.f32 %v9861_v35, %v9933_v5  ;;  %v10006_v28 = vpop.f32.mrb[224].mxu0 }
 0x2d6   : > { %v10008_v49 = vpop.f32.mrb[224].mxu1  ;;  %v5346_v14 = vsel %vm4334_vm3, %v4293_v62, 0.0  ;;  %v4296_v37 = vmax.f32 %v3672_v29, 0.0  ;;  %v4294_v16 = vmax.f32 %v3664_v4, 0.0  ;;  %v3675_v52 = vadd.f32 %v9861_v35, %v9939_v33  ;;  %v10013_v44 = vpop.f32.mrb[225].mxu0 }
 0x2d7   : > { %v10015_v41 = vpop.f32.mrb[225].mxu1  ;;  %v4793_v48 = vadd.f32 %v4792_v24, %v4791_v6  ;;  %v5345_v18 = vadd.f32 %v5344_v38, %v5343_v59  ;;  %v4800_v9 = vsel %vm4334_vm3, %v4040_v20, 0.0  ;;  %v2643_v5 = vadd.f32 %v9861_v35, %v9941_v51  ;;  %v10020_v56 = vpop.f32.mrb[226].mxu0 }
 0x2d8   : > { %v10022_v60 = vpop.f32.mrb[226].mxu1  ;;  %v4796_v10 = vsel %vm4334_vm3, %v4038_v13, 0.0  ;;  %v5348_v3 = vsel %vm4334_vm3, %v4294_v16, 0.0  ;;  %v3667_v33 = vadd.f32 %v9861_v35, %v9945_v23  ;;  %v2664_v47 = vadd.f32 %v9861_v35, %v6307_v34  ;;  %v10029_v0 = vpop.f32.mrb[227].mxu0 }
 0x2d9   : > { %v10031_v12 = vpop.f32.mrb[227].mxu1  ;;  %v4795_v32 = vadd.f32 %v4794_v31, %v4793_v48  ;;  %v5347_v11 = vadd.f32 %v5346_v14, %v5345_v18  ;;  %v4041_v51 = vmax.f32 %v2651_v57, 0.0  ;;  %v4039_v30 = vmax.f32 %v2643_v5, 0.0 }
 0x2da   : > { %v4297_v21 = vmax.f32 %v3675_v52, 0.0  ;;  %v4295_v1 = vmax.f32 %v3667_v33, 0.0  ;;  %v4044_v24 = vmax.f32 %v2664_v47, 0.0  ;;  %v3688_v19 = vadd.f32 %v9861_v35, %v9967_v22 }
 0x2db   : > { %v4797_v63 = vadd.f32 %v4796_v10, %v4795_v32  ;;  %v5349_v17 = vadd.f32 %v5348_v3, %v5347_v11  ;;  %v4798_v23 = vsel %vm4334_vm3, %v4039_v30, 0.0  ;;  %v2656_v34 = vadd.f32 %v9861_v35, %v9970_v50 }
 0x2dc   : > { %v5352_v61 = vsel %vm4334_vm3, %v4296_v37, 0.0  ;;  %v5350_v39 = vsel %vm4334_vm3, %v4295_v1, 0.0  ;;  %v4300_v42 = vmax.f32 %v3688_v19, 0.0  ;;  %v3680_v43 = vadd.f32 %v9861_v35, %v9972_v45 }
 0x2dd   : > { %v4799_v54 = vadd.f32 %v4798_v23, %v4797_v63  ;;  %v5351_v27 = vadd.f32 %v5350_v39, %v5349_v17  ;;  %v4042_v62 = vmax.f32 %v2656_v34, 0.0  ;;  %v2667_v22 = vadd.f32 %v9861_v35, %v9977_v40  ;;  %v6315_v46 = vpop.f32.mrb[228].mxu0 }
 0x2de   : > { %v4802_v29 = vsel %vm4334_vm3, %v4041_v51, 0.0  ;;  %v4298_v7 = vmax.f32 %v3680_v43, 0.0  ;;  %v3691_v50 = vadd.f32 %v9861_v35, %v9979_v53  ;;  %v2659_v26 = vadd.f32 %v9861_v35, %v9984_v15  ;;  %v6571_v2 = vpop.f32.mrb[228].mxu1  ;;  %v10049_v36 = vpop.f32.mrb[229].mxu0 }
 0x2df   : > { %v5354_v45 = vsel %vm4334_vm3, %v4297_v21, 0.0  ;;  %v4801_v20 = vadd.f32 %v4800_v9, %v4799_v54  ;;  %v5353_v38 = vadd.f32 %v5352_v61, %v5351_v27  ;;  %v4808_v55 = vsel %vm4334_vm3, %v4044_v24, 0.0  ;;  %v3711_v40 = vpop.f32.mrb[229].mxu1  ;;  %v10053_v13 = vpop.f32.mrb[230].mxu0 }
 0x2e0   : > { %v5360_v4 = vsel %vm4334_vm3, %v4300_v42, 0.0  ;;  %v4804_v31 = vsel %vm4334_vm3, %v4042_v62, 0.0  ;;  %v5356_v53 = vsel %vm4334_vm3, %v4298_v7, 0.0  ;;  %v4043_v6 = vmax.f32 %v2659_v26, 0.0  ;;  %v10058_v15 = vpop.f32.mrb[230].mxu1  ;;  %v10060_v59 = vpop.f32.mrb[231].mxu0 }
 0x2e1   : > { %v4803_v57 = vadd.f32 %v4802_v29, %v4801_v20  ;;  %v5355_v14 = vadd.f32 %v5354_v45, %v5353_v38  ;;  %v4045_v37 = vmax.f32 %v2667_v22, 0.0  ;;  %v3683_v16 = vadd.f32 %v9861_v35, %v9986_v58  ;;  %v10064_v52 = vpop.f32.mrb[231].mxu1 }
 0x2e2   : > { %v4301_v48 = vmax.f32 %v3691_v50, 0.0  ;;  %v4806_v18 = vsel %vm4334_vm3, %v4043_v6, 0.0  ;;  %v2680_v9 = vadd.f32 %v9861_v35, %v10006_v28  ;;  %v3704_v5 = vadd.f32 %v9861_v35, %v10008_v49 }
 0x2e3   : > { %v4805_v10 = vadd.f32 %v4804_v31, %v4803_v57  ;;  %v5357_v3 = vadd.f32 %v5356_v53, %v5355_v14  ;;  %v4299_v33 = vmax.f32 %v3683_v16, 0.0  ;;  %v2672_v47 = vadd.f32 %v9861_v35, %v10013_v44 }
 0x2e4   : > { %v4048_v32 = vmax.f32 %v2680_v9, 0.0  ;;  %v4304_v11 = vmax.f32 %v3704_v5, 0.0  ;;  %v3696_v58 = vadd.f32 %v9861_v35, %v10015_v41  ;;  %v2683_v51 = vadd.f32 %v9861_v35, %v10020_v56 }
 0x2e5   : > { %v4807_v30 = vadd.f32 %v4806_v18, %v4805_v10  ;;  %v5358_v28 = vsel %vm4334_vm3, %v4299_v33, 0.0  ;;  %v4046_v21 = vmax.f32 %v2672_v47, 0.0  ;;  %v3707_v49 = vadd.f32 %v9861_v35, %v10022_v60 }
 0x2e6   : > { %v4810_v1 = vsel %vm4334_vm3, %v4045_v37, 0.0  ;;  %v5362_v24 = vsel %vm4334_vm3, %v4301_v48, 0.0  ;;  %v5359_v44 = vadd.f32 %v5358_v28, %v5357_v3  ;;  %v4302_v19 = vmax.f32 %v3696_v58, 0.0  ;;  %v10082_v63 = vpop.f32.mrb[232].mxu0 }
 0x2e7   : > { %v4809_v17 = vadd.f32 %v4808_v55, %v4807_v30  ;;  %v4821_v41 = vsel %vm4334_vm3, %v4048_v32, 0.0  ;;  %v5373_v56 = vsel %vm4334_vm3, %v4304_v11, 0.0  ;;  %v4049_v23 = vmax.f32 %v2683_v51, 0.0  ;;  %v10086_v34 = vpop.f32.mrb[232].mxu1  ;;  %v10088_v61 = vpop.f32.mrb[233].mxu0 }
 0x2e8   : > { %v5361_v39 = vadd.f32 %v5360_v4, %v5359_v44  ;;  %v4305_v60 = vmax.f32 %v3707_v49, 0.0  ;;  %v2675_v42 = vadd.f32 %v9861_v35, %v10029_v0  ;;  %v3699_v43 = vadd.f32 %v9861_v35, %v10031_v12  ;;  %v10094_v54 = vpop.f32.mrb[233].mxu1  ;;  %v10096_v27 = vpop.f32.mrb[234].mxu0 }
 0x2e9   : > { %v4811_v62 = vadd.f32 %v4810_v1, %v4809_v17  ;;  %v4818_v22 = vsel %vm4334_vm3, %v4046_v21, 0.0  ;;  %v5370_v29 = vsel %vm4334_vm3, %v4302_v19, 0.0  ;;  %v2696_v7 = vadd.f32 %v9861_v35, %v6315_v46  ;;  %v10101_v50 = vpop.f32.mrb[234].mxu1  ;;  %v10103_v26 = vpop.f32.mrb[235].mxu0 }
 0x2ea   : > { %v5363_v45 = vadd.f32 %v5362_v24, %v5361_v39  ;;  %v4047_v0 = vmax.f32 %v2675_v42, 0.0  ;;  %v4303_v20 = vmax.f32 %v3699_v43, 0.0  ;;  %v3720_v12 = vadd.f32 %v9861_v35, %v6571_v2  ;;  %v10106_v38 = vpop.f32.mrb[235].mxu1 }
 0x2eb   : > { %v4812_v55 = vrot.slane %v4811_v62, 4  ;;  %v4823_v4 = vsel %vm4334_vm3, %v4049_v23, 0.0  ;;  %v2688_v31 = vadd.f32 %v9861_v35, %v10049_v36  ;;  %v3712_v53 = vadd.f32 %v9861_v35, %v3711_v40 }
 0x2ec   : > { %v5364_v46 = vrot.slane %v5363_v45, 4  ;;  %v5375_v6 = vsel %vm4334_vm3, %v4305_v60, 0.0  ;;  %v4819_v57 = vsel %vm4334_vm3, %v4047_v0, 0.0  ;;  %v5371_v14 = vsel %vm4334_vm3, %v4303_v20, 0.0 }
 0x2ed   : > { %v4813_v37 = vadd.f32 %v4812_v55, %v4811_v62  ;;  %v4820_v16 = vadd.f32 %v4819_v57, %v4818_v22  ;;  %v5372_v2 = vadd.f32 %v5371_v14, %v5370_v29  ;;  %v4052_v48 = vmax.f32 %v2696_v7, 0.0 }
 0x2ee   : > { %v5365_v18 = vadd.f32 %v5364_v46, %v5363_v45  ;;  %v4308_v9 = vmax.f32 %v3720_v12, 0.0  ;;  %v4050_v5 = vmax.f32 %v2688_v31, 0.0  ;;  %v4306_v10 = vmax.f32 %v3712_v53, 0.0 }
 0x2ef   : > { %v4814_v3 = vrot.slane %v4813_v37, 2  ;;  %v4822_v36 = vadd.f32 %v4821_v41, %v4820_v16  ;;  %v5374_v33 = vadd.f32 %v5373_v56, %v5372_v2  ;;  %v2699_v40 = vadd.f32 %v9861_v35, %v10053_v13 }
 0x2f0   : > { %v6323_v47 = vpop.f32.mrb[236].mxu0  ;;  %v5366_v32 = vrot.slane %v5365_v18, 2  ;;  %v4825_v11 = vsel %vm4334_vm3, %v4050_v5, 0.0  ;;  %v5377_v58 = vsel %vm4334_vm3, %v4306_v10, 0.0  ;;  %v3723_v51 = vadd.f32 %v9861_v35, %v10058_v15 }
 0x2f1   : > { %v6579_v30 = vpop.f32.mrb[236].mxu1  ;;  %v10121_v28 = vpop.f32.mrb[237].mxu0  ;;  %v4815_v21 = vadd.f32 %v4814_v3, %v4813_v37  ;;  %v4829_v49 = vsel %vm4334_vm3, %v4052_v48, 0.0  ;;  %v4824_v1 = vadd.f32 %v4823_v4, %v4822_v36  ;;  %v5376_v24 = vadd.f32 %v5375_v6, %v5374_v33 }
 0x2f2   : > { %v10124_v44 = vpop.f32.mrb[237].mxu1  ;;  %v10126_v13 = vpop.f32.mrb[238].mxu0  ;;  %v5367_v19 = vadd.f32 %v5366_v32, %v5365_v18  ;;  %v5381_v17 = vsel %vm4334_vm3, %v4308_v9, 0.0  ;;  %v2691_v41 = vadd.f32 %v9861_v35, %v10060_v59  ;;  %v3715_v15 = vadd.f32 %v9861_v35, %v10064_v52 }
 0x2f3   : > { %v10133_v56 = vpop.f32.mrb[238].mxu1  ;;  %v10135_v23 = vpop.f32.mrb[239].mxu0  ;;  %v4816_v39 = vrot.slane %v4815_v21, 1  ;;  %v4826_v60 = vadd.f32 %v4825_v11, %v4824_v1  ;;  %v5378_v42 = vadd.f32 %v5377_v58, %v5376_v24  ;;  %v4053_v43 = vmax.f32 %v2699_v40, 0.0 }
 0x2f4   : > { %v10137_v62 = vpop.f32.mrb[239].mxu1  ;;  %v5368_v22 = vrot.slane %v5367_v19, 1  ;;  %v4309_v29 = vmax.f32 %v3723_v51, 0.0  ;;  %v4051_v7 = vmax.f32 %v2691_v41, 0.0  ;;  %v4307_v45 = vmax.f32 %v3715_v15, 0.0 }
 0x2f5   : > { %v4817_v0 = vadd.f32 %v4816_v39, %v4815_v21  ;;  %v2712_v59 = vadd.f32 %v9861_v35, %v10082_v63  ;;  %v3736_v52 = vadd.f32 %v9861_v35, %v10086_v34  ;;  %v2704_v20 = vadd.f32 %v9861_v35, %v10088_v61 }
 0x2f6   : > { %v5369_v12 = vadd.f32 %v5368_v22, %v5367_v19  ;;  %v4827_v55 = vsel %vm4334_vm3, %v4051_v7, 0.0  ;;  %v5379_v4 = vsel %vm4334_vm3, %v4307_v45, 0.0  ;;  %v3728_v31 = vadd.f32 %v9861_v35, %v10094_v54 }
 0x2f7   : > { %v5446_v53 = vmul.f32 0.00390625, %v4817_v0  ;;  %v4831_v46 = vsel %vm4334_vm3, %v4053_v43, 0.0  ;;  %v4828_v6 = vadd.f32 %v4827_v55, %v4826_v60  ;;  %v5380_v57 = vadd.f32 %v5379_v4, %v5378_v42 }
 0x2f8   : > { %v5454_v63 = vmul.f32 0.00390625, %v5369_v12  ;;  %v5383_v14 = vsel %vm4334_vm3, %v4309_v29, 0.0  ;;  %v4054_v34 = vmax.f32 %v2704_v20, 0.0  ;;  %v4310_v37 = vmax.f32 %v3728_v31, 0.0 }
 0x2f9   : > { %v10153_v61 = vsel %vm5482_vm9, %v5446_v53, %v9852_v8  ;;  %v4830_v16 = vadd.f32 %v4829_v49, %v4828_v6  ;;  %v5382_v2 = vadd.f32 %v5381_v17, %v5380_v57  ;;  %v4056_v48 = vmax.f32 %v2712_v59, 0.0 }
 0x2fa   : > { %v10157_v54 = vsel %vm5482_vm9, %v5454_v63, %v9856_v25  ;;  %v4312_v18 = vmax.f32 %v3736_v52, 0.0  ;;  %v4833_v9 = vsel %vm4334_vm3, %v4054_v34, 0.0  ;;  %v5385_v5 = vsel %vm4334_vm3, %v4310_v37, 0.0 }
 0x2fb   : > { %v4832_v10 = vadd.f32 %v4831_v46, %v4830_v16  ;;  %v5384_v3 = vadd.f32 %v5383_v14, %v5382_v2  ;;  %v2715_v36 = vadd.f32 %v9861_v35, %v10096_v27  ;;  %v3739_v8 = vadd.f32 %v9861_v35, %v10101_v50 }
 0x2fc   : > { %v2707_v33 = vadd.f32 %v9861_v35, %v10103_v26  ;;  %v3731_v25 = vadd.f32 %v9861_v35, %v10106_v38  ;;  %v2728_v40 = vadd.f32 %v9861_v35, %v6323_v47  ;;  %v3752_v32 = vadd.f32 %v9861_v35, %v6579_v30 }
 0x2fd   : > { %v6327_v11 = vpop.f32.mrb[240].mxu0  ;;  %v4834_v58 = vadd.f32 %v4833_v9, %v4832_v10  ;;  %v5386_v51 = vadd.f32 %v5385_v5, %v5384_v3  ;;  %v6583_v21 = vpop.f32.mrb[240].mxu1  ;;  %v4837_v27 = vsel %vm4334_vm3, %v4056_v48, 0.0  ;;  %v5389_v1 = vsel %vm4334_vm3, %v4312_v18, 0.0 }
 0x2fe   : > { %v2735_v49 = vpop.f32.mrb[241].mxu0  ;;  %v4055_v50 = vmax.f32 %v2707_v33, 0.0  ;;  %v4311_v24 = vmax.f32 %v3731_v25, 0.0  ;;  %v3759_v19 = vpop.f32.mrb[241].mxu1  ;;  %v4057_v17 = vmax.f32 %v2715_v36, 0.0  ;;  %v4313_v41 = vmax.f32 %v3739_v8, 0.0 }
 0x2ff   : > { %v6328_v26 = vpop.f32.mrb[242].mxu0  ;;  %v2720_v38 = vadd.f32 %v9861_v35, %v10121_v28  ;;  %v3744_v47 = vadd.f32 %v9861_v35, %v10124_v44  ;;  %v6584_v30 = vpop.f32.mrb[242].mxu1  ;;  %v4060_v42 = vmax.f32 %v2728_v40, 0.0  ;;  %v4316_v43 = vmax.f32 %v3752_v32, 0.0 }
 0x300   : > { %v2738_v15 = vpop.f32.mrb[243].mxu0  ;;  %v4835_v39 = vsel %vm4334_vm3, %v4055_v50, 0.0  ;;  %v5387_v60 = vsel %vm4334_vm3, %v4311_v24, 0.0  ;;  %v3762_v22 = vpop.f32.mrb[243].mxu1  ;;  %v2731_v59 = vadd.f32 %v9861_v35, %v10126_v13  ;;  %v3755_v28 = vadd.f32 %v9861_v35, %v10133_v56 }
 0x301   : > { %v4836_v29 = vadd.f32 %v4835_v39, %v4834_v58  ;;  %v5388_v7 = vadd.f32 %v5387_v60, %v5386_v51  ;;  %v4058_v45 = vmax.f32 %v2720_v38, 0.0  ;;  %v4314_v0 = vmax.f32 %v3744_v47, 0.0 }
 0x302   : > { %v2723_v44 = vadd.f32 %v9861_v35, %v10135_v23  ;;  %v3747_v52 = vadd.f32 %v9861_v35, %v10137_v62  ;;  %v4839_v20 = vsel %vm4334_vm3, %v4057_v17, 0.0  ;;  %v5391_v12 = vsel %vm4334_vm3, %v4313_v41, 0.0 }
 0x303   : > { %v4838_v55 = vadd.f32 %v4837_v27, %v4836_v29  ;;  %v5390_v4 = vadd.f32 %v5389_v1, %v5388_v7  ;;  %v4841_v31 = vsel %vm4334_vm3, %v4058_v45, 0.0  ;;  %v5393_v53 = vsel %vm4334_vm3, %v4314_v0, 0.0 }
 0x304   : > { %v4059_v13 = vmax.f32 %v2723_v44, 0.0  ;;  %v4315_v46 = vmax.f32 %v3747_v52, 0.0  ;;  %v4061_v57 = vmax.f32 %v2731_v59, 0.0  ;;  %v4317_v63 = vmax.f32 %v3755_v28, 0.0 }
 0x305   : > { %v4840_v6 = vadd.f32 %v4839_v20, %v4838_v55  ;;  %v5392_v56 = vadd.f32 %v5391_v12, %v5390_v4  ;;  %v2744_v34 = vadd.f32 %v9861_v35, %v6327_v11  ;;  %v3768_v37 = vadd.f32 %v9861_v35, %v6583_v21 }
 0x306   : > { %v6331_v23 = vpop.f32.mrb[244].mxu0  ;;  %v4843_v14 = vsel %vm4334_vm3, %v4059_v13, 0.0  ;;  %v5395_v62 = vsel %vm4334_vm3, %v4315_v46, 0.0  ;;  %v6587_v16 = vpop.f32.mrb[244].mxu1  ;;  %v4845_v48 = vsel %vm4334_vm3, %v4060_v42, 0.0  ;;  %v5397_v18 = vsel %vm4334_vm3, %v4316_v43, 0.0 }
 0x307   : > { %v2751_v2 = vpop.f32.mrb[245].mxu0  ;;  %v4842_v9 = vadd.f32 %v4841_v31, %v4840_v6  ;;  %v5394_v5 = vadd.f32 %v5393_v53, %v5392_v56  ;;  %v3775_v10 = vpop.f32.mrb[245].mxu1  ;;  %v2736_v36 = vadd.f32 %v9861_v35, %v2735_v49  ;;  %v3760_v8 = vadd.f32 %v9861_v35, %v3759_v19 }
 0x308   : > { %v6332_v3 = vpop.f32.mrb[246].mxu0  ;;  %v2747_v33 = vadd.f32 %v9861_v35, %v6328_v26  ;;  %v3771_v25 = vadd.f32 %v9861_v35, %v6584_v30  ;;  %v6588_v40 = vpop.f32.mrb[246].mxu1  ;;  %v4847_v11 = vsel %vm4334_vm3, %v4061_v57, 0.0  ;;  %v5399_v58 = vsel %vm4334_vm3, %v4317_v63, 0.0 }
 0x309   : > { %v2754_v32 = vpop.f32.mrb[247].mxu0  ;;  %v4844_v51 = vadd.f32 %v4843_v14, %v4842_v9  ;;  %v5396_v21 = vadd.f32 %v5395_v62, %v5394_v5  ;;  %v3778_v27 = vpop.f32.mrb[247].mxu1  ;;  %v4064_v1 = vmax.f32 %v2744_v34, 0.0  ;;  %v4320_v50 = vmax.f32 %v3768_v37, 0.0 }
 0x30a   : > { %v4062_v24 = vmax.f32 %v2736_v36, 0.0  ;;  %v4318_v17 = vmax.f32 %v3760_v8, 0.0  ;;  %v2739_v19 = vadd.f32 %v9861_v35, %v2738_v15  ;;  %v3763_v26 = vadd.f32 %v9861_v35, %v3762_v22 }
 0x30b   : > { %v4846_v49 = vadd.f32 %v4845_v48, %v4844_v51  ;;  %v5398_v41 = vadd.f32 %v5397_v18, %v5396_v21  ;;  %v4065_v30 = vmax.f32 %v2747_v33, 0.0  ;;  %v4321_v39 = vmax.f32 %v3771_v25, 0.0 }
 0x30c   : > { %v4849_v38 = vsel %vm4334_vm3, %v4062_v24, 0.0  ;;  %v5401_v47 = vsel %vm4334_vm3, %v4318_v17, 0.0  ;;  %v4063_v43 = vmax.f32 %v2739_v19, 0.0  ;;  %v4319_v29 = vmax.f32 %v3763_v26, 0.0 }
 0x30d   : > { %v4848_v60 = vadd.f32 %v4847_v11, %v4846_v49  ;;  %v5400_v42 = vadd.f32 %v5399_v58, %v5398_v41  ;;  %v2760_v7 = vadd.f32 %v9861_v35, %v6331_v23  ;;  %v3784_v45 = vadd.f32 %v9861_v35, %v6587_v16 }
 0x30e   : > { %v2752_v0 = vadd.f32 %v9861_v35, %v2751_v2  ;;  %v3776_v15 = vadd.f32 %v9861_v35, %v3775_v10  ;;  %v6335_v59 = vpop.f32.mrb[248].mxu0  ;;  %v4851_v44 = vsel %vm4334_vm3, %v4063_v43, 0.0  ;;  %v5403_v52 = vsel %vm4334_vm3, %v4319_v29, 0.0 }
 0x30f   : > { %v4850_v22 = vadd.f32 %v4849_v38, %v4848_v60  ;;  %v5402_v28 = vadd.f32 %v5401_v47, %v5400_v42  ;;  %v6591_v20 = vpop.f32.mrb[248].mxu1  ;;  %v2767_v12 = vpop.f32.mrb[249].mxu0  ;;  %v4068_v55 = vmax.f32 %v2760_v7, 0.0  ;;  %v4324_v56 = vmax.f32 %v3784_v45, 0.0 }
 0x310   : > { %v4066_v4 = vmax.f32 %v2752_v0, 0.0  ;;  %v4322_v31 = vmax.f32 %v3776_v15, 0.0  ;;  %v3791_v53 = vpop.f32.mrb[249].mxu1  ;;  %v6336_v13 = vpop.f32.mrb[250].mxu0  ;;  %v2763_v57 = vadd.f32 %v9861_v35, %v6332_v3  ;;  %v4853_v14 = vsel %vm4334_vm3, %v4064_v1, 0.0 }
 0x311   : > { %v4852_v46 = vadd.f32 %v4851_v44, %v4850_v22  ;;  %v5404_v6 = vadd.f32 %v5403_v52, %v5402_v28  ;;  %v6592_v63 = vpop.f32.mrb[250].mxu1  ;;  %v2770_v23 = vpop.f32.mrb[251].mxu0  ;;  %v5405_v62 = vsel %vm4334_vm3, %v4320_v50, 0.0  ;;  %v4855_v34 = vsel %vm4334_vm3, %v4065_v30, 0.0 }
 0x312   : > { %v3787_v37 = vadd.f32 %v9861_v35, %v6588_v40  ;;  %v3794_v16 = vpop.f32.mrb[251].mxu1  ;;  %v5407_v2 = vsel %vm4334_vm3, %v4321_v39, 0.0  ;;  %v4857_v9 = vsel %vm4334_vm3, %v4066_v4, 0.0  ;;  %v5409_v5 = vsel %vm4334_vm3, %v4322_v31, 0.0 }
 0x313   : > { %v4854_v48 = vadd.f32 %v4853_v14, %v4852_v46  ;;  %v5406_v18 = vadd.f32 %v5405_v62, %v5404_v6  ;;  %v4069_v10 = vmax.f32 %v2763_v57, 0.0  ;;  %v2755_v3 = vadd.f32 %v9861_v35, %v2754_v32 }
 0x314   : > { %v3779_v36 = vadd.f32 %v9861_v35, %v3778_v27  ;;  %v4861_v8 = vsel %vm4334_vm3, %v4068_v55, 0.0  ;;  %v5413_v33 = vsel %vm4334_vm3, %v4324_v56, 0.0  ;;  %v4325_v11 = vmax.f32 %v3787_v37, 0.0 }
 0x315   : > { %v4856_v25 = vadd.f32 %v4855_v34, %v4854_v48  ;;  %v5408_v40 = vadd.f32 %v5407_v2, %v5406_v18  ;;  %v4067_v58 = vmax.f32 %v2755_v3, 0.0  ;;  %v2776_v21 = vadd.f32 %v9861_v35, %v6335_v59 }
 0x316   : > { %v4323_v51 = vmax.f32 %v3779_v36, 0.0  ;;  %v2768_v24 = vadd.f32 %v9861_v35, %v2767_v12  ;;  %v3792_v17 = vadd.f32 %v9861_v35, %v3791_v53  ;;  %v4863_v32 = vsel %vm4334_vm3, %v4069_v10, 0.0 }
 0x317   : > { %v4858_v1 = vadd.f32 %v4857_v9, %v4856_v25  ;;  %v5410_v50 = vadd.f32 %v5409_v5, %v5408_v40  ;;  %v4859_v27 = vsel %vm4334_vm3, %v4067_v58, 0.0  ;;  %v3800_v41 = vadd.f32 %v9861_v35, %v6591_v20  ;;  %v6617_v25 = vld [vmem:[%s10274_s2] ss:$0 sm:$0xff] }
 0x318   : > { %v5411_v49 = vsel %vm4334_vm3, %v4323_v51, 0.0  ;;  %v6339_v19 = vpop.f32.mrb[252].mxu0  ;;  %v6595_v26 = vpop.f32.mrb[252].mxu1  ;;  %v4070_v30 = vmax.f32 %v2768_v24, 0.0  ;;  %v4326_v39 = vmax.f32 %v3792_v17, 0.0  ;;  %v5415_v43 = vsel %vm4334_vm3, %v4325_v11, 0.0 }
 0x319   : > { %v4860_v38 = vadd.f32 %v4859_v27, %v4858_v1  ;;  %v5412_v47 = vadd.f32 %v5411_v49, %v5410_v50  ;;  %v2783_v60 = vpop.f32.mrb[253].mxu0  ;;  %v3807_v42 = vpop.f32.mrb[253].mxu1  ;;  %v2779_v29 = vadd.f32 %v9861_v35, %v6336_v13  ;;  %v2771_v7 = vadd.f32 %v9861_v35, %v2770_v23 }
 0x31a   : > { %v3795_v45 = vadd.f32 %v9861_v35, %v3794_v16  ;;  %v6340_v0 = vpop.f32.mrb[254].mxu0  ;;  %v6596_v15 = vpop.f32.mrb[254].mxu1  ;;  %v4072_v28 = vmax.f32 %v2776_v21, 0.0  ;;  %v3803_v44 = vadd.f32 %v9861_v35, %v6592_v63  ;;  %v4865_v12 = vsel %vm4334_vm3, %v4070_v30, 0.0 }
 0x31b   : > { %v4862_v59 = vadd.f32 %v4861_v8, %v4860_v38  ;;  %v5414_v22 = vadd.f32 %v5413_v33, %v5412_v47  ;;  %v2786_v52 = vpop.f32.mrb[255].mxu0  ;;  %v3810_v20 = vpop.f32.mrb[255].mxu1  ;;  %v5417_v55 = vsel %vm4334_vm3, %v4326_v39, 0.0  ;;  %v4071_v4 = vmax.f32 %v2771_v7, 0.0 }
 0x31c   : > { %v4327_v31 = vmax.f32 %v3795_v45, 0.0  ;;  %v4328_v53 = vmax.f32 %v3800_v41, 0.0  ;;  %v4073_v6 = vmax.f32 %v2779_v29, 0.0  ;;  %v4329_v62 = vmax.f32 %v3803_v44, 0.0 }
 0x31d   : > { %v4864_v13 = vadd.f32 %v4863_v32, %v4862_v59  ;;  %v5416_v46 = vadd.f32 %v5415_v43, %v5414_v22  ;;  %v4867_v56 = vsel %vm4334_vm3, %v4071_v4, 0.0  ;;  %v4869_v63 = vsel %vm4334_vm3, %v4072_v28, 0.0 }
 0x31e   : > { %v5419_v57 = vsel %vm4334_vm3, %v4327_v31, 0.0  ;;  %v2784_v34 = vadd.f32 %v9861_v35, %v2783_v60  ;;  %v3808_v37 = vadd.f32 %v9861_v35, %v3807_v42  ;;  %v5421_v16 = vsel %vm4334_vm3, %v4328_v53, 0.0 }
 0x31f   : > { %v4866_v23 = vadd.f32 %v4865_v12, %v4864_v13  ;;  %v5418_v14 = vadd.f32 %v5417_v55, %v5416_v46  ;;  %v2792_v18 = vadd.f32 %v9861_v35, %v6339_v19  ;;  %v4871_v9 = vsel %vm4334_vm3, %v4073_v6, 0.0 }
 0x320   : > { %v3816_v5 = vadd.f32 %v9861_v35, %v6595_v26  ;;  %v4074_v10 = vmax.f32 %v2784_v34, 0.0  ;;  %v4330_v3 = vmax.f32 %v3808_v37, 0.0  ;;  %v5423_v36 = vsel %vm4334_vm3, %v4329_v62, 0.0 }
 0x321   : > { %v4868_v2 = vadd.f32 %v4867_v56, %v4866_v23  ;;  %v5420_v48 = vadd.f32 %v5419_v57, %v5418_v14  ;;  %v2787_v40 = vadd.f32 %v6617_v25, %v2786_v52  ;;  %v2795_v51 = vadd.f32 %v6617_v25, %v6340_v0 }
 0x322   : > { %v4873_v11 = vsel %vm4334_vm3, %v4074_v10, 0.0  ;;  %v5425_v58 = vsel %vm4334_vm3, %v4330_v3, 0.0  ;;  %v3819_v21 = vadd.f32 %v6617_v25, %v6596_v15  ;;  %v3811_v24 = vadd.f32 %v6617_v25, %v3810_v20 }
 0x323   : > { %v4870_v8 = vadd.f32 %v4869_v63, %v4868_v2  ;;  %v5422_v33 = vadd.f32 %v5421_v16, %v5420_v48  ;;  %v4075_v35 = vmax.f32 %v2787_v40, 0.0  ;;  %v4076_v17 = vmax.f32 %v2792_v18, 0.0 }
 0x324   : > { %v4332_v32 = vmax.f32 %v3816_v5, 0.0  ;;  %v4331_v19 = vmax.f32 %v3811_v24, 0.0  ;;  %v4077_v26 = vmax.f32 %v2795_v51, 0.0  ;;  %v4333_v38 = vmax.f32 %v3819_v21, 0.0 }
 0x325   : > { %v4872_v1 = vadd.f32 %v4871_v9, %v4870_v8  ;;  %v5424_v50 = vadd.f32 %v5423_v36, %v5422_v33  ;;  %v4875_v41 = vsel %vm4334_vm3, %v4075_v35, 0.0  ;;  %v4877_v39 = vsel %vm4334_vm3, %v4076_v17, 0.0 }
 0x326   : > { %v5427_v30 = vsel %vm4334_vm3, %v4331_v19, 0.0  ;;  %v5429_v42 = vsel %vm4334_vm3, %v4332_v32, 0.0  ;;  %v4879_v29 = vsel %vm4334_vm3, %v4077_v26, 0.0  ;;  %v5431_v45 = vsel %vm4334_vm3, %v4333_v38, 0.0 }
 0x327   : > { %v4874_v27 = vadd.f32 %v4873_v11, %v4872_v1  ;;  %v5426_v49 = vadd.f32 %v5425_v58, %v5424_v50 }
 0x329   : > { %v4876_v47 = vadd.f32 %v4875_v41, %v4874_v27  ;;  %v5428_v60 = vadd.f32 %v5427_v30, %v5426_v49 }
 0x32b   : > { %v4878_v43 = vadd.f32 %v4877_v39, %v4876_v47  ;;  %v5430_v7 = vadd.f32 %v5429_v42, %v5428_v60 }
 0x32d   : > { %v4880_v0 = vadd.f32 %v4879_v29, %v4878_v43  ;;  %v5432_v15 = vadd.f32 %v5431_v45, %v5430_v7 }
 0x32f   : > { %v4881_v59 = vrot.slane %v4880_v0, 4  ;;  %v5433_v22 = vrot.slane %v5432_v15, 4 }
 0x331   : > { %v4882_v28 = vadd.f32 %v4881_v59, %v4880_v0  ;;  %v5434_v44 = vadd.f32 %v5433_v22, %v5432_v15 }
 0x333   : > { %v4883_v52 = vrot.slane %v4882_v28, 2  ;;  %v5435_v20 = vrot.slane %v5434_v44, 2 }
 0x335   : > { %v4884_v12 = vadd.f32 %v4883_v52, %v4882_v28  ;;  %v5436_v55 = vadd.f32 %v5435_v20, %v5434_v44 }
 0x337   : > { %v4885_v4 = vrot.slane %v4884_v12, 1  ;;  %v5437_v31 = vrot.slane %v5436_v55, 1 }
 0x339   : > { %v4886_v53 = vadd.f32 %v4885_v4, %v4884_v12  ;;  %v5438_v13 = vadd.f32 %v5437_v31, %v5436_v55 }
 0x33b   : > { %v5447_v46 = vmul.f32 0.00390625, %v4886_v53  ;;  %v5455_v6 = vmul.f32 0.00390625, %v5438_v13 }
 0x33d   : > { %v5485_v56 = vsel %vm5484_vm10, %v5447_v46, %v10153_v61  ;;  %v5492_v57 = vsel %vm5484_vm10, %v5455_v6, %v10157_v54 }
 0x33e   : > { %5495 = vst.msk [vmem:[%s172_s15] sm:$0xff] %vm4334_vm3, %v5485_v56  ;;  %5496 = vst.msk [vmem:[%s172_s15 + $0x8] sm:$0xff] %vm4334_vm3, %v5492_v57 }
 0x33f PF: > { %s13_s12 = sadd.s32 1, %s6624_s12  }
 0x340   : > { %p10_p5 = scmp.ge.s32.totalorder %s13_s12, 4  }
 0x342   :  { %12 = sbr.rel (!%p10_p5) target bundleno = 1 (0x1), region = 62 }

// kernel: tile.23
= control target key start
LH: loop header
LB: loop body
LE: loop exit
PB: predicated region body
PF: predicated region fallthrough
CT: control target
= control target key end

     0   :  { %v13_v2 = vmov 0   ;;  %s30_s0 = inlined_call_operand.vmem [shape: pred[56], index: 0, kind: input, shape index: {}]   ;;  %s31_s1 = inlined_call_operand.vmem [shape: pred[2,56], index: 1, kind: output, shape index: {}]  }
   0x1   :  { %v4_v0 = vld [vmem:[%s30_s0] ss:$0 sm:$0xff] }
   0x2   :  { %v7_v1 = vand.u32 255, %v4_v0 }
   0x4   :  { %v8_v3 = vpack.c.b16 %v13_v2, %v7_v1 }
   0x6   :  { %v9_v4 = vpack.c.b8 %v13_v2, %v8_v3 }
   0x8   :  { %11 = vst [vmem:[%s31_s1] sm:$0x1] %v9_v4 }

// kernel: cnn_trx_forward.3
= control target key start
LH: loop header
LB: loop body
LE: loop exit
PB: predicated region body
PF: predicated region fallthrough
CT: control target
= control target key end

     0   :  { %s2667_s24 = smov 0   ;;  %s3640_s0 = inlined_call_operand.vmem [shape: f32[2,224,96], index: 0, kind: input, shape index: {}]   ;;  %s3641_s1 = inlined_call_operand.vmem [shape: bf16[2,96,256], index: 1, kind: input, shape index: {}]   ;;  %s3642_s2 = inlined_call_operand.vmem [shape: f32[2,1,256], index: 2, kind: input, shape index: {}]   ;;  %s3643_s3 = inlined_call_operand.vmem [shape: f32[2,1,128], index: 3, kind: input, shape index: {}]   ;;  %s3644_s4 = inlined_call_operand.vmem [shape: f32[2,1,128], index: 4, kind: input, shape index: {}]   ;;  %s3645_s5 = inlined_call_operand.vmem [shape: f32[2,2,112], index: 5, kind: input, shape index: {}]   ;;  %s3646_s6 = inlined_call_operand.vmem [shape: f32[2,2,112], index: 6, kind: input, shape index: {}]   ;;  %s3647_s7 = inlined_call_operand.vmem [shape: f32[2,2,2], index: 7, kind: output, shape index: {}]  }
   0x1 LB: > { %s2124_s25 = sadd.s32 4294967295, %s2621_s24   ;;  %p2128_p0 = scmp.ge.s32.totalorder %s2621_s24, 1  ;;  %s2621_s24 = sphi %s2667_s24, %s17_s24  }
   0x2   : > { %p290_p1 = scmp.lt.s32.totalorder %s2621_s24, 3 }
   0x4   : > { %p291_p2 = pnand %p2128_p0, %p290_p1 }
   0x6   : > { %294 = sbr.rel (%p291_p2) target bundleno = 1860 (0x744), region = 48 }
   0xd   : > { %p344_p3 = scmp.lt.s32.totalorder %s2124_s25, 1  ;;  %v2623_v0 = vmov 0   ;;  %vm503_vm0 = vcmask 785408   ;;  %v3650_v51 = vmov 0.0   ;;  %v433_v56 = vlaneseq }
   0xe   : > { %578 = vmatprep.mubr.bf16.mxu0 %v2623_v0  ;;  %2237 = vmatprep.subr.bf16.mxu1 %v3650_v51  ;;  %vm2625_vm1 = vmmov 0   ;;  %vm1241_vm2 = vcmask 916480   ;;  %vm1914_vm3 = vcmask 7168   ;;  %vm2003_vm4 = vcmask 9216  }
   0xf   : > { %s3664_s25 = smov (!%p344_p3, %s2124_s25), 1  ;;  %v2748_v57 = vshrl.u32 %v433_v56, 7  ;;  %2251 = vmatprep.mubr.msk.bf16.mxu1 %vm2625_vm1, %v3650_v51 }
  0x10   : > { %s2416_s26 = smul.u32 96, %s3664_s25  ;;  %s2746_s11 = sshll.u32 %s3664_s25, 1 }
  0x11   : > { %s2415_s30 = smul.u32 224, %s3664_s25  ;;  %s357_s14 = scalar_lea.vmem %s3642_s2, %s2746_s11  ;;  %v3649_v58 = vsub.s32 0, %v2748_v57  ;;  %v3648_v60 = vsub.s32 1, %v2748_v57 }
  0x12   : > { %s353_s29 = scalar_lea.vmem %s3641_s1, %s2416_s26  ;;  %v431_v59 = vld [vmem:[%s357_s14] sm:$0x3]  ;;  %s360_s17 = scalar_lea.vmem %s3643_s3, %s3664_s25 }
  0x13   : > { %v2429_v1 = vld [vmem:[%s353_s29 + $0x4] ss:$8 sps:$4 sm:$0xff]   ;;  %v2431_v2 = vld [vmem:[%s353_s29] ss:$8 sps:$4 sm:$0xff]   ;;  %v2432_v3 = vld [vmem:[%s353_s29 + $0x14] ss:$8 sps:$4 sm:$0xff]   ;;  %s2686_s10 = scalar_lea.vmem %s3640_s0, %s2415_s30  ;;  %v2758_v61 = vrot.slane %v431_v59, %v3649_v58  ;;  %v2762_v62 = vrot.slane %v431_v59, %v3648_v60  ;;  %s363_s20 = scalar_lea.vmem %s3644_s4, %s3664_s25 }
  0x14   : > { %546 = vmatprep.subr.bf16.mxu0 %v2429_v1  ;;  %v2434_v4 = vld [vmem:[%s353_s29 + $0x10] ss:$8 sps:$4 sm:$0xff]   ;;  %v2435_v5 = vld [vmem:[%s353_s29 + $0x24] ss:$8 sps:$4 sm:$0xff]   ;;  %v2437_v6 = vld [vmem:[%s353_s29 + $0x20] ss:$8 sps:$4 sm:$0xff]   ;;  %s367_s23 = scalar_lea.vmem %s3645_s5, %s2746_s11  ;;  %s371_s27 = scalar_lea.vmem %s3646_s6, %s2746_s11 }
  0x15   : > { %547 = vmatpush1.bf16.msra.mxu0 %v2431_v2  ;;  %v2438_v7 = vld [vmem:[%s353_s29 + $0x34] ss:$8 sps:$4 sm:$0xff]   ;;  %v2440_v8 = vld [vmem:[%s353_s29 + $0x30] ss:$8 sps:$4 sm:$0xff]   ;;  %v2441_v9 = vld [vmem:[%s353_s29 + $0x44] ss:$8 sps:$4 sm:$0xff]   ;;  %s375_s30 = scalar_lea.vmem %s3647_s7, %s2746_s11 }
  0x16   : > { %548 = vmatprep.subr.bf16.mxu0 %v2432_v3  ;;  %v2443_v10 = vld [vmem:[%s353_s29 + $0x40] ss:$8 sps:$4 sm:$0xff]   ;;  %v2444_v11 = vld [vmem:[%s353_s29 + $0x54] ss:$8 sps:$4 sm:$0xff]   ;;  %v2446_v12 = vld [vmem:[%s353_s29 + $0x50] ss:$8 sps:$4 sm:$0xff]  }
  0x17   : > { %v377_v13 = vld [vmem:[%s2686_s10] sm:$0xff]  ;;  %v378_v14 = vld [vmem:[%s2686_s10 + $0x8] sm:$0xff]  ;;  %v379_v16 = vld [vmem:[%s2686_s10 + $0x10] sm:$0xff] }
  0x18   : > { %v405_v15 = vpack.c.bf16 %v378_v14, %v377_v13  ;;  %v380_v17 = vld [vmem:[%s2686_s10 + $0x18] sm:$0xff]  ;;  %v381_v19 = vld [vmem:[%s2686_s10 + $0x20] sm:$0xff]  ;;  %v382_v20 = vld [vmem:[%s2686_s10 + $0x28] sm:$0xff] }
  0x19   : > { %549 = vmatpush1.bf16.msra.mxu0 %v2434_v4  ;;  %v406_v18 = vpack.c.bf16 %v380_v17, %v379_v16  ;;  %v407_v21 = vpack.c.bf16 %v382_v20, %v381_v19  ;;  %v383_v22 = vld [vmem:[%s2686_s10 + $0x30] sm:$0xff]  ;;  %v384_v23 = vld [vmem:[%s2686_s10 + $0x38] sm:$0xff]  ;;  %v385_v25 = vld [vmem:[%s2686_s10 + $0x40] sm:$0xff] }
  0x1a   : > { %550 = vmatprep.subr.bf16.mxu0 %v2435_v5  ;;  %v408_v24 = vpack.c.bf16 %v384_v23, %v383_v22  ;;  %v386_v26 = vld [vmem:[%s2686_s10 + $0x48] sm:$0xff]  ;;  %v387_v28 = vld [vmem:[%s2686_s10 + $0x50] sm:$0xff]  ;;  %v388_v29 = vld [vmem:[%s2686_s10 + $0x58] sm:$0xff] }
  0x1b   : > { %v409_v27 = vpack.c.bf16 %v386_v26, %v385_v25  ;;  %v410_v30 = vpack.c.bf16 %v388_v29, %v387_v28  ;;  %v389_v31 = vld [vmem:[%s2686_s10 + $0x60] sm:$0xff]  ;;  %v390_v32 = vld [vmem:[%s2686_s10 + $0x68] sm:$0xff]  ;;  %v391_v34 = vld [vmem:[%s2686_s10 + $0x70] sm:$0xff] }
  0x1c   : > { %v411_v33 = vpack.c.bf16 %v390_v32, %v389_v31  ;;  %v392_v35 = vld [vmem:[%s2686_s10 + $0x78] sm:$0xff]  ;;  %v393_v37 = vld [vmem:[%s2686_s10 + $0x80] sm:$0xff]  ;;  %v394_v38 = vld [vmem:[%s2686_s10 + $0x88] sm:$0xff] }
  0x1d   : > { %551 = vmatpush1.bf16.msra.mxu0 %v2437_v6  ;;  %v412_v36 = vpack.c.bf16 %v392_v35, %v391_v34  ;;  %v413_v39 = vpack.c.bf16 %v394_v38, %v393_v37  ;;  %v395_v40 = vld [vmem:[%s2686_s10 + $0x90] sm:$0xff]  ;;  %v396_v41 = vld [vmem:[%s2686_s10 + $0x98] sm:$0xff]  ;;  %v397_v43 = vld [vmem:[%s2686_s10 + $0xa0] sm:$0xff] }
  0x1e   : > { %552 = vmatprep.subr.bf16.mxu0 %v2438_v7  ;;  %v414_v42 = vpack.c.bf16 %v396_v41, %v395_v40  ;;  %v398_v44 = vld [vmem:[%s2686_s10 + $0xa8] sm:$0xff]  ;;  %v399_v46 = vld [vmem:[%s2686_s10 + $0xb0] sm:$0xff]  ;;  %v400_v47 = vld [vmem:[%s2686_s10 + $0xb8] sm:$0xff] }
  0x1f   : > { %v415_v45 = vpack.c.bf16 %v398_v44, %v397_v43  ;;  %v416_v48 = vpack.c.bf16 %v400_v47, %v399_v46  ;;  %v401_v49 = vld [vmem:[%s2686_s10 + $0xc0] sm:$0xff]  ;;  %v402_v50 = vld [vmem:[%s2686_s10 + $0xc8] sm:$0xff]  ;;  %v403_v53 = vld [vmem:[%s2686_s10 + $0xd0] sm:$0xff] }
  0x20   : > { %v417_v52 = vpack.c.bf16 %v402_v50, %v401_v49  ;;  %v404_v54 = vld [vmem:[%s2686_s10 + $0xd8] sm:$0xff] }
  0x21   : > { %553 = vmatpush1.bf16.msra.mxu0 %v2440_v8  ;;  %v418_v55 = vpack.c.bf16 %v404_v54, %v403_v53 }
  0x22   : > { %554 = vmatprep.subr.bf16.mxu0 %v2441_v9 }
  0x25   : > { %555 = vmatpush1.bf16.msra.mxu0 %v2443_v10 }
  0x26   : > { %556 = vmatprep.subr.bf16.mxu0 %v2444_v11 }
  0x29   : > { %557 = vmatpush1.bf16.msra.mxu0 %v2446_v12 }
  0x2a   : > { %2321 = vmatprep.subr.bf16.mxu0 %v3650_v51 }
  0x2c   : > { %2147 = vmatmul.mubr.msk.bf16.vlgmr.msra.gmra.mrb[0].mxu0 %vm503_vm0, %v405_v15 }
  0x2d   : > { %588 = vmatprep.mubr.bf16.mxu0 %v2623_v0 }
  0x34   : > { %2148 = vmatmul.mubr.msk.bf16.gmra.mrb[4].mxu0 %vm503_vm0, %v406_v18 }
  0x35   : > { %598 = vmatprep.mubr.bf16.mxu0 %v2623_v0 }
  0x3c   : > { %2149 = vmatmul.mubr.msk.bf16.gmra.mrb[8].mxu0 %vm503_vm0, %v407_v21 }
  0x3d   : > { %608 = vmatprep.mubr.bf16.mxu0 %v2623_v0 }
  0x44   : > { %2150 = vmatmul.mubr.msk.bf16.gmra.mrb[12].mxu0 %vm503_vm0, %v408_v24 }
  0x45   : > { %618 = vmatprep.mubr.bf16.mxu0 %v2623_v0 }
  0x4c   : > { %2151 = vmatmul.mubr.msk.bf16.gmra.mrb[16].mxu0 %vm503_vm0, %v409_v27 }
  0x4d   : > { %628 = vmatprep.mubr.bf16.mxu0 %v2623_v0 }
  0x54   : > { %2152 = vmatmul.mubr.msk.bf16.gmra.mrb[20].mxu0 %vm503_vm0, %v410_v30 }
  0x55   : > { %638 = vmatprep.mubr.bf16.mxu0 %v2623_v0 }
  0x5c   : > { %2153 = vmatmul.mubr.msk.bf16.gmra.mrb[24].mxu0 %vm503_vm0, %v411_v33 }
  0x5d   : > { %648 = vmatprep.mubr.bf16.mxu0 %v2623_v0 }
  0x64   : > { %2154 = vmatmul.mubr.msk.bf16.gmra.mrb[28].mxu0 %vm503_vm0, %v412_v36 }
  0x65   : > { %658 = vmatprep.mubr.bf16.mxu0 %v2623_v0 }
  0x6c   : > { %2155 = vmatmul.mubr.msk.bf16.gmra.mrb[32].mxu0 %vm503_vm0, %v413_v39 }
  0x6d   : > { %668 = vmatprep.mubr.bf16.mxu0 %v2623_v0 }
  0x74   : > { %2156 = vmatmul.mubr.msk.bf16.gmra.mrb[36].mxu0 %vm503_vm0, %v414_v42 }
  0x75   : > { %678 = vmatprep.mubr.bf16.mxu0 %v2623_v0 }
  0x7c   : > { %2157 = vmatmul.mubr.msk.bf16.gmra.mrb[40].mxu0 %vm503_vm0, %v415_v45 }
  0x7d   : > { %688 = vmatprep.mubr.bf16.mxu0 %v2623_v0 }
  0x84   : > { %2158 = vmatmul.mubr.msk.bf16.gmra.mrb[44].mxu0 %vm503_vm0, %v416_v48 }
  0x85   : > { %698 = vmatprep.mubr.bf16.mxu0 %v2623_v0 }
  0x8c   : > { %2159 = vmatmul.mubr.msk.bf16.gmra.mrb[48].mxu0 %vm503_vm0, %v417_v52 }
  0x8d   : > { %708 = vmatprep.mubr.bf16.mxu0 %v2623_v0 }
  0x94   : > { %2160 = vmatmul.mubr.msk.bf16.gmra.mrb[52].mxu0 %vm503_vm0, %v418_v55 }
  0x95   : > { %2335 = vmatprep.mubr.msk.bf16.mxu0 %vm2625_vm1, %v3650_v51 }
  0xff   : > { %v580_v63 = vpop.f32.mrb[0].mxu0 }
 0x100   : > { %v2765_v0 = vadd.f32 %v580_v63, %v2758_v61  ;;  %v582_v1 = vpop.f32.mrb[1].mxu0 }
 0x101   : > { %v584_v2 = vpop.f32.mrb[2].mxu0  ;;  %v583_v4 = vadd.f32 %v582_v1, %v2762_v62 }
 0x102   : > { %v586_v3 = vpop.f32.mrb[3].mxu0  ;;  %719 = vadd.xlane.f32.xlu0 %v2765_v0  ;;  %v2771_v6 = vadd.f32 %v584_v2, %v2758_v61 }
 0x103   : > { %v587_v5 = vadd.f32 %v586_v3, %v2762_v62 }
 0x105   : > { %v2773_v7 = vpack.c.bf16 %v587_v5, %v583_v4 }
 0x106   : > { %721 = vadd.xlane.f32.xlu0 %v2771_v6 }
 0x107   : > { %v590_v8 = vpop.f32.mrb[4].mxu0  ;;  %2322 = vmatpush3.bf16.msra.mxu0 %v2773_v7 }
 0x108   : > { %v2778_v9 = vadd.f32 %v590_v8, %v2758_v61  ;;  %v592_v10 = vpop.f32.mrb[5].mxu0  ;;  %2323 = vmatprep.subr.bf16.mxu0 %v3650_v51 }
 0x109   : > { %v594_v11 = vpop.f32.mrb[6].mxu0  ;;  %v593_v13 = vadd.f32 %v592_v10, %v2762_v62 }
 0x10a   : > { %v596_v12 = vpop.f32.mrb[7].mxu0  ;;  %723 = vadd.xlane.f32.xlu1 %v2778_v9  ;;  %v2785_v15 = vadd.f32 %v594_v11, %v2758_v61 }
 0x10b   : > { %v597_v14 = vadd.f32 %v596_v12, %v2762_v62 }
 0x10d   : > { %v2787_v16 = vpack.c.bf16 %v597_v14, %v593_v13 }
 0x10e   : > { %725 = vadd.xlane.f32.xlu1 %v2785_v15 }
 0x10f   : > { %v600_v17 = vpop.f32.mrb[8].mxu0  ;;  %2324 = vmatpush3.bf16.msra.mxu0 %v2787_v16 }
 0x110   : > { %v2792_v18 = vadd.f32 %v600_v17, %v2758_v61  ;;  %v602_v19 = vpop.f32.mrb[9].mxu0  ;;  %2325 = vmatprep.subr.bf16.mxu0 %v3650_v51 }
 0x111   : > { %v603_v20 = vadd.f32 %v602_v19, %v2762_v62  ;;  %v604_v21 = vpop.f32.mrb[10].mxu0 }
 0x112   : > { %v2797_v22 = vadd.f32 %v604_v21, %v2758_v61  ;;  %v606_v23 = vpop.f32.mrb[11].mxu0  ;;  %727 = vadd.xlane.f32.xlu0 %v2792_v18 }
 0x113   : > { %v607_v24 = vadd.f32 %v606_v23, %v2762_v62 }
 0x114   : > { %729 = vadd.xlane.f32.xlu1 %v2797_v22 }
 0x115   : > { %v2802_v25 = vpack.c.bf16 %v607_v24, %v603_v20 }
 0x117   : > { %v610_v26 = vpop.f32.mrb[12].mxu0  ;;  %2326 = vmatpush3.bf16.msra.mxu0 %v2802_v25 }
 0x118   : > { %v2806_v27 = vadd.f32 %v610_v26, %v2758_v61  ;;  %v612_v28 = vpop.f32.mrb[13].mxu0  ;;  %2327 = vmatprep.subr.bf16.mxu0 %v3650_v51 }
 0x119   : > { %v613_v29 = vadd.f32 %v612_v28, %v2762_v62  ;;  %v614_v30 = vpop.f32.mrb[14].mxu0 }
 0x11a   : > { %v2811_v31 = vadd.f32 %v614_v30, %v2758_v61  ;;  %731 = vadd.xlane.f32.xlu0 %v2806_v27  ;;  %v616_v32 = vpop.f32.mrb[15].mxu0 }
 0x11b   : > { %v617_v33 = vadd.f32 %v616_v32, %v2762_v62 }
 0x11c   : > { %733 = vadd.xlane.f32.xlu1 %v2811_v31 }
 0x11d   : > { %v2816_v34 = vpack.c.bf16 %v617_v33, %v613_v29 }
 0x11f   : > { %v620_v35 = vpop.f32.mrb[16].mxu0  ;;  %2328 = vmatpush3.bf16.msra.mxu0 %v2816_v34 }
 0x120   : > { %v2820_v36 = vadd.f32 %v620_v35, %v2758_v61  ;;  %v622_v37 = vpop.f32.mrb[17].mxu0  ;;  %2329 = vmatprep.subr.bf16.mxu0 %v3650_v51 }
 0x121   : > { %v623_v38 = vadd.f32 %v622_v37, %v2762_v62  ;;  %v624_v39 = vpop.f32.mrb[18].mxu0 }
 0x122   : > { %v2825_v40 = vadd.f32 %v624_v39, %v2758_v61  ;;  %735 = vadd.xlane.f32.xlu0 %v2820_v36  ;;  %v626_v41 = vpop.f32.mrb[19].mxu0 }
 0x123   : > { %v627_v42 = vadd.f32 %v626_v41, %v2762_v62 }
 0x124   : > { %737 = vadd.xlane.f32.xlu1 %v2825_v40 }
 0x125   : > { %v2830_v43 = vpack.c.bf16 %v627_v42, %v623_v38 }
 0x127   : > { %v630_v44 = vpop.f32.mrb[20].mxu0  ;;  %2330 = vmatpush3.bf16.msra.mxu0 %v2830_v43 }
 0x128   : > { %v2834_v45 = vadd.f32 %v630_v44, %v2758_v61  ;;  %v632_v46 = vpop.f32.mrb[21].mxu0  ;;  %2331 = vmatprep.subr.bf16.mxu0 %v3650_v51 }
 0x129   : > { %v633_v47 = vadd.f32 %v632_v46, %v2762_v62  ;;  %v634_v48 = vpop.f32.mrb[22].mxu0 }
 0x12a   : > { %v2839_v49 = vadd.f32 %v634_v48, %v2758_v61  ;;  %739 = vadd.xlane.f32.xlu0 %v2834_v45  ;;  %v636_v50 = vpop.f32.mrb[23].mxu0 }
 0x12b   : > { %v637_v52 = vadd.f32 %v636_v50, %v2762_v62 }
 0x12c   : > { %741 = vadd.xlane.f32.xlu1 %v2839_v49 }
 0x12d   : > { %v2844_v53 = vpack.c.bf16 %v637_v52, %v633_v47 }
 0x12f   : > { %v640_v54 = vpop.f32.mrb[24].mxu0  ;;  %2332 = vmatpush3.bf16.msra.mxu0 %v2844_v53 }
 0x130   : > { %v2848_v55 = vadd.f32 %v640_v54, %v2758_v61  ;;  %v642_v56 = vpop.f32.mrb[25].mxu0  ;;  %2333 = vmatprep.subr.bf16.mxu0 %v3650_v51 }
 0x131   : > { %v643_v59 = vadd.f32 %v642_v56, %v2762_v62  ;;  %v644_v63 = vpop.f32.mrb[26].mxu0 }
 0x132   : > { %v2853_v1 = vadd.f32 %v644_v63, %v2758_v61  ;;  %743 = vadd.xlane.f32.xlu0 %v2848_v55  ;;  %v646_v2 = vpop.f32.mrb[27].mxu0 }
 0x133   : > { %v647_v3 = vadd.f32 %v646_v2, %v2762_v62 }
 0x134   : > { %745 = vadd.xlane.f32.xlu1 %v2853_v1 }
 0x135   : > { %v2858_v4 = vpack.c.bf16 %v647_v3, %v643_v59 }
 0x137   : > { %v650_v5 = vpop.f32.mrb[28].mxu0  ;;  %2334 = vmatpush3.bf16.msra.mxu0 %v2858_v4 }
 0x138   : > { %v2862_v8 = vadd.f32 %v650_v5, %v2758_v61  ;;  %v2864_v10 = vpop.f32.mrb[29].mxu0 }
 0x139   : > { %v654_v11 = vpop.f32.mrb[30].mxu0 }
 0x13a   : > { %v2867_v12 = vadd.f32 %v654_v11, %v2758_v61  ;;  %747 = vadd.xlane.f32.xlu0 %v2862_v8  ;;  %v2870_v13 = vpop.f32.mrb[31].mxu0 }
 0x13c   : > { %749 = vadd.xlane.f32.xlu1 %v2867_v12 }
 0x13f   : > { %v660_v14 = vpop.f32.mrb[32].mxu0 }
 0x140   : > { %v2874_v17 = vadd.f32 %v660_v14, %v2758_v61  ;;  %v2876_v19 = vpop.f32.mrb[33].mxu0 }
 0x141   : > { %v664_v20 = vpop.f32.mrb[34].mxu0 }
 0x142   : > { %v2879_v21 = vadd.f32 %v664_v20, %v2758_v61  ;;  %751 = vadd.xlane.f32.xlu0 %v2874_v17  ;;  %v2882_v23 = vpop.f32.mrb[35].mxu0 }
 0x144   : > { %753 = vadd.xlane.f32.xlu1 %v2879_v21 }
 0x147   : > { %v670_v24 = vpop.f32.mrb[36].mxu0 }
 0x148   : > { %v2886_v26 = vadd.f32 %v670_v24, %v2758_v61  ;;  %v2888_v28 = vpop.f32.mrb[37].mxu0 }
 0x149   : > { %v674_v29 = vpop.f32.mrb[38].mxu0 }
 0x14a   : > { %v2891_v30 = vadd.f32 %v674_v29, %v2758_v61  ;;  %755 = vadd.xlane.f32.xlu0 %v2886_v26  ;;  %v2894_v32 = vpop.f32.mrb[39].mxu0 }
 0x14c   : > { %757 = vadd.xlane.f32.xlu1 %v2891_v30 }
 0x14f   : > { %v680_v33 = vpop.f32.mrb[40].mxu0 }
 0x150   : > { %v2898_v35 = vadd.f32 %v680_v33, %v2758_v61  ;;  %v2900_v37 = vpop.f32.mrb[41].mxu0 }
 0x151   : > { %v684_v38 = vpop.f32.mrb[42].mxu0 }
 0x152   : > { %v2903_v39 = vadd.f32 %v684_v38, %v2758_v61  ;;  %759 = vadd.xlane.f32.xlu0 %v2898_v35  ;;  %v2906_v41 = vpop.f32.mrb[43].mxu0 }
 0x154   : > { %761 = vadd.xlane.f32.xlu1 %v2903_v39 }
 0x157   : > { %v690_v42 = vpop.f32.mrb[44].mxu0 }
 0x158   : > { %v2909_v44 = vpop.f32.mrb[45].mxu0  ;;  %v2927_v29 = vadd.f32 %v690_v42, %v2758_v61 }
 0x159   : > { %v694_v46 = vpop.f32.mrb[46].mxu0 }
 0x15a   : > { %v2911_v47 = vpop.f32.mrb[47].mxu0 }
 0x15f   : > { %v700_v48 = vpop.f32.mrb[48].mxu0 }
 0x160   : > { %v2913_v50 = vpop.f32.mrb[49].mxu0 }
 0x161   : > { %3652 = vst [vmem:[#allocation2_spill] sm:$0xff] %v2913_v50  ;;  %v704_v52 = vpop.f32.mrb[50].mxu0 }
 0x162   : > { %v2915_v54 = vpop.f32.mrb[51].mxu0 }
 0x163   : > { %3653 = vst [vmem:[#allocation3_spill] sm:$0xff] %v2915_v54 }
 0x167   : > { %v710_v56 = vpop.f32.mrb[52].mxu0 }
 0x168   : > { %v2917_v59 = vpop.f32.mrb[53].mxu0 }
 0x169   : > { %3654 = vst [vmem:[#allocation4_spill] sm:$0xff] %v2917_v59  ;;  %v714_v63 = vpop.f32.mrb[54].mxu0 }
 0x16a   : > { %v2919_v2 = vpop.f32.mrb[55].mxu0 }
 0x16b   : > { %3655 = vst [vmem:[#allocation5_spill] sm:$0xff] %v2919_v2 }
 0x18f   : > { %v720_v3 = vpop.xlane.xlu0 %719 }
 0x190   : > { %v776_v5 = vmul.f32 0.0078125, %v720_v3 }
 0x192   : > { %v2922_v11 = vsub.f32 %v2765_v0, %v776_v5 }
 0x193   : > { %v722_v14 = vpop.xlane.xlu0 %721 }
 0x194   : > { %v777_v20 = vmul.f32 0.0078125, %v722_v14  ;;  %v832_v24 = vmul.f32 %v2922_v11, %v2922_v11  ;;  %v2939_v14 = vadd.f32 %v694_v46, %v2758_v61 }
 0x196   : > { %860 = vadd.xlane.f32.xlu0 %v832_v24  ;;  %v2930_v33 = vsub.f32 %v2771_v6, %v777_v20  ;;  %v2944_v20 = vadd.f32 %v700_v48, %v2758_v61  ;;  %v2957_v48 = vadd.f32 %v704_v52, %v2758_v61 }
 0x197   : > { %v724_v38 = vpop.xlane.xlu1 %723 }
 0x198   : > { %v778_v60 = vmul.f32 0.0078125, %v724_v38  ;;  %v833_v3 = vmul.f32 %v2930_v33, %v2930_v33 }
 0x19a   : > { %763 = vadd.xlane.f32.xlu0 %v2927_v29  ;;  %862 = vadd.xlane.f32.xlu1 %v833_v3  ;;  %v2936_v0 = vsub.f32 %v2778_v9, %v778_v60 }
 0x19b   : > { %v726_v5 = vpop.xlane.xlu1 %725 }
 0x19c   : > { %v779_v42 = vmul.f32 0.0078125, %v726_v5  ;;  %v834_v6 = vmul.f32 %v2936_v0, %v2936_v0 }
 0x19e   : > { %864 = vadd.xlane.f32.xlu0 %v834_v6  ;;  %765 = vadd.xlane.f32.xlu1 %v2939_v14  ;;  %v2948_v24 = vsub.f32 %v2785_v15, %v779_v42  ;;  %v2965_v6 = vadd.f32 %v710_v56, %v2758_v61 }
 0x19f   : > { %v728_v38 = vpop.xlane.xlu0 %727 }
 0x1a0   : > { %v780_v60 = vmul.f32 0.0078125, %v728_v38  ;;  %v835_v9 = vmul.f32 %v2948_v24, %v2948_v24 }
 0x1a1   : > { %v730_v46 = vpop.xlane.xlu1 %729 }
 0x1a2   : > { %v781_v3 = vmul.f32 0.0078125, %v730_v46  ;;  %767 = vadd.xlane.f32.xlu0 %v2944_v20  ;;  %866 = vadd.xlane.f32.xlu1 %v835_v9  ;;  %v2954_v5 = vsub.f32 %v2792_v18, %v780_v60 }
 0x1a4   : > { %v836_v15 = vmul.f32 %v2954_v5, %v2954_v5  ;;  %v2962_v42 = vsub.f32 %v2797_v22, %v781_v3  ;;  %v2975_v22 = vadd.f32 %v714_v63, %v2758_v61 }
 0x1a6   : > { %769 = vadd.xlane.f32.xlu1 %v2957_v48  ;;  %868 = vadd.xlane.f32.xlu0 %v836_v15  ;;  %v837_v18 = vmul.f32 %v2962_v42, %v2962_v42 }
 0x1a7   : > { %v732_v38 = vpop.xlane.xlu0 %731 }
 0x1a8   : > { %v782_v9 = vmul.f32 0.0078125, %v732_v38 }
 0x1a9   : > { %v734_v60 = vpop.xlane.xlu1 %733 }
 0x1aa   : > { %v783_v52 = vmul.f32 0.0078125, %v734_v60  ;;  %870 = vadd.xlane.f32.xlu1 %v837_v18  ;;  %771 = vadd.xlane.f32.xlu0 %v2965_v6  ;;  %v2972_v46 = vsub.f32 %v2806_v27, %v782_v9 }
 0x1ac   : > { %v838_v56 = vmul.f32 %v2972_v46, %v2972_v46  ;;  %v2980_v3 = vsub.f32 %v2811_v31, %v783_v52 }
 0x1ae   : > { %773 = vadd.xlane.f32.xlu1 %v2975_v22  ;;  %872 = vadd.xlane.f32.xlu0 %v838_v56  ;;  %v839_v18 = vmul.f32 %v2980_v3, %v2980_v3 }
 0x1af   : > { %v736_v15 = vpop.xlane.xlu0 %735 }
 0x1b0   : > { %v784_v38 = vmul.f32 0.0078125, %v736_v15 }
 0x1b1   : > { %v738_v60 = vpop.xlane.xlu1 %737 }
 0x1b2   : > { %v785_v27 = vmul.f32 0.0078125, %v738_v60  ;;  %874 = vadd.xlane.f32.xlu1 %v839_v18  ;;  %v2986_v61 = vsub.f32 %v2820_v36, %v784_v38 }
 0x1b4   : > { %v840_v63 = vmul.f32 %v2986_v61, %v2986_v61  ;;  %v2991_v31 = vsub.f32 %v2825_v40, %v785_v27 }
 0x1b6   : > { %876 = vadd.xlane.f32.xlu0 %v840_v63  ;;  %v841_v9 = vmul.f32 %v2991_v31, %v2991_v31 }
 0x1b7   : > { %v740_v52 = vpop.xlane.xlu0 %739 }
 0x1b8   : > { %v786_v56 = vmul.f32 0.0078125, %v740_v52  ;;  %878 = vadd.xlane.f32.xlu1 %v841_v9 }
 0x1b9   : > { %v742_v15 = vpop.xlane.xlu1 %741 }
 0x1ba   : > { %v787_v58 = vmul.f32 0.0078125, %v742_v15  ;;  %v2996_v18 = vsub.f32 %v2834_v45, %v786_v56 }
 0x1bc   : > { %v842_v36 = vmul.f32 %v2996_v18, %v2996_v18  ;;  %v3001_v38 = vsub.f32 %v2839_v49, %v787_v58 }
 0x1be   : > { %880 = vadd.xlane.f32.xlu0 %v842_v36  ;;  %v843_v40 = vmul.f32 %v3001_v38, %v3001_v38 }
 0x1bf   : > { %v744_v60 = vpop.xlane.xlu0 %743 }
 0x1c0   : > { %v788_v27 = vmul.f32 0.0078125, %v744_v60  ;;  %882 = vadd.xlane.f32.xlu1 %v843_v40 }
 0x1c1   : > { %v746_v63 = vpop.xlane.xlu1 %745 }
 0x1c2   : > { %v789_v9 = vmul.f32 0.0078125, %v746_v63  ;;  %v3006_v52 = vsub.f32 %v2848_v55, %v788_v27 }
 0x1c4   : > { %v844_v45 = vmul.f32 %v3006_v52, %v3006_v52  ;;  %v3011_v56 = vsub.f32 %v2853_v1, %v789_v9 }
 0x1c6   : > { %884 = vadd.xlane.f32.xlu0 %v844_v45  ;;  %v845_v58 = vmul.f32 %v3011_v56, %v3011_v56 }
 0x1c7   : > { %v748_v49 = vpop.xlane.xlu0 %747 }
 0x1c8   : > { %v790_v15 = vmul.f32 0.0078125, %v748_v49  ;;  %886 = vadd.xlane.f32.xlu1 %v845_v58 }
 0x1c9   : > { %v750_v36 = vpop.xlane.xlu1 %749 }
 0x1ca   : > { %v791_v40 = vmul.f32 0.0078125, %v750_v36  ;;  %v3016_v60 = vsub.f32 %v2862_v8, %v790_v15 }
 0x1cc   : > { %v846_v55 = vmul.f32 %v3016_v60, %v3016_v60  ;;  %v3021_v27 = vsub.f32 %v2867_v12, %v791_v40 }
 0x1ce   : > { %888 = vadd.xlane.f32.xlu0 %v846_v55  ;;  %v847_v1 = vmul.f32 %v3021_v27, %v3021_v27 }
 0x1cf   : > { %v752_v63 = vpop.xlane.xlu0 %751 }
 0x1d0   : > { %v792_v9 = vmul.f32 0.0078125, %v752_v63  ;;  %890 = vadd.xlane.f32.xlu1 %v847_v1 }
 0x1d1   : > { %v754_v45 = vpop.xlane.xlu1 %753 }
 0x1d2   : > { %v793_v58 = vmul.f32 0.0078125, %v754_v45  ;;  %v3026_v49 = vsub.f32 %v2874_v17, %v792_v9 }
 0x1d4   : > { %v848_v8 = vmul.f32 %v3026_v49, %v3026_v49  ;;  %v3031_v15 = vsub.f32 %v2879_v21, %v793_v58 }
 0x1d6   : > { %892 = vadd.xlane.f32.xlu0 %v848_v8  ;;  %v849_v12 = vmul.f32 %v3031_v15, %v3031_v15 }
 0x1d7   : > { %v756_v36 = vpop.xlane.xlu0 %755 }
 0x1d8   : > { %v794_v40 = vmul.f32 0.0078125, %v756_v36  ;;  %894 = vadd.xlane.f32.xlu1 %v849_v12 }
 0x1d9   : > { %v758_v55 = vpop.xlane.xlu1 %757 }
 0x1da   : > { %v795_v1 = vmul.f32 0.0078125, %v758_v55  ;;  %v3036_v63 = vsub.f32 %v2886_v26, %v794_v40 }
 0x1dc   : > { %v850_v17 = vmul.f32 %v3036_v63, %v3036_v63  ;;  %v3041_v9 = vsub.f32 %v2891_v30, %v795_v1 }
 0x1de   : > { %896 = vadd.xlane.f32.xlu0 %v850_v17  ;;  %v851_v21 = vmul.f32 %v3041_v9, %v3041_v9 }
 0x1df   : > { %v760_v45 = vpop.xlane.xlu0 %759 }
 0x1e0   : > { %v796_v58 = vmul.f32 0.0078125, %v760_v45  ;;  %898 = vadd.xlane.f32.xlu1 %v851_v21 }
 0x1e1   : > { %v762_v8 = vpop.xlane.xlu1 %761 }
 0x1e2   : > { %v797_v12 = vmul.f32 0.0078125, %v762_v8  ;;  %v3046_v36 = vsub.f32 %v2898_v35, %v796_v58 }
 0x1e4   : > { %v852_v26 = vmul.f32 %v3046_v36, %v3046_v36  ;;  %v3051_v40 = vsub.f32 %v2903_v39, %v797_v12 }
 0x1e6   : > { %900 = vadd.xlane.f32.xlu0 %v852_v26  ;;  %v853_v30 = vmul.f32 %v3051_v40, %v3051_v40 }
 0x1e8   : > { %902 = vadd.xlane.f32.xlu1 %v853_v30 }
 0x223   : > { %v861_v35 = vpop.xlane.xlu0 %860 }
 0x224   : > { %v916_v55 = vmul.f32 0.0078125, %v861_v35 }
 0x226   : > { %v944_v1 = vadd.f32 1e-05, %v916_v55 }
 0x227   : > { %v863_v17 = vpop.xlane.xlu1 %862  ;;  %v764_v21 = vpop.xlane.xlu0 %763 }
 0x228   : > { %2447 = vrsqrt.f32 %v944_v1  ;;  %v917_v39 = vmul.f32 0.0078125, %v863_v17  ;;  %v798_v45 = vmul.f32 0.0078125, %v764_v21 }
 0x22a   : > { %v945_v58 = vadd.f32 1e-05, %v917_v39  ;;  %v3060_v8 = vsub.f32 %v2927_v29, %v798_v45 }
 0x22b   : > { %v766_v12 = vpop.xlane.xlu1 %765  ;;  %v865_v26 = vpop.xlane.xlu0 %864 }
 0x22c   : > { %2449 = vrsqrt.f32 %v945_v58  ;;  %v799_v30 = vmul.f32 0.0078125, %v766_v12  ;;  %v918_v2 = vmul.f32 0.0078125, %v865_v26  ;;  %v854_v51 = vmul.f32 %v3060_v8, %v3060_v8  ;;  %v3077_v26 = vld [vmem:[%s360_s17] ss:$0 sm:$0xff] }
 0x22e   : > { %v946_v35 = vadd.f32 1e-05, %v918_v2  ;;  %904 = vadd.xlane.f32.xlu0 %v854_v51  ;;  %v3065_v55 = vsub.f32 %v2939_v14, %v799_v30 }
 0x22f   : > { %v867_v1 = vpop.xlane.xlu1 %866  ;;  %v768_v17 = vpop.xlane.xlu0 %767 }
 0x230   : > { %2451 = vrsqrt.f32 %v946_v35  ;;  %v919_v21 = vmul.f32 0.0078125, %v867_v1  ;;  %v800_v29 = vmul.f32 0.0078125, %v768_v17  ;;  %v855_v39 = vmul.f32 %v3065_v55, %v3065_v55 }
 0x232   : > { %v2448_v45 = vpop.eup %2447  ;;  %v947_v58 = vadd.f32 1e-05, %v919_v21  ;;  %906 = vadd.xlane.f32.xlu1 %v855_v39  ;;  %v3074_v51 = vsub.f32 %v2944_v20, %v800_v29 }
 0x233   : > { %v770_v2 = vpop.xlane.xlu1 %769  ;;  %v869_v14 = vpop.xlane.xlu0 %868  ;;  %v1000_v12 = vmul.f32 %v2448_v45, %v2922_v11 }
 0x234   : > { %2453 = vrsqrt.f32 %v947_v58  ;;  %v801_v30 = vmul.f32 0.0078125, %v770_v2  ;;  %v920_v35 = vmul.f32 0.0078125, %v869_v14  ;;  %v856_v1 = vmul.f32 %v3074_v51, %v3074_v51  ;;  %v3090_v58 = vld [vmem:[%s363_s20] ss:$0 sm:$0xff] }
 0x235   : > { %v1035_v45 = vmul.f32 %v3077_v26, %v1000_v12 }
 0x236   : > { %v2450_v17 = vpop.eup %2449  ;;  %v948_v21 = vadd.f32 1e-05, %v920_v35  ;;  %908 = vadd.xlane.f32.xlu0 %v856_v1  ;;  %v3086_v20 = vsub.f32 %v2957_v48, %v801_v30 }
 0x237   : > { %v871_v29 = vpop.xlane.xlu1 %870  ;;  %v772_v11 = vpop.xlane.xlu0 %771  ;;  %v1001_v39 = vmul.f32 %v2450_v17, %v2930_v33  ;;  %v1070_v12 = vadd.f32 %v3090_v58, %v1035_v45 }
 0x238   : > { %2455 = vrsqrt.f32 %v948_v21  ;;  %v921_v2 = vmul.f32 0.0078125, %v871_v29  ;;  %v802_v14 = vmul.f32 0.0078125, %v772_v11  ;;  %v857_v59 = vmul.f32 %v3086_v20, %v3086_v20 }
 0x239   : > { %v1036_v35 = vmul.f32 %v3077_v26, %v1001_v39 }
 0x23a   : > { %v2452_v1 = vpop.eup %2451  ;;  %v949_v54 = vadd.f32 1e-05, %v921_v2  ;;  %910 = vadd.xlane.f32.xlu1 %v857_v59  ;;  %v3096_v48 = vsub.f32 %v2965_v6, %v802_v14 }
 0x23b   : > { %v774_v30 = vpop.xlane.xlu1 %773  ;;  %v873_v33 = vpop.xlane.xlu0 %872  ;;  %v1071_v17 = vadd.f32 %v3090_v58, %v1036_v35  ;;  %v1002_v21 = vmul.f32 %v2452_v1, %v2936_v0  ;;  %v3656_v1 = vmov 0.0  }
 0x23c   : > { %2457 = vrsqrt.f32 %v949_v54  ;;  %v803_v29 = vmul.f32 0.0078125, %v774_v30  ;;  %v922_v11 = vmul.f32 0.0078125, %v873_v33  ;;  %v858_v39 = vmul.f32 %v3096_v48, %v3096_v48 }
 0x23d   : > { %v1098_v50 = vpack.c.bf16 %v1071_v17, %v1070_v12  ;;  %v1037_v35 = vmul.f32 %v3077_v26, %v1002_v21 }
 0x23e   : > { %v2454_v2 = vpop.eup %2453  ;;  %v950_v59 = vadd.f32 1e-05, %v922_v11  ;;  %912 = vadd.xlane.f32.xlu0 %v858_v39  ;;  %v3104_v6 = vsub.f32 %v2975_v22, %v803_v29 }
 0x23f   : > { %v875_v14 = vpop.xlane.xlu1 %874  ;;  %2238 = vmatpush3.bf16.xpose.msra.mxu1 %v1098_v50  ;;  %v1003_v45 = vmul.f32 %v2454_v2, %v2948_v24  ;;  %v1072_v17 = vadd.f32 %v3090_v58, %v1037_v35 }
 0x240   : > { %2459 = vrsqrt.f32 %v950_v59  ;;  %v923_v54 = vmul.f32 0.0078125, %v875_v14  ;;  %v859_v0 = vmul.f32 %v3104_v6, %v3104_v6  ;;  %2239 = vmatprep.subr.bf16.mxu1 %v3656_v1 }
 0x241   : > { %v1038_v30 = vmul.f32 %v3077_v26, %v1003_v45 }
 0x242   : > { %v2456_v33 = vpop.eup %2455  ;;  %v951_v12 = vadd.f32 1e-05, %v923_v54  ;;  %914 = vadd.xlane.f32.xlu1 %v859_v0 }
 0x243   : > { %v877_v22 = vpop.xlane.xlu0 %876  ;;  %v1073_v50 = vadd.f32 %v3090_v58, %v1038_v30  ;;  %v1004_v24 = vmul.f32 %v2456_v33, %v2954_v5 }
 0x244   : > { %2461 = vrsqrt.f32 %v951_v12  ;;  %v924_v21 = vmul.f32 0.0078125, %v877_v22 }
 0x245   : > { %v879_v29 = vpop.xlane.xlu1 %878  ;;  %v1099_v11 = vpack.c.bf16 %v1073_v50, %v1072_v17  ;;  %v1039_v45 = vmul.f32 %v3077_v26, %v1004_v24 }
 0x246   : > { %v2458_v39 = vpop.eup %2457  ;;  %v952_v2 = vadd.f32 1e-05, %v924_v21  ;;  %v925_v59 = vmul.f32 0.0078125, %v879_v29 }
 0x247   : > { %2240 = vmatpush3.bf16.xpose.msra.mxu1 %v1099_v11  ;;  %v1005_v14 = vmul.f32 %v2458_v39, %v2962_v42  ;;  %v1074_v30 = vadd.f32 %v3090_v58, %v1039_v45 }
 0x248   : > { %2463 = vrsqrt.f32 %v952_v2  ;;  %v953_v54 = vadd.f32 1e-05, %v925_v59  ;;  %2241 = vmatprep.subr.bf16.mxu1 %v3656_v1 }
 0x249   : > { %v1040_v35 = vmul.f32 %v3077_v26, %v1005_v14 }
 0x24a   : > { %v2460_v0 = vpop.eup %2459  ;;  %2465 = vrsqrt.f32 %v953_v54 }
 0x24b   : > { %v881_v5 = vpop.xlane.xlu0 %880  ;;  %v1075_v33 = vadd.f32 %v3090_v58, %v1040_v35  ;;  %v1006_v12 = vmul.f32 %v2460_v0, %v2972_v46 }
 0x24c   : > { %v926_v22 = vmul.f32 0.0078125, %v881_v5 }
 0x24d   : > { %v883_v17 = vpop.xlane.xlu1 %882  ;;  %v1100_v42 = vpack.c.bf16 %v1075_v33, %v1074_v30  ;;  %v1041_v11 = vmul.f32 %v3077_v26, %v1006_v12 }
 0x24e   : > { %v2462_v50 = vpop.eup %2461  ;;  %v954_v24 = vadd.f32 1e-05, %v926_v22  ;;  %v927_v21 = vmul.f32 0.0078125, %v883_v17 }
 0x24f   : > { %2242 = vmatpush3.bf16.xpose.msra.mxu1 %v1100_v42  ;;  %v1007_v29 = vmul.f32 %v2462_v50, %v2980_v3  ;;  %v1076_v14 = vadd.f32 %v3090_v58, %v1041_v11 }
 0x250   : > { %2467 = vrsqrt.f32 %v954_v24  ;;  %v955_v39 = vadd.f32 1e-05, %v927_v21  ;;  %2243 = vmatprep.subr.bf16.mxu1 %v3656_v1 }
 0x251   : > { %v1042_v2 = vmul.f32 %v3077_v26, %v1007_v29 }
 0x252   : > { %v2464_v59 = vpop.eup %2463  ;;  %2469 = vrsqrt.f32 %v955_v39 }
 0x253   : > { %v885_v46 = vpop.xlane.xlu0 %884  ;;  %v1077_v45 = vadd.f32 %v3090_v58, %v1042_v2  ;;  %v1008_v54 = vmul.f32 %v2464_v59, %v2986_v61 }
 0x254   : > { %v2466_v35 = vpop.eup %2465  ;;  %v928_v0 = vmul.f32 0.0078125, %v885_v46 }
 0x255   : > { %v887_v3 = vpop.xlane.xlu1 %886  ;;  %v1101_v5 = vpack.c.bf16 %v1077_v45, %v1076_v14  ;;  %v1009_v30 = vmul.f32 %v2466_v35, %v2991_v31  ;;  %v1043_v22 = vmul.f32 %v3077_v26, %v1008_v54 }
 0x256   : > { %v956_v33 = vadd.f32 1e-05, %v928_v0  ;;  %v929_v12 = vmul.f32 0.0078125, %v887_v3 }
 0x257   : > { %2244 = vmatpush3.bf16.xpose.msra.mxu1 %v1101_v5  ;;  %v1044_v17 = vmul.f32 %v3077_v26, %v1009_v30  ;;  %v1078_v21 = vadd.f32 %v3090_v58, %v1043_v22 }
 0x258   : > { %2471 = vrsqrt.f32 %v956_v33  ;;  %v957_v42 = vadd.f32 1e-05, %v929_v12  ;;  %2245 = vmatprep.subr.bf16.mxu1 %v3656_v1 }
 0x259   : > { %v1079_v50 = vadd.f32 %v3090_v58, %v1044_v17 }
 0x25a   : > { %v2468_v61 = vpop.eup %2467  ;;  %2473 = vrsqrt.f32 %v957_v42 }
 0x25b   : > { %v889_v24 = vpop.xlane.xlu0 %888  ;;  %v1010_v31 = vmul.f32 %v2468_v61, %v2996_v18  ;;  %v1102_v2 = vpack.c.bf16 %v1079_v50, %v1078_v21 }
 0x25c   : > { %v2470_v29 = vpop.eup %2469  ;;  %v930_v11 = vmul.f32 0.0078125, %v889_v24 }
 0x25d   : > { %v891_v39 = vpop.xlane.xlu1 %890  ;;  %v1011_v59 = vmul.f32 %v2470_v29, %v3001_v38  ;;  %v1045_v45 = vmul.f32 %v3077_v26, %v1010_v31 }
 0x25e   : > { %v958_v46 = vadd.f32 1e-05, %v930_v11  ;;  %v931_v14 = vmul.f32 0.0078125, %v891_v39 }
 0x25f   : > { %2246 = vmatpush3.bf16.xpose.msra.mxu1 %v1102_v2  ;;  %v1046_v54 = vmul.f32 %v3077_v26, %v1011_v59  ;;  %v1080_v5 = vadd.f32 %v3090_v58, %v1045_v45 }
 0x260   : > { %2475 = vrsqrt.f32 %v958_v46  ;;  %v959_v35 = vadd.f32 1e-05, %v931_v14  ;;  %2247 = vmatprep.subr.bf16.mxu1 %v3656_v1 }
 0x261   : > { %v1081_v0 = vadd.f32 %v3090_v58, %v1046_v54 }
 0x262   : > { %v2472_v18 = vpop.eup %2471  ;;  %2477 = vrsqrt.f32 %v959_v35 }
 0x263   : > { %v893_v3 = vpop.xlane.xlu0 %892  ;;  %v1012_v38 = vmul.f32 %v2472_v18, %v3006_v52  ;;  %v1103_v22 = vpack.c.bf16 %v1081_v0, %v1080_v5 }
 0x264   : > { %v2474_v30 = vpop.eup %2473  ;;  %v932_v33 = vmul.f32 0.0078125, %v893_v3 }
 0x265   : > { %v895_v12 = vpop.xlane.xlu1 %894  ;;  %v1013_v17 = vmul.f32 %v2474_v30, %v3011_v56  ;;  %v1047_v61 = vmul.f32 %v3077_v26, %v1012_v38 }
 0x266   : > { %v960_v42 = vadd.f32 1e-05, %v932_v33  ;;  %v933_v50 = vmul.f32 0.0078125, %v895_v12 }
 0x267   : > { %2248 = vmatpush3.bf16.xpose.msra.mxu1 %v1103_v22  ;;  %v1048_v24 = vmul.f32 %v3077_v26, %v1013_v17  ;;  %v1082_v11 = vadd.f32 %v3090_v58, %v1047_v61 }
 0x268   : > { %2479 = vrsqrt.f32 %v960_v42  ;;  %v961_v21 = vadd.f32 1e-05, %v933_v50  ;;  %2249 = vmatprep.subr.bf16.mxu1 %v3656_v1 }
 0x269   : > { %v1083_v31 = vadd.f32 %v3090_v58, %v1048_v24 }
 0x26a   : > { %v2476_v52 = vpop.eup %2475  ;;  %2481 = vrsqrt.f32 %v961_v21 }
 0x26b   : > { %v897_v29 = vpop.xlane.xlu0 %896  ;;  %v1014_v56 = vmul.f32 %v2476_v52, %v3016_v60  ;;  %v1104_v46 = vpack.c.bf16 %v1083_v31, %v1082_v11 }
 0x26c   : > { %v2478_v39 = vpop.eup %2477  ;;  %v934_v2 = vmul.f32 0.0078125, %v897_v29 }
 0x26d   : > { %v899_v59 = vpop.xlane.xlu1 %898  ;;  %v1015_v14 = vmul.f32 %v2478_v39, %v3021_v27  ;;  %v1049_v45 = vmul.f32 %v3077_v26, %v1014_v56 }
 0x26e   : > { %v962_v54 = vadd.f32 1e-05, %v934_v2  ;;  %v935_v35 = vmul.f32 0.0078125, %v899_v59 }
 0x26f   : > { %2250 = vmatpush3.bf16.xpose.msra.mxu1 %v1104_v46  ;;  %v1050_v0 = vmul.f32 %v3077_v26, %v1015_v14  ;;  %v1084_v18 = vadd.f32 %v3090_v58, %v1049_v45 }
 0x270   : > { %2483 = vrsqrt.f32 %v962_v54  ;;  %v963_v3 = vadd.f32 1e-05, %v935_v35  ;;  %2279 = vmatprep.subr.bf16.mxu1 %v3656_v1 }
 0x271   : > { %v1085_v60 = vadd.f32 %v3090_v58, %v1050_v0  ;;  %v1112_v30 = vmul.f32 0.088388346, %v1084_v18 }
 0x272   : > { %v2480_v5 = vpop.eup %2479  ;;  %2485 = vrsqrt.f32 %v963_v3 }
 0x273   : > { %v901_v38 = vpop.xlane.xlu0 %900  ;;  %v1113_v27 = vmul.f32 0.088388346, %v1085_v60  ;;  %v1016_v33 = vmul.f32 %v2480_v5, %v3026_v49 }
 0x274   : > { %v2482_v12 = vpop.eup %2481  ;;  %v936_v22 = vmul.f32 0.0078125, %v901_v38 }
 0x275   : > { %v903_v17 = vpop.xlane.xlu1 %902  ;;  %v1126_v42 = vpack.c.bf16 %v1113_v27, %v1112_v30  ;;  %v1017_v50 = vmul.f32 %v2482_v12, %v3031_v15  ;;  %v1051_v61 = vmul.f32 %v3077_v26, %v1016_v33 }
 0x276   : > { %v964_v24 = vadd.f32 1e-05, %v936_v22  ;;  %v937_v21 = vmul.f32 0.0078125, %v903_v17 }
 0x277   : > { %2252 = vmatmul.mubr.bf16.vlgmr.msra.gmra.mrb[0].mxu1 %v1126_v42  ;;  %v1052_v31 = vmul.f32 %v3077_v26, %v1017_v50  ;;  %v1086_v52 = vadd.f32 %v3090_v58, %v1051_v61 }
 0x278   : > { %2487 = vrsqrt.f32 %v964_v24  ;;  %v965_v29 = vadd.f32 1e-05, %v937_v21  ;;  %2280 = vmatpush3.bf16.msra.mxu1 %v2773_v7  ;;  %2255 = vmatprep.mubr.msk.bf16.mxu1 %vm2625_vm1, %v3656_v1 }
 0x279   : > { %2281 = vmatprep.subr.bf16.mxu1 %v3656_v1  ;;  %v1087_v49 = vadd.f32 %v3090_v58, %v1052_v31  ;;  %v1114_v11 = vmul.f32 0.088388346, %v1086_v52 }
 0x27a   : > { %v2484_v15 = vpop.eup %2483  ;;  %2489 = vrsqrt.f32 %v965_v29 }
 0x27b   : > { %v1115_v56 = vmul.f32 0.088388346, %v1087_v49  ;;  %v1018_v39 = vmul.f32 %v2484_v15, %v3036_v63 }
 0x27c   : > { %v2486_v2 = vpop.eup %2485  ;;  %2282 = vmatpush3.bf16.msra.mxu1 %v2787_v16 }
 0x27d   : > { %2283 = vmatprep.subr.bf16.mxu1 %v3656_v1  ;;  %v1127_v59 = vpack.c.bf16 %v1115_v56, %v1114_v11  ;;  %v1019_v7 = vmul.f32 %v2486_v2, %v3041_v9  ;;  %v1053_v46 = vmul.f32 %v3077_v26, %v1018_v39 }
 0x27f   : > { %2256 = vmatmul.mubr.bf16.gmra.mrb[4].mxu1 %v1127_v59  ;;  %v1054_v14 = vmul.f32 %v3077_v26, %v1019_v7  ;;  %v1088_v45 = vadd.f32 %v3090_v58, %v1053_v46 }
 0x280   : > { %2284 = vmatpush3.bf16.msra.mxu1 %v2802_v25  ;;  %2259 = vmatprep.mubr.msk.bf16.mxu1 %vm2625_vm1, %v3656_v1 }
 0x281   : > { %2285 = vmatprep.subr.bf16.mxu1 %v3656_v1  ;;  %v1089_v16 = vadd.f32 %v3090_v58, %v1054_v14  ;;  %v1116_v54 = vmul.f32 0.088388346, %v1088_v45 }
 0x282   : > { %v2488_v63 = vpop.eup %2487 }
 0x283   : > { %v1117_v35 = vmul.f32 0.088388346, %v1089_v16  ;;  %v1020_v9 = vmul.f32 %v2488_v63, %v3046_v36 }
 0x284   : > { %v2490_v0 = vpop.eup %2489  ;;  %2286 = vmatpush3.bf16.msra.mxu1 %v2816_v34 }
 0x285   : > { %2287 = vmatprep.subr.bf16.mxu1 %v3656_v1  ;;  %v1128_v18 = vpack.c.bf16 %v1117_v35, %v1116_v54  ;;  %v1021_v25 = vmul.f32 %v2490_v0, %v3051_v40  ;;  %v1055_v3 = vmul.f32 %v3077_v26, %v1020_v9 }
 0x287   : > { %2260 = vmatmul.mubr.bf16.gmra.mrb[8].mxu1 %v1128_v18  ;;  %v1056_v60 = vmul.f32 %v3077_v26, %v1021_v25  ;;  %v1090_v5 = vadd.f32 %v3090_v58, %v1055_v3 }
 0x288   : > { %2288 = vmatpush3.bf16.msra.mxu1 %v2830_v43  ;;  %2263 = vmatprep.mubr.msk.bf16.mxu1 %vm2625_vm1, %v3656_v1 }
 0x289   : > { %2289 = vmatprep.subr.bf16.mxu1 %v3656_v1  ;;  %v1091_v34 = vadd.f32 %v3090_v58, %v1056_v60  ;;  %v1118_v36 = vmul.f32 0.088388346, %v1090_v5 }
 0x28b   : > { %v1119_v38 = vmul.f32 0.088388346, %v1091_v34 }
 0x28c   : > { %2290 = vmatpush3.bf16.msra.mxu1 %v2844_v53 }
 0x28d   : > { %2291 = vmatprep.subr.bf16.mxu1 %v3656_v1  ;;  %v1129_v40 = vpack.c.bf16 %v1119_v38, %v1118_v36 }
 0x28f   : > { %2264 = vmatmul.mubr.bf16.gmra.mrb[12].mxu1 %v1129_v40 }
 0x290   : > { %2292 = vmatpush3.bf16.msra.mxu1 %v2858_v4  ;;  %2267 = vmatprep.mubr.msk.bf16.mxu1 %vm2625_vm1, %v3656_v1 }
 0x2bb   : > { %v905_v43 = vpop.xlane.xlu0 %904 }
 0x2bc   : > { %v938_v30 = vmul.f32 0.0078125, %v905_v43 }
 0x2be   : > { %v966_v27 = vadd.f32 1e-05, %v938_v30 }
 0x2bf   : > { %v907_v33 = vpop.xlane.xlu1 %906 }
 0x2c0   : > { %2491 = vrsqrt.f32 %v966_v27  ;;  %v939_v12 = vmul.f32 0.0078125, %v907_v33 }
 0x2c2   : > { %v967_v22 = vadd.f32 1e-05, %v939_v12  ;;  %v3658_v12 = vsub.s32 1, %v2748_v57 }
 0x2c3   : > { %v909_v17 = vpop.xlane.xlu0 %908 }
 0x2c4   : > { %2493 = vrsqrt.f32 %v967_v22  ;;  %v940_v42 = vmul.f32 0.0078125, %v909_v17 }
 0x2c6   : > { %v968_v53 = vadd.f32 1e-05, %v940_v42 }
 0x2c7   : > { %v911_v50 = vpop.xlane.xlu1 %910 }
 0x2c8   : > { %2495 = vrsqrt.f32 %v968_v53  ;;  %v941_v61 = vmul.f32 0.0078125, %v911_v50 }
 0x2ca   : > { %v2492_v24 = vpop.eup %2491  ;;  %v969_v21 = vadd.f32 1e-05, %v941_v61 }
 0x2cb   : > { %v913_v4 = vpop.xlane.xlu0 %912  ;;  %v1022_v31 = vmul.f32 %v2492_v24, %v3060_v8 }
 0x2cc   : > { %2497 = vrsqrt.f32 %v969_v21  ;;  %v942_v52 = vmul.f32 0.0078125, %v913_v4 }
 0x2cd   : > { %v1057_v29 = vmul.f32 %v3077_v26, %v1022_v31 }
 0x2ce   : > { %v2494_v49 = vpop.eup %2493  ;;  %v970_v15 = vadd.f32 1e-05, %v942_v52 }
 0x2cf   : > { %v915_v11 = vpop.xlane.xlu1 %914  ;;  %v1023_v56 = vmul.f32 %v2494_v49, %v3065_v55  ;;  %v1092_v59 = vadd.f32 %v3090_v58, %v1057_v29 }
 0x2d0   : > { %2499 = vrsqrt.f32 %v970_v15  ;;  %v943_v39 = vmul.f32 0.0078125, %v915_v11 }
 0x2d1   : > { %v1058_v2 = vmul.f32 %v3077_v26, %v1023_v56  ;;  %v1120_v45 = vmul.f32 0.088388346, %v1092_v59 }
 0x2d2   : > { %v2496_v7 = vpop.eup %2495  ;;  %v971_v46 = vadd.f32 1e-05, %v943_v39 }
 0x2d3   : > { %v1093_v14 = vadd.f32 %v3090_v58, %v1058_v2  ;;  %v1024_v8 = vmul.f32 %v2496_v7, %v3074_v51 }
 0x2d4   : > { %2501 = vrsqrt.f32 %v971_v46 }
 0x2d5   : > { %v1121_v16 = vmul.f32 0.088388346, %v1093_v14  ;;  %v1059_v63 = vmul.f32 %v3077_v26, %v1024_v8 }
 0x2d6   : > { %v2498_v54 = vpop.eup %2497 }
 0x2d7   : > { %v1130_v35 = vpack.c.bf16 %v1121_v16, %v1120_v45  ;;  %v1025_v55 = vmul.f32 %v2498_v54, %v3086_v20  ;;  %v1094_v0 = vadd.f32 %v3090_v58, %v1059_v63 }
 0x2d9   : > { %2268 = vmatmul.mubr.bf16.gmra.mrb[16].mxu1 %v1130_v35  ;;  %v1060_v9 = vmul.f32 %v3077_v26, %v1025_v55  ;;  %v1122_v3 = vmul.f32 0.088388346, %v1094_v0 }
 0x2da   : > { %v2500_v18 = vpop.eup %2499  ;;  %2271 = vmatprep.mubr.msk.bf16.mxu1 %vm2625_vm1, %v3656_v1 }
 0x2db   : > { %v1095_v51 = vadd.f32 %v3090_v58, %v1060_v9  ;;  %v1026_v25 = vmul.f32 %v2500_v18, %v3096_v48 }
 0x2dd   : > { %v1123_v60 = vmul.f32 0.088388346, %v1095_v51  ;;  %v1061_v5 = vmul.f32 %v3077_v26, %v1026_v25 }
 0x2de   : > { %v2502_v34 = vpop.eup %2501 }
 0x2df   : > { %v1131_v20 = vpack.c.bf16 %v1123_v60, %v1122_v3  ;;  %v1027_v36 = vmul.f32 %v2502_v34, %v3104_v6  ;;  %v1096_v40 = vadd.f32 %v3090_v58, %v1061_v5  ;;  %v1222_v6 = vld [vmem:[%s367_s23] sm:$0x3] }
 0x2e0   : > { %v3229_v22 = vrot.slane %v1222_v6, %v3658_v12 }
 0x2e1   : > { %2272 = vmatmul.mubr.bf16.gmra.mrb[20].mxu1 %v1131_v20  ;;  %v1062_v38 = vmul.f32 %v3077_v26, %v1027_v36  ;;  %v1124_v48 = vmul.f32 0.088388346, %v1096_v40  ;;  %v3657_v26 = vsub.s32 0, %v2748_v57 }
 0x2e2   : > { %2275 = vmatprep.mubr.msk.bf16.mxu1 %vm2625_vm1, %v3656_v1 }
 0x2e3   : > { %v1097_v43 = vadd.f32 %v3090_v58, %v1062_v38  ;;  %v3225_v33 = vrot.slane %v1222_v6, %v3657_v26 }
 0x2e5   : > { %v1125_v30 = vmul.f32 0.088388346, %v1097_v43 }
 0x2e7   : > { %v1132_v27 = vpack.c.bf16 %v1125_v30, %v1124_v48 }
 0x2e9   : > { %2276 = vmatmul.mubr.bf16.gmra.mrb[24].mxu1 %v1132_v27 }
 0x2ea   : > { %2293 = vmatprep.mubr.msk.bf16.mxu1 %vm2625_vm1, %v3656_v1 }
 0x34a   : > { %v1167_v58 = vpop.f32.mrb[0].mxu1 }
 0x34b   : > { %v3232_v17 = vadd.f32 %v3225_v33, %v1167_v58  ;;  %v2253_v42 = vpop.f32.mrb[1].mxu1  ;;  %v3235_v50 = vadd.f32 %v3229_v22, %v1167_v58 }
 0x34c   : > { %v1170_v53 = vpop.f32.mrb[2].mxu1 }
 0x34d   : > { %v3238_v61 = vadd.f32 %v3225_v33, %v1170_v53  ;;  %v2254_v24 = vpop.f32.mrb[3].mxu1  ;;  %v1242_v21 = vsel %vm1241_vm2, %v3232_v17, -inf  ;;  %v3243_v57 = vadd.f32 %v3229_v22, %v1170_v53  ;;  %v1587_v31 = vsel %vm1241_vm2, %v3235_v50, -inf }
 0x34e   : > { %1243 = vmax.xlane.f32.xlu0 %v1242_v21 }
 0x34f   : > { %v1245_v4 = vsel %vm1241_vm2, %v3238_v61, -inf  ;;  %v1590_v15 = vsel %vm1241_vm2, %v3243_v57, -inf }
 0x350   : > { %1246 = vmax.xlane.f32.xlu1 %v1245_v4 }
 0x352   : > { %1588 = vmax.xlane.f32.xlu0 %v1587_v31  ;;  %v1175_v52 = vpop.f32.mrb[4].mxu1 }
 0x353   : > { %v3250_v29 = vadd.f32 %v3225_v33, %v1175_v52  ;;  %v2257_v49 = vpop.f32.mrb[5].mxu1  ;;  %v3255_v56 = vadd.f32 %v3229_v22, %v1175_v52 }
 0x354   : > { %1591 = vmax.xlane.f32.xlu1 %v1590_v15  ;;  %v1178_v11 = vpop.f32.mrb[6].mxu1 }
 0x355   : > { %v3258_v39 = vadd.f32 %v3225_v33, %v1178_v11  ;;  %v2258_v2 = vpop.f32.mrb[7].mxu1  ;;  %v1248_v59 = vsel %vm1241_vm2, %v3250_v29, -inf  ;;  %v3263_v7 = vadd.f32 %v3229_v22, %v1178_v11  ;;  %v1593_v14 = vsel %vm1241_vm2, %v3255_v56, -inf }
 0x356   : > { %1249 = vmax.xlane.f32.xlu0 %v1248_v59 }
 0x357   : > { %v1251_v46 = vsel %vm1241_vm2, %v3258_v39, -inf  ;;  %v1596_v63 = vsel %vm1241_vm2, %v3263_v7, -inf }
 0x358   : > { %1252 = vmax.xlane.f32.xlu1 %v1251_v46 }
 0x35a   : > { %1594 = vmax.xlane.f32.xlu0 %v1593_v14  ;;  %v1183_v8 = vpop.f32.mrb[8].mxu1 }
 0x35b   : > { %v3270_v45 = vadd.f32 %v3225_v33, %v1183_v8  ;;  %v2261_v16 = vpop.f32.mrb[9].mxu1  ;;  %v3275_v35 = vadd.f32 %v3229_v22, %v1183_v8 }
 0x35c   : > { %1597 = vmax.xlane.f32.xlu1 %v1596_v63  ;;  %v1186_v54 = vpop.f32.mrb[10].mxu1 }
 0x35d   : > { %v3278_v55 = vadd.f32 %v3225_v33, %v1186_v54  ;;  %v2262_v9 = vpop.f32.mrb[11].mxu1  ;;  %v1254_v0 = vsel %vm1241_vm2, %v3270_v45, -inf  ;;  %v3283_v18 = vadd.f32 %v3229_v22, %v1186_v54  ;;  %v1599_v25 = vsel %vm1241_vm2, %v3275_v35, -inf }
 0x35e   : > { %1255 = vmax.xlane.f32.xlu0 %v1254_v0 }
 0x35f   : > { %v1257_v51 = vsel %vm1241_vm2, %v3278_v55, -inf  ;;  %v1602_v34 = vsel %vm1241_vm2, %v3283_v18, -inf }
 0x360   : > { %1258 = vmax.xlane.f32.xlu1 %v1257_v51 }
 0x362   : > { %1600 = vmax.xlane.f32.xlu0 %v1599_v25  ;;  %v1191_v3 = vpop.f32.mrb[12].mxu1 }
 0x363   : > { %v3290_v60 = vadd.f32 %v3225_v33, %v1191_v3  ;;  %v2265_v5 = vpop.f32.mrb[13].mxu1  ;;  %v3295_v36 = vadd.f32 %v3229_v22, %v1191_v3 }
 0x364   : > { %1603 = vmax.xlane.f32.xlu1 %v1602_v34  ;;  %v1194_v20 = vpop.f32.mrb[14].mxu1 }
 0x365   : > { %v3298_v38 = vadd.f32 %v3225_v33, %v1194_v20  ;;  %v2266_v40 = vpop.f32.mrb[15].mxu1  ;;  %v1260_v43 = vsel %vm1241_vm2, %v3290_v60, -inf  ;;  %v3303_v48 = vadd.f32 %v3229_v22, %v1194_v20  ;;  %v1605_v27 = vsel %vm1241_vm2, %v3295_v36, -inf }
 0x366   : > { %1261 = vmax.xlane.f32.xlu0 %v1260_v43 }
 0x367   : > { %v1263_v30 = vsel %vm1241_vm2, %v3298_v38, -inf  ;;  %v1608_v6 = vsel %vm1241_vm2, %v3303_v48, -inf }
 0x368   : > { %1264 = vmax.xlane.f32.xlu1 %v1263_v30 }
 0x36a   : > { %1606 = vmax.xlane.f32.xlu0 %v1605_v27 }
 0x36c   : > { %1609 = vmax.xlane.f32.xlu1 %v1608_v6 }
 0x3ac   : > { %v1199_v26 = vpop.f32.mrb[16].mxu1 }
 0x3ad   : > { %v3312_v12 = vadd.f32 %v3225_v33, %v1199_v26  ;;  %v2269_v58 = vpop.f32.mrb[17].mxu1  ;;  %v3315_v53 = vadd.f32 %v3229_v22, %v1199_v26 }
 0x3ae   : > { %v1202_v42 = vpop.f32.mrb[18].mxu1 }
 0x3af   : > { %v3318_v24 = vadd.f32 %v3225_v33, %v1202_v42  ;;  %v2270_v21 = vpop.f32.mrb[19].mxu1  ;;  %v1266_v4 = vsel %vm1241_vm2, %v3312_v12, -inf  ;;  %v3323_v31 = vadd.f32 %v3229_v22, %v1202_v42  ;;  %v1611_v49 = vsel %vm1241_vm2, %v3315_v53, -inf }
 0x3b0   : > { %1267 = vmax.xlane.f32.xlu0 %v1266_v4 }
 0x3b1   : > { %v1269_v52 = vsel %vm1241_vm2, %v3318_v24, -inf  ;;  %v1614_v59 = vsel %vm1241_vm2, %v3323_v31, -inf }
 0x3b2   : > { %1270 = vmax.xlane.f32.xlu1 %v1269_v52 }
 0x3b4   : > { %1612 = vmax.xlane.f32.xlu0 %v1611_v49  ;;  %v1207_v15 = vpop.f32.mrb[20].mxu1 }
 0x3b5   : > { %v3330_v11 = vadd.f32 %v3225_v33, %v1207_v15  ;;  %v2273_v2 = vpop.f32.mrb[21].mxu1  ;;  %v3335_v14 = vadd.f32 %v3229_v22, %v1207_v15 }
 0x3b6   : > { %1615 = vmax.xlane.f32.xlu1 %v1614_v59  ;;  %v1210_v46 = vpop.f32.mrb[22].mxu1 }
 0x3b7   : > { %v3338_v8 = vadd.f32 %v3225_v33, %v1210_v46  ;;  %v2274_v16 = vpop.f32.mrb[23].mxu1  ;;  %v1272_v63 = vsel %vm1241_vm2, %v3330_v11, -inf  ;;  %v3343_v54 = vadd.f32 %v3229_v22, %v1210_v46  ;;  %v1617_v0 = vsel %vm1241_vm2, %v3335_v14, -inf }
 0x3b8   : > { %1273 = vmax.xlane.f32.xlu0 %v1272_v63 }
 0x3b9   : > { %v1275_v9 = vsel %vm1241_vm2, %v3338_v8, -inf  ;;  %v1620_v5 = vsel %vm1241_vm2, %v3343_v54, -inf }
 0x3ba   : > { %1276 = vmax.xlane.f32.xlu1 %v1275_v9 }
 0x3bc   : > { %1618 = vmax.xlane.f32.xlu0 %v1617_v0  ;;  %v1215_v51 = vpop.f32.mrb[24].mxu1 }
 0x3bd   : > { %v3350_v25 = vadd.f32 %v3225_v33, %v1215_v51  ;;  %v2277_v3 = vpop.f32.mrb[25].mxu1  ;;  %v3355_v20 = vadd.f32 %v3229_v22, %v1215_v51 }
 0x3be   : > { %1621 = vmax.xlane.f32.xlu1 %v1620_v5  ;;  %v1218_v34 = vpop.f32.mrb[26].mxu1 }
 0x3bf   : > { %v3358_v40 = vadd.f32 %v3225_v33, %v1218_v34  ;;  %v2278_v43 = vpop.f32.mrb[27].mxu1  ;;  %v1278_v30 = vsel %vm1241_vm2, %v3350_v25, -inf  ;;  %v3363_v27 = vadd.f32 %v3229_v22, %v1218_v34  ;;  %v1623_v26 = vsel %vm1241_vm2, %v3355_v20, -inf }
 0x3c0   : > { %1279 = vmax.xlane.f32.xlu0 %v1278_v30 }
 0x3c1   : > { %v1281_v6 = vsel %vm1241_vm2, %v3358_v40, -inf  ;;  %v1626_v33 = vsel %vm1241_vm2, %v3363_v27, -inf }
 0x3c2   : > { %1282 = vmax.xlane.f32.xlu1 %v1281_v6 }
 0x3c4   : > { %1624 = vmax.xlane.f32.xlu0 %v1623_v26 }
 0x3c6   : > { %1627 = vmax.xlane.f32.xlu1 %v1626_v33 }
 0x3db   : > { %v1244_v58 = vpop.xlane.xlu0 %1243 }
 0x3dc   : > { %v1284_v42 = vsub.f32 %v3232_v17, %v1244_v58 }
 0x3dd   : > { %v1247_v21 = vpop.xlane.xlu1 %1246 }
 0x3de   : > { %v1298_v4 = vmul.f32 1.442695, %v1284_v42  ;;  %v1285_v22 = vsub.f32 %v3238_v61, %v1247_v21 }
 0x3df   : > { %v1589_v52 = vpop.xlane.xlu0 %1588 }
 0x3e0   : > { %2503 = vpow2.f32 %v1298_v4  ;;  %v1300_v49 = vmul.f32 1.442695, %v1285_v22  ;;  %v1629_v15 = vsub.f32 %v3235_v50, %v1589_v52 }
 0x3e1   : > { %v1592_v2 = vpop.xlane.xlu1 %1591 }
 0x3e2   : > { %2505 = vpow2.f32 %v1300_v49  ;;  %v1643_v59 = vmul.f32 1.442695, %v1629_v15  ;;  %v1630_v46 = vsub.f32 %v3243_v57, %v1592_v2 }
 0x3e3   : > { %v1250_v16 = vpop.xlane.xlu0 %1249 }
 0x3e4   : > { %2507 = vpow2.f32 %v1643_v59  ;;  %v1645_v63 = vmul.f32 1.442695, %v1630_v46  ;;  %v1286_v9 = vsub.f32 %v3250_v29, %v1250_v16 }
 0x3e5   : > { %v1253_v17 = vpop.xlane.xlu1 %1252 }
 0x3e6   : > { %2509 = vpow2.f32 %v1645_v63  ;;  %v1302_v0 = vmul.f32 1.442695, %v1286_v9  ;;  %v1287_v61 = vsub.f32 %v3258_v39, %v1253_v17 }
 0x3e7   : > { %v1595_v51 = vpop.xlane.xlu0 %1594 }
 0x3e8   : > { %2511 = vpow2.f32 %v1302_v0  ;;  %v1304_v3 = vmul.f32 1.442695, %v1287_v61  ;;  %v1631_v50 = vsub.f32 %v3255_v56, %v1595_v51 }
 0x3e9   : > { %v1598_v5 = vpop.xlane.xlu1 %1597 }
 0x3ea   : > { %v3378_v34 = vpop.eup %2503  ;;  %2513 = vpow2.f32 %v1304_v3  ;;  %v1647_v57 = vmul.f32 1.442695, %v1631_v50  ;;  %v1632_v43 = vsub.f32 %v3263_v7, %v1598_v5 }
 0x3eb   : > { %v1256_v30 = vpop.xlane.xlu0 %1255  ;;  %v1326_v29 = vsel %vm1241_vm2, %v3378_v34, 0.0 }
 0x3ec   : > { %v3383_v6 = vpop.eup %2505  ;;  %2515 = vpow2.f32 %v1647_v57  ;;  %v1649_v39 = vmul.f32 1.442695, %v1632_v43  ;;  %v1288_v26 = vsub.f32 %v3270_v45, %v1256_v30  ;;  %1327 = vadd.xlane.f32.xlu0 %v1326_v29 }
 0x3ed   : > { %v1259_v33 = vpop.xlane.xlu1 %1258  ;;  %v1329_v56 = vsel %vm1241_vm2, %v3383_v6, 0.0 }
 0x3ee   : > { %v3388_v58 = vpop.eup %2507  ;;  %2517 = vpow2.f32 %v1649_v39  ;;  %v1306_v42 = vmul.f32 1.442695, %v1288_v26  ;;  %v1289_v7 = vsub.f32 %v3278_v55, %v1259_v33  ;;  %1330 = vadd.xlane.f32.xlu1 %v1329_v56 }
 0x3ef   : > { %v1601_v21 = vpop.xlane.xlu0 %1600  ;;  %v1671_v4 = vsel %vm1241_vm2, %v3388_v58, 0.0 }
 0x3f0   : > { %v3393_v22 = vpop.eup %2509  ;;  %2519 = vpow2.f32 %v1306_v42  ;;  %v1308_v45 = vmul.f32 1.442695, %v1289_v7  ;;  %v1633_v52 = vsub.f32 %v3275_v35, %v1601_v21  ;;  %1672 = vadd.xlane.f32.xlu0 %v1671_v4 }
 0x3f1   : > { %v1604_v49 = vpop.xlane.xlu1 %1603  ;;  %v1674_v15 = vsel %vm1241_vm2, %v3393_v22, 0.0 }
 0x3f2   : > { %v3398_v2 = vpop.eup %2511  ;;  %2521 = vpow2.f32 %v1308_v45  ;;  %v1651_v55 = vmul.f32 1.442695, %v1633_v52  ;;  %v1634_v59 = vsub.f32 %v3283_v18, %v1604_v49  ;;  %1675 = vadd.xlane.f32.xlu1 %v1674_v15 }
 0x3f3   : > { %v1262_v46 = vpop.xlane.xlu0 %1261  ;;  %v1332_v16 = vsel %vm1241_vm2, %v3398_v2, 0.0 }
 0x3f4   : > { %v3403_v63 = vpop.eup %2513  ;;  %2523 = vpow2.f32 %v1651_v55  ;;  %v1653_v35 = vmul.f32 1.442695, %v1634_v59  ;;  %v1290_v9 = vsub.f32 %v3290_v60, %v1262_v46  ;;  %1333 = vadd.xlane.f32.xlu0 %v1332_v16 }
 0x3f5   : > { %v1265_v17 = vpop.xlane.xlu1 %1264  ;;  %v1335_v0 = vsel %vm1241_vm2, %v3403_v63, 0.0 }
 0x3f6   : > { %v3408_v61 = vpop.eup %2515  ;;  %2525 = vpow2.f32 %v1653_v35  ;;  %v1310_v18 = vmul.f32 1.442695, %v1290_v9  ;;  %v1291_v51 = vsub.f32 %v3298_v38, %v1265_v17  ;;  %1336 = vadd.xlane.f32.xlu1 %v1335_v0 }
 0x3f7   : > { %v1607_v3 = vpop.xlane.xlu0 %1606  ;;  %v1677_v50 = vsel %vm1241_vm2, %v3408_v61, 0.0 }
 0x3f8   : > { %v3413_v5 = vpop.eup %2517  ;;  %2527 = vpow2.f32 %v1310_v18  ;;  %v1312_v60 = vmul.f32 1.442695, %v1291_v51  ;;  %v1635_v57 = vsub.f32 %v3295_v36, %v1607_v3  ;;  %1678 = vadd.xlane.f32.xlu0 %v1677_v50 }
 0x3f9   : > { %v1610_v43 = vpop.xlane.xlu1 %1609  ;;  %v1680_v30 = vsel %vm1241_vm2, %v3413_v5, 0.0 }
 0x3fa   : > { %v3418_v29 = vpop.eup %2519  ;;  %2529 = vpow2.f32 %v1312_v60  ;;  %v1655_v38 = vmul.f32 1.442695, %v1635_v57  ;;  %v1636_v39 = vsub.f32 %v3303_v48, %v1610_v43  ;;  %1681 = vadd.xlane.f32.xlu1 %v1680_v30 }
 0x3fb   : > { %v1338_v26 = vsel %vm1241_vm2, %v3418_v29, 0.0 }
 0x3fc   : > { %v3423_v33 = vpop.eup %2521  ;;  %2531 = vpow2.f32 %v1655_v38  ;;  %v1657_v56 = vmul.f32 1.442695, %v1636_v39  ;;  %1339 = vadd.xlane.f32.xlu0 %v1338_v26 }
 0x3fd   : > { %v1341_v36 = vsel %vm1241_vm2, %v3423_v33, 0.0 }
 0x3fe   : > { %v3427_v42 = vpop.eup %2523  ;;  %2533 = vpow2.f32 %v1657_v56  ;;  %1342 = vadd.xlane.f32.xlu1 %v1341_v36 }
 0x3ff   : > { %v1683_v7 = vsel %vm1241_vm2, %v3427_v42, 0.0 }
 0x400   : > { %v3431_v48 = vpop.eup %2525  ;;  %1684 = vadd.xlane.f32.xlu0 %v1683_v7 }
 0x401   : > { %v1686_v21 = vsel %vm1241_vm2, %v3431_v48, 0.0 }
 0x402   : > { %v3435_v4 = vpop.eup %2527  ;;  %1687 = vadd.xlane.f32.xlu1 %v1686_v21 }
 0x403   : > { %v1344_v45 = vsel %vm1241_vm2, %v3435_v4, 0.0 }
 0x404   : > { %v3439_v52 = vpop.eup %2529  ;;  %1345 = vadd.xlane.f32.xlu0 %v1344_v45 }
 0x405   : > { %v1347_v49 = vsel %vm1241_vm2, %v3439_v52, 0.0 }
 0x406   : > { %v3443_v15 = vpop.eup %2531  ;;  %1348 = vadd.xlane.f32.xlu1 %v1347_v49 }
 0x407   : > { %v1689_v55 = vsel %vm1241_vm2, %v3443_v15, 0.0 }
 0x408   : > { %v3447_v59 = vpop.eup %2533  ;;  %1690 = vadd.xlane.f32.xlu0 %v1689_v55 }
 0x409   : > { %v1692_v46 = vsel %vm1241_vm2, %v3447_v59, 0.0 }
 0x40a   : > { %1693 = vadd.xlane.f32.xlu1 %v1692_v46 }
 0x43d   : > { %v1268_v16 = vpop.xlane.xlu0 %1267 }
 0x43e   : > { %v1292_v35 = vsub.f32 %v3312_v12, %v1268_v16 }
 0x43f   : > { %v1271_v9 = vpop.xlane.xlu1 %1270 }
 0x440   : > { %v1314_v17 = vmul.f32 1.442695, %v1292_v35  ;;  %v1293_v0 = vsub.f32 %v3318_v24, %v1271_v9 }
 0x441   : > { %v1613_v18 = vpop.xlane.xlu0 %1612 }
 0x442   : > { %2535 = vpow2.f32 %v1314_v17  ;;  %v1316_v51 = vmul.f32 1.442695, %v1293_v0  ;;  %v1637_v3 = vsub.f32 %v3315_v53, %v1613_v18 }
 0x443   : > { %v1616_v50 = vpop.xlane.xlu1 %1615 }
 0x444   : > { %2537 = vpow2.f32 %v1316_v51  ;;  %v1659_v60 = vmul.f32 1.442695, %v1637_v3  ;;  %v1638_v57 = vsub.f32 %v3323_v31, %v1616_v50 }
 0x445   : > { %v1274_v43 = vpop.xlane.xlu0 %1273 }
 0x446   : > { %2539 = vpow2.f32 %v1659_v60  ;;  %v1661_v30 = vmul.f32 1.442695, %v1638_v57  ;;  %v1294_v38 = vsub.f32 %v3330_v11, %v1274_v43 }
 0x447   : > { %v1277_v12 = vpop.xlane.xlu1 %1276 }
 0x448   : > { %2541 = vpow2.f32 %v1661_v30  ;;  %v1318_v39 = vmul.f32 1.442695, %v1294_v38  ;;  %v1295_v24 = vsub.f32 %v3338_v8, %v1277_v12 }
 0x449   : > { %v1619_v26 = vpop.xlane.xlu0 %1618 }
 0x44a   : > { %2543 = vpow2.f32 %v1318_v39  ;;  %v1320_v56 = vmul.f32 1.442695, %v1295_v24  ;;  %v1639_v53 = vsub.f32 %v3335_v14, %v1619_v26 }
 0x44b   : > { %v1622_v36 = vpop.xlane.xlu1 %1621 }
 0x44c   : > { %v3458_v7 = vpop.eup %2535  ;;  %2545 = vpow2.f32 %v1320_v56  ;;  %v1663_v31 = vmul.f32 1.442695, %v1639_v53  ;;  %v1640_v21 = vsub.f32 %v3343_v54, %v1622_v36 }
 0x44d   : > { %v1280_v45 = vpop.xlane.xlu0 %1279  ;;  %v1350_v11 = vsel %vm1241_vm2, %v3458_v7, 0.0 }
 0x44e   : > { %v3463_v49 = vpop.eup %2537  ;;  %2547 = vpow2.f32 %v1663_v31  ;;  %v1665_v8 = vmul.f32 1.442695, %v1640_v21  ;;  %v1296_v55 = vsub.f32 %v3350_v25, %v1280_v45  ;;  %1351 = vadd.xlane.f32.xlu0 %v1350_v11 }
 0x44f   : > { %v1283_v46 = vpop.xlane.xlu1 %1282  ;;  %v1353_v14 = vsel %vm1241_vm2, %v3463_v49, 0.0 }
 0x450   : > { %v3468_v16 = vpop.eup %2539  ;;  %2549 = vpow2.f32 %v1665_v8  ;;  %v1322_v35 = vmul.f32 1.442695, %v1296_v55  ;;  %v1297_v54 = vsub.f32 %v3358_v40, %v1283_v46  ;;  %1354 = vadd.xlane.f32.xlu1 %v1353_v14 }
 0x451   : > { %v1625_v9 = vpop.xlane.xlu0 %1624  ;;  %v1695_v17 = vsel %vm1241_vm2, %v3468_v16, 0.0 }
 0x452   : > { %v3473_v0 = vpop.eup %2541  ;;  %2551 = vpow2.f32 %v1322_v35  ;;  %v1324_v25 = vmul.f32 1.442695, %v1297_v54  ;;  %v1641_v18 = vsub.f32 %v3355_v20, %v1625_v9  ;;  %1696 = vadd.xlane.f32.xlu0 %v1695_v17 }
 0x453   : > { %v1628_v51 = vpop.xlane.xlu1 %1627  ;;  %v1698_v3 = vsel %vm1241_vm2, %v3473_v0, 0.0 }
 0x454   : > { %v3478_v50 = vpop.eup %2543  ;;  %2553 = vpow2.f32 %v1324_v25  ;;  %v1667_v40 = vmul.f32 1.442695, %v1641_v18  ;;  %v1642_v60 = vsub.f32 %v3363_v27, %v1628_v51  ;;  %1699 = vadd.xlane.f32.xlu1 %v1698_v3 }
 0x455   : > { %v1356_v57 = vsel %vm1241_vm2, %v3478_v50, 0.0 }
 0x456   : > { %v3483_v43 = vpop.eup %2545  ;;  %2555 = vpow2.f32 %v1667_v40  ;;  %v1669_v30 = vmul.f32 1.442695, %v1642_v60  ;;  %1357 = vadd.xlane.f32.xlu0 %v1356_v57 }
 0x457   : > { %v1359_v20 = vsel %vm1241_vm2, %v3483_v43, 0.0 }
 0x458   : > { %v3487_v38 = vpop.eup %2547  ;;  %2557 = vpow2.f32 %v1669_v30  ;;  %1360 = vadd.xlane.f32.xlu1 %v1359_v20 }
 0x459   : > { %v1701_v12 = vsel %vm1241_vm2, %v3487_v38, 0.0 }
 0x45a   : > { %v3491_v27 = vpop.eup %2549  ;;  %1702 = vadd.xlane.f32.xlu0 %v1701_v12 }
 0x45b   : > { %v1704_v39 = vsel %vm1241_vm2, %v3491_v27, 0.0 }
 0x45c   : > { %v3495_v24 = vpop.eup %2551  ;;  %1705 = vadd.xlane.f32.xlu1 %v1704_v39 }
 0x45d   : > { %v1362_v26 = vsel %vm1241_vm2, %v3495_v24, 0.0 }
 0x45e   : > { %v3499_v56 = vpop.eup %2553  ;;  %1363 = vadd.xlane.f32.xlu0 %v1362_v26 }
 0x45f   : > { %v1365_v53 = vsel %vm1241_vm2, %v3499_v56, 0.0 }
 0x460   : > { %v3503_v36 = vpop.eup %2555  ;;  %1366 = vadd.xlane.f32.xlu1 %v1365_v53 }
 0x461   : > { %v1707_v31 = vsel %vm1241_vm2, %v3503_v36, 0.0 }
 0x462   : > { %v3507_v21 = vpop.eup %2557  ;;  %1708 = vadd.xlane.f32.xlu0 %v1707_v31 }
 0x463   : > { %v1710_v45 = vsel %vm1241_vm2, %v3507_v21, 0.0 }
 0x464   : > { %1711 = vadd.xlane.f32.xlu1 %v1710_v45 }
 0x479   : > { %v1328_v11 = vpop.xlane.xlu0 %1327 }
 0x47a   : > { %2559 = vrcp.f32 %v1328_v11 }
 0x47b   : > { %v1331_v8 = vpop.xlane.xlu1 %1330 }
 0x47c   : > { %2561 = vrcp.f32 %v1331_v8 }
 0x47d   : > { %v1673_v55 = vpop.xlane.xlu0 %1672 }
 0x47e   : > { %2563 = vrcp.f32 %v1673_v55 }
 0x47f   : > { %v1676_v46 = vpop.xlane.xlu1 %1675 }
 0x480   : > { %2565 = vrcp.f32 %v1676_v46 }
 0x481   : > { %v1334_v14 = vpop.xlane.xlu0 %1333 }
 0x482   : > { %2567 = vrcp.f32 %v1334_v14 }
 0x483   : > { %v1337_v35 = vpop.xlane.xlu1 %1336 }
 0x484   : > { %v2560_v54 = vpop.eup %2559  ;;  %2569 = vrcp.f32 %v1337_v35 }
 0x485   : > { %v1679_v9 = vpop.xlane.xlu0 %1678  ;;  %v1382_v25 = vmul.f32 %v2560_v54, %v3378_v34 }
 0x486   : > { %v2562_v17 = vpop.eup %2561  ;;  %2571 = vrcp.f32 %v1679_v9 }
 0x487   : > { %v1383_v18 = vmul.f32 %v2562_v17, %v3383_v6  ;;  %v1682_v51 = vpop.xlane.xlu1 %1681 }
 0x488   : > { %v2564_v3 = vpop.eup %2563  ;;  %2573 = vrcp.f32 %v1682_v51 }
 0x489   : > { %v1396_v40 = vpack.c.bf16 %v1383_v18, %v1382_v25  ;;  %v1340_v60 = vpop.xlane.xlu0 %1339  ;;  %v1727_v30 = vmul.f32 %v2564_v3, %v3388_v58 }
 0x48a   : > { %v2566_v57 = vpop.eup %2565  ;;  %2575 = vrcp.f32 %v1340_v60 }
 0x48b   : > { %v1728_v20 = vmul.f32 %v2566_v57, %v3393_v22  ;;  %v1343_v12 = vpop.xlane.xlu1 %1342  ;;  %2294 = vmatmul.mubr.msk.bf16.vlgmr.msra.gmra.mrb[28].mxu1 %vm1241_vm2, %v1396_v40 }
 0x48c   : > { %v2568_v39 = vpop.eup %2567  ;;  %2577 = vrcp.f32 %v1343_v12  ;;  %2297 = vmatprep.mubr.msk.bf16.mxu1 %vm2625_vm1, %v3656_v1 }
 0x48d   : > { %v1741_v34 = vpack.c.bf16 %v1728_v20, %v1727_v30  ;;  %v1685_v6 = vpop.xlane.xlu0 %1684  ;;  %v1384_v31 = vmul.f32 %v2568_v39, %v3398_v2 }
 0x48e   : > { %v2570_v26 = vpop.eup %2569  ;;  %2579 = vrcp.f32 %v1685_v6 }
 0x48f   : > { %v1688_v53 = vpop.xlane.xlu1 %1687  ;;  %2336 = vmatmul.mubr.msk.bf16.vlgmr.msra.gmra.mrb[56].mxu0 %vm1241_vm2, %v1741_v34  ;;  %v1385_v58 = vmul.f32 %v2570_v26, %v3403_v63 }
 0x490   : > { %v2572_v22 = vpop.eup %2571  ;;  %2581 = vrcp.f32 %v1688_v53  ;;  %2339 = vmatprep.mubr.msk.bf16.mxu0 %vm2625_vm1, %v3656_v1 }
 0x491   : > { %v1346_v45 = vpop.xlane.xlu0 %1345  ;;  %v1397_v11 = vpack.c.bf16 %v1385_v58, %v1384_v31  ;;  %v1729_v46 = vmul.f32 %v2572_v22, %v3408_v61 }
 0x492   : > { %v2574_v8 = vpop.eup %2573  ;;  %2583 = vrcp.f32 %v1346_v45 }
 0x493   : > { %v1349_v55 = vpop.xlane.xlu1 %1348  ;;  %2298 = vmatmul.mubr.msk.bf16.gmra.mrb[32].mxu1 %vm1241_vm2, %v1397_v11  ;;  %v1730_v14 = vmul.f32 %v2574_v8, %v3413_v5 }
 0x494   : > { %v2576_v35 = vpop.eup %2575  ;;  %2585 = vrcp.f32 %v1349_v55  ;;  %2301 = vmatprep.mubr.msk.bf16.mxu1 %vm2625_vm1, %v3656_v1 }
 0x495   : > { %v1691_v2 = vpop.xlane.xlu0 %1690  ;;  %v1742_v63 = vpack.c.bf16 %v1730_v14, %v1729_v46  ;;  %v1386_v17 = vmul.f32 %v2576_v35, %v3418_v29 }
 0x496   : > { %v2578_v54 = vpop.eup %2577  ;;  %2587 = vrcp.f32 %v1691_v2 }
 0x497   : > { %v1694_v9 = vpop.xlane.xlu1 %1693  ;;  %2340 = vmatmul.mubr.msk.bf16.gmra.mrb[60].mxu0 %vm1241_vm2, %v1742_v63  ;;  %v1387_v25 = vmul.f32 %v2578_v54, %v3423_v33 }
 0x498   : > { %v2580_v18 = vpop.eup %2579  ;;  %2589 = vrcp.f32 %v1694_v9  ;;  %2343 = vmatprep.mubr.msk.bf16.mxu0 %vm2625_vm1, %v3656_v1 }
 0x499   : > { %v1398_v61 = vpack.c.bf16 %v1387_v25, %v1386_v17  ;;  %v1731_v51 = vmul.f32 %v2580_v18, %v3427_v42 }
 0x49a   : > { %v2582_v5 = vpop.eup %2581 }
 0x49b   : > { %2302 = vmatmul.mubr.msk.bf16.gmra.mrb[36].mxu1 %vm1241_vm2, %v1398_v61  ;;  %v1732_v3 = vmul.f32 %v2582_v5, %v3431_v48 }
 0x49c   : > { %v2584_v40 = vpop.eup %2583  ;;  %2305 = vmatprep.mubr.msk.bf16.mxu1 %vm2625_vm1, %v3656_v1 }
 0x49d   : > { %v1743_v29 = vpack.c.bf16 %v1732_v3, %v1731_v51  ;;  %v1388_v33 = vmul.f32 %v2584_v40, %v3435_v4 }
 0x49e   : > { %v2586_v60 = vpop.eup %2585 }
 0x49f   : > { %2344 = vmatmul.mubr.msk.bf16.gmra.mrb[64].mxu0 %vm1241_vm2, %v1743_v29  ;;  %v1389_v57 = vmul.f32 %v2586_v60, %v3439_v52 }
 0x4a0   : > { %v2588_v30 = vpop.eup %2587  ;;  %2347 = vmatprep.mubr.msk.bf16.mxu0 %vm2625_vm1, %v3656_v1 }
 0x4a1   : > { %v1399_v20 = vpack.c.bf16 %v1389_v57, %v1388_v33  ;;  %v1733_v48 = vmul.f32 %v2588_v30, %v3443_v15  ;;  %v657_v30 = vadd.f32 %v2870_v13, %v2762_v62 }
 0x4a2   : > { %v2590_v42 = vpop.eup %2589 }
 0x4a3   : > { %2306 = vmatmul.mubr.msk.bf16.gmra.mrb[40].mxu1 %vm1241_vm2, %v1399_v20  ;;  %v1734_v12 = vmul.f32 %v2590_v42, %v3447_v59 }
 0x4a4   : > { %2309 = vmatprep.mubr.msk.bf16.mxu1 %vm2625_vm1, %v3656_v1 }
 0x4a5   : > { %v1744_v39 = vpack.c.bf16 %v1734_v12, %v1733_v48 }
 0x4a7   : > { %2348 = vmatmul.mubr.msk.bf16.gmra.mrb[68].mxu0 %vm1241_vm2, %v1744_v39 }
 0x4a8   : > { %2351 = vmatprep.mubr.msk.bf16.mxu0 %vm2625_vm1, %v3656_v1 }
 0x4db   : > { %v1352_v4 = vpop.xlane.xlu0 %1351 }
 0x4dc   : > { %2591 = vrcp.f32 %v1352_v4 }
 0x4dd   : > { %v1355_v52 = vpop.xlane.xlu1 %1354 }
 0x4de   : > { %2593 = vrcp.f32 %v1355_v52 }
 0x4df   : > { %v1697_v34 = vpop.xlane.xlu0 %1696 }
 0x4e0   : > { %2595 = vrcp.f32 %v1697_v34 }
 0x4e1   : > { %v1700_v6 = vpop.xlane.xlu1 %1699 }
 0x4e2   : > { %2597 = vrcp.f32 %v1700_v6  ;;  %v663_v6 = vadd.f32 %v2876_v19, %v2762_v62 }
 0x4e3   : > { %v1358_v15 = vpop.xlane.xlu0 %1357 }
 0x4e4   : > { %2599 = vrcp.f32 %v1358_v15 }
 0x4e5   : > { %v1361_v59 = vpop.xlane.xlu1 %1360 }
 0x4e6   : > { %v2592_v26 = vpop.eup %2591  ;;  %2601 = vrcp.f32 %v1361_v59 }
 0x4e7   : > { %v1703_v53 = vpop.xlane.xlu0 %1702  ;;  %v1390_v22 = vmul.f32 %v2592_v26, %v3458_v7  ;;  %v667_v26 = vadd.f32 %v2882_v23, %v2762_v62 }
 0x4e8   : > { %v2594_v31 = vpop.eup %2593  ;;  %2603 = vrcp.f32 %v1703_v53 }
 0x4e9   : > { %v1706_v58 = vpop.xlane.xlu1 %1705  ;;  %v1391_v45 = vmul.f32 %v2594_v31, %v3463_v49 }
 0x4ea   : > { %v2596_v11 = vpop.eup %2595  ;;  %2605 = vrcp.f32 %v1706_v58 }
 0x4eb   : > { %v1364_v8 = vpop.xlane.xlu0 %1363  ;;  %v1400_v55 = vpack.c.bf16 %v1391_v45, %v1390_v22  ;;  %v1735_v35 = vmul.f32 %v2596_v11, %v3468_v16 }
 0x4ec   : > { %v2598_v46 = vpop.eup %2597  ;;  %2607 = vrcp.f32 %v1364_v8 }
 0x4ed   : > { %v1367_v14 = vpop.xlane.xlu1 %1366  ;;  %2310 = vmatmul.mubr.msk.bf16.gmra.mrb[44].mxu1 %vm1241_vm2, %v1400_v55  ;;  %v1736_v2 = vmul.f32 %v2598_v46, %v3473_v0 }
 0x4ee   : > { %v2600_v63 = vpop.eup %2599  ;;  %2609 = vrcp.f32 %v1367_v14  ;;  %2313 = vmatprep.mubr.msk.bf16.mxu1 %vm2625_vm1, %v3656_v1 }
 0x4ef   : > { %v1709_v7 = vpop.xlane.xlu0 %1708  ;;  %v1745_v49 = vpack.c.bf16 %v1736_v2, %v1735_v35  ;;  %v1392_v17 = vmul.f32 %v2600_v63, %v3478_v50  ;;  %v673_v2 = vadd.f32 %v2888_v28, %v2762_v62 }
 0x4f0   : > { %v2602_v54 = vpop.eup %2601  ;;  %2611 = vrcp.f32 %v1709_v7 }
 0x4f1   : > { %v1712_v9 = vpop.xlane.xlu1 %1711  ;;  %2352 = vmatmul.mubr.msk.bf16.gmra.mrb[72].mxu0 %vm1241_vm2, %v1745_v49  ;;  %v1393_v25 = vmul.f32 %v2602_v54, %v3483_v43  ;;  %v677_v54 = vadd.f32 %v2894_v32, %v2762_v62 }
 0x4f2   : > { %v2604_v18 = vpop.eup %2603  ;;  %2613 = vrcp.f32 %v1712_v9  ;;  %2355 = vmatprep.mubr.msk.bf16.mxu0 %vm2625_vm1, %v3656_v1 }
 0x4f3   : > { %v1401_v16 = vpack.c.bf16 %v1393_v25, %v1392_v17  ;;  %v1737_v61 = vmul.f32 %v2604_v18, %v3487_v38 }
 0x4f4   : > { %v2606_v0 = vpop.eup %2605 }
 0x4f5   : > { %2314 = vmatmul.mubr.msk.bf16.gmra.mrb[48].mxu1 %vm1241_vm2, %v1401_v16  ;;  %v1738_v5 = vmul.f32 %v2606_v0, %v3491_v27 }
 0x4f6   : > { %v2608_v51 = vpop.eup %2607  ;;  %2317 = vmatprep.mubr.msk.bf16.mxu1 %vm2625_vm1, %v3656_v1 }
 0x4f7   : > { %v1746_v50 = vpack.c.bf16 %v1738_v5, %v1737_v61  ;;  %v1394_v43 = vmul.f32 %v2608_v51, %v3495_v24  ;;  %v653_v24 = vadd.f32 %v2864_v10, %v2762_v62 }
 0x4f8   : > { %v2610_v3 = vpop.eup %2609 }
 0x4f9   : > { %2356 = vmatmul.mubr.msk.bf16.gmra.mrb[76].mxu0 %vm1241_vm2, %v1746_v50  ;;  %v1395_v40 = vmul.f32 %v2610_v3, %v3499_v56 }
 0x4fa   : > { %v2612_v29 = vpop.eup %2611  ;;  %2359 = vmatprep.mubr.msk.bf16.mxu0 %vm2625_vm1, %v3656_v1 }
 0x4fb   : > { %v1402_v60 = vpack.c.bf16 %v1395_v40, %v1394_v43  ;;  %v1739_v27 = vmul.f32 %v2612_v29, %v3503_v36  ;;  %v683_v43 = vadd.f32 %v2900_v37, %v2762_v62 }
 0x4fc   : > { %v2614_v38 = vpop.eup %2613 }
 0x4fd   : > { %2318 = vmatmul.mubr.msk.bf16.gmra.mrb[52].mxu1 %vm1241_vm2, %v1402_v60  ;;  %v1740_v33 = vmul.f32 %v2614_v38, %v3507_v21  ;;  %v687_v38 = vadd.f32 %v2906_v41, %v2762_v62 }
 0x4fe   : > { %2391 = vmatprep.mubr.msk.f32.mxu1 %vm2625_vm1, %v3656_v1 }
 0x4ff   : > { %v1747_v57 = vpack.c.bf16 %v1740_v33, %v1739_v27 }
 0x501   : > { %2360 = vmatmul.mubr.msk.bf16.gmra.mrb[80].mxu0 %vm1241_vm2, %v1747_v57 }
 0x55e   : > { %v1458_v56 = vpop.f32.mrb[28].mxu1 }
 0x55f   : > { %v1513_v20 = vsub.f32 %v653_v24, %v1458_v56  ;;  %v2295_v42 = vpop.f32.mrb[29].mxu1 }
 0x560   : > { %v1461_v48 = vpop.f32.mrb[30].mxu1  ;;  %v2626_v42 = vmov 0.0|0.0  }
 0x561   : > { %v1527_v12 = vmul.f32 %v1513_v20, %v1513_v20  ;;  %v1514_v36 = vsub.f32 %v657_v30, %v1461_v48  ;;  %v2296_v39 = vpop.f32.mrb[31].mxu1  ;;  %2394 = vmatprep.subr.bf16.mxu1 %v2626_v42 }
 0x562   : > { %v1803_v21 = vpop.f32.mrb[56].mxu0 }
 0x563   : > { %v1528_v4 = vmul.f32 %v1514_v36, %v1514_v36  ;;  %v1858_v52 = vsub.f32 %v653_v24, %v1803_v21  ;;  %1541 = vadd.xlane.f32.xlu0 %v1527_v12  ;;  %v2337_v1 = vpop.f32.mrb[57].mxu0 }
 0x564   : > { %v1806_v34 = vpop.f32.mrb[58].mxu0  ;;  %v693_v1 = vadd.f32 %v2909_v44, %v2762_v62 }
 0x565   : > { %v1872_v10 = vmul.f32 %v1858_v52, %v1858_v52  ;;  %v1859_v15 = vsub.f32 %v657_v30, %v1806_v34  ;;  %1543 = vadd.xlane.f32.xlu1 %v1528_v4  ;;  %v2338_v59 = vpop.f32.mrb[59].mxu0 }
 0x566   : > { %v1466_v13 = vpop.f32.mrb[32].mxu1 }
 0x567   : > { %v1873_v53 = vmul.f32 %v1859_v15, %v1859_v15  ;;  %v1515_v31 = vsub.f32 %v663_v6, %v1466_v13  ;;  %1886 = vadd.xlane.f32.xlu0 %v1872_v10  ;;  %v2299_v58 = vpop.f32.mrb[33].mxu1 }
 0x568   : > { %v1469_v22 = vpop.f32.mrb[34].mxu1 }
 0x569   : > { %v1529_v45 = vmul.f32 %v1515_v31, %v1515_v31  ;;  %v1516_v11 = vsub.f32 %v667_v26, %v1469_v22  ;;  %1888 = vadd.xlane.f32.xlu1 %v1873_v53  ;;  %v2300_v8 = vpop.f32.mrb[35].mxu1 }
 0x56a   : > { %v1811_v55 = vpop.f32.mrb[60].mxu0  ;;  %v3659_v8 = vld [vmem:[#allocation2_spill] sm:$0xff] }
 0x56b   : > { %v1530_v46 = vmul.f32 %v1516_v11, %v1516_v11  ;;  %v1860_v19 = vsub.f32 %v663_v6, %v1811_v55  ;;  %1545 = vadd.xlane.f32.xlu0 %v1529_v45  ;;  %v2341_v14 = vpop.f32.mrb[61].mxu0  ;;  %v697_v6 = vadd.f32 %v2911_v47, %v2762_v62  ;;  %v703_v55 = vadd.f32 %v3659_v8, %v2762_v62 }
 0x56c   : > { %v1814_v35 = vpop.f32.mrb[62].mxu0  ;;  %v3660_v14 = vld [vmem:[#allocation3_spill] sm:$0xff] }
 0x56d   : > { %v1874_v63 = vmul.f32 %v1860_v19, %v1860_v19  ;;  %v1861_v23 = vsub.f32 %v667_v26, %v1814_v35  ;;  %1547 = vadd.xlane.f32.xlu1 %v1530_v46  ;;  %v2342_v7 = vpop.f32.mrb[63].mxu0  ;;  %v707_v35 = vadd.f32 %v3660_v14, %v2762_v62 }
 0x56e   : > { %v1474_v49 = vpop.f32.mrb[36].mxu1 }
 0x56f   : > { %v1875_v9 = vmul.f32 %v1861_v23, %v1861_v23  ;;  %v1517_v17 = vsub.f32 %v673_v2, %v1474_v49  ;;  %1890 = vadd.xlane.f32.xlu0 %v1874_v63  ;;  %v2303_v25 = vpop.f32.mrb[37].mxu1 }
 0x570   : > { %v1477_v18 = vpop.f32.mrb[38].mxu1 }
 0x571   : > { %v1531_v16 = vmul.f32 %v1517_v17, %v1517_v17  ;;  %v1518_v0 = vsub.f32 %v677_v54, %v1477_v18  ;;  %1892 = vadd.xlane.f32.xlu1 %v1875_v9  ;;  %v2304_v61 = vpop.f32.mrb[39].mxu1 }
 0x572   : > { %v1819_v5 = vpop.f32.mrb[64].mxu0  ;;  %v3661_v61 = vld [vmem:[#allocation4_spill] sm:$0xff] }
 0x573   : > { %v1532_v51 = vmul.f32 %v1518_v0, %v1518_v0  ;;  %v1862_v28 = vsub.f32 %v673_v2, %v1819_v5  ;;  %1549 = vadd.xlane.f32.xlu0 %v1531_v16  ;;  %v2345_v50 = vpop.f32.mrb[65].mxu0  ;;  %v713_v5 = vadd.f32 %v3661_v61, %v2762_v62 }
 0x574   : > { %v1822_v3 = vpop.f32.mrb[66].mxu0 }
 0x575   : > { %v1876_v40 = vmul.f32 %v1862_v28, %v1862_v28  ;;  %v1863_v32 = vsub.f32 %v677_v54, %v1822_v3  ;;  %1551 = vadd.xlane.f32.xlu1 %v1532_v51  ;;  %v2346_v29 = vpop.f32.mrb[67].mxu0 }
 0x576   : > { %v1482_v60 = vpop.f32.mrb[40].mxu1 }
 0x577   : > { %v1877_v27 = vmul.f32 %v1863_v32, %v1863_v32  ;;  %v1519_v33 = vsub.f32 %v683_v43, %v1482_v60  ;;  %1894 = vadd.xlane.f32.xlu0 %v1876_v40  ;;  %v2307_v57 = vpop.f32.mrb[41].mxu1 }
 0x578   : > { %v1485_v24 = vpop.f32.mrb[42].mxu1 }
 0x579   : > { %v1533_v56 = vmul.f32 %v1519_v33, %v1519_v33  ;;  %v1520_v30 = vsub.f32 %v687_v38, %v1485_v24  ;;  %1896 = vadd.xlane.f32.xlu1 %v1877_v27  ;;  %v2308_v20 = vpop.f32.mrb[43].mxu1 }
 0x57a   : > { %v1827_v37 = vpop.f32.mrb[68].mxu0 }
 0x57b   : > { %v1534_v48 = vmul.f32 %v1520_v30, %v1520_v30  ;;  %v1864_v12 = vsub.f32 %v683_v43, %v1827_v37  ;;  %1553 = vadd.xlane.f32.xlu0 %v1533_v56  ;;  %v2349_v36 = vpop.f32.mrb[69].mxu0  ;;  %v3662_v43 = vld [vmem:[#allocation5_spill] sm:$0xff] }
 0x57c   : > { %v1830_v39 = vpop.f32.mrb[70].mxu0  ;;  %v717_v40 = vadd.f32 %v3662_v43, %v2762_v62 }
 0x57d   : > { %v1878_v21 = vmul.f32 %v1864_v12, %v1864_v12  ;;  %v1865_v41 = vsub.f32 %v687_v38, %v1830_v39  ;;  %1555 = vadd.xlane.f32.xlu1 %v1534_v48  ;;  %v2350_v4 = vpop.f32.mrb[71].mxu0 }
 0x57f   : > { %v1879_v52 = vmul.f32 %v1865_v41, %v1865_v41  ;;  %1898 = vadd.xlane.f32.xlu0 %v1878_v21 }
 0x581   : > { %1900 = vadd.xlane.f32.xlu1 %v1879_v52 }
 0x5c0   : > { %v1490_v34 = vpop.f32.mrb[44].mxu1 }
 0x5c1   : > { %v1521_v10 = vsub.f32 %v693_v1, %v1490_v34  ;;  %v2311_v15 = vpop.f32.mrb[45].mxu1 }
 0x5c2   : > { %v1493_v59 = vpop.f32.mrb[46].mxu1 }
 0x5c3   : > { %v1535_v13 = vmul.f32 %v1521_v10, %v1521_v10  ;;  %v1522_v26 = vsub.f32 %v697_v6, %v1493_v59  ;;  %v2312_v53 = vpop.f32.mrb[47].mxu1 }
 0x5c4   : > { %v1835_v31 = vpop.f32.mrb[72].mxu0 }
 0x5c5   : > { %v1536_v58 = vmul.f32 %v1522_v26, %v1522_v26  ;;  %v1866_v22 = vsub.f32 %v693_v1, %v1835_v31  ;;  %1557 = vadd.xlane.f32.xlu0 %v1535_v13  ;;  %v2353_v45 = vpop.f32.mrb[73].mxu0 }
 0x5c6   : > { %v1838_v11 = vpop.f32.mrb[74].mxu0 }
 0x5c7   : > { %v1880_v44 = vmul.f32 %v1866_v22, %v1866_v22  ;;  %v1867_v46 = vsub.f32 %v697_v6, %v1838_v11  ;;  %1559 = vadd.xlane.f32.xlu1 %v1536_v58  ;;  %v2354_v19 = vpop.f32.mrb[75].mxu0 }
 0x5c8   : > { %v1498_v47 = vpop.f32.mrb[48].mxu1 }
 0x5c9   : > { %v1881_v2 = vmul.f32 %v1867_v46, %v1867_v46  ;;  %v1523_v63 = vsub.f32 %v703_v55, %v1498_v47  ;;  %1902 = vadd.xlane.f32.xlu0 %v1880_v44  ;;  %v2315_v23 = vpop.f32.mrb[49].mxu1 }
 0x5ca   : > { %v1501_v7 = vpop.f32.mrb[50].mxu1 }
 0x5cb   : > { %v1537_v49 = vmul.f32 %v1523_v63, %v1523_v63  ;;  %v1524_v54 = vsub.f32 %v707_v35, %v1501_v7  ;;  %1904 = vadd.xlane.f32.xlu1 %v1881_v2  ;;  %v2316_v9 = vpop.f32.mrb[51].mxu1 }
 0x5cc   : > { %v1843_v17 = vpop.f32.mrb[76].mxu0 }
 0x5cd   : > { %v1538_v25 = vmul.f32 %v1524_v54, %v1524_v54  ;;  %v1868_v18 = vsub.f32 %v703_v55, %v1843_v17  ;;  %1561 = vadd.xlane.f32.xlu0 %v1537_v49  ;;  %v2357_v16 = vpop.f32.mrb[77].mxu0 }
 0x5ce   : > { %v1846_v0 = vpop.f32.mrb[78].mxu0 }
 0x5cf   : > { %v1882_v51 = vmul.f32 %v1868_v18, %v1868_v18  ;;  %v1869_v28 = vsub.f32 %v707_v35, %v1846_v0  ;;  %1563 = vadd.xlane.f32.xlu1 %v1538_v25  ;;  %v2358_v50 = vpop.f32.mrb[79].mxu0 }
 0x5d0   : > { %v1506_v3 = vpop.f32.mrb[52].mxu1 }
 0x5d1   : > { %v1883_v32 = vmul.f32 %v1869_v28, %v1869_v28  ;;  %v1525_v29 = vsub.f32 %v713_v5, %v1506_v3  ;;  %1906 = vadd.xlane.f32.xlu0 %v1882_v51  ;;  %v2319_v60 = vpop.f32.mrb[53].mxu1 }
 0x5d2   : > { %v1509_v38 = vpop.f32.mrb[54].mxu1  ;;  %v1929_v60 = vld [vmem:[%s371_s27] sm:$0x3] }
 0x5d3   : > { %v1539_v27 = vmul.f32 %v1525_v29, %v1525_v29  ;;  %v1526_v33 = vsub.f32 %v717_v40, %v1509_v38  ;;  %1908 = vadd.xlane.f32.xlu1 %v1883_v32  ;;  %v2320_v57 = vpop.f32.mrb[55].mxu1 }
 0x5d4   : > { %v1851_v24 = vpop.f32.mrb[80].mxu0 }
 0x5d5   : > { %v1540_v56 = vmul.f32 %v1526_v33, %v1526_v33  ;;  %v1870_v30 = vsub.f32 %v713_v5, %v1851_v24  ;;  %1565 = vadd.xlane.f32.xlu0 %v1539_v27  ;;  %v2361_v20 = vpop.f32.mrb[81].mxu0 }
 0x5d6   : > { %v1854_v37 = vpop.f32.mrb[82].mxu0 }
 0x5d7   : > { %v1884_v48 = vmul.f32 %v1870_v30, %v1870_v30  ;;  %v1871_v12 = vsub.f32 %v717_v40, %v1854_v37  ;;  %1567 = vadd.xlane.f32.xlu1 %v1540_v56  ;;  %v2362_v36 = vpop.f32.mrb[83].mxu0 }
 0x5d9   : > { %v1885_v62 = vmul.f32 %v1871_v12, %v1871_v12  ;;  %1910 = vadd.xlane.f32.xlu0 %v1884_v48 }
 0x5db   : > { %1912 = vadd.xlane.f32.xlu1 %v1885_v62 }
 0x5f0   : > { %v1542_v39 = vpop.xlane.xlu0 %1541 }
 0x5f2   : > { %v1544_v21 = vpop.xlane.xlu1 %1543 }
 0x5f4   : > { %v1887_v41 = vpop.xlane.xlu0 %1886 }
 0x5f5   : > { %v1915_v52 = vsel %vm1914_vm3, %v1542_v39, %v1887_v41 }
 0x5f6   : > { %v1889_v4 = vpop.xlane.xlu1 %1888 }
 0x5f7   : > { %v1916_v1 = vsel %vm1914_vm3, %v1544_v21, %v1889_v4 }
 0x5f8   : > { %v2395_v34 = vpack.c.bf16 %v1916_v1, %v1915_v52  ;;  %v1546_v6 = vpop.xlane.xlu0 %1545 }
 0x5fa   : > { %v1548_v10 = vpop.xlane.xlu1 %1547  ;;  %2396 = vmatpush3.bf16.msra.mxu1 %v2395_v34 }
 0x5fb   : > { %2397 = vmatprep.subr.bf16.mxu1 %v2626_v42 }
 0x5fc   : > { %v1891_v15 = vpop.xlane.xlu0 %1890 }
 0x5fd   : > { %v1917_v13 = vsel %vm1914_vm3, %v1546_v6, %v1891_v15 }
 0x5fe   : > { %v1893_v59 = vpop.xlane.xlu1 %1892 }
 0x5ff   : > { %v1918_v26 = vsel %vm1914_vm3, %v1548_v10, %v1893_v59 }
 0x600   : > { %v2398_v53 = vpack.c.bf16 %v1918_v26, %v1917_v13  ;;  %v1550_v31 = vpop.xlane.xlu0 %1549 }
 0x602   : > { %v1552_v58 = vpop.xlane.xlu1 %1551  ;;  %2399 = vmatpush3.bf16.msra.mxu1 %v2398_v53 }
 0x603   : > { %2400 = vmatprep.subr.bf16.mxu1 %v2626_v42 }
 0x604   : > { %v1895_v22 = vpop.xlane.xlu0 %1894 }
 0x605   : > { %v1919_v11 = vsel %vm1914_vm3, %v1550_v31, %v1895_v22 }
 0x606   : > { %v1897_v45 = vpop.xlane.xlu1 %1896 }
 0x607   : > { %v1920_v8 = vsel %vm1914_vm3, %v1552_v58, %v1897_v45 }
 0x608   : > { %v2401_v55 = vpack.c.bf16 %v1920_v8, %v1919_v11  ;;  %v1554_v44 = vpop.xlane.xlu0 %1553 }
 0x60a   : > { %v1556_v46 = vpop.xlane.xlu1 %1555  ;;  %2402 = vmatpush3.bf16.msra.mxu1 %v2401_v55 }
 0x60b   : > { %2403 = vmatprep.subr.bf16.mxu1 %v2626_v42 }
 0x60c   : > { %v1899_v19 = vpop.xlane.xlu0 %1898 }
 0x60d   : > { %v1921_v14 = vsel %vm1914_vm3, %v1554_v44, %v1899_v19 }
 0x60e   : > { %v1901_v47 = vpop.xlane.xlu1 %1900 }
 0x60f   : > { %v1922_v35 = vsel %vm1914_vm3, %v1556_v46, %v1901_v47 }
 0x610   : > { %v2404_v2 = vpack.c.bf16 %v1922_v35, %v1921_v14 }
 0x612   : > { %2405 = vmatpush3.bf16.msra.mxu1 %v2404_v2 }
 0x613   : > { %2406 = vmatprep.subr.bf16.mxu1 %v2626_v42 }
 0x652   : > { %v1558_v63 = vpop.xlane.xlu0 %1557 }
 0x654   : > { %v1560_v23 = vpop.xlane.xlu1 %1559 }
 0x656   : > { %v1903_v7 = vpop.xlane.xlu0 %1902 }
 0x657   : > { %v1923_v54 = vsel %vm1914_vm3, %v1558_v63, %v1903_v7 }
 0x658   : > { %v1905_v49 = vpop.xlane.xlu1 %1904 }
 0x659   : > { %v1924_v9 = vsel %vm1914_vm3, %v1560_v23, %v1905_v49 }
 0x65a   : > { %v2407_v17 = vpack.c.bf16 %v1924_v9, %v1923_v54  ;;  %v1562_v25 = vpop.xlane.xlu0 %1561 }
 0x65c   : > { %v1564_v18 = vpop.xlane.xlu1 %1563  ;;  %2408 = vmatpush3.bf16.msra.mxu1 %v2407_v17 }
 0x65d   : > { %2409 = vmatprep.subr.bf16.mxu1 %v2626_v42 }
 0x65e   : > { %v1907_v16 = vpop.xlane.xlu0 %1906 }
 0x65f   : > { %v1925_v61 = vsel %vm1914_vm3, %v1562_v25, %v1907_v16 }
 0x660   : > { %v1909_v0 = vpop.xlane.xlu1 %1908 }
 0x661   : > { %v1926_v5 = vsel %vm1914_vm3, %v1564_v18, %v1909_v0 }
 0x662   : > { %v2410_v51 = vpack.c.bf16 %v1926_v5, %v1925_v61  ;;  %v1566_v28 = vpop.xlane.xlu0 %1565 }
 0x664   : > { %v1568_v50 = vpop.xlane.xlu1 %1567  ;;  %2411 = vmatpush3.bf16.msra.mxu1 %v2410_v51 }
 0x665   : > { %2412 = vmatprep.subr.bf16.mxu1 %v2626_v42 }
 0x666   : > { %v1911_v3 = vpop.xlane.xlu0 %1910 }
 0x667   : > { %v1927_v40 = vsel %vm1914_vm3, %v1566_v28, %v1911_v3 }
 0x668   : > { %v1913_v43 = vpop.xlane.xlu1 %1912 }
 0x669   : > { %v1928_v32 = vsel %vm1914_vm3, %v1568_v50, %v1913_v43 }
 0x66a   : > { %v2413_v29 = vpack.c.bf16 %v1928_v32, %v1927_v40 }
 0x66c   : > { %2414 = vmatpush3.bf16.msra.mxu1 %v2413_v29 }
 0x66f   : > { %2392 = vmatmul.mubr.msk.f32.vlgmr.msra.gmra.mrb[56].mxu1 %vm1241_vm2, %v1929_v60 }
 0x742   : > { %v1999_v42 = vpop.f32.mrb[56].mxu1 }
 0x743   : > { %2004 = vst.msk [vmem:[%s375_s30] sm:$0x3] %vm2003_vm4, %v1999_v42  ;;  %v2393_v38 = vpop.f32.mrb[57].mxu1 }
 0x744 PF: > { %s17_s24 = sadd.s32 1, %s2621_s24  }
 0x745   : > { %p14_p4 = scmp.ge.s32.totalorder %s17_s24, 4  }
 0x747   :  { %16 = sbr.rel (!%p14_p4) target bundleno = 1 (0x1), region = 96 }

</bundles_post_ra>
